<compile_context>
chip_gen: v6e
topology: v6e:2x2x1
jax: 0.10.0
libtpu: 0.0.40
codegen_flags: <defaults>
</compile_context>

<pallas_src>
import functools

import numpy as np

import jax
import jax.numpy as jnp
from jax.experimental import pallas as pl
from jax.experimental.pallas import tpu as pltpu

EPS = 1e-8
KSIZE = 5
PAD = KSIZE // 2
SCAL = 1
VEC = 7
# feat_type_out1 = 1 x irrep_0 (size 1) + 7 x irrep_1 (size 2)  -> 15 channels
FIELDS_HIDDEN = (1,) + (2,) * VEC
# feat_type_out_final = 1 x irrep_0 + 1 x irrep_1               -> 3 channels
FIELDS_FINAL = (1, 2)
C_HIDDEN = sum(FIELDS_HIDDEN)   # 15
C_FINAL = sum(FIELDS_FINAL)     # 3


# ---------------------------------------------------------------------------
# Pallas kernels
# ---------------------------------------------------------------------------
def _se2_feature_kernel(x_ref, w1_ref, w2_ref, s_ref, mask_ref, out_ref, *,
                        offsets, ltot, eps):
    """Fused netSE2 feature extractor on a padded-flat, lane-dense layout.

    x_ref   : (1, L)        receptor+ligand, each zero-padded by 2 and flattened
                            into its own 128-aligned lane segment.
    w1_ref  : (25, 15, 1)   conv1 taps (tap-major), Cin = 1.
    w2_ref  : (25, 3, 15)   conv2 taps (tap-major).
    s_ref   : (15, 15)      field-membership 0/1 matrix (same-irrep-field mask).
    mask_ref: (1, L)        1 at valid (interior) positions, 0 on padding ring.
    out_ref : (2, L)        invariant features [bulk, bound] in padded-flat layout.
    """
    x = x_ref[...]                                      # (1, L)
    mask = mask_ref[...]                                # (1, L)

    def shift(v, off):
        # shifted[..., i] = v[..., i + off]  (circular; wrap only hits the
        # padding ring / tail junk, which is never read as a valid output).
        if off == 0:
            return v
        return pltpu.roll(v, (-off) % ltot, axis=1)

    # --- conv1: 1 -> 15 channels, 5x5, zero padding (taps = lane rotations).
    y1 = jnp.zeros((C_HIDDEN, ltot), jnp.float32)
    for k, off in enumerate(offsets):
        y1 = y1 + w1_ref[k] * shift(x, off)             # (15,1)*(1,L) -> (15,L)

    # --- NormNonLinearity('n_relu', bias=False): per-irrep-field norm.
    # norm^2 broadcast per channel via a single 15x15 membership matmul (MXU);
    # relu(norm) == norm since norm >= 0 and bias == 0.
    nsq = jnp.dot(s_ref[...], y1 * y1, preferred_element_type=jnp.float32)
    n1 = jnp.sqrt(nsq)
    m1 = n1 * pl.reciprocal(jnp.maximum(n1, eps), approx=True)
    h = y1 * m1 * mask          # zero the padding ring -> conv2 sees zero padding

    # --- conv2: 15 -> 3 channels, 5x5, zero padding.
    y2 = jnp.zeros((C_FINAL, ltot), jnp.float32)
    for k, off in enumerate(offsets):
        y2 = y2 + jnp.dot(w2_ref[k], shift(h, off),
                          preferred_element_type=jnp.float32)

    # --- NormNonLinearity + NormPool -> 2 invariant channels [bulk, bound].
    # ||f * (n/max(n,eps))|| == n^2 / max(n, eps)   (pure VPU + EUP reciprocal).
    ns = jnp.abs(y2[0:1, :])
    nv = jnp.sqrt(y2[1:2, :] * y2[1:2, :] + y2[2:3, :] * y2[2:3, :])
    out0 = ns * (ns * pl.reciprocal(jnp.maximum(ns, eps), approx=True))
    out1 = nv * (nv * pl.reciprocal(jnp.maximum(nv, eps), approx=True))
    out_ref[...] = jnp.concatenate([out0, out1], axis=0)


def _fft_score_kernel(cr1r_ref, cr1i_ref, cr2r_ref, cr2i_ref,
                      lbdr_ref, lbdi_ref, lbkr_ref, lbki_ref,
                      outr_ref, outi_ref):
    """score_hat = CR1 * conj(LBd) + CR2 * conj(LBk), per angle block.

    CR1 = wb*RBd + w2*RBk,  CR2 = w1*RBd - wk*RBk (receptor-only, resident).
    """
    cr1r = cr1r_ref[...]
    cr1i = cr1i_ref[...]
    cr2r = cr2r_ref[...]
    cr2i = cr2i_ref[...]
    lbdr = lbdr_ref[...]
    lbdi = lbdi_ref[...]
    lbkr = lbkr_ref[...]
    lbki = lbki_ref[...]
    # a * conj(b) = (ar*br + ai*bi) + i*(ai*br - ar*bi)
    outr_ref[...] = cr1r * lbdr + cr1i * lbdi + cr2r * lbkr + cr2i * lbki
    outi_ref[...] = cr1i * lbdr - cr1r * lbdi + cr2i * lbkr - cr2r * lbki


def _vmem_spec():
    return pl.BlockSpec(memory_space=pltpu.MemorySpace.VMEM)


# ---------------------------------------------------------------------------
# JAX glue
# ---------------------------------------------------------------------------
def _field_membership(fields):
    c = sum(fields)
    s = np.zeros((c, c), np.float32)
    o = 0
    for fs in fields:
        s[o:o + fs, o:o + fs] = 1.0
        o += fs
    return jnp.asarray(s)


def se2_invariant_features_pair(receptor, ligand, w_conv1, w_conv2):
    """netSE2 (R2Conv -> NormNonLin -> R2Conv -> NormNonLin) + NormPool, fused.

    receptor/ligand: (1, H, W)  ->  two (2, H, W) maps (ch0 = bulk, ch1 = bound).
    Both images are processed in ONE pallas_call (batched along the lane axis).
    """
    _, h, w = receptor.shape
    hp, wp = h + 2 * PAD, w + 2 * PAD
    pflat = hp * wp
    pseg = pl.cdiv(pflat, 128) * 128        # 128-aligned lane segment per image
    ltot = 2 * pseg

    def flat_seg(x):
        xp = jnp.pad(x[0], PAD)                          # (hp, wp), zero ring
        f = xp.reshape(pflat)
        return jnp.pad(f, (0, pseg - pflat))

    xpf = jnp.concatenate([flat_seg(receptor), flat_seg(ligand)])[None, :]

    # validity mask (1 at interior positions of each padded-flat segment).
    m2 = np.zeros((hp, wp), np.float32)
    m2[PAD:PAD + h, PAD:PAD + w] = 1.0
    mseg = np.zeros((pseg,), np.float32)
    mseg[:pflat] = m2.reshape(-1)
    mask = jnp.asarray(np.concatenate([mseg, mseg]))[None, :]

    # flat-index offsets of the 25 conv taps in padded coordinates.
    offsets = tuple((dy - PAD) * wp + (dx - PAD)
                    for dy in range(KSIZE) for dx in range(KSIZE))

    # tap-major weight layouts (channels on sublanes inside the kernel).
    w1e = w_conv1[:, 0, :, :].transpose(1, 2, 0).reshape(KSIZE * KSIZE,
                                                         C_HIDDEN)[..., None]
    w2e = w_conv2.transpose(2, 3, 0, 1).reshape(KSIZE * KSIZE, C_FINAL, C_HIDDEN)
    smat = _field_membership(FIELDS_HIDDEN)

    out = pl.pallas_call(
        functools.partial(_se2_feature_kernel,
                          offsets=offsets, ltot=ltot, eps=EPS),
        out_shape=jax.ShapeDtypeStruct((2, ltot), jnp.float32),
        in_specs=[_vmem_spec()] * 5,
        out_specs=_vmem_spec(),
        compiler_params=pltpu.CompilerParams(vmem_limit_bytes=32 * 1024 * 1024),
    )(xpf, w1e, w2e, smat, mask)

    def unpack(seg):
        return seg[:, :pflat].reshape(2, hp, wp)[:, PAD:PAD + h, PAD:PAD + w]

    rec_feat = unpack(out[:, :pseg])
    lig_feat = unpack(out[:, pseg:])
    return rec_feat, lig_feat


def rotate_bilinear(imgs, angles):
    """F.affine_grid + F.grid_sample(bilinear, zeros, align_corners=True) equivalent.

    imgs: (C, H, W), angles: (A,) -> (A, C, H, W).
    """
    # TODO(synk): the data-dependent bilinear gather of grid_sample stays in plain
    # JAX; it has no clean rectangular-BlockSpec Pallas equivalent.
    c, hgt, wid = imgs.shape
    ys = jnp.linspace(-1.0, 1.0, hgt)
    xs = jnp.linspace(-1.0, 1.0, wid)
    gy, gx = jnp.meshgrid(ys, xs, indexing="ij")
    cos = jnp.cos(angles)[:, None, None]
    sin = jnp.sin(angles)[:, None, None]
    sx = cos * gx[None] - sin * gy[None]
    sy = sin * gx[None] + cos * gy[None]
    px = (sx + 1.0) * (wid - 1) / 2.0
    py = (sy + 1.0) * (hgt - 1) / 2.0
    x0 = jnp.floor(px)
    y0 = jnp.floor(py)
    x1 = x0 + 1.0
    y1 = y0 + 1.0
    wx1 = px - x0
    wx0 = 1.0 - wx1
    wy1 = py - y0
    wy0 = 1.0 - wy1

    def gather(yc, xc):
        valid = (xc >= 0) & (xc <= wid - 1) & (yc >= 0) & (yc <= hgt - 1)
        xi = jnp.clip(xc, 0, wid - 1).astype(jnp.int32)
        yi = jnp.clip(yc, 0, hgt - 1).astype(jnp.int32)
        vals = imgs[:, yi, xi]                       # (C, A, H, W)
        return vals * valid[None].astype(imgs.dtype)

    out = (gather(y0, x0) * (wy0 * wx0)[None]
           + gather(y0, x1) * (wy0 * wx1)[None]
           + gather(y1, x0) * (wy1 * wx0)[None]
           + gather(y1, x1) * (wy1 * wx1)[None])
    return out.transpose(1, 0, 2, 3)


def dock_global(rec_feat, lig_feat, weights, num_angles):
    """TorchDockingFilter.dock_global equivalent. Returns (A, 2H, 2W) score volume."""
    box = rec_feat.shape[-1]
    pad = box // 2
    angles = jnp.linspace(-jnp.pi, jnp.pi, num_angles).astype(jnp.float32)
    rot_lig = rotate_bilinear(lig_feat, angles)                     # (A, 2, H, W)

    if box % 2 == 0:
        pads = ((pad, pad), (pad, pad))
    else:
        pads = ((pad, pad + 1), (pad, pad + 1))
    rec_p = jnp.pad(rec_feat, ((0, 0),) + pads)                     # (2, Bp, Bp)
    lig_p = jnp.pad(rot_lig, ((0, 0), (0, 0)) + pads)               # (A, 2, Bp, Bp)
    bp = rec_p.shape[-1]
    nf = bp // 2 + 1
    nfp = pl.cdiv(nf, 128) * 128            # lane-dense (padded) frequency axis

    # FFTs stay in plain JAX (XLA FFT); the spectral combination runs in Pallas.
    rbk = jnp.fft.rfft2(rec_p[0])                                   # receptor bulk
    rbd = jnp.fft.rfft2(rec_p[1])                                   # receptor bound
    lbk = jnp.fft.rfft2(lig_p[:, 0], axes=(-2, -1))                 # ligand bulk
    lbd = jnp.fft.rfft2(lig_p[:, 1], axes=(-2, -1))                 # ligand bound

    # Angle-independent receptor pre-combination (tiny, once per call):
    #   score = wb*RBd*conj(LBd) + w1*RBd*conj(LBk) + w2*RBk*conj(LBd) - wk*RBk*conj(LBk)
    #         = CR1*conj(LBd) + CR2*conj(LBk)
    wb, w1, w2, wk = weights[0], weights[1], weights[2], weights[3]
    cr1 = wb * rbd + w2 * rbk
    cr2 = w1 * rbd - wk * rbk

    def split_pad2(x):                       # (Bp, nf) complex -> padded real/imag
        padw = ((0, 0), (0, nfp - nf))
        return (jnp.pad(jnp.real(x).astype(jnp.float32), padw),
                jnp.pad(jnp.imag(x).astype(jnp.float32), padw))

    cr1r, cr1i = split_pad2(cr1)
    cr2r, cr2i = split_pad2(cr2)

    # Angle block size from a VMEM budget (fits v7x's 64 MiB / 32 MiB scoped VMEM
    # with double buffering even at realistic box sizes).
    per_angle_bytes = 6 * bp * nfp * 4            # 4 ligand inputs + 2 outputs
    ta = max(1, min((8 << 20) // (2 * per_angle_bytes), 4, num_angles))
    a_pad = pl.cdiv(num_angles, ta) * ta

    def split_pad3(x):                       # (A, Bp, nf) complex -> padded real/imag
        padw = ((0, a_pad - num_angles), (0, 0), (0, nfp - nf))
        return (jnp.pad(jnp.real(x).astype(jnp.float32), padw),
                jnp.pad(jnp.imag(x).astype(jnp.float32), padw))

    lbdr, lbdi = split_pad3(lbd)
    lbkr, lbki = split_pad3(lbk)

    rspec = pl.BlockSpec((bp, nfp), lambda a: (0, 0))          # resident receptor
    lspec = pl.BlockSpec((ta, bp, nfp), lambda a: (a, 0, 0))   # per-angle block

    out_r, out_i = pl.pallas_call(
        _fft_score_kernel,
        out_shape=(jax.ShapeDtypeStruct((a_pad, bp, nfp), jnp.float32),
                   jax.ShapeDtypeStruct((a_pad, bp, nfp), jnp.float32)),
        grid=(a_pad // ta,),
        in_specs=[rspec, rspec, rspec, rspec, lspec, lspec, lspec, lspec],
        out_specs=(lspec, lspec),
        compiler_params=pltpu.CompilerParams(
            dimension_semantics=("parallel",),
            vmem_limit_bytes=32 * 1024 * 1024),
        cost_estimate=pl.CostEstimate(
            flops=14 * a_pad * bp * nfp,
            transcendentals=0,
            bytes_accessed=4 * (4 * bp * nfp + 6 * a_pad * bp * nfp)),
    )(cr1r, cr1i, cr2r, cr2i, lbdr, lbdi, lbkr, lbki)

    score_hat = out_r[:num_angles, :, :nf] + 1j * out_i[:num_angles, :, :nf]
    fft_score = jnp.fft.irfft2(score_hat, s=(bp, bp), axes=(-2, -1))
    return fft_score.astype(jnp.float32)                            # (A, Bp, Bp)


class BruteForceDockingPallas:
    """Synthetic-weight reimplementation of Models/BruteForce/model_bruteforce_docking.py."""

    def __init__(self, key, num_angles=8):
        k_w, k_c1, k_c2 = jax.random.split(key, 3)
        # boundW, crosstermW1, crosstermW2, bulkW  (each torch.rand(1))
        self.weights = jax.random.uniform(k_w, (4,), jnp.float32)
        # TODO(synk): e2cnn R2Conv filters are parameterized through an SO(2)-steerable
        # basis; here we deterministically initialize the expanded dense 5x5 filters
        # directly (same shapes / same conv math, constraint not enforced).
        self.w_conv1 = jax.random.normal(k_c1, (C_HIDDEN, 1, KSIZE, KSIZE),
                                         jnp.float32) * (1.0 / (KSIZE * KSIZE))
        self.w_conv2 = jax.random.normal(k_c2, (C_FINAL, C_HIDDEN, KSIZE, KSIZE),
                                         jnp.float32) * (1.0 / (C_HIDDEN * KSIZE * KSIZE)) ** 0.5
        self.num_angles = num_angles

    def __call__(self, receptor, ligand):
        rec_feat, lig_feat = se2_invariant_features_pair(
            receptor, ligand, self.w_conv1, self.w_conv2)
        return dock_global(rec_feat, lig_feat, self.weights, self.num_angles)


if __name__ == "__main__":
    key = jax.random.PRNGKey(0)
    k_param, k_rec, k_lig = jax.random.split(key, 3)

    NUM_ANGLES = 8
    H = W = 16
    model = BruteForceDockingPallas(k_param, num_angles=NUM_ANGLES)

    receptor = jax.random.uniform(k_rec, (1, H, W), jnp.float32)
    ligand = jax.random.uniform(k_lig, (1, H, W), jnp.float32)

    fwd = jax.jit(model.__call__)
    fft_score = fwd(receptor, ligand)
    jax.block_until_ready(fft_score)

    assert fft_score.shape == (NUM_ANGLES, 2 * H, 2 * W), fft_score.shape
    assert bool(jnp.all(jnp.isfinite(fft_score)))
    print("KERNEL_OK")
</pallas_src>

<mosaic_0001>
module attributes {stable_mosaic.version = 11 : i64} {
  func.func @_se2_feature_kernel(%arg0: memref<1x1024xf32, #tpu.memory_space<vmem>>, %arg1: memref<25x15x1xf32, #tpu.memory_space<vmem>>, %arg2: memref<25x3x15xf32, #tpu.memory_space<vmem>>, %arg3: memref<15x15xf32, #tpu.memory_space<vmem>>, %arg4: memref<1x1024xf32, #tpu.memory_space<vmem>>, %arg5: memref<2x1024xf32, #tpu.memory_space<vmem>>) attributes {dimension_semantics = [], scalar_prefetch = 0 : i64, scratch_operands = 0 : i64, tpu.core_type = #tpu.core_type<tc>} {
    %c0 = arith.constant 0 : index
    %c0_0 = arith.constant 0 : index
    %0 = vector.load %arg0[%c0, %c0_0] : memref<1x1024xf32, #tpu.memory_space<vmem>>, vector<1x1024xf32>
    %c0_1 = arith.constant 0 : index
    %c0_2 = arith.constant 0 : index
    %1 = vector.load %arg4[%c0_1, %c0_2] : memref<1x1024xf32, #tpu.memory_space<vmem>>, vector<1x1024xf32>
    %cst = arith.constant 0.000000e+00 : f32
    %2 = vector.broadcast %cst : f32 to vector<15x1024xf32>
    %c0_3 = arith.constant 0 : index
    %c0_4 = arith.constant 0 : index
    %c0_5 = arith.constant 0 : index
    %3 = vector.load %arg1[%c0_3, %c0_4, %c0_5] : memref<25x15x1xf32, #tpu.memory_space<vmem>>, vector<1x15x1xf32>
    %4 = vector.shape_cast %3 : vector<1x15x1xf32> to vector<15x1xf32>
    %c42_i32 = arith.constant 42 : i32
    %5 = tpu.dynamic_rotate %0 by %c42_i32 dim 1 : vector<1x1024xf32>, i32 -> vector<1x1024xf32>
    %6 = vector.broadcast %4 : vector<15x1xf32> to vector<15x1024xf32>
    %7 = vector.broadcast %5 : vector<1x1024xf32> to vector<15x1024xf32>
    %8 = arith.mulf %6, %7 : vector<15x1024xf32>
    %9 = arith.addf %2, %8 : vector<15x1024xf32>
    %c1 = arith.constant 1 : index
    %c0_6 = arith.constant 0 : index
    %c0_7 = arith.constant 0 : index
    %10 = vector.load %arg1[%c1, %c0_6, %c0_7] : memref<25x15x1xf32, #tpu.memory_space<vmem>>, vector<1x15x1xf32>
    %11 = vector.shape_cast %10 : vector<1x15x1xf32> to vector<15x1xf32>
    %c41_i32 = arith.constant 41 : i32
    %12 = tpu.dynamic_rotate %0 by %c41_i32 dim 1 : vector<1x1024xf32>, i32 -> vector<1x1024xf32>
    %13 = vector.broadcast %11 : vector<15x1xf32> to vector<15x1024xf32>
    %14 = vector.broadcast %12 : vector<1x1024xf32> to vector<15x1024xf32>
    %15 = arith.mulf %13, %14 : vector<15x1024xf32>
    %16 = arith.addf %9, %15 : vector<15x1024xf32>
    %c2 = arith.constant 2 : index
    %c0_8 = arith.constant 0 : index
    %c0_9 = arith.constant 0 : index
    %17 = vector.load %arg1[%c2, %c0_8, %c0_9] : memref<25x15x1xf32, #tpu.memory_space<vmem>>, vector<1x15x1xf32>
    %18 = vector.shape_cast %17 : vector<1x15x1xf32> to vector<15x1xf32>
    %c40_i32 = arith.constant 40 : i32
    %19 = tpu.dynamic_rotate %0 by %c40_i32 dim 1 : vector<1x1024xf32>, i32 -> vector<1x1024xf32>
    %20 = vector.broadcast %18 : vector<15x1xf32> to vector<15x1024xf32>
    %21 = vector.broadcast %19 : vector<1x1024xf32> to vector<15x1024xf32>
    %22 = arith.mulf %20, %21 : vector<15x1024xf32>
    %23 = arith.addf %16, %22 : vector<15x1024xf32>
    %c3 = arith.constant 3 : index
    %c0_10 = arith.constant 0 : index
    %c0_11 = arith.constant 0 : index
    %24 = vector.load %arg1[%c3, %c0_10, %c0_11] : memref<25x15x1xf32, #tpu.memory_space<vmem>>, vector<1x15x1xf32>
    %25 = vector.shape_cast %24 : vector<1x15x1xf32> to vector<15x1xf32>
    %c39_i32 = arith.constant 39 : i32
    %26 = tpu.dynamic_rotate %0 by %c39_i32 dim 1 : vector<1x1024xf32>, i32 -> vector<1x1024xf32>
    %27 = vector.broadcast %25 : vector<15x1xf32> to vector<15x1024xf32>
    %28 = vector.broadcast %26 : vector<1x1024xf32> to vector<15x1024xf32>
    %29 = arith.mulf %27, %28 : vector<15x1024xf32>
    %30 = arith.addf %23, %29 : vector<15x1024xf32>
    %c4 = arith.constant 4 : index
    %c0_12 = arith.constant 0 : index
    %c0_13 = arith.constant 0 : index
    %31 = vector.load %arg1[%c4, %c0_12, %c0_13] : memref<25x15x1xf32, #tpu.memory_space<vmem>>, vector<1x15x1xf32>
    %32 = vector.shape_cast %31 : vector<1x15x1xf32> to vector<15x1xf32>
    %c38_i32 = arith.constant 38 : i32
    %33 = tpu.dynamic_rotate %0 by %c38_i32 dim 1 : vector<1x1024xf32>, i32 -> vector<1x1024xf32>
    %34 = vector.broadcast %32 : vector<15x1xf32> to vector<15x1024xf32>
    %35 = vector.broadcast %33 : vector<1x1024xf32> to vector<15x1024xf32>
    %36 = arith.mulf %34, %35 : vector<15x1024xf32>
    %37 = arith.addf %30, %36 : vector<15x1024xf32>
    %c5 = arith.constant 5 : index
    %c0_14 = arith.constant 0 : index
    %c0_15 = arith.constant 0 : index
    %38 = vector.load %arg1[%c5, %c0_14, %c0_15] : memref<25x15x1xf32, #tpu.memory_space<vmem>>, vector<1x15x1xf32>
    %39 = vector.shape_cast %38 : vector<1x15x1xf32> to vector<15x1xf32>
    %c22_i32 = arith.constant 22 : i32
    %40 = tpu.dynamic_rotate %0 by %c22_i32 dim 1 : vector<1x1024xf32>, i32 -> vector<1x1024xf32>
    %41 = vector.broadcast %39 : vector<15x1xf32> to vector<15x1024xf32>
    %42 = vector.broadcast %40 : vector<1x1024xf32> to vector<15x1024xf32>
    %43 = arith.mulf %41, %42 : vector<15x1024xf32>
    %44 = arith.addf %37, %43 : vector<15x1024xf32>
    %c6 = arith.constant 6 : index
    %c0_16 = arith.constant 0 : index
    %c0_17 = arith.constant 0 : index
    %45 = vector.load %arg1[%c6, %c0_16, %c0_17] : memref<25x15x1xf32, #tpu.memory_space<vmem>>, vector<1x15x1xf32>
    %46 = vector.shape_cast %45 : vector<1x15x1xf32> to vector<15x1xf32>
    %c21_i32 = arith.constant 21 : i32
    %47 = tpu.dynamic_rotate %0 by %c21_i32 dim 1 : vector<1x1024xf32>, i32 -> vector<1x1024xf32>
    %48 = vector.broadcast %46 : vector<15x1xf32> to vector<15x1024xf32>
    %49 = vector.broadcast %47 : vector<1x1024xf32> to vector<15x1024xf32>
    %50 = arith.mulf %48, %49 : vector<15x1024xf32>
    %51 = arith.addf %44, %50 : vector<15x1024xf32>
    %c7 = arith.constant 7 : index
    %c0_18 = arith.constant 0 : index
    %c0_19 = arith.constant 0 : index
    %52 = vector.load %arg1[%c7, %c0_18, %c0_19] : memref<25x15x1xf32, #tpu.memory_space<vmem>>, vector<1x15x1xf32>
    %53 = vector.shape_cast %52 : vector<1x15x1xf32> to vector<15x1xf32>
    %c20_i32 = arith.constant 20 : i32
    %54 = tpu.dynamic_rotate %0 by %c20_i32 dim 1 : vector<1x1024xf32>, i32 -> vector<1x1024xf32>
    %55 = vector.broadcast %53 : vector<15x1xf32> to vector<15x1024xf32>
    %56 = vector.broadcast %54 : vector<1x1024xf32> to vector<15x1024xf32>
    %57 = arith.mulf %55, %56 : vector<15x1024xf32>
    %58 = arith.addf %51, %57 : vector<15x1024xf32>
    %c8 = arith.constant 8 : index
    %c0_20 = arith.constant 0 : index
    %c0_21 = arith.constant 0 : index
    %59 = vector.load %arg1[%c8, %c0_20, %c0_21] : memref<25x15x1xf32, #tpu.memory_space<vmem>>, vector<1x15x1xf32>
    %60 = vector.shape_cast %59 : vector<1x15x1xf32> to vector<15x1xf32>
    %c19_i32 = arith.constant 19 : i32
    %61 = tpu.dynamic_rotate %0 by %c19_i32 dim 1 : vector<1x1024xf32>, i32 -> vector<1x1024xf32>
    %62 = vector.broadcast %60 : vector<15x1xf32> to vector<15x1024xf32>
    %63 = vector.broadcast %61 : vector<1x1024xf32> to vector<15x1024xf32>
    %64 = arith.mulf %62, %63 : vector<15x1024xf32>
    %65 = arith.addf %58, %64 : vector<15x1024xf32>
    %c9 = arith.constant 9 : index
    %c0_22 = arith.constant 0 : index
    %c0_23 = arith.constant 0 : index
    %66 = vector.load %arg1[%c9, %c0_22, %c0_23] : memref<25x15x1xf32, #tpu.memory_space<vmem>>, vector<1x15x1xf32>
    %67 = vector.shape_cast %66 : vector<1x15x1xf32> to vector<15x1xf32>
    %c18_i32 = arith.constant 18 : i32
    %68 = tpu.dynamic_rotate %0 by %c18_i32 dim 1 : vector<1x1024xf32>, i32 -> vector<1x1024xf32>
    %69 = vector.broadcast %67 : vector<15x1xf32> to vector<15x1024xf32>
    %70 = vector.broadcast %68 : vector<1x1024xf32> to vector<15x1024xf32>
    %71 = arith.mulf %69, %70 : vector<15x1024xf32>
    %72 = arith.addf %65, %71 : vector<15x1024xf32>
    %c10 = arith.constant 10 : index
    %c0_24 = arith.constant 0 : index
    %c0_25 = arith.constant 0 : index
    %73 = vector.load %arg1[%c10, %c0_24, %c0_25] : memref<25x15x1xf32, #tpu.memory_space<vmem>>, vector<1x15x1xf32>
    %74 = vector.shape_cast %73 : vector<1x15x1xf32> to vector<15x1xf32>
    %c2_i32 = arith.constant 2 : i32
    %75 = tpu.dynamic_rotate %0 by %c2_i32 dim 1 : vector<1x1024xf32>, i32 -> vector<1x1024xf32>
    %76 = vector.broadcast %74 : vector<15x1xf32> to vector<15x1024xf32>
    %77 = vector.broadcast %75 : vector<1x1024xf32> to vector<15x1024xf32>
    %78 = arith.mulf %76, %77 : vector<15x1024xf32>
    %79 = arith.addf %72, %78 : vector<15x1024xf32>
    %c11 = arith.constant 11 : index
    %c0_26 = arith.constant 0 : index
    %c0_27 = arith.constant 0 : index
    %80 = vector.load %arg1[%c11, %c0_26, %c0_27] : memref<25x15x1xf32, #tpu.memory_space<vmem>>, vector<1x15x1xf32>
    %81 = vector.shape_cast %80 : vector<1x15x1xf32> to vector<15x1xf32>
    %c1_i32 = arith.constant 1 : i32
    %82 = tpu.dynamic_rotate %0 by %c1_i32 dim 1 : vector<1x1024xf32>, i32 -> vector<1x1024xf32>
    %83 = vector.broadcast %81 : vector<15x1xf32> to vector<15x1024xf32>
    %84 = vector.broadcast %82 : vector<1x1024xf32> to vector<15x1024xf32>
    %85 = arith.mulf %83, %84 : vector<15x1024xf32>
    %86 = arith.addf %79, %85 : vector<15x1024xf32>
    %c12 = arith.constant 12 : index
    %c0_28 = arith.constant 0 : index
    %c0_29 = arith.constant 0 : index
    %87 = vector.load %arg1[%c12, %c0_28, %c0_29] : memref<25x15x1xf32, #tpu.memory_space<vmem>>, vector<1x15x1xf32>
    %88 = vector.shape_cast %87 : vector<1x15x1xf32> to vector<15x1xf32>
    %89 = vector.broadcast %88 : vector<15x1xf32> to vector<15x1024xf32>
    %90 = vector.broadcast %0 : vector<1x1024xf32> to vector<15x1024xf32>
    %91 = arith.mulf %89, %90 : vector<15x1024xf32>
    %92 = arith.addf %86, %91 : vector<15x1024xf32>
    %c13 = arith.constant 13 : index
    %c0_30 = arith.constant 0 : index
    %c0_31 = arith.constant 0 : index
    %93 = vector.load %arg1[%c13, %c0_30, %c0_31] : memref<25x15x1xf32, #tpu.memory_space<vmem>>, vector<1x15x1xf32>
    %94 = vector.shape_cast %93 : vector<1x15x1xf32> to vector<15x1xf32>
    %c1023_i32 = arith.constant 1023 : i32
    %95 = tpu.dynamic_rotate %0 by %c1023_i32 dim 1 : vector<1x1024xf32>, i32 -> vector<1x1024xf32>
    %96 = vector.broadcast %94 : vector<15x1xf32> to vector<15x1024xf32>
    %97 = vector.broadcast %95 : vector<1x1024xf32> to vector<15x1024xf32>
    %98 = arith.mulf %96, %97 : vector<15x1024xf32>
    %99 = arith.addf %92, %98 : vector<15x1024xf32>
    %c14 = arith.constant 14 : index
    %c0_32 = arith.constant 0 : index
    %c0_33 = arith.constant 0 : index
    %100 = vector.load %arg1[%c14, %c0_32, %c0_33] : memref<25x15x1xf32, #tpu.memory_space<vmem>>, vector<1x15x1xf32>
    %101 = vector.shape_cast %100 : vector<1x15x1xf32> to vector<15x1xf32>
    %c1022_i32 = arith.constant 1022 : i32
    %102 = tpu.dynamic_rotate %0 by %c1022_i32 dim 1 : vector<1x1024xf32>, i32 -> vector<1x1024xf32>
    %103 = vector.broadcast %101 : vector<15x1xf32> to vector<15x1024xf32>
    %104 = vector.broadcast %102 : vector<1x1024xf32> to vector<15x1024xf32>
    %105 = arith.mulf %103, %104 : vector<15x1024xf32>
    %106 = arith.addf %99, %105 : vector<15x1024xf32>
    %c15 = arith.constant 15 : index
    %c0_34 = arith.constant 0 : index
    %c0_35 = arith.constant 0 : index
    %107 = vector.load %arg1[%c15, %c0_34, %c0_35] : memref<25x15x1xf32, #tpu.memory_space<vmem>>, vector<1x15x1xf32>
    %108 = vector.shape_cast %107 : vector<1x15x1xf32> to vector<15x1xf32>
    %c1006_i32 = arith.constant 1006 : i32
    %109 = tpu.dynamic_rotate %0 by %c1006_i32 dim 1 : vector<1x1024xf32>, i32 -> vector<1x1024xf32>
    %110 = vector.broadcast %108 : vector<15x1xf32> to vector<15x1024xf32>
    %111 = vector.broadcast %109 : vector<1x1024xf32> to vector<15x1024xf32>
    %112 = arith.mulf %110, %111 : vector<15x1024xf32>
    %113 = arith.addf %106, %112 : vector<15x1024xf32>
    %c16 = arith.constant 16 : index
    %c0_36 = arith.constant 0 : index
    %c0_37 = arith.constant 0 : index
    %114 = vector.load %arg1[%c16, %c0_36, %c0_37] : memref<25x15x1xf32, #tpu.memory_space<vmem>>, vector<1x15x1xf32>
    %115 = vector.shape_cast %114 : vector<1x15x1xf32> to vector<15x1xf32>
    %c1005_i32 = arith.constant 1005 : i32
    %116 = tpu.dynamic_rotate %0 by %c1005_i32 dim 1 : vector<1x1024xf32>, i32 -> vector<1x1024xf32>
    %117 = vector.broadcast %115 : vector<15x1xf32> to vector<15x1024xf32>
    %118 = vector.broadcast %116 : vector<1x1024xf32> to vector<15x1024xf32>
    %119 = arith.mulf %117, %118 : vector<15x1024xf32>
    %120 = arith.addf %113, %119 : vector<15x1024xf32>
    %c17 = arith.constant 17 : index
    %c0_38 = arith.constant 0 : index
    %c0_39 = arith.constant 0 : index
    %121 = vector.load %arg1[%c17, %c0_38, %c0_39] : memref<25x15x1xf32, #tpu.memory_space<vmem>>, vector<1x15x1xf32>
    %122 = vector.shape_cast %121 : vector<1x15x1xf32> to vector<15x1xf32>
    %c1004_i32 = arith.constant 1004 : i32
    %123 = tpu.dynamic_rotate %0 by %c1004_i32 dim 1 : vector<1x1024xf32>, i32 -> vector<1x1024xf32>
    %124 = vector.broadcast %122 : vector<15x1xf32> to vector<15x1024xf32>
    %125 = vector.broadcast %123 : vector<1x1024xf32> to vector<15x1024xf32>
    %126 = arith.mulf %124, %125 : vector<15x1024xf32>
    %127 = arith.addf %120, %126 : vector<15x1024xf32>
    %c18 = arith.constant 18 : index
    %c0_40 = arith.constant 0 : index
    %c0_41 = arith.constant 0 : index
    %128 = vector.load %arg1[%c18, %c0_40, %c0_41] : memref<25x15x1xf32, #tpu.memory_space<vmem>>, vector<1x15x1xf32>
    %129 = vector.shape_cast %128 : vector<1x15x1xf32> to vector<15x1xf32>
    %c1003_i32 = arith.constant 1003 : i32
    %130 = tpu.dynamic_rotate %0 by %c1003_i32 dim 1 : vector<1x1024xf32>, i32 -> vector<1x1024xf32>
    %131 = vector.broadcast %129 : vector<15x1xf32> to vector<15x1024xf32>
    %132 = vector.broadcast %130 : vector<1x1024xf32> to vector<15x1024xf32>
    %133 = arith.mulf %131, %132 : vector<15x1024xf32>
    %134 = arith.addf %127, %133 : vector<15x1024xf32>
    %c19 = arith.constant 19 : index
    %c0_42 = arith.constant 0 : index
    %c0_43 = arith.constant 0 : index
    %135 = vector.load %arg1[%c19, %c0_42, %c0_43] : memref<25x15x1xf32, #tpu.memory_space<vmem>>, vector<1x15x1xf32>
    %136 = vector.shape_cast %135 : vector<1x15x1xf32> to vector<15x1xf32>
    %c1002_i32 = arith.constant 1002 : i32
    %137 = tpu.dynamic_rotate %0 by %c1002_i32 dim 1 : vector<1x1024xf32>, i32 -> vector<1x1024xf32>
    %138 = vector.broadcast %136 : vector<15x1xf32> to vector<15x1024xf32>
    %139 = vector.broadcast %137 : vector<1x1024xf32> to vector<15x1024xf32>
    %140 = arith.mulf %138, %139 : vector<15x1024xf32>
    %141 = arith.addf %134, %140 : vector<15x1024xf32>
    %c20 = arith.constant 20 : index
    %c0_44 = arith.constant 0 : index
    %c0_45 = arith.constant 0 : index
    %142 = vector.load %arg1[%c20, %c0_44, %c0_45] : memref<25x15x1xf32, #tpu.memory_space<vmem>>, vector<1x15x1xf32>
    %143 = vector.shape_cast %142 : vector<1x15x1xf32> to vector<15x1xf32>
    %c986_i32 = arith.constant 986 : i32
    %144 = tpu.dynamic_rotate %0 by %c986_i32 dim 1 : vector<1x1024xf32>, i32 -> vector<1x1024xf32>
    %145 = vector.broadcast %143 : vector<15x1xf32> to vector<15x1024xf32>
    %146 = vector.broadcast %144 : vector<1x1024xf32> to vector<15x1024xf32>
    %147 = arith.mulf %145, %146 : vector<15x1024xf32>
    %148 = arith.addf %141, %147 : vector<15x1024xf32>
    %c21 = arith.constant 21 : index
    %c0_46 = arith.constant 0 : index
    %c0_47 = arith.constant 0 : index
    %149 = vector.load %arg1[%c21, %c0_46, %c0_47] : memref<25x15x1xf32, #tpu.memory_space<vmem>>, vector<1x15x1xf32>
    %150 = vector.shape_cast %149 : vector<1x15x1xf32> to vector<15x1xf32>
    %c985_i32 = arith.constant 985 : i32
    %151 = tpu.dynamic_rotate %0 by %c985_i32 dim 1 : vector<1x1024xf32>, i32 -> vector<1x1024xf32>
    %152 = vector.broadcast %150 : vector<15x1xf32> to vector<15x1024xf32>
    %153 = vector.broadcast %151 : vector<1x1024xf32> to vector<15x1024xf32>
    %154 = arith.mulf %152, %153 : vector<15x1024xf32>
    %155 = arith.addf %148, %154 : vector<15x1024xf32>
    %c22 = arith.constant 22 : index
    %c0_48 = arith.constant 0 : index
    %c0_49 = arith.constant 0 : index
    %156 = vector.load %arg1[%c22, %c0_48, %c0_49] : memref<25x15x1xf32, #tpu.memory_space<vmem>>, vector<1x15x1xf32>
    %157 = vector.shape_cast %156 : vector<1x15x1xf32> to vector<15x1xf32>
    %c984_i32 = arith.constant 984 : i32
    %158 = tpu.dynamic_rotate %0 by %c984_i32 dim 1 : vector<1x1024xf32>, i32 -> vector<1x1024xf32>
    %159 = vector.broadcast %157 : vector<15x1xf32> to vector<15x1024xf32>
    %160 = vector.broadcast %158 : vector<1x1024xf32> to vector<15x1024xf32>
    %161 = arith.mulf %159, %160 : vector<15x1024xf32>
    %162 = arith.addf %155, %161 : vector<15x1024xf32>
    %c23 = arith.constant 23 : index
    %c0_50 = arith.constant 0 : index
    %c0_51 = arith.constant 0 : index
    %163 = vector.load %arg1[%c23, %c0_50, %c0_51] : memref<25x15x1xf32, #tpu.memory_space<vmem>>, vector<1x15x1xf32>
    %164 = vector.shape_cast %163 : vector<1x15x1xf32> to vector<15x1xf32>
    %c983_i32 = arith.constant 983 : i32
    %165 = tpu.dynamic_rotate %0 by %c983_i32 dim 1 : vector<1x1024xf32>, i32 -> vector<1x1024xf32>
    %166 = vector.broadcast %164 : vector<15x1xf32> to vector<15x1024xf32>
    %167 = vector.broadcast %165 : vector<1x1024xf32> to vector<15x1024xf32>
    %168 = arith.mulf %166, %167 : vector<15x1024xf32>
    %169 = arith.addf %162, %168 : vector<15x1024xf32>
    %c24 = arith.constant 24 : index
    %c0_52 = arith.constant 0 : index
    %c0_53 = arith.constant 0 : index
    %170 = vector.load %arg1[%c24, %c0_52, %c0_53] : memref<25x15x1xf32, #tpu.memory_space<vmem>>, vector<1x15x1xf32>
    %171 = vector.shape_cast %170 : vector<1x15x1xf32> to vector<15x1xf32>
    %c982_i32 = arith.constant 982 : i32
    %172 = tpu.dynamic_rotate %0 by %c982_i32 dim 1 : vector<1x1024xf32>, i32 -> vector<1x1024xf32>
    %173 = vector.broadcast %171 : vector<15x1xf32> to vector<15x1024xf32>
    %174 = vector.broadcast %172 : vector<1x1024xf32> to vector<15x1024xf32>
    %175 = arith.mulf %173, %174 : vector<15x1024xf32>
    %176 = arith.addf %169, %175 : vector<15x1024xf32>
    %c0_54 = arith.constant 0 : index
    %c0_55 = arith.constant 0 : index
    %177 = vector.load %arg3[%c0_54, %c0_55] : memref<15x15xf32, #tpu.memory_space<vmem>>, vector<15x15xf32>
    %178 = arith.mulf %176, %176 : vector<15x1024xf32>
    %cst_56 = arith.constant dense<0.000000e+00> : vector<15x1024xf32>
    %179 = tpu.matmul %177, %178, %cst_56 {dimension_numbers = #tpu.dot_dimension_numbers<[1], [0], [0], [1], [0, 0, 1, 1], [], []>} : vector<15x15xf32>, vector<15x1024xf32>, vector<15x1024xf32> -> vector<15x1024xf32>
    %180 = math.sqrt %179 : vector<15x1024xf32>
    %cst_57 = arith.constant 9.99999993E-9 : f32
    %181 = vector.broadcast %cst_57 : f32 to vector<15x1024xf32>
    %182 = arith.maximumf %180, %181 : vector<15x1024xf32>
    %183 = tpu.reciprocal %182 {approx = true} : vector<15x1024xf32> -> vector<15x1024xf32>
    %184 = arith.mulf %180, %183 : vector<15x1024xf32>
    %185 = arith.mulf %176, %184 : vector<15x1024xf32>
    %186 = vector.broadcast %1 : vector<1x1024xf32> to vector<15x1024xf32>
    %187 = arith.mulf %185, %186 : vector<15x1024xf32>
    %cst_58 = arith.constant 0.000000e+00 : f32
    %188 = vector.broadcast %cst_58 : f32 to vector<3x1024xf32>
    %c0_59 = arith.constant 0 : index
    %c0_60 = arith.constant 0 : index
    %c0_61 = arith.constant 0 : index
    %189 = vector.load %arg2[%c0_59, %c0_60, %c0_61] : memref<25x3x15xf32, #tpu.memory_space<vmem>>, vector<1x3x15xf32>
    %190 = vector.shape_cast %189 : vector<1x3x15xf32> to vector<3x15xf32>
    %c42_i32_62 = arith.constant 42 : i32
    %191 = tpu.dynamic_rotate %187 by %c42_i32_62 dim 1 : vector<15x1024xf32>, i32 -> vector<15x1024xf32>
    %cst_63 = arith.constant dense<0.000000e+00> : vector<3x1024xf32>
    %192 = tpu.matmul %190, %191, %cst_63 {dimension_numbers = #tpu.dot_dimension_numbers<[1], [0], [0], [1], [0, 0, 1, 1], [], []>} : vector<3x15xf32>, vector<15x1024xf32>, vector<3x1024xf32> -> vector<3x1024xf32>
    %193 = arith.addf %188, %192 : vector<3x1024xf32>
    %c1_64 = arith.constant 1 : index
    %c0_65 = arith.constant 0 : index
    %c0_66 = arith.constant 0 : index
    %194 = vector.load %arg2[%c1_64, %c0_65, %c0_66] : memref<25x3x15xf32, #tpu.memory_space<vmem>>, vector<1x3x15xf32>
    %195 = vector.shape_cast %194 : vector<1x3x15xf32> to vector<3x15xf32>
    %c41_i32_67 = arith.constant 41 : i32
    %196 = tpu.dynamic_rotate %187 by %c41_i32_67 dim 1 : vector<15x1024xf32>, i32 -> vector<15x1024xf32>
    %cst_68 = arith.constant dense<0.000000e+00> : vector<3x1024xf32>
    %197 = tpu.matmul %195, %196, %cst_68 {dimension_numbers = #tpu.dot_dimension_numbers<[1], [0], [0], [1], [0, 0, 1, 1], [], []>} : vector<3x15xf32>, vector<15x1024xf32>, vector<3x1024xf32> -> vector<3x1024xf32>
    %198 = arith.addf %193, %197 : vector<3x1024xf32>
    %c2_69 = arith.constant 2 : index
    %c0_70 = arith.constant 0 : index
    %c0_71 = arith.constant 0 : index
    %199 = vector.load %arg2[%c2_69, %c0_70, %c0_71] : memref<25x3x15xf32, #tpu.memory_space<vmem>>, vector<1x3x15xf32>
    %200 = vector.shape_cast %199 : vector<1x3x15xf32> to vector<3x15xf32>
    %c40_i32_72 = arith.constant 40 : i32
    %201 = tpu.dynamic_rotate %187 by %c40_i32_72 dim 1 : vector<15x1024xf32>, i32 -> vector<15x1024xf32>
    %cst_73 = arith.constant dense<0.000000e+00> : vector<3x1024xf32>
    %202 = tpu.matmul %200, %201, %cst_73 {dimension_numbers = #tpu.dot_dimension_numbers<[1], [0], [0], [1], [0, 0, 1, 1], [], []>} : vector<3x15xf32>, vector<15x1024xf32>, vector<3x1024xf32> -> vector<3x1024xf32>
    %203 = arith.addf %198, %202 : vector<3x1024xf32>
    %c3_74 = arith.constant 3 : index
    %c0_75 = arith.constant 0 : index
    %c0_76 = arith.constant 0 : index
    %204 = vector.load %arg2[%c3_74, %c0_75, %c0_76] : memref<25x3x15xf32, #tpu.memory_space<vmem>>, vector<1x3x15xf32>
    %205 = vector.shape_cast %204 : vector<1x3x15xf32> to vector<3x15xf32>
    %c39_i32_77 = arith.constant 39 : i32
    %206 = tpu.dynamic_rotate %187 by %c39_i32_77 dim 1 : vector<15x1024xf32>, i32 -> vector<15x1024xf32>
    %cst_78 = arith.constant dense<0.000000e+00> : vector<3x1024xf32>
    %207 = tpu.matmul %205, %206, %cst_78 {dimension_numbers = #tpu.dot_dimension_numbers<[1], [0], [0], [1], [0, 0, 1, 1], [], []>} : vector<3x15xf32>, vector<15x1024xf32>, vector<3x1024xf32> -> vector<3x1024xf32>
    %208 = arith.addf %203, %207 : vector<3x1024xf32>
    %c4_79 = arith.constant 4 : index
    %c0_80 = arith.constant 0 : index
    %c0_81 = arith.constant 0 : index
    %209 = vector.load %arg2[%c4_79, %c0_80, %c0_81] : memref<25x3x15xf32, #tpu.memory_space<vmem>>, vector<1x3x15xf32>
    %210 = vector.shape_cast %209 : vector<1x3x15xf32> to vector<3x15xf32>
    %c38_i32_82 = arith.constant 38 : i32
    %211 = tpu.dynamic_rotate %187 by %c38_i32_82 dim 1 : vector<15x1024xf32>, i32 -> vector<15x1024xf32>
    %cst_83 = arith.constant dense<0.000000e+00> : vector<3x1024xf32>
    %212 = tpu.matmul %210, %211, %cst_83 {dimension_numbers = #tpu.dot_dimension_numbers<[1], [0], [0], [1], [0, 0, 1, 1], [], []>} : vector<3x15xf32>, vector<15x1024xf32>, vector<3x1024xf32> -> vector<3x1024xf32>
    %213 = arith.addf %208, %212 : vector<3x1024xf32>
    %c5_84 = arith.constant 5 : index
    %c0_85 = arith.constant 0 : index
    %c0_86 = arith.constant 0 : index
    %214 = vector.load %arg2[%c5_84, %c0_85, %c0_86] : memref<25x3x15xf32, #tpu.memory_space<vmem>>, vector<1x3x15xf32>
    %215 = vector.shape_cast %214 : vector<1x3x15xf32> to vector<3x15xf32>
    %c22_i32_87 = arith.constant 22 : i32
    %216 = tpu.dynamic_rotate %187 by %c22_i32_87 dim 1 : vector<15x1024xf32>, i32 -> vector<15x1024xf32>
    %cst_88 = arith.constant dense<0.000000e+00> : vector<3x1024xf32>
    %217 = tpu.matmul %215, %216, %cst_88 {dimension_numbers = #tpu.dot_dimension_numbers<[1], [0], [0], [1], [0, 0, 1, 1], [], []>} : vector<3x15xf32>, vector<15x1024xf32>, vector<3x1024xf32> -> vector<3x1024xf32>
    %218 = arith.addf %213, %217 : vector<3x1024xf32>
    %c6_89 = arith.constant 6 : index
    %c0_90 = arith.constant 0 : index
    %c0_91 = arith.constant 0 : index
    %219 = vector.load %arg2[%c6_89, %c0_90, %c0_91] : memref<25x3x15xf32, #tpu.memory_space<vmem>>, vector<1x3x15xf32>
    %220 = vector.shape_cast %219 : vector<1x3x15xf32> to vector<3x15xf32>
    %c21_i32_92 = arith.constant 21 : i32
    %221 = tpu.dynamic_rotate %187 by %c21_i32_92 dim 1 : vector<15x1024xf32>, i32 -> vector<15x1024xf32>
    %cst_93 = arith.constant dense<0.000000e+00> : vector<3x1024xf32>
    %222 = tpu.matmul %220, %221, %cst_93 {dimension_numbers = #tpu.dot_dimension_numbers<[1], [0], [0], [1], [0, 0, 1, 1], [], []>} : vector<3x15xf32>, vector<15x1024xf32>, vector<3x1024xf32> -> vector<3x1024xf32>
    %223 = arith.addf %218, %222 : vector<3x1024xf32>
    %c7_94 = arith.constant 7 : index
    %c0_95 = arith.constant 0 : index
    %c0_96 = arith.constant 0 : index
    %224 = vector.load %arg2[%c7_94, %c0_95, %c0_96] : memref<25x3x15xf32, #tpu.memory_space<vmem>>, vector<1x3x15xf32>
    %225 = vector.shape_cast %224 : vector<1x3x15xf32> to vector<3x15xf32>
    %c20_i32_97 = arith.constant 20 : i32
    %226 = tpu.dynamic_rotate %187 by %c20_i32_97 dim 1 : vector<15x1024xf32>, i32 -> vector<15x1024xf32>
    %cst_98 = arith.constant dense<0.000000e+00> : vector<3x1024xf32>
    %227 = tpu.matmul %225, %226, %cst_98 {dimension_numbers = #tpu.dot_dimension_numbers<[1], [0], [0], [1], [0, 0, 1, 1], [], []>} : vector<3x15xf32>, vector<15x1024xf32>, vector<3x1024xf32> -> vector<3x1024xf32>
    %228 = arith.addf %223, %227 : vector<3x1024xf32>
    %c8_99 = arith.constant 8 : index
    %c0_100 = arith.constant 0 : index
    %c0_101 = arith.constant 0 : index
    %229 = vector.load %arg2[%c8_99, %c0_100, %c0_101] : memref<25x3x15xf32, #tpu.memory_space<vmem>>, vector<1x3x15xf32>
    %230 = vector.shape_cast %229 : vector<1x3x15xf32> to vector<3x15xf32>
    %c19_i32_102 = arith.constant 19 : i32
    %231 = tpu.dynamic_rotate %187 by %c19_i32_102 dim 1 : vector<15x1024xf32>, i32 -> vector<15x1024xf32>
    %cst_103 = arith.constant dense<0.000000e+00> : vector<3x1024xf32>
    %232 = tpu.matmul %230, %231, %cst_103 {dimension_numbers = #tpu.dot_dimension_numbers<[1], [0], [0], [1], [0, 0, 1, 1], [], []>} : vector<3x15xf32>, vector<15x1024xf32>, vector<3x1024xf32> -> vector<3x1024xf32>
    %233 = arith.addf %228, %232 : vector<3x1024xf32>
    %c9_104 = arith.constant 9 : index
    %c0_105 = arith.constant 0 : index
    %c0_106 = arith.constant 0 : index
    %234 = vector.load %arg2[%c9_104, %c0_105, %c0_106] : memref<25x3x15xf32, #tpu.memory_space<vmem>>, vector<1x3x15xf32>
    %235 = vector.shape_cast %234 : vector<1x3x15xf32> to vector<3x15xf32>
    %c18_i32_107 = arith.constant 18 : i32
    %236 = tpu.dynamic_rotate %187 by %c18_i32_107 dim 1 : vector<15x1024xf32>, i32 -> vector<15x1024xf32>
    %cst_108 = arith.constant dense<0.000000e+00> : vector<3x1024xf32>
    %237 = tpu.matmul %235, %236, %cst_108 {dimension_numbers = #tpu.dot_dimension_numbers<[1], [0], [0], [1], [0, 0, 1, 1], [], []>} : vector<3x15xf32>, vector<15x1024xf32>, vector<3x1024xf32> -> vector<3x1024xf32>
    %238 = arith.addf %233, %237 : vector<3x1024xf32>
    %c10_109 = arith.constant 10 : index
    %c0_110 = arith.constant 0 : index
    %c0_111 = arith.constant 0 : index
    %239 = vector.load %arg2[%c10_109, %c0_110, %c0_111] : memref<25x3x15xf32, #tpu.memory_space<vmem>>, vector<1x3x15xf32>
    %240 = vector.shape_cast %239 : vector<1x3x15xf32> to vector<3x15xf32>
    %c2_i32_112 = arith.constant 2 : i32
    %241 = tpu.dynamic_rotate %187 by %c2_i32_112 dim 1 : vector<15x1024xf32>, i32 -> vector<15x1024xf32>
    %cst_113 = arith.constant dense<0.000000e+00> : vector<3x1024xf32>
    %242 = tpu.matmul %240, %241, %cst_113 {dimension_numbers = #tpu.dot_dimension_numbers<[1], [0], [0], [1], [0, 0, 1, 1], [], []>} : vector<3x15xf32>, vector<15x1024xf32>, vector<3x1024xf32> -> vector<3x1024xf32>
    %243 = arith.addf %238, %242 : vector<3x1024xf32>
    %c11_114 = arith.constant 11 : index
    %c0_115 = arith.constant 0 : index
    %c0_116 = arith.constant 0 : index
    %244 = vector.load %arg2[%c11_114, %c0_115, %c0_116] : memref<25x3x15xf32, #tpu.memory_space<vmem>>, vector<1x3x15xf32>
    %245 = vector.shape_cast %244 : vector<1x3x15xf32> to vector<3x15xf32>
    %c1_i32_117 = arith.constant 1 : i32
    %246 = tpu.dynamic_rotate %187 by %c1_i32_117 dim 1 : vector<15x1024xf32>, i32 -> vector<15x1024xf32>
    %cst_118 = arith.constant dense<0.000000e+00> : vector<3x1024xf32>
    %247 = tpu.matmul %245, %246, %cst_118 {dimension_numbers = #tpu.dot_dimension_numbers<[1], [0], [0], [1], [0, 0, 1, 1], [], []>} : vector<3x15xf32>, vector<15x1024xf32>, vector<3x1024xf32> -> vector<3x1024xf32>
    %248 = arith.addf %243, %247 : vector<3x1024xf32>
    %c12_119 = arith.constant 12 : index
    %c0_120 = arith.constant 0 : index
    %c0_121 = arith.constant 0 : index
    %249 = vector.load %arg2[%c12_119, %c0_120, %c0_121] : memref<25x3x15xf32, #tpu.memory_space<vmem>>, vector<1x3x15xf32>
    %250 = vector.shape_cast %249 : vector<1x3x15xf32> to vector<3x15xf32>
    %cst_122 = arith.constant dense<0.000000e+00> : vector<3x1024xf32>
    %251 = tpu.matmul %250, %187, %cst_122 {dimension_numbers = #tpu.dot_dimension_numbers<[1], [0], [0], [1], [0, 0, 1, 1], [], []>} : vector<3x15xf32>, vector<15x1024xf32>, vector<3x1024xf32> -> vector<3x1024xf32>
    %252 = arith.addf %248, %251 : vector<3x1024xf32>
    %c13_123 = arith.constant 13 : index
    %c0_124 = arith.constant 0 : index
    %c0_125 = arith.constant 0 : index
    %253 = vector.load %arg2[%c13_123, %c0_124, %c0_125] : memref<25x3x15xf32, #tpu.memory_space<vmem>>, vector<1x3x15xf32>
    %254 = vector.shape_cast %253 : vector<1x3x15xf32> to vector<3x15xf32>
    %c1023_i32_126 = arith.constant 1023 : i32
    %255 = tpu.dynamic_rotate %187 by %c1023_i32_126 dim 1 : vector<15x1024xf32>, i32 -> vector<15x1024xf32>
    %cst_127 = arith.constant dense<0.000000e+00> : vector<3x1024xf32>
    %256 = tpu.matmul %254, %255, %cst_127 {dimension_numbers = #tpu.dot_dimension_numbers<[1], [0], [0], [1], [0, 0, 1, 1], [], []>} : vector<3x15xf32>, vector<15x1024xf32>, vector<3x1024xf32> -> vector<3x1024xf32>
    %257 = arith.addf %252, %256 : vector<3x1024xf32>
    %c14_128 = arith.constant 14 : index
    %c0_129 = arith.constant 0 : index
    %c0_130 = arith.constant 0 : index
    %258 = vector.load %arg2[%c14_128, %c0_129, %c0_130] : memref<25x3x15xf32, #tpu.memory_space<vmem>>, vector<1x3x15xf32>
    %259 = vector.shape_cast %258 : vector<1x3x15xf32> to vector<3x15xf32>
    %c1022_i32_131 = arith.constant 1022 : i32
    %260 = tpu.dynamic_rotate %187 by %c1022_i32_131 dim 1 : vector<15x1024xf32>, i32 -> vector<15x1024xf32>
    %cst_132 = arith.constant dense<0.000000e+00> : vector<3x1024xf32>
    %261 = tpu.matmul %259, %260, %cst_132 {dimension_numbers = #tpu.dot_dimension_numbers<[1], [0], [0], [1], [0, 0, 1, 1], [], []>} : vector<3x15xf32>, vector<15x1024xf32>, vector<3x1024xf32> -> vector<3x1024xf32>
    %262 = arith.addf %257, %261 : vector<3x1024xf32>
    %c15_133 = arith.constant 15 : index
    %c0_134 = arith.constant 0 : index
    %c0_135 = arith.constant 0 : index
    %263 = vector.load %arg2[%c15_133, %c0_134, %c0_135] : memref<25x3x15xf32, #tpu.memory_space<vmem>>, vector<1x3x15xf32>
    %264 = vector.shape_cast %263 : vector<1x3x15xf32> to vector<3x15xf32>
    %c1006_i32_136 = arith.constant 1006 : i32
    %265 = tpu.dynamic_rotate %187 by %c1006_i32_136 dim 1 : vector<15x1024xf32>, i32 -> vector<15x1024xf32>
    %cst_137 = arith.constant dense<0.000000e+00> : vector<3x1024xf32>
    %266 = tpu.matmul %264, %265, %cst_137 {dimension_numbers = #tpu.dot_dimension_numbers<[1], [0], [0], [1], [0, 0, 1, 1], [], []>} : vector<3x15xf32>, vector<15x1024xf32>, vector<3x1024xf32> -> vector<3x1024xf32>
    %267 = arith.addf %262, %266 : vector<3x1024xf32>
    %c16_138 = arith.constant 16 : index
    %c0_139 = arith.constant 0 : index
    %c0_140 = arith.constant 0 : index
    %268 = vector.load %arg2[%c16_138, %c0_139, %c0_140] : memref<25x3x15xf32, #tpu.memory_space<vmem>>, vector<1x3x15xf32>
    %269 = vector.shape_cast %268 : vector<1x3x15xf32> to vector<3x15xf32>
    %c1005_i32_141 = arith.constant 1005 : i32
    %270 = tpu.dynamic_rotate %187 by %c1005_i32_141 dim 1 : vector<15x1024xf32>, i32 -> vector<15x1024xf32>
    %cst_142 = arith.constant dense<0.000000e+00> : vector<3x1024xf32>
    %271 = tpu.matmul %269, %270, %cst_142 {dimension_numbers = #tpu.dot_dimension_numbers<[1], [0], [0], [1], [0, 0, 1, 1], [], []>} : vector<3x15xf32>, vector<15x1024xf32>, vector<3x1024xf32> -> vector<3x1024xf32>
    %272 = arith.addf %267, %271 : vector<3x1024xf32>
    %c17_143 = arith.constant 17 : index
    %c0_144 = arith.constant 0 : index
    %c0_145 = arith.constant 0 : index
    %273 = vector.load %arg2[%c17_143, %c0_144, %c0_145] : memref<25x3x15xf32, #tpu.memory_space<vmem>>, vector<1x3x15xf32>
    %274 = vector.shape_cast %273 : vector<1x3x15xf32> to vector<3x15xf32>
    %c1004_i32_146 = arith.constant 1004 : i32
    %275 = tpu.dynamic_rotate %187 by %c1004_i32_146 dim 1 : vector<15x1024xf32>, i32 -> vector<15x1024xf32>
    %cst_147 = arith.constant dense<0.000000e+00> : vector<3x1024xf32>
    %276 = tpu.matmul %274, %275, %cst_147 {dimension_numbers = #tpu.dot_dimension_numbers<[1], [0], [0], [1], [0, 0, 1, 1], [], []>} : vector<3x15xf32>, vector<15x1024xf32>, vector<3x1024xf32> -> vector<3x1024xf32>
    %277 = arith.addf %272, %276 : vector<3x1024xf32>
    %c18_148 = arith.constant 18 : index
    %c0_149 = arith.constant 0 : index
    %c0_150 = arith.constant 0 : index
    %278 = vector.load %arg2[%c18_148, %c0_149, %c0_150] : memref<25x3x15xf32, #tpu.memory_space<vmem>>, vector<1x3x15xf32>
    %279 = vector.shape_cast %278 : vector<1x3x15xf32> to vector<3x15xf32>
    %c1003_i32_151 = arith.constant 1003 : i32
    %280 = tpu.dynamic_rotate %187 by %c1003_i32_151 dim 1 : vector<15x1024xf32>, i32 -> vector<15x1024xf32>
    %cst_152 = arith.constant dense<0.000000e+00> : vector<3x1024xf32>
    %281 = tpu.matmul %279, %280, %cst_152 {dimension_numbers = #tpu.dot_dimension_numbers<[1], [0], [0], [1], [0, 0, 1, 1], [], []>} : vector<3x15xf32>, vector<15x1024xf32>, vector<3x1024xf32> -> vector<3x1024xf32>
    %282 = arith.addf %277, %281 : vector<3x1024xf32>
    %c19_153 = arith.constant 19 : index
    %c0_154 = arith.constant 0 : index
    %c0_155 = arith.constant 0 : index
    %283 = vector.load %arg2[%c19_153, %c0_154, %c0_155] : memref<25x3x15xf32, #tpu.memory_space<vmem>>, vector<1x3x15xf32>
    %284 = vector.shape_cast %283 : vector<1x3x15xf32> to vector<3x15xf32>
    %c1002_i32_156 = arith.constant 1002 : i32
    %285 = tpu.dynamic_rotate %187 by %c1002_i32_156 dim 1 : vector<15x1024xf32>, i32 -> vector<15x1024xf32>
    %cst_157 = arith.constant dense<0.000000e+00> : vector<3x1024xf32>
    %286 = tpu.matmul %284, %285, %cst_157 {dimension_numbers = #tpu.dot_dimension_numbers<[1], [0], [0], [1], [0, 0, 1, 1], [], []>} : vector<3x15xf32>, vector<15x1024xf32>, vector<3x1024xf32> -> vector<3x1024xf32>
    %287 = arith.addf %282, %286 : vector<3x1024xf32>
    %c20_158 = arith.constant 20 : index
    %c0_159 = arith.constant 0 : index
    %c0_160 = arith.constant 0 : index
    %288 = vector.load %arg2[%c20_158, %c0_159, %c0_160] : memref<25x3x15xf32, #tpu.memory_space<vmem>>, vector<1x3x15xf32>
    %289 = vector.shape_cast %288 : vector<1x3x15xf32> to vector<3x15xf32>
    %c986_i32_161 = arith.constant 986 : i32
    %290 = tpu.dynamic_rotate %187 by %c986_i32_161 dim 1 : vector<15x1024xf32>, i32 -> vector<15x1024xf32>
    %cst_162 = arith.constant dense<0.000000e+00> : vector<3x1024xf32>
    %291 = tpu.matmul %289, %290, %cst_162 {dimension_numbers = #tpu.dot_dimension_numbers<[1], [0], [0], [1], [0, 0, 1, 1], [], []>} : vector<3x15xf32>, vector<15x1024xf32>, vector<3x1024xf32> -> vector<3x1024xf32>
    %292 = arith.addf %287, %291 : vector<3x1024xf32>
    %c21_163 = arith.constant 21 : index
    %c0_164 = arith.constant 0 : index
    %c0_165 = arith.constant 0 : index
    %293 = vector.load %arg2[%c21_163, %c0_164, %c0_165] : memref<25x3x15xf32, #tpu.memory_space<vmem>>, vector<1x3x15xf32>
    %294 = vector.shape_cast %293 : vector<1x3x15xf32> to vector<3x15xf32>
    %c985_i32_166 = arith.constant 985 : i32
    %295 = tpu.dynamic_rotate %187 by %c985_i32_166 dim 1 : vector<15x1024xf32>, i32 -> vector<15x1024xf32>
    %cst_167 = arith.constant dense<0.000000e+00> : vector<3x1024xf32>
    %296 = tpu.matmul %294, %295, %cst_167 {dimension_numbers = #tpu.dot_dimension_numbers<[1], [0], [0], [1], [0, 0, 1, 1], [], []>} : vector<3x15xf32>, vector<15x1024xf32>, vector<3x1024xf32> -> vector<3x1024xf32>
    %297 = arith.addf %292, %296 : vector<3x1024xf32>
    %c22_168 = arith.constant 22 : index
    %c0_169 = arith.constant 0 : index
    %c0_170 = arith.constant 0 : index
    %298 = vector.load %arg2[%c22_168, %c0_169, %c0_170] : memref<25x3x15xf32, #tpu.memory_space<vmem>>, vector<1x3x15xf32>
    %299 = vector.shape_cast %298 : vector<1x3x15xf32> to vector<3x15xf32>
    %c984_i32_171 = arith.constant 984 : i32
    %300 = tpu.dynamic_rotate %187 by %c984_i32_171 dim 1 : vector<15x1024xf32>, i32 -> vector<15x1024xf32>
    %cst_172 = arith.constant dense<0.000000e+00> : vector<3x1024xf32>
    %301 = tpu.matmul %299, %300, %cst_172 {dimension_numbers = #tpu.dot_dimension_numbers<[1], [0], [0], [1], [0, 0, 1, 1], [], []>} : vector<3x15xf32>, vector<15x1024xf32>, vector<3x1024xf32> -> vector<3x1024xf32>
    %302 = arith.addf %297, %301 : vector<3x1024xf32>
    %c23_173 = arith.constant 23 : index
    %c0_174 = arith.constant 0 : index
    %c0_175 = arith.constant 0 : index
    %303 = vector.load %arg2[%c23_173, %c0_174, %c0_175] : memref<25x3x15xf32, #tpu.memory_space<vmem>>, vector<1x3x15xf32>
    %304 = vector.shape_cast %303 : vector<1x3x15xf32> to vector<3x15xf32>
    %c983_i32_176 = arith.constant 983 : i32
    %305 = tpu.dynamic_rotate %187 by %c983_i32_176 dim 1 : vector<15x1024xf32>, i32 -> vector<15x1024xf32>
    %cst_177 = arith.constant dense<0.000000e+00> : vector<3x1024xf32>
    %306 = tpu.matmul %304, %305, %cst_177 {dimension_numbers = #tpu.dot_dimension_numbers<[1], [0], [0], [1], [0, 0, 1, 1], [], []>} : vector<3x15xf32>, vector<15x1024xf32>, vector<3x1024xf32> -> vector<3x1024xf32>
    %307 = arith.addf %302, %306 : vector<3x1024xf32>
    %c24_178 = arith.constant 24 : index
    %c0_179 = arith.constant 0 : index
    %c0_180 = arith.constant 0 : index
    %308 = vector.load %arg2[%c24_178, %c0_179, %c0_180] : memref<25x3x15xf32, #tpu.memory_space<vmem>>, vector<1x3x15xf32>
    %309 = vector.shape_cast %308 : vector<1x3x15xf32> to vector<3x15xf32>
    %c982_i32_181 = arith.constant 982 : i32
    %310 = tpu.dynamic_rotate %187 by %c982_i32_181 dim 1 : vector<15x1024xf32>, i32 -> vector<15x1024xf32>
    %cst_182 = arith.constant dense<0.000000e+00> : vector<3x1024xf32>
    %311 = tpu.matmul %309, %310, %cst_182 {dimension_numbers = #tpu.dot_dimension_numbers<[1], [0], [0], [1], [0, 0, 1, 1], [], []>} : vector<3x15xf32>, vector<15x1024xf32>, vector<3x1024xf32> -> vector<3x1024xf32>
    %312 = arith.addf %307, %311 : vector<3x1024xf32>
    %313 = vector.extract_strided_slice %312 {offsets = [0, 0], sizes = [1, 1024], strides = [1, 1]} : vector<3x1024xf32> to vector<1x1024xf32>
    %314 = math.absf %313 : vector<1x1024xf32>
    %315 = vector.extract_strided_slice %312 {offsets = [1, 0], sizes = [1, 1024], strides = [1, 1]} : vector<3x1024xf32> to vector<1x1024xf32>
    %316 = vector.extract_strided_slice %312 {offsets = [1, 0], sizes = [1, 1024], strides = [1, 1]} : vector<3x1024xf32> to vector<1x1024xf32>
    %317 = arith.mulf %315, %316 : vector<1x1024xf32>
    %318 = vector.extract_strided_slice %312 {offsets = [2, 0], sizes = [1, 1024], strides = [1, 1]} : vector<3x1024xf32> to vector<1x1024xf32>
    %319 = vector.extract_strided_slice %312 {offsets = [2, 0], sizes = [1, 1024], strides = [1, 1]} : vector<3x1024xf32> to vector<1x1024xf32>
    %320 = arith.mulf %318, %319 : vector<1x1024xf32>
    %321 = arith.addf %317, %320 : vector<1x1024xf32>
    %322 = math.sqrt %321 : vector<1x1024xf32>
    %cst_183 = arith.constant 9.99999993E-9 : f32
    %323 = vector.broadcast %cst_183 : f32 to vector<1x1024xf32>
    %324 = arith.maximumf %314, %323 : vector<1x1024xf32>
    %325 = tpu.reciprocal %324 {approx = true} : vector<1x1024xf32> -> vector<1x1024xf32>
    %326 = arith.mulf %314, %325 : vector<1x1024xf32>
    %327 = arith.mulf %314, %326 : vector<1x1024xf32>
    %cst_184 = arith.constant 9.99999993E-9 : f32
    %328 = vector.broadcast %cst_184 : f32 to vector<1x1024xf32>
    %329 = arith.maximumf %322, %328 : vector<1x1024xf32>
    %330 = tpu.reciprocal %329 {approx = true} : vector<1x1024xf32> -> vector<1x1024xf32>
    %331 = arith.mulf %322, %330 : vector<1x1024xf32>
    %332 = arith.mulf %322, %331 : vector<1x1024xf32>
    %333 = tpu.concatenate %327, %332 in 0 : vector<1x1024xf32>, vector<1x1024xf32> -> vector<2x1024xf32>
    %c0_185 = arith.constant 0 : index
    %c0_186 = arith.constant 0 : index
    %334 = vector.load %arg5[%c0_185, %c0_186] : memref<2x1024xf32, #tpu.memory_space<vmem>>, vector<2x1024xf32>
    tpu.vector_store %arg5[%c0_185, %c0_186], %333 {strides = array<i32>} : memref<2x1024xf32, #tpu.memory_space<vmem>>, vector<2x1024xf32>,
    return
  }
}

module attributes {stable_mosaic.version = 11 : i64} {
  func.func @_fft_score_kernel(%arg0: i32, %arg1: memref<32x128xf32, #tpu.memory_space<vmem>>, %arg2: memref<32x128xf32, #tpu.memory_space<vmem>>, %arg3: memref<32x128xf32, #tpu.memory_space<vmem>>, %arg4: memref<32x128xf32, #tpu.memory_space<vmem>>, %arg5: memref<4x32x128xf32, #tpu.memory_space<vmem>>, %arg6: memref<4x32x128xf32, #tpu.memory_space<vmem>>, %arg7: memref<4x32x128xf32, #tpu.memory_space<vmem>>, %arg8: memref<4x32x128xf32, #tpu.memory_space<vmem>>, %arg9: memref<4x32x128xf32, #tpu.memory_space<vmem>>, %arg10: memref<4x32x128xf32, #tpu.memory_space<vmem>>) attributes {dimension_semantics = [#tpu.dimension_semantics<parallel>], iteration_bounds = array<i64: 2>, scalar_prefetch = 0 : i64, scratch_operands = 0 : i64, tpu.core_type = #tpu.core_type<tc>, window_params = [{pipeline_mode = #tpu.pipeline_mode<synchronous>, transform_indices = @transform_0, window_bounds = array<i64: 32, 128>}, {pipeline_mode = #tpu.pipeline_mode<synchronous>, transform_indices = @transform_1, window_bounds = array<i64: 32, 128>}, {pipeline_mode = #tpu.pipeline_mode<synchronous>, transform_indices = @transform_2, window_bounds = array<i64: 32, 128>}, {pipeline_mode = #tpu.pipeline_mode<synchronous>, transform_indices = @transform_3, window_bounds = array<i64: 32, 128>}, {transform_indices = @transform_4, window_bounds = array<i64: 4, 32, 128>}, {transform_indices = @transform_5, window_bounds = array<i64: 4, 32, 128>}, {transform_indices = @transform_6, window_bounds = array<i64: 4, 32, 128>}, {transform_indices = @transform_7, window_bounds = array<i64: 4, 32, 128>}, {transform_indices = @transform_8, window_bounds = array<i64: 4, 32, 128>}, {transform_indices = @transform_9, window_bounds = array<i64: 4, 32, 128>}]} {
    %c0 = arith.constant 0 : index
    %c0_0 = arith.constant 0 : index
    %0 = vector.load %arg1[%c0, %c0_0] : memref<32x128xf32, #tpu.memory_space<vmem>>, vector<32x128xf32>
    %c0_1 = arith.constant 0 : index
    %c0_2 = arith.constant 0 : index
    %1 = vector.load %arg2[%c0_1, %c0_2] : memref<32x128xf32, #tpu.memory_space<vmem>>, vector<32x128xf32>
    %c0_3 = arith.constant 0 : index
    %c0_4 = arith.constant 0 : index
    %2 = vector.load %arg3[%c0_3, %c0_4] : memref<32x128xf32, #tpu.memory_space<vmem>>, vector<32x128xf32>
    %c0_5 = arith.constant 0 : index
    %c0_6 = arith.constant 0 : index
    %3 = vector.load %arg4[%c0_5, %c0_6] : memref<32x128xf32, #tpu.memory_space<vmem>>, vector<32x128xf32>
    %c0_7 = arith.constant 0 : index
    %c0_8 = arith.constant 0 : index
    %c0_9 = arith.constant 0 : index
    %4 = vector.load %arg5[%c0_7, %c0_8, %c0_9] : memref<4x32x128xf32, #tpu.memory_space<vmem>>, vector<4x32x128xf32>
    %c0_10 = arith.constant 0 : index
    %c0_11 = arith.constant 0 : index
    %c0_12 = arith.constant 0 : index
    %5 = vector.load %arg6[%c0_10, %c0_11, %c0_12] : memref<4x32x128xf32, #tpu.memory_space<vmem>>, vector<4x32x128xf32>
    %c0_13 = arith.constant 0 : index
    %c0_14 = arith.constant 0 : index
    %c0_15 = arith.constant 0 : index
    %6 = vector.load %arg7[%c0_13, %c0_14, %c0_15] : memref<4x32x128xf32, #tpu.memory_space<vmem>>, vector<4x32x128xf32>
    %c0_16 = arith.constant 0 : index
    %c0_17 = arith.constant 0 : index
    %c0_18 = arith.constant 0 : index
    %7 = vector.load %arg8[%c0_16, %c0_17, %c0_18] : memref<4x32x128xf32, #tpu.memory_space<vmem>>, vector<4x32x128xf32>
    %8 = vector.shape_cast %0 : vector<32x128xf32> to vector<1x32x128xf32>
    %9 = vector.broadcast %8 : vector<1x32x128xf32> to vector<4x32x128xf32>
    %10 = arith.mulf %9, %4 : vector<4x32x128xf32>
    %11 = vector.shape_cast %1 : vector<32x128xf32> to vector<1x32x128xf32>
    %12 = vector.broadcast %11 : vector<1x32x128xf32> to vector<4x32x128xf32>
    %13 = arith.mulf %12, %5 : vector<4x32x128xf32>
    %14 = arith.addf %10, %13 : vector<4x32x128xf32>
    %15 = vector.shape_cast %2 : vector<32x128xf32> to vector<1x32x128xf32>
    %16 = vector.broadcast %15 : vector<1x32x128xf32> to vector<4x32x128xf32>
    %17 = arith.mulf %16, %6 : vector<4x32x128xf32>
    %18 = arith.addf %14, %17 : vector<4x32x128xf32>
    %19 = vector.shape_cast %3 : vector<32x128xf32> to vector<1x32x128xf32>
    %20 = vector.broadcast %19 : vector<1x32x128xf32> to vector<4x32x128xf32>
    %21 = arith.mulf %20, %7 : vector<4x32x128xf32>
    %22 = arith.addf %18, %21 : vector<4x32x128xf32>
    %c0_19 = arith.constant 0 : index
    %c0_20 = arith.constant 0 : index
    %c0_21 = arith.constant 0 : index
    %23 = vector.load %arg9[%c0_19, %c0_20, %c0_21] : memref<4x32x128xf32, #tpu.memory_space<vmem>>, vector<4x32x128xf32>
    tpu.vector_store %arg9[%c0_19, %c0_20, %c0_21], %22 {strides = array<i32>} : memref<4x32x128xf32, #tpu.memory_space<vmem>>, vector<4x32x128xf32>,
    %24 = vector.shape_cast %1 : vector<32x128xf32> to vector<1x32x128xf32>
    %25 = vector.broadcast %24 : vector<1x32x128xf32> to vector<4x32x128xf32>
    %26 = arith.mulf %25, %4 : vector<4x32x128xf32>
    %27 = vector.shape_cast %0 : vector<32x128xf32> to vector<1x32x128xf32>
    %28 = vector.broadcast %27 : vector<1x32x128xf32> to vector<4x32x128xf32>
    %29 = arith.mulf %28, %5 : vector<4x32x128xf32>
    %30 = arith.subf %26, %29 : vector<4x32x128xf32>
    %31 = vector.shape_cast %3 : vector<32x128xf32> to vector<1x32x128xf32>
    %32 = vector.broadcast %31 : vector<1x32x128xf32> to vector<4x32x128xf32>
    %33 = arith.mulf %32, %6 : vector<4x32x128xf32>
    %34 = arith.addf %30, %33 : vector<4x32x128xf32>
    %35 = vector.shape_cast %2 : vector<32x128xf32> to vector<1x32x128xf32>
    %36 = vector.broadcast %35 : vector<1x32x128xf32> to vector<4x32x128xf32>
    %37 = arith.mulf %36, %7 : vector<4x32x128xf32>
    %38 = arith.subf %34, %37 : vector<4x32x128xf32>
    %c0_22 = arith.constant 0 : index
    %c0_23 = arith.constant 0 : index
    %c0_24 = arith.constant 0 : index
    %39 = vector.load %arg10[%c0_22, %c0_23, %c0_24] : memref<4x32x128xf32, #tpu.memory_space<vmem>>, vector<4x32x128xf32>
    tpu.vector_store %arg10[%c0_22, %c0_23, %c0_24], %38 {strides = array<i32>} : memref<4x32x128xf32, #tpu.memory_space<vmem>>, vector<4x32x128xf32>,
    return
  }
  func.func @transform_0(%arg0: i32) -> (i32, i32) {
    %c0_i32 = arith.constant 0 : i32
    %c0_i32_0 = arith.constant 0 : i32
    %c0_i32_1 = arith.constant 0 : i32
    return %c0_i32, %c0_i32_0 : i32, i32
  }
  func.func @transform_1(%arg0: i32) -> (i32, i32) {
    %c0_i32 = arith.constant 0 : i32
    %c0_i32_0 = arith.constant 0 : i32
    %c0_i32_1 = arith.constant 0 : i32
    return %c0_i32, %c0_i32_0 : i32, i32
  }
  func.func @transform_2(%arg0: i32) -> (i32, i32) {
    %c0_i32 = arith.constant 0 : i32
    %c0_i32_0 = arith.constant 0 : i32
    %c0_i32_1 = arith.constant 0 : i32
    return %c0_i32, %c0_i32_0 : i32, i32
  }
  func.func @transform_3(%arg0: i32) -> (i32, i32) {
    %c0_i32 = arith.constant 0 : i32
    %c0_i32_0 = arith.constant 0 : i32
    %c0_i32_1 = arith.constant 0 : i32
    return %c0_i32, %c0_i32_0 : i32, i32
  }
  func.func @transform_4(%arg0: i32) -> (i32, i32, i32) {
    %c0_i32 = arith.constant 0 : i32
    %c0_i32_0 = arith.constant 0 : i32
    %c0_i32_1 = arith.constant 0 : i32
    return %arg0, %c0_i32, %c0_i32_0 : i32, i32, i32
  }
  func.func @transform_5(%arg0: i32) -> (i32, i32, i32) {
    %c0_i32 = arith.constant 0 : i32
    %c0_i32_0 = arith.constant 0 : i32
    %c0_i32_1 = arith.constant 0 : i32
    return %arg0, %c0_i32, %c0_i32_0 : i32, i32, i32
  }
  func.func @transform_6(%arg0: i32) -> (i32, i32, i32) {
    %c0_i32 = arith.constant 0 : i32
    %c0_i32_0 = arith.constant 0 : i32
    %c0_i32_1 = arith.constant 0 : i32
    return %arg0, %c0_i32, %c0_i32_0 : i32, i32, i32
  }
  func.func @transform_7(%arg0: i32) -> (i32, i32, i32) {
    %c0_i32 = arith.constant 0 : i32
    %c0_i32_0 = arith.constant 0 : i32
    %c0_i32_1 = arith.constant 0 : i32
    return %arg0, %c0_i32, %c0_i32_0 : i32, i32, i32
  }
  func.func @transform_8(%arg0: i32) -> (i32, i32, i32) {
    %c0_i32 = arith.constant 0 : i32
    %c0_i32_0 = arith.constant 0 : i32
    %c0_i32_1 = arith.constant 0 : i32
    return %arg0, %c0_i32, %c0_i32_0 : i32, i32, i32
  }
  func.func @transform_9(%arg0: i32) -> (i32, i32, i32) {
    %c0_i32 = arith.constant 0 : i32
    %c0_i32_0 = arith.constant 0 : i32
    %c0_i32_1 = arith.constant 0 : i32
    return %arg0, %c0_i32, %c0_i32_0 : i32, i32, i32
  }
}

</mosaic_0001>

<bundles_post_ra>
// kernel: a_call__.2
= control target key start
LH: loop header
LB: loop body
LE: loop exit
PB: predicated region body
PF: predicated region fallthrough
CT: control target
= control target key end

     0   :  { %v19079_v0 = vlaneseq  ;;  %v13064_v1 = vmov 0   ;;  %s13065_s20 = smov 42   ;;  %s13066_s24 = smov 41   ;;  %s19066_s0 = inlined_call_operand.vmem [shape: f32[1,1024], index: 0, kind: input, shape index: {}]   ;;  %s19067_s1 = inlined_call_operand.vmem [shape: f32[25,15,1], index: 1, kind: input, shape index: {}]   ;;  %s19068_s3 = inlined_call_operand.vmem [shape: f32[15,15], index: 3, kind: input, shape index: {}]   ;;  %s19069_s4 = inlined_call_operand.vmem [shape: f32[1,1024], index: 4, kind: input, shape index: {}]   ;;  %s19070_s2 = inlined_call_operand.vmem [shape: f32[25,3,15], index: 2, kind: input, shape index: {}]   ;;  %s19071_s5 = inlined_call_operand.vmem [shape: f32[2,1024], index: 5, kind: output, shape index: {}]  }
   0x1   :  { %12951 = vset.pattern.permute.xlu1 %v13064_v1  ;;  %12950 = vset.pattern.permute.xlu0 %v13064_v1  ;;  %v20_v3 = vld [vmem:[%s19066_s0] sm:$0xff]  ;;  %v23_v20 = vld [vmem:[%s19067_s1 + $0x8] sm:$0x7f]  ;;  %v12535_v22 = vld [vmem:[%s19067_s1 + $0x10] sm:$0xff]  ;;  %s13067_s29 = smov 40   ;;  %s13068_s9 = smov 39  }
   0x2   :  { %v13122_v2 = vshrl.u32 %v19079_v0, 7  ;;  %v22_v21 = vld [vmem:[%s19067_s1] sm:$0xff]  ;;  %v12536_v23 = vld [vmem:[%s19067_s1 + $0x18] sm:$0x7f]  ;;  %v12538_v25 = vld [vmem:[%s19067_s1 + $0x28] sm:$0x7f] }
   0x3   :  { %v12537_v24 = vld [vmem:[%s19067_s1 + $0x20] sm:$0xff]  ;;  %v12539_v26 = vld [vmem:[%s19067_s1 + $0x30] sm:$0xff]  ;;  %v12540_v27 = vld [vmem:[%s19067_s1 + $0x38] sm:$0x7f]  ;;  %s13069_s14 = smov 38   ;;  %s13070_s19 = smov 22  }
   0x4   :  { %19254 = vst [vmem:[#allocation2_spill] sm:$0xff] %v13122_v2  ;;  %v13128_v4 = vsub.s32 0, %v13122_v2  ;;  %v19078_v5 = vsub.s32 2, %v13122_v2  ;;  %v19076_v6 = vsub.s32 3, %v13122_v2  ;;  %v19077_v7 = vsub.s32 1, %v13122_v2  ;;  %v12541_v28 = vld [vmem:[%s19067_s1 + $0x40] sm:$0xff] }
   0x5   :  { %v19074_v12 = vsub.s32 5, %v13122_v2  ;;  %v19075_v13 = vsub.s32 4, %v13122_v2  ;;  %v19072_v16 = vsub.s32 7, %v13122_v2  ;;  %v19073_v17 = vsub.s32 6, %v13122_v2  ;;  %v12542_v29 = vld [vmem:[%s19067_s1 + $0x48] sm:$0x7f] }
   0x6   :  { %v13135_v8 = vrot.slane %v20_v3, %v19078_v5  ;;  %v13138_v9 = vrot.slane %v20_v3, %v13128_v4  ;;  %v13146_v10 = vrot.slane %v20_v3, %v19076_v6  ;;  %v13150_v11 = vrot.slane %v20_v3, %v19077_v7  ;;  %v12543_v30 = vld [vmem:[%s19067_s1 + $0x50] sm:$0xff]  ;;  %v12544_v31 = vld [vmem:[%s19067_s1 + $0x58] sm:$0x7f]  ;;  %s13071_s25 = smov 21   ;;  %v12545_v38 = vld [vmem:[%s19067_s1 + $0x60] sm:$0xff]  ;;  %s13072_s6 = smov 20  }
   0x7   :  { %v13160_v14 = vrot.slane %v20_v3, %v19074_v12  ;;  %v13164_v15 = vrot.slane %v20_v3, %v19075_v13  ;;  %v13174_v18 = vrot.slane %v20_v3, %v19072_v16  ;;  %v13178_v19 = vrot.slane %v20_v3, %v19073_v17  ;;  %v12546_v39 = vld [vmem:[%s19067_s1 + $0x68] sm:$0x7f]  ;;  %v12547_v50 = vld [vmem:[%s19067_s1 + $0x70] sm:$0xff]  ;;  %v12548_v51 = vld [vmem:[%s19067_s1 + $0x78] sm:$0x7f]  ;;  %s13073_s12 = smov 19  }
   0x8   :  { %19255 = vst [vmem:[#allocation3_spill] sm:$0xff] %v13135_v8  ;;  %69 = vrot.lane.b32.xlu1 %v13135_v8, %s13065_s20  ;;  %65 = vrot.lane.b32.xlu0 %v13138_v9, %s13065_s20  ;;  %19256 = vst [vmem:[#allocation4_spill] sm:$0xff] %v13146_v10  ;;  %v12549_v62 = vld [vmem:[%s19067_s1 + $0x80] sm:$0xff]  ;;  %v12550_v63 = vld [vmem:[%s19067_s1 + $0x88] sm:$0x7f]  ;;  %s13074_s18 = smov 18  }
   0x9   :  { %s13075_s26 = smov 2   ;;  %v12553_v16 = vld [vmem:[%s19067_s1 + $0xa0] sm:$0xff]  ;;  %v12554_v17 = vld [vmem:[%s19067_s1 + $0xa8] sm:$0x7f]  ;;  %s13076_s8 = smov 1  }
   0xa   :  { %s13077_s22 = smov 127   ;;  %s13078_s7 = smov 126  }
   0xb   :  { %s13079_s16 = smov 110   ;;  %s13080_s27 = smov 109  }
   0xc   :  { %71 = vrot.lane.b32.xlu1 %v13146_v10, %s13065_s20  ;;  %67 = vrot.lane.b32.xlu0 %v13150_v11, %s13065_s20  ;;  %s13081_s13 = smov 108   ;;  %s13082_s23 = smov 107  }
   0xd   :  { %s13083_s15 = smov 106   ;;  %s13084_s30 = smov 90  }
   0xe   :  { %s19199_s21 = smov 89   ;;  %s13086_s0 = smov 88  }
   0xf   :  { %s13087_s11 = smov 87  }
  0x10   :  { %75 = vrot.lane.b32.xlu1 %v13160_v14, %s13065_s20  ;;  %73 = vrot.lane.b32.xlu0 %v13164_v15, %s13065_s20 }
  0x14   :  { %79 = vrot.lane.b32.xlu1 %v13174_v18, %s13065_s20  ;;  %77 = vrot.lane.b32.xlu0 %v13178_v19, %s13065_s20 }
  0x18   :  { %99 = vperm.xlu1 %12951, %v23_v20   ;;  %94 = vperm.xlu0 %12950, %v22_v21  }
  0x1c   :  { %169 = vrot.lane.b32.xlu1 %v13138_v9, %s13066_s24  ;;  %171 = vrot.lane.b32.xlu0 %v13150_v11, %s13066_s24 }
  0x20   :  { %173 = vrot.lane.b32.xlu1 %v13135_v8, %s13066_s24  ;;  %175 = vrot.lane.b32.xlu0 %v13146_v10, %s13066_s24 }
  0x24   :  { %177 = vrot.lane.b32.xlu1 %v13164_v15, %s13066_s24  ;;  %179 = vrot.lane.b32.xlu0 %v13160_v14, %s13066_s24 }
  0x28   :  { %181 = vrot.lane.b32.xlu1 %v13178_v19, %s13066_s24  ;;  %183 = vrot.lane.b32.xlu0 %v13174_v18, %s13066_s24 }
  0x2c   :  { %196 = vperm.xlu1 %12951, %v12535_v22   ;;  %201 = vperm.xlu0 %12950, %v12536_v23  }
  0x30   :  { %271 = vrot.lane.b32.xlu1 %v13138_v9, %s13067_s29  ;;  %273 = vrot.lane.b32.xlu0 %v13150_v11, %s13067_s29 }
  0x34   :  { %275 = vrot.lane.b32.xlu1 %v13135_v8, %s13067_s29  ;;  %277 = vrot.lane.b32.xlu0 %v13146_v10, %s13067_s29 }
  0x38   :  { %279 = vrot.lane.b32.xlu1 %v13164_v15, %s13067_s29  ;;  %281 = vrot.lane.b32.xlu0 %v13160_v14, %s13067_s29 }
  0x3c   :  { %283 = vrot.lane.b32.xlu1 %v13178_v19, %s13067_s29  ;;  %285 = vrot.lane.b32.xlu0 %v13174_v18, %s13067_s29 }
  0x40   :  { %298 = vperm.xlu1 %12951, %v12537_v24   ;;  %303 = vperm.xlu0 %12950, %v12538_v25  }
  0x44   :  { %373 = vrot.lane.b32.xlu1 %v13138_v9, %s13068_s9  ;;  %375 = vrot.lane.b32.xlu0 %v13150_v11, %s13068_s9 }
  0x48   :  { %377 = vrot.lane.b32.xlu1 %v13135_v8, %s13068_s9  ;;  %379 = vrot.lane.b32.xlu0 %v13146_v10, %s13068_s9 }
  0x4c   :  { %381 = vrot.lane.b32.xlu1 %v13164_v15, %s13068_s9  ;;  %383 = vrot.lane.b32.xlu0 %v13160_v14, %s13068_s9 }
  0x50   :  { %385 = vrot.lane.b32.xlu1 %v13178_v19, %s13068_s9  ;;  %387 = vrot.lane.b32.xlu0 %v13174_v18, %s13068_s9 }
  0x54   :  { %400 = vperm.xlu1 %12951, %v12539_v26   ;;  %405 = vperm.xlu0 %12950, %v12540_v27  }
  0x58   :  { %475 = vrot.lane.b32.xlu1 %v13138_v9, %s13069_s14  ;;  %477 = vrot.lane.b32.xlu0 %v13150_v11, %s13069_s14 }
  0x5c   :  { %479 = vrot.lane.b32.xlu1 %v13135_v8, %s13069_s14  ;;  %481 = vrot.lane.b32.xlu0 %v13146_v10, %s13069_s14 }
  0x60   :  { %483 = vrot.lane.b32.xlu1 %v13164_v15, %s13069_s14  ;;  %485 = vrot.lane.b32.xlu0 %v13160_v14, %s13069_s14 }
  0x64   :  { %487 = vrot.lane.b32.xlu1 %v13178_v19, %s13069_s14  ;;  %489 = vrot.lane.b32.xlu0 %v13174_v18, %s13069_s14 }
  0x68   :  { %502 = vperm.xlu1 %12951, %v12541_v28   ;;  %507 = vperm.xlu0 %12950, %v12542_v29   ;;  %v12551_v28 = vld [vmem:[%s19067_s1 + $0x90] sm:$0xff]  ;;  %v12552_v29 = vld [vmem:[%s19067_s1 + $0x98] sm:$0x7f] }
  0x6c   :  { %577 = vrot.lane.b32.xlu1 %v13138_v9, %s13070_s19  ;;  %579 = vrot.lane.b32.xlu0 %v13150_v11, %s13070_s19 }
  0x70   :  { %581 = vrot.lane.b32.xlu1 %v13135_v8, %s13070_s19  ;;  %583 = vrot.lane.b32.xlu0 %v13146_v10, %s13070_s19 }
  0x74   :  { %585 = vrot.lane.b32.xlu1 %v13164_v15, %s13070_s19  ;;  %587 = vrot.lane.b32.xlu0 %v13160_v14, %s13070_s19 }
  0x78   :  { %589 = vrot.lane.b32.xlu1 %v13178_v19, %s13070_s19  ;;  %591 = vrot.lane.b32.xlu0 %v13174_v18, %s13070_s19 }
  0x7a   :  { %v13300_v32 = vpop.permute.xlu1 %69  ;;  %v13302_v33 = vpop.permute.xlu0 %65 }
  0x7c   :  { %604 = vperm.xlu1 %12951, %v12543_v30   ;;  %609 = vperm.xlu0 %12950, %v12544_v31  }
  0x7e   :  { %v13308_v34 = vpop.permute.xlu1 %71  ;;  %v13310_v35 = vpop.permute.xlu0 %67 }
  0x80   :  { %679 = vrot.lane.b32.xlu1 %v13138_v9, %s13071_s25  ;;  %681 = vrot.lane.b32.xlu0 %v13150_v11, %s13071_s25 }
  0x82   :  { %v13320_v36 = vpop.permute.xlu1 %75  ;;  %v13322_v37 = vpop.permute.xlu0 %73 }
  0x84   :  { %683 = vrot.lane.b32.xlu1 %v13135_v8, %s13071_s25  ;;  %685 = vrot.lane.b32.xlu0 %v13146_v10, %s13071_s25 }
  0x86   :  { %v13334_v40 = vpop.permute.xlu1 %79  ;;  %v13336_v41 = vpop.permute.xlu0 %77 }
  0x88   :  { %687 = vrot.lane.b32.xlu1 %v13164_v15, %s13071_s25  ;;  %689 = vrot.lane.b32.xlu0 %v13160_v14, %s13071_s25 }
  0x8c   :  { %691 = vrot.lane.b32.xlu1 %v13178_v19, %s13071_s25  ;;  %693 = vrot.lane.b32.xlu0 %v13174_v18, %s13071_s25 }
  0x90   :  { %706 = vperm.xlu1 %12951, %v12545_v38   ;;  %711 = vperm.xlu0 %12950, %v12546_v39  }
  0x93   :  { %v13338_v42 = vpop.permute.xlu1 %99  ;;  %v13340_v43 = vpop.permute.xlu0 %94 }
  0x94   :  { %781 = vrot.lane.b32.xlu1 %v13138_v9, %s13072_s6  ;;  %783 = vrot.lane.b32.xlu0 %v13150_v11, %s13072_s6 }
  0x97   :  { %v13346_v44 = vpop.permute.xlu1 %169  ;;  %v13348_v45 = vpop.permute.xlu0 %171 }
  0x98   :  { %785 = vrot.lane.b32.xlu1 %v13135_v8, %s13072_s6  ;;  %787 = vrot.lane.b32.xlu0 %v13146_v10, %s13072_s6 }
  0x9b   :  { %v13354_v46 = vpop.permute.xlu1 %173  ;;  %v13356_v47 = vpop.permute.xlu0 %175 }
  0x9c   :  { %789 = vrot.lane.b32.xlu1 %v13164_v15, %s13072_s6  ;;  %791 = vrot.lane.b32.xlu0 %v13160_v14, %s13072_s6 }
  0x9f   :  { %v13362_v48 = vpop.permute.xlu1 %177  ;;  %v13364_v49 = vpop.permute.xlu0 %179 }
  0xa0   :  { %793 = vrot.lane.b32.xlu1 %v13178_v19, %s13072_s6  ;;  %795 = vrot.lane.b32.xlu0 %v13174_v18, %s13072_s6 }
  0xa3   :  { %v13376_v52 = vpop.permute.xlu1 %181  ;;  %v13378_v53 = vpop.permute.xlu0 %183 }
  0xa4   :  { %808 = vperm.xlu1 %12951, %v12547_v50   ;;  %813 = vperm.xlu0 %12950, %v12548_v51  }
  0xa7   :  { %v13380_v54 = vpop.permute.xlu1 %196  ;;  %v13382_v55 = vpop.permute.xlu0 %201 }
  0xa8   :  { %883 = vrot.lane.b32.xlu1 %v13138_v9, %s13073_s12  ;;  %885 = vrot.lane.b32.xlu0 %v13150_v11, %s13073_s12 }
  0xab   :  { %v13388_v56 = vpop.permute.xlu1 %271  ;;  %v13390_v57 = vpop.permute.xlu0 %273 }
  0xac   :  { %887 = vrot.lane.b32.xlu1 %v13135_v8, %s13073_s12  ;;  %889 = vrot.lane.b32.xlu0 %v13146_v10, %s13073_s12 }
  0xaf   :  { %v13396_v58 = vpop.permute.xlu1 %275  ;;  %v13398_v59 = vpop.permute.xlu0 %277 }
  0xb0   :  { %891 = vrot.lane.b32.xlu1 %v13164_v15, %s13073_s12  ;;  %893 = vrot.lane.b32.xlu0 %v13160_v14, %s13073_s12 }
  0xb3   :  { %v13404_v60 = vpop.permute.xlu1 %279  ;;  %v13406_v61 = vpop.permute.xlu0 %281 }
  0xb4   :  { %895 = vrot.lane.b32.xlu1 %v13178_v19, %s13073_s12  ;;  %897 = vrot.lane.b32.xlu0 %v13174_v18, %s13073_s12 }
  0xb7   :  { %v13418_v1 = vpop.permute.xlu1 %283  ;;  %v13420_v3 = vpop.permute.xlu0 %285 }
  0xb8   :  { %910 = vperm.xlu1 %12951, %v12549_v62   ;;  %915 = vperm.xlu0 %12950, %v12550_v63  }
  0xbb   :  { %v13422_v20 = vpop.permute.xlu1 %298  ;;  %v13424_v21 = vpop.permute.xlu0 %303 }
  0xbc   :  { %19257 = vst [vmem:[#allocation5_spill] sm:$0xff] %v13424_v21  ;;  %985 = vrot.lane.b32.xlu1 %v13138_v9, %s13074_s18  ;;  %987 = vrot.lane.b32.xlu0 %v13150_v11, %s13074_s18 }
  0xbf   :  { %v13430_v22 = vpop.permute.xlu1 %373  ;;  %v13432_v23 = vpop.permute.xlu0 %375 }
  0xc0   :  { %19258 = vst [vmem:[#allocation6_spill] sm:$0xff] %v13432_v23  ;;  %989 = vrot.lane.b32.xlu1 %v13135_v8, %s13074_s18  ;;  %991 = vrot.lane.b32.xlu0 %v13146_v10, %s13074_s18 }
  0xc3   :  { %v13438_v24 = vpop.permute.xlu1 %377  ;;  %v13440_v25 = vpop.permute.xlu0 %379 }
  0xc4   :  { %19259 = vst [vmem:[#allocation7_spill] sm:$0xff] %v13438_v24  ;;  %19260 = vst [vmem:[#allocation8_spill] sm:$0xff] %v13440_v25  ;;  %993 = vrot.lane.b32.xlu1 %v13164_v15, %s13074_s18  ;;  %995 = vrot.lane.b32.xlu0 %v13160_v14, %s13074_s18 }
  0xc7   :  { %v13446_v26 = vpop.permute.xlu1 %381  ;;  %v13448_v27 = vpop.permute.xlu0 %383 }
  0xc8   :  { %19261 = vst [vmem:[#allocation9_spill] sm:$0xff] %v13446_v26  ;;  %19262 = vst [vmem:[#allocation10_spill] sm:$0xff] %v13448_v27  ;;  %997 = vrot.lane.b32.xlu1 %v13178_v19, %s13074_s18  ;;  %999 = vrot.lane.b32.xlu0 %v13174_v18, %s13074_s18 }
  0xcb   :  { %v13460_v30 = vpop.permute.xlu1 %385  ;;  %v13462_v31 = vpop.permute.xlu0 %387 }
  0xcc   :  { %19263 = vst [vmem:[#allocation11_spill] sm:$0xff] %v13460_v30  ;;  %1012 = vperm.xlu1 %12951, %v12551_v28   ;;  %1017 = vperm.xlu0 %12950, %v12552_v29  }
  0xcf   :  { %v13464_v38 = vpop.permute.xlu1 %400  ;;  %v13466_v39 = vpop.permute.xlu0 %405 }
  0xd0   :  { %19264 = vst [vmem:[#allocation12_spill] sm:$0xff] %v13464_v38  ;;  %19265 = vst [vmem:[#allocation13_spill] sm:$0xff] %v13466_v39  ;;  %1087 = vrot.lane.b32.xlu1 %v13138_v9, %s13075_s26  ;;  %1089 = vrot.lane.b32.xlu0 %v13150_v11, %s13075_s26 }
  0xd3   :  { %v13472_v50 = vpop.permute.xlu1 %475  ;;  %v13474_v51 = vpop.permute.xlu0 %477 }
  0xd4   :  { %19266 = vst [vmem:[#allocation14_spill] sm:$0xff] %v13472_v50  ;;  %19267 = vst [vmem:[#allocation15_spill] sm:$0xff] %v13474_v51  ;;  %1091 = vrot.lane.b32.xlu1 %v13135_v8, %s13075_s26  ;;  %1093 = vrot.lane.b32.xlu0 %v13146_v10, %s13075_s26 }
  0xd7   :  { %v13480_v62 = vpop.permute.xlu1 %479  ;;  %v13482_v63 = vpop.permute.xlu0 %481 }
  0xd8   :  { %19268 = vst [vmem:[#allocation16_spill] sm:$0xff] %v13480_v62  ;;  %19269 = vst [vmem:[#allocation17_spill] sm:$0xff] %v13482_v63  ;;  %1095 = vrot.lane.b32.xlu1 %v13164_v15, %s13075_s26  ;;  %1097 = vrot.lane.b32.xlu0 %v13160_v14, %s13075_s26 }
  0xdb   :  { %v13488_v28 = vpop.permute.xlu1 %483  ;;  %v13490_v29 = vpop.permute.xlu0 %485 }
  0xdc   :  { %19270 = vst [vmem:[#allocation18_spill] sm:$0xff] %v13488_v28  ;;  %19271 = vst [vmem:[#allocation19_spill] sm:$0xff] %v13490_v29  ;;  %1099 = vrot.lane.b32.xlu1 %v13178_v19, %s13075_s26  ;;  %1101 = vrot.lane.b32.xlu0 %v13174_v18, %s13075_s26 }
  0xdf   :  { %v13502_v12 = vpop.permute.xlu1 %487  ;;  %v13504_v13 = vpop.permute.xlu0 %489 }
  0xe0   :  { %19272 = vst [vmem:[#allocation20_spill] sm:$0xff] %v13502_v12  ;;  %19273 = vst [vmem:[#allocation21_spill] sm:$0xff] %v13504_v13  ;;  %1114 = vperm.xlu1 %12951, %v12553_v16   ;;  %1119 = vperm.xlu0 %12950, %v12554_v17  }
  0xe3   :  { %v13506_v6 = vpop.permute.xlu1 %502  ;;  %v13508_v7 = vpop.permute.xlu0 %507 }
  0xe4   :  { %19274 = vst [vmem:[#allocation22_spill] sm:$0xff] %v13506_v6  ;;  %19275 = vst [vmem:[#allocation23_spill] sm:$0xff] %v13508_v7  ;;  %1189 = vrot.lane.b32.xlu1 %v13138_v9, %s13076_s8  ;;  %1191 = vrot.lane.b32.xlu0 %v13150_v11, %s13076_s8 }
  0xe7   :  { %v13514_v5 = vpop.permute.xlu1 %577  ;;  %v13516_v0 = vpop.permute.xlu0 %579 }
  0xe8   :  { %19276 = vst [vmem:[#allocation24_spill] sm:$0xff] %v13514_v5  ;;  %19277 = vst [vmem:[#allocation25_spill] sm:$0xff] %v13516_v0  ;;  %1193 = vrot.lane.b32.xlu1 %v13135_v8, %s13076_s8  ;;  %1195 = vrot.lane.b32.xlu0 %v13146_v10, %s13076_s8 }
  0xeb   :  { %v13522_v16 = vpop.permute.xlu1 %581  ;;  %v13524_v17 = vpop.permute.xlu0 %583 }
  0xec   :  { %19278 = vst [vmem:[#allocation26_spill] sm:$0xff] %v13522_v16  ;;  %19279 = vst [vmem:[#allocation27_spill] sm:$0xff] %v13524_v17  ;;  %1197 = vrot.lane.b32.xlu1 %v13164_v15, %s13076_s8  ;;  %1199 = vrot.lane.b32.xlu0 %v13160_v14, %s13076_s8  ;;  %v12555_v17 = vld [vmem:[%s19067_s1 + $0xb0] sm:$0xff]  ;;  %v12556_v16 = vld [vmem:[%s19067_s1 + $0xb8] sm:$0x7f] }
  0xef   :  { %v13530_v2 = vpop.permute.xlu1 %585  ;;  %v13532_v7 = vpop.permute.xlu0 %587 }
  0xf0   :  { %19280 = vst [vmem:[#allocation28_spill] sm:$0xff] %v13530_v2  ;;  %19281 = vst [vmem:[#allocation29_spill] sm:$0xff] %v13532_v7  ;;  %1201 = vrot.lane.b32.xlu1 %v13178_v19, %s13076_s8  ;;  %1203 = vrot.lane.b32.xlu0 %v13174_v18, %s13076_s8  ;;  %v12557_v2 = vld [vmem:[%s19067_s1 + $0xc0] sm:$0xff]  ;;  %v12558_v7 = vld [vmem:[%s19067_s1 + $0xc8] sm:$0x7f] }
  0xf3   :  { %v13544_v0 = vpop.permute.xlu1 %589  ;;  %v13546_v5 = vpop.permute.xlu0 %591 }
  0xf4   :  { %19282 = vst [vmem:[#allocation30_spill] sm:$0xff] %v13544_v0  ;;  %19283 = vst [vmem:[#allocation31_spill] sm:$0xff] %v13546_v5  ;;  %1216 = vperm.xlu1 %12951, %v12555_v17   ;;  %1221 = vperm.xlu0 %12950, %v12556_v16  }
  0xf7   :  { %v13554_v6 = vpop.permute.xlu1 %604  ;;  %v13556_v28 = vpop.permute.xlu0 %609 }
  0xf8   :  { %19284 = vst [vmem:[#allocation32_spill] sm:$0xff] %v13554_v6  ;;  %19285 = vst [vmem:[#allocation33_spill] sm:$0xff] %v13556_v28  ;;  %1293 = vperm.xlu1 %12951, %v12557_v2   ;;  %1298 = vperm.xlu0 %12950, %v12558_v7  }
  0xfb   :  { %v13558_v63 = vpop.permute.xlu1 %679  ;;  %v13560_v0 = vpop.permute.xlu0 %681 }
  0xfc   :  { %19286 = vst [vmem:[#allocation34_spill] sm:$0xff] %v13558_v63  ;;  %19287 = vst [vmem:[#allocation35_spill] sm:$0xff] %v13560_v0  ;;  %1336 = vrot.lane.b32.xlu1 %v13138_v9, %s13077_s22  ;;  %1338 = vrot.lane.b32.xlu0 %v13150_v11, %s13077_s22 }
  0xff   :  { %v13566_v16 = vpop.permute.xlu1 %683  ;;  %v13568_v17 = vpop.permute.xlu0 %685 }
 0x100   :  { %19288 = vst [vmem:[#allocation36_spill] sm:$0xff] %v13566_v16  ;;  %19289 = vst [vmem:[#allocation37_spill] sm:$0xff] %v13568_v17  ;;  %1340 = vrot.lane.b32.xlu1 %v13135_v8, %s13077_s22  ;;  %1342 = vrot.lane.b32.xlu0 %v13146_v10, %s13077_s22  ;;  %v12560_v17 = vld [vmem:[%s19067_s1 + $0xd8] sm:$0x7f] }
 0x103   :  { %v13574_v2 = vpop.permute.xlu1 %687  ;;  %v13576_v7 = vpop.permute.xlu0 %689 }
 0x104   :  { %19290 = vst [vmem:[#allocation38_spill] sm:$0xff] %v13574_v2  ;;  %19291 = vst [vmem:[#allocation39_spill] sm:$0xff] %v13576_v7  ;;  %1344 = vrot.lane.b32.xlu1 %v13164_v15, %s13077_s22  ;;  %1346 = vrot.lane.b32.xlu0 %v13160_v14, %s13077_s22  ;;  %v12559_v2 = vld [vmem:[%s19067_s1 + $0xd0] sm:$0xff] }
 0x107   :  { %v13582_v0 = vpop.permute.xlu1 %691  ;;  %v13584_v16 = vpop.permute.xlu0 %693 }
 0x108   :  { %19292 = vst [vmem:[#allocation40_spill] sm:$0xff] %v13582_v0  ;;  %19293 = vst [vmem:[#allocation41_spill] sm:$0xff] %v13584_v16  ;;  %1348 = vrot.lane.b32.xlu1 %v13178_v19, %s13077_s22  ;;  %1350 = vrot.lane.b32.xlu0 %v13174_v18, %s13077_s22 }
 0x10b   :  { %v13596_v7 = vpop.permute.xlu1 %706  ;;  %v13598_v28 = vpop.permute.xlu0 %711 }
 0x10c   :  { %19294 = vst [vmem:[#allocation42_spill] sm:$0xff] %v13596_v7  ;;  %19295 = vst [vmem:[#allocation43_spill] sm:$0xff] %v13598_v28  ;;  %1363 = vperm.xlu1 %12951, %v12559_v2   ;;  %1368 = vperm.xlu0 %12950, %v12560_v17  }
 0x10f   :  { %v13600_v0 = vpop.permute.xlu1 %781  ;;  %v13602_v16 = vpop.permute.xlu0 %783 }
 0x110   :  { %19296 = vst [vmem:[#allocation44_spill] sm:$0xff] %v13600_v0  ;;  %19297 = vst [vmem:[#allocation45_spill] sm:$0xff] %v13602_v16  ;;  %1438 = vrot.lane.b32.xlu1 %v13138_v9, %s13078_s7  ;;  %1440 = vrot.lane.b32.xlu0 %v13150_v11, %s13078_s7 }
 0x113   :  { %v13608_v63 = vpop.permute.xlu1 %785  ;;  %v13610_v6 = vpop.permute.xlu0 %787 }
 0x114   :  { %19298 = vst [vmem:[#allocation46_spill] sm:$0xff] %v13608_v63  ;;  %19299 = vst [vmem:[#allocation47_spill] sm:$0xff] %v13610_v6  ;;  %1442 = vrot.lane.b32.xlu1 %v13135_v8, %s13078_s7  ;;  %1444 = vrot.lane.b32.xlu0 %v13146_v10, %s13078_s7  ;;  %v12562_v6 = vld [vmem:[%s19067_s1 + $0xe8] sm:$0x7f] }
 0x117   :  { %v13616_v17 = vpop.permute.xlu1 %789  ;;  %v13618_v2 = vpop.permute.xlu0 %791 }
 0x118   :  { %19300 = vst [vmem:[#allocation48_spill] sm:$0xff] %v13616_v17  ;;  %19301 = vst [vmem:[#allocation49_spill] sm:$0xff] %v13618_v2  ;;  %1446 = vrot.lane.b32.xlu1 %v13164_v15, %s13078_s7  ;;  %1448 = vrot.lane.b32.xlu0 %v13160_v14, %s13078_s7  ;;  %v12561_v17 = vld [vmem:[%s19067_s1 + $0xe0] sm:$0xff] }
 0x11b   :  { %v13624_v16 = vpop.permute.xlu1 %793  ;;  %v13626_v63 = vpop.permute.xlu0 %795 }
 0x11c   :  { %19302 = vst [vmem:[#allocation50_spill] sm:$0xff] %v13624_v16  ;;  %19303 = vst [vmem:[#allocation51_spill] sm:$0xff] %v13626_v63  ;;  %1450 = vrot.lane.b32.xlu1 %v13178_v19, %s13078_s7  ;;  %1452 = vrot.lane.b32.xlu0 %v13174_v18, %s13078_s7 }
 0x11f   :  { %v13638_v2 = vpop.permute.xlu1 %808  ;;  %v13640_v28 = vpop.permute.xlu0 %813 }
 0x120   :  { %19304 = vst [vmem:[#allocation52_spill] sm:$0xff] %v13638_v2  ;;  %19305 = vst [vmem:[#allocation53_spill] sm:$0xff] %v13640_v28  ;;  %1465 = vperm.xlu1 %12951, %v12561_v17   ;;  %1470 = vperm.xlu0 %12950, %v12562_v6  }
 0x123   :  { %v13642_v16 = vpop.permute.xlu1 %883  ;;  %v13644_v63 = vpop.permute.xlu0 %885 }
 0x124   :  { %19306 = vst [vmem:[#allocation54_spill] sm:$0xff] %v13642_v16  ;;  %19307 = vst [vmem:[#allocation55_spill] sm:$0xff] %v13644_v63  ;;  %1540 = vrot.lane.b32.xlu1 %v13138_v9, %s13079_s16  ;;  %1542 = vrot.lane.b32.xlu0 %v13150_v11, %s13079_s16 }
 0x127   :  { %v13650_v0 = vpop.permute.xlu1 %887  ;;  %v13652_v7 = vpop.permute.xlu0 %889 }
 0x128   :  { %19308 = vst [vmem:[#allocation56_spill] sm:$0xff] %v13650_v0  ;;  %19309 = vst [vmem:[#allocation57_spill] sm:$0xff] %v13652_v7  ;;  %1544 = vrot.lane.b32.xlu1 %v13135_v8, %s13079_s16  ;;  %1546 = vrot.lane.b32.xlu0 %v13146_v10, %s13079_s16  ;;  %v12564_v7 = vld [vmem:[%s19067_s1 + $0xf8] sm:$0x7f] }
 0x12b   :  { %v13658_v6 = vpop.permute.xlu1 %891  ;;  %v13660_v17 = vpop.permute.xlu0 %893 }
 0x12c   :  { %19310 = vst [vmem:[#allocation58_spill] sm:$0xff] %v13658_v6  ;;  %19311 = vst [vmem:[#allocation59_spill] sm:$0xff] %v13660_v17  ;;  %1548 = vrot.lane.b32.xlu1 %v13164_v15, %s13079_s16  ;;  %1550 = vrot.lane.b32.xlu0 %v13160_v14, %s13079_s16  ;;  %v12563_v6 = vld [vmem:[%s19067_s1 + $0xf0] sm:$0xff] }
 0x12f   :  { %v13666_v63 = vpop.permute.xlu1 %895  ;;  %v13668_v0 = vpop.permute.xlu0 %897 }
 0x130   :  { %19312 = vst [vmem:[#allocation60_spill] sm:$0xff] %v13666_v63  ;;  %19313 = vst [vmem:[#allocation61_spill] sm:$0xff] %v13668_v0  ;;  %1552 = vrot.lane.b32.xlu1 %v13178_v19, %s13079_s16  ;;  %1554 = vrot.lane.b32.xlu0 %v13174_v18, %s13079_s16 }
 0x133   :  { %v13680_v17 = vpop.permute.xlu1 %910  ;;  %v13682_v28 = vpop.permute.xlu0 %915 }
 0x134   :  { %19314 = vst [vmem:[#allocation62_spill] sm:$0xff] %v13680_v17  ;;  %19315 = vst [vmem:[#allocation63_spill] sm:$0xff] %v13682_v28  ;;  %1567 = vperm.xlu1 %12951, %v12563_v6   ;;  %1572 = vperm.xlu0 %12950, %v12564_v7   ;;  %v19320_v7 = vlaneseq  ;;  %v12566_v17 = vld [vmem:[%s19067_s1 + $0x108] sm:$0x7f] }
 0x136   :  { %v13701_v6 = vand.u32 127, %v19320_v7 }
 0x137   :  { %v13684_v63 = vpop.permute.xlu1 %985  ;;  %v13686_v0 = vpop.permute.xlu0 %987 }
 0x138   :  { %19316 = vst [vmem:[#allocation64_spill] sm:$0xff] %v13684_v63  ;;  %19317 = vst [vmem:[#allocation65_spill] sm:$0xff] %v13686_v0  ;;  %1642 = vrot.lane.b32.xlu1 %v13138_v9, %s13080_s27  ;;  %1644 = vrot.lane.b32.xlu0 %v13150_v11, %s13080_s27  ;;  %vm83_vm0 = vcmp.lt.s32.totalorder %v13701_v6, 42  ;;  %vm185_vm1 = vcmp.lt.s32.totalorder %v13701_v6, 41  ;;  %vm19252_vm2 = vcmp.lt.s32.totalorder %v13701_v6, 40  ;;  %vm19251_vm3 = vcmp.lt.s32.totalorder %v13701_v6, 39 }
 0x139   :  { %v88_v7 = vsel %vm83_vm0, %v13300_v32, %v13308_v34  ;;  %v86_v63 = vsel %vm83_vm0, %v13322_v37, %v13320_v36  ;;  %v84_v5 = vsel %vm83_vm0, %v13336_v41, %v13334_v40  ;;  %vm19250_vm4 = vcmp.lt.s32.totalorder %v13701_v6, 38 }
 0x13a   :  { %v117_v29 = vrot.slane %v88_v7, %v13128_v4  ;;  %v125_v51 = vrot.slane %v86_v63, %v13128_v4  ;;  %v192_v63 = vsel %vm185_vm1, %v13346_v44, %v13348_v45  ;;  %vm19249_vm5 = vcmp.lt.s32.totalorder %v13701_v6, 22 }
 0x13b   :  { %v13692_v16 = vpop.permute.xlu1 %989  ;;  %v13694_v2 = vpop.permute.xlu0 %991  ;;  %vm19248_vm6 = vcmp.lt.s32.totalorder %v13701_v6, 21  ;;  %vm19247_vm7 = vcmp.lt.s32.totalorder %v13701_v6, 20  ;;  %vm19246_vm8 = vcmp.lt.s32.totalorder %v13701_v6, 19  ;;  %vm19245_vm9 = vcmp.lt.s32.totalorder %v13701_v6, 18 }
 0x13c   :  { %19318 = vst [vmem:[#allocation66_spill] sm:$0xff] %v13692_v16  ;;  %19319 = vst [vmem:[#allocation67_spill] sm:$0xff] %v13694_v2  ;;  %1646 = vrot.lane.b32.xlu1 %v13135_v8, %s13080_s27  ;;  %1648 = vrot.lane.b32.xlu0 %v13146_v10, %s13080_s27  ;;  %v139_v27 = vmul.f32 %v125_v51, %v13340_v43  ;;  %vm19244_vm10 = vcmp.lt.s32.totalorder %v13701_v6, 2  ;;  %vm19240_vm11 = vcmp.lt.s32.totalorder %v13701_v6, 1  ;;  %vm19238_vm12 = vcmp.lt.s32.totalorder %v13701_v6, 127 }
 0x13d   :  { %vm19237_vm13 = vcmp.lt.s32.totalorder %v13701_v6, 126  ;;  %vm19221_vm14 = vcmp.lt.s32.totalorder %v13701_v6, 110  ;;  %vm19229_vm15 = vcmp.lt.s32.totalorder %v13701_v6, 109 }
 0x13f   :  { %v13703_v0 = vpop.permute.xlu1 %993  ;;  %v13705_v28 = vpop.permute.xlu0 %995 }
 0x140   :  { %19321 = vst [vmem:[#allocation68_spill] sm:$0xff] %v13703_v0  ;;  %19322 = vst [vmem:[#allocation69_spill] sm:$0xff] %v13705_v28  ;;  %1650 = vrot.lane.b32.xlu1 %v13164_v15, %s13080_s27  ;;  %1652 = vrot.lane.b32.xlu0 %v13160_v14, %s13080_s27  ;;  %v90_v0 = vsel %vm83_vm0, %v13302_v33, %v13310_v35  ;;  %v91_v28 = vsel %vm83_vm0, %v13334_v40, %v13302_v33 }
 0x141   :  { %v87_v33 = vsel %vm83_vm0, %v13308_v34, %v13322_v37  ;;  %v109_v34 = vrot.slane %v90_v0, %v13128_v4  ;;  %v105_v37 = vrot.slane %v91_v28, %v13128_v4 }
 0x142   :  { %v121_v62 = vrot.slane %v87_v33, %v13128_v4  ;;  %v188_v33 = vsel %vm185_vm1, %v13362_v48, %v13364_v49 }
 0x143   :  { %v13712_v2 = vpop.permute.xlu1 %997  ;;  %v13714_v16 = vpop.permute.xlu0 %999  ;;  %v13776_v28 = vmul.f32 %v105_v37, %v13338_v42  ;;  %v227_v13 = vrot.slane %v188_v33, %v13128_v4 }
 0x144   :  { %19323 = vst [vmem:[#allocation70_spill] sm:$0xff] %v13712_v2  ;;  %19324 = vst [vmem:[#allocation71_spill] sm:$0xff] %v13714_v16  ;;  %1654 = vrot.lane.b32.xlu1 %v13178_v19, %s13080_s27  ;;  %1656 = vrot.lane.b32.xlu0 %v13174_v18, %s13080_s27  ;;  %v12565_v2 = vld [vmem:[%s19067_s1 + $0x100] sm:$0xff]  ;;  %v89_v16 = vsel %vm83_vm0, %v13310_v35, %v13300_v32  ;;  %v85_v32 = vsel %vm83_vm0, %v13320_v36, %v13336_v41 }
 0x145   :  { %v113_v40 = vrot.slane %v89_v16, %v13128_v4  ;;  %v193_v36 = vsel %vm185_vm1, %v13378_v53, %v13346_v44  ;;  %v129_v0 = vrot.slane %v85_v32, %v13128_v4  ;;  %v133_v41 = vrot.slane %v84_v5, %v13128_v4 }
 0x146   :  { %v191_v16 = vsel %vm185_vm1, %v13348_v45, %v13354_v46  ;;  %v187_v5 = vsel %vm185_vm1, %v13364_v49, %v13376_v52  ;;  %v190_v44 = vsel %vm185_vm1, %v13354_v46, %v13356_v47  ;;  %v189_v45 = vsel %vm185_vm1, %v13356_v47, %v13362_v48 }
 0x147   :  { %v13758_v35 = vpop.permute.xlu1 %1012  ;;  %v13764_v12 = vpop.permute.xlu0 %1017  ;;  %v207_v32 = vrot.slane %v193_v36, %v13128_v4  ;;  %v13818_v46 = vmul.f32 %v113_v40, %v13338_v42  ;;  %v13821_v47 = vmul.f32 %v117_v29, %v13338_v42  ;;  %v13827_v48 = vmul.f32 %v125_v51, %v13338_v42 }
 0x148   :  { %19325 = vst [vmem:[#allocation72_spill] sm:$0xff] %v13758_v35  ;;  %19326 = vst [vmem:[#allocation73_spill] sm:$0xff] %v13764_v12  ;;  %1669 = vperm.xlu1 %12951, %v12565_v2   ;;  %1674 = vperm.xlu0 %12950, %v12566_v17   ;;  %v13779_v2 = vmul.f32 %v109_v34, %v13338_v42  ;;  %v186_v17 = vsel %vm185_vm1, %v13376_v52, %v13378_v53 }
 0x149   :  { %v13824_v53 = vmul.f32 %v121_v62, %v13338_v42  ;;  %v211_v49 = vrot.slane %v192_v63, %v13128_v4  ;;  %v215_v36 = vrot.slane %v191_v16, %v13128_v4  ;;  %v13837_v12 = vrot.slane %v186_v17, %v13128_v4 }
 0x14a   :  { %v219_v35 = vrot.slane %v190_v44, %v13128_v4  ;;  %v223_v39 = vrot.slane %v189_v45, %v13128_v4  ;;  %v13848_v63 = vmul.f32 %v133_v41, %v13338_v42  ;;  %v236_v16 = vmul.f32 %v207_v32, %v13380_v54 }
 0x14b   :  { %v13797_v7 = vpop.permute.xlu1 %1087  ;;  %v13813_v52 = vpop.permute.xlu0 %1089  ;;  %v238_v17 = vmul.f32 %v215_v36, %v13380_v54  ;;  %v134_v44 = vmul.f32 %v105_v37, %v13340_v43  ;;  %v136_v26 = vmul.f32 %v113_v40, %v13340_v43  ;;  %v137_v37 = vmul.f32 %v117_v29, %v13340_v43 }
 0x14c   :  { %19327 = vst [vmem:[#allocation74_spill] sm:$0xff] %v13797_v7  ;;  %19328 = vst [vmem:[#allocation75_spill] sm:$0xff] %v13813_v52  ;;  %1744 = vrot.lane.b32.xlu1 %v13138_v9, %s13081_s13  ;;  %1746 = vrot.lane.b32.xlu0 %v13150_v11, %s13081_s13  ;;  %v13834_v52 = vrot.slane %v187_v5, %v13128_v4  ;;  %v13840_v7 = vmul.f32 %v129_v0, %v13338_v42 }
 0x14d   :  { %v237_v5 = vmul.f32 %v211_v49, %v13380_v54  ;;  %v239_v45 = vmul.f32 %v219_v35, %v13380_v54  ;;  %v240_v33 = vmul.f32 %v223_v39, %v13380_v54  ;;  %v241_v42 = vmul.f32 %v227_v13, %v13380_v54 }
 0x14e   :  { %v138_v25 = vmul.f32 %v121_v62, %v13340_v43  ;;  %v140_v30 = vmul.f32 %v129_v0, %v13340_v43  ;;  %v13880_v23 = vadd.f32 %v238_v17, %v136_v26  ;;  %v244_v29 = vmul.f32 %v207_v32, %v13382_v55 }
 0x14f   :  { %v13845_v50 = vpop.permute.xlu1 %1091  ;;  %v13853_v38 = vpop.permute.xlu0 %1093  ;;  %v13890_v62 = vadd.f32 %v241_v42, %v139_v27  ;;  %v245_v0 = vmul.f32 %v211_v49, %v13382_v55  ;;  %v293_v27 = vsel %vm19252_vm2, %v13390_v57, %v13396_v58  ;;  %v249_v49 = vmul.f32 %v227_v13, %v13382_v55  ;;  %v12568_v13 = vld [vmem:[%s19067_s1 + $0x118] sm:$0x7f] }
 0x150   :  { %19329 = vst [vmem:[#allocation76_spill] sm:$0xff] %v13845_v50  ;;  %19330 = vst [vmem:[#allocation77_spill] sm:$0xff] %v13853_v38  ;;  %1748 = vrot.lane.b32.xlu1 %v13135_v8, %s13081_s13  ;;  %1750 = vrot.lane.b32.xlu0 %v13146_v10, %s13081_s13  ;;  %v135_v50 = vmul.f32 %v109_v34, %v13340_v43  ;;  %v242_v38 = vmul.f32 %v13834_v52, %v13380_v54 }
 0x151   :  { %v243_v8 = vmul.f32 %v13837_v12, %v13380_v54  ;;  %v141_v34 = vmul.f32 %v133_v41, %v13340_v43  ;;  %v13876_v10 = vadd.f32 %v236_v16, %v134_v44  ;;  %v13886_v54 = vadd.f32 %v239_v45, %v137_v37 }
 0x152   :  { %v13878_v40 = vadd.f32 %v237_v5, %v135_v50  ;;  %v13888_v51 = vadd.f32 %v240_v33, %v138_v25  ;;  %v295_v43 = vsel %vm19252_vm2, %v13420_v3, %v13388_v56  ;;  %v13898_v26 = vadd.f32 %v242_v38, %v140_v30 }
 0x153   :  { %v13873_v24 = vpop.permute.xlu1 %1095  ;;  %v13882_v21 = vpop.permute.xlu0 %1097  ;;  %v13900_v50 = vadd.f32 %v243_v8, %v141_v34  ;;  %v294_v25 = vsel %vm19252_vm2, %v13388_v56, %v13390_v57  ;;  %v289_v8 = vsel %vm19252_vm2, %v13406_v61, %v13418_v1  ;;  %v288_v30 = vsel %vm19252_vm2, %v13418_v1, %v13420_v3 }
 0x154   :  { %1752 = vrot.lane.b32.xlu1 %v13164_v15, %s13081_s13  ;;  %1754 = vrot.lane.b32.xlu0 %v13160_v14, %s13081_s13  ;;  %v292_v56 = vsel %vm19252_vm2, %v13396_v58, %v13398_v59  ;;  %v291_v57 = vsel %vm19252_vm2, %v13398_v59, %v13404_v60  ;;  %v290_v41 = vsel %vm19252_vm2, %v13404_v60, %v13406_v61  ;;  %v12567_v60 = vld [vmem:[%s19067_s1 + $0x110] sm:$0xff] }
 0x155   :  { %v309_v32 = vrot.slane %v295_v43, %v13128_v4  ;;  %v246_v58 = vmul.f32 %v215_v36, %v13382_v55  ;;  %v247_v3 = vmul.f32 %v219_v35, %v13382_v55  ;;  %v248_v59 = vmul.f32 %v223_v39, %v13382_v55 }
 0x156   :  { %v313_v61 = vrot.slane %v294_v25, %v13128_v4  ;;  %v317_v16 = vrot.slane %v293_v27, %v13128_v4  ;;  %v13952_v5 = vrot.slane %v289_v8, %v13128_v4  ;;  %v13955_v35 = vrot.slane %v288_v30, %v13128_v4 }
 0x157   :  { %v13920_v38 = vpop.permute.xlu1 %1099  ;;  %v13936_v1 = vpop.permute.xlu0 %1101  ;;  %v250_v39 = vmul.f32 %v13834_v52, %v13382_v55  ;;  %v321_v36 = vrot.slane %v292_v56, %v13128_v4  ;;  %v325_v17 = vrot.slane %v291_v57, %v13128_v4  ;;  %v329_v44 = vrot.slane %v290_v41, %v13128_v4 }
 0x158   :  { %1756 = vrot.lane.b32.xlu1 %v13178_v19, %s13081_s13  ;;  %1758 = vrot.lane.b32.xlu0 %v13174_v18, %s13081_s13  ;;  %v251_v33 = vmul.f32 %v13837_v12, %v13382_v55  ;;  %v338_v42 = vmul.f32 %v309_v32, %v13422_v20  ;;  %v339_v37 = vmul.f32 %v313_v61, %v13422_v20 }
 0x159   :  { %v340_v34 = vmul.f32 %v317_v16, %v13422_v20  ;;  %v260_v52 = vadd.f32 %v244_v29, %v13776_v28  ;;  %v341_v25 = vmul.f32 %v321_v36, %v13422_v20  ;;  %v342_v27 = vmul.f32 %v325_v17, %v13422_v20 }
 0x15a   :  { %v343_v8 = vmul.f32 %v329_v44, %v13422_v20  ;;  %v261_v12 = vadd.f32 %v245_v0, %v13779_v2  ;;  %v262_v55 = vadd.f32 %v246_v58, %v13818_v46  ;;  %v344_v30 = vmul.f32 %v13952_v5, %v13422_v20 }
 0x15b   :  { %v13965_v45 = vpop.permute.xlu1 %1114  ;;  %v13972_v43 = vpop.permute.xlu0 %1119  ;;  %v345_v56 = vmul.f32 %v13955_v35, %v13422_v20  ;;  %v263_v57 = vadd.f32 %v247_v3, %v13821_v47  ;;  %v264_v28 = vadd.f32 %v248_v59, %v13824_v53  ;;  %v265_v29 = vadd.f32 %v249_v49, %v13827_v48  ;;  %v19334_v48 = vld [vmem:[#allocation5_spill] sm:$0xff]  ;;  %v19337_v59 = vld [vmem:[#allocation11_spill] sm:$0xff]  ;;  %v19338_v49 = vld [vmem:[#allocation10_spill] sm:$0xff] }
 0x15c   :  { %19331 = vst [vmem:[#allocation78_spill] sm:$0xff] %v13972_v43  ;;  %1771 = vperm.xlu1 %12951, %v12567_v60   ;;  %1776 = vperm.xlu0 %12950, %v12568_v13   ;;  %v266_v41 = vadd.f32 %v250_v39, %v13840_v7  ;;  %v267_v2 = vadd.f32 %v251_v33, %v13848_v63  ;;  %v19341_v39 = vld [vmem:[#allocation9_spill] sm:$0xff] }
 0x15d   :  { %v354_v46 = vadd.f32 %v338_v42, %v13876_v10  ;;  %v355_v0 = vadd.f32 %v339_v37, %v13878_v40  ;;  %v356_v58 = vadd.f32 %v340_v34, %v13880_v23  ;;  %v357_v20 = vadd.f32 %v341_v25, %v13886_v54  ;;  %v19335_v54 = vld [vmem:[#allocation6_spill] sm:$0xff]  ;;  %v19343_v34 = vld [vmem:[#allocation3_spill] sm:$0xff] }
 0x15e   :  { %v358_v7 = vadd.f32 %v342_v27, %v13888_v51  ;;  %v359_v47 = vadd.f32 %v343_v8, %v13890_v62  ;;  %v397_v10 = vsel %vm19251_vm3, %v13462_v31, %v13430_v22  ;;  %v360_v23 = vadd.f32 %v344_v30, %v13898_v26  ;;  %v19336_v62 = vld [vmem:[#allocation7_spill] sm:$0xff] }
 0x15f   :  { %v13988_v60 = vpop.permute.xlu1 %1189  ;;  %v13994_v13 = vpop.permute.xlu0 %1191  ;;  %v361_v53 = vadd.f32 %v345_v56, %v13900_v50  ;;  %v346_v63 = vmul.f32 %v309_v32, %v19334_v48  ;;  %v347_v40 = vmul.f32 %v313_v61, %v19334_v48  ;;  %v396_v51 = vsel %vm19251_vm3, %v13430_v22, %v19335_v54  ;;  %v19340_v61 = vld [vmem:[#allocation8_spill] sm:$0xff] }
 0x160   :  { %19332 = vst [vmem:[#allocation79_spill] sm:$0xff] %v13988_v60  ;;  %19333 = vst [vmem:[#allocation80_spill] sm:$0xff] %v13994_v13  ;;  %1846 = vrot.lane.b32.xlu1 %v13138_v9, %s13082_s23  ;;  %1848 = vrot.lane.b32.xlu0 %v13150_v11, %s13082_s23  ;;  %v395_v3 = vsel %vm19251_vm3, %v19335_v54, %v19336_v62  ;;  %v391_v26 = vsel %vm19251_vm3, %v19338_v49, %v19337_v59  ;;  %v19344_v56 = vld [vmem:[#allocation4_spill] sm:$0xff] }
 0x161   :  { %v390_v50 = vsel %vm19251_vm3, %v19337_v59, %v13462_v31  ;;  %v394_v22 = vsel %vm19251_vm3, %v19336_v62, %v19340_v61  ;;  %v393_v33 = vsel %vm19251_vm3, %v19340_v61, %v19341_v39  ;;  %v392_v42 = vsel %vm19251_vm3, %v19341_v39, %v19338_v49 }
 0x162   :  { %v411_v37 = vrot.slane %v397_v10, %v13128_v4  ;;  %v348_v25 = vmul.f32 %v317_v16, %v19334_v48  ;;  %v349_v27 = vmul.f32 %v321_v36, %v19334_v48  ;;  %v350_v8 = vmul.f32 %v325_v17, %v19334_v48 }
 0x163   :  { %v14027_v32 = vpop.permute.xlu1 %1193  ;;  %v14043_v31 = vpop.permute.xlu0 %1195  ;;  %v351_v30 = vmul.f32 %v329_v44, %v19334_v48  ;;  %v415_v10 = vrot.slane %v396_v51, %v13128_v4  ;;  %v419_v54 = vrot.slane %v395_v3, %v13128_v4  ;;  %v14056_v62 = vrot.slane %v391_v26, %v13128_v4  ;;  %v19346_v3 = vld [vmem:[#allocation12_spill] sm:$0xff] }
 0x164   :  { %19339 = vst [vmem:[#allocation5_spill] sm:$0xff] %v14027_v32  ;;  %19342 = vst [vmem:[#allocation6_spill] sm:$0xff] %v14043_v31  ;;  %1850 = vrot.lane.b32.xlu1 %v19343_v34, %s13082_s23  ;;  %1852 = vrot.lane.b32.xlu0 %v19344_v56, %s13082_s23  ;;  %v14059_v59 = vrot.slane %v390_v50, %v13128_v4  ;;  %v352_v16 = vmul.f32 %v13952_v5, %v19334_v48 }
 0x165   :  { %v423_v36 = vrot.slane %v394_v22, %v13128_v4  ;;  %v427_v17 = vrot.slane %v393_v33, %v13128_v4  ;;  %v431_v44 = vrot.slane %v392_v42, %v13128_v4  ;;  %v353_v51 = vmul.f32 %v13955_v35, %v19334_v48 }
 0x166   :  { %v440_v26 = vmul.f32 %v411_v37, %v19346_v3  ;;  %v441_v61 = vmul.f32 %v415_v10, %v19346_v3  ;;  %v442_v50 = vmul.f32 %v419_v54, %v19346_v3  ;;  %v14077_v5 = vadd.f32 %v346_v63, %v260_v52 }
 0x167   :  { %v14066_v49 = vpop.permute.xlu1 %1197  ;;  %v14073_v39 = vpop.permute.xlu0 %1199  ;;  %v443_v22 = vmul.f32 %v423_v36, %v19346_v3  ;;  %v444_v33 = vmul.f32 %v427_v17, %v19346_v3  ;;  %v445_v42 = vmul.f32 %v431_v44, %v19346_v3  ;;  %v14084_v35 = vadd.f32 %v347_v40, %v261_v12 }
 0x168   :  { %19345 = vst [vmem:[#allocation7_spill] sm:$0xff] %v14066_v49  ;;  %19347 = vst [vmem:[#allocation11_spill] sm:$0xff] %v14073_v39  ;;  %1854 = vrot.lane.b32.xlu1 %v13164_v15, %s13082_s23  ;;  %1856 = vrot.lane.b32.xlu0 %v13160_v14, %s13082_s23  ;;  %v14086_v48 = vadd.f32 %v348_v25, %v262_v55  ;;  %v446_v49 = vmul.f32 %v14056_v62, %v19346_v3 }
 0x169   :  { %v447_v52 = vmul.f32 %v14059_v59, %v19346_v3  ;;  %v14092_v63 = vadd.f32 %v349_v27, %v263_v57  ;;  %v14094_v31 = vadd.f32 %v350_v8, %v264_v28  ;;  %v14096_v32 = vadd.f32 %v351_v30, %v265_v29  ;;  %v12570_v8 = vld [vmem:[%s19067_s1 + $0x128] sm:$0x7f] }
 0x16a   :  { %v14098_v13 = vadd.f32 %v352_v16, %v266_v41  ;;  %v14102_v12 = vadd.f32 %v353_v51, %v267_v2  ;;  %v14104_v55 = vadd.f32 %v440_v26, %v354_v46  ;;  %v14106_v40 = vadd.f32 %v441_v61, %v355_v0  ;;  %v19350_v41 = vld [vmem:[#allocation14_spill] sm:$0xff]  ;;  %v19351_v2 = vld [vmem:[#allocation21_spill] sm:$0xff]  ;;  %v19353_v30 = vld [vmem:[#allocation15_spill] sm:$0xff] }
 0x16b   :  { %v14100_v39 = vpop.permute.xlu1 %1201  ;;  %v14108_v25 = vadd.f32 %v442_v50, %v356_v58  ;;  %v14110_v43 = vpop.permute.xlu0 %1203  ;;  %v14114_v57 = vadd.f32 %v443_v22, %v357_v20  ;;  %v14116_v28 = vadd.f32 %v444_v33, %v358_v7  ;;  %v14118_v29 = vadd.f32 %v445_v42, %v359_v47  ;;  %v12569_v0 = vld [vmem:[%s19067_s1 + $0x120] sm:$0xff]  ;;  %v19352_v7 = vld [vmem:[#allocation13_spill] sm:$0xff]  ;;  %v19354_v51 = vld [vmem:[#allocation16_spill] sm:$0xff] }
 0x16c   :  { %19348 = vst [vmem:[#allocation10_spill] sm:$0xff] %v14100_v39  ;;  %19349 = vst [vmem:[#allocation8_spill] sm:$0xff] %v14110_v43  ;;  %1858 = vrot.lane.b32.xlu1 %v13178_v19, %s13082_s23  ;;  %v499_v46 = vsel %vm19250_vm4, %v19351_v2, %v19350_v41  ;;  %1860 = vrot.lane.b32.xlu0 %v13174_v18, %s13082_s23  ;;  %v14129_v58 = vadd.f32 %v446_v49, %v360_v23  ;;  %v19356_v49 = vld [vmem:[#allocation19_spill] sm:$0xff]  ;;  %v19358_v26 = vld [vmem:[#allocation17_spill] sm:$0xff] }
 0x16d   :  { %v14131_v20 = vadd.f32 %v447_v52, %v361_v53  ;;  %v448_v27 = vmul.f32 %v411_v37, %v19352_v7  ;;  %v449_v47 = vmul.f32 %v415_v10, %v19352_v7  ;;  %v498_v16 = vsel %vm19250_vm4, %v19350_v41, %v19353_v30  ;;  %v19355_v53 = vld [vmem:[#allocation20_spill] sm:$0xff]  ;;  %v19359_v50 = vld [vmem:[#allocation18_spill] sm:$0xff] }
 0x16e   :  { %v497_v23 = vsel %vm19250_vm4, %v19353_v30, %v19354_v51  ;;  %v493_v37 = vsel %vm19250_vm4, %v19356_v49, %v19355_v53  ;;  %v492_v10 = vsel %vm19250_vm4, %v19355_v53, %v19351_v2  ;;  %v496_v61 = vsel %vm19250_vm4, %v19354_v51, %v19358_v26 }
 0x16f   :  { %v14154_v3 = vpop.permute.xlu1 %1216  ;;  %v495_v22 = vsel %vm19250_vm4, %v19358_v26, %v19359_v50  ;;  %v494_v33 = vsel %vm19250_vm4, %v19359_v50, %v19356_v49  ;;  %v513_v42 = vrot.slane %v499_v46, %v13128_v4  ;;  %v14170_v52 = vpop.permute.xlu0 %1221  ;;  %v450_v41 = vmul.f32 %v419_v54, %v19352_v7 }
 0x170   :  { %19357 = vst [vmem:[#allocation9_spill] sm:$0xff] %v14154_v3  ;;  %19360 = vst [vmem:[#allocation3_spill] sm:$0xff] %v14170_v52  ;;  %1873 = vperm.xlu1 %12951, %v12569_v0   ;;  %v451_v2 = vmul.f32 %v423_v36, %v19352_v7  ;;  %v452_v30 = vmul.f32 %v427_v17, %v19352_v7  ;;  %v453_v51 = vmul.f32 %v431_v44, %v19352_v7 }
 0x171   :  { %1878 = vperm.xlu0 %12950, %v12570_v8   ;;  %v517_v53 = vrot.slane %v498_v16, %v13128_v4  ;;  %v521_v49 = vrot.slane %v497_v23, %v13128_v4  ;;  %v14179_v46 = vrot.slane %v493_v37, %v13128_v4  ;;  %v14182_v26 = vrot.slane %v492_v10, %v13128_v4  ;;  %v19362_v16 = vld [vmem:[#allocation22_spill] sm:$0xff] }
 0x172   :  { %v454_v54 = vmul.f32 %v14056_v62, %v19352_v7  ;;  %v525_v36 = vrot.slane %v496_v61, %v13128_v4  ;;  %v529_v17 = vrot.slane %v495_v22, %v13128_v4  ;;  %v533_v44 = vrot.slane %v494_v33, %v13128_v4 }
 0x173   :  { %v14189_v0 = vpop.permute.xlu1 %1293  ;;  %v455_v8 = vmul.f32 %v14059_v59, %v19352_v7  ;;  %v542_v23 = vmul.f32 %v513_v42, %v19362_v16  ;;  %v543_v37 = vmul.f32 %v517_v53, %v19362_v16  ;;  %v544_v10 = vmul.f32 %v521_v49, %v19362_v16  ;;  %v14196_v50 = vpop.permute.xlu0 %1298 }
 0x174   :  { %19361 = vst [vmem:[#allocation4_spill] sm:$0xff] %v14189_v0  ;;  %19363 = vst [vmem:[#allocation12_spill] sm:$0xff] %v14196_v50  ;;  %1948 = vrot.lane.b32.xlu1 %v13138_v9, %s13083_s15  ;;  %v464_v62 = vadd.f32 %v448_v27, %v14077_v5  ;;  %v545_v61 = vmul.f32 %v525_v36, %v19362_v16  ;;  %v546_v22 = vmul.f32 %v529_v17, %v19362_v16 }
 0x175   :  { %v547_v59 = vmul.f32 %v533_v44, %v19362_v16  ;;  %1950 = vrot.lane.b32.xlu0 %v13150_v11, %s13083_s15  ;;  %v465_v7 = vadd.f32 %v449_v47, %v14084_v35  ;;  %v466_v33 = vadd.f32 %v450_v41, %v14086_v48  ;;  %v548_v50 = vmul.f32 %v14179_v46, %v19362_v16 }
 0x176   :  { %v549_v0 = vmul.f32 %v14182_v26, %v19362_v16  ;;  %v14213_v5 = vadd.f32 %v451_v2, %v14092_v63  ;;  %v14216_v27 = vadd.f32 %v452_v30, %v14094_v31  ;;  %v14219_v52 = vadd.f32 %v453_v51, %v14096_v32  ;;  %v19368_v30 = vld [vmem:[#allocation23_spill] sm:$0xff] }
 0x177   :  { %v14222_v3 = vadd.f32 %v454_v54, %v14098_v13  ;;  %v14224_v35 = vpop.permute.xlu1 %1336  ;;  %v14227_v48 = vadd.f32 %v455_v8, %v14102_v12  ;;  %v14230_v47 = vadd.f32 %v542_v23, %v14104_v55  ;;  %v14233_v63 = vadd.f32 %v543_v37, %v14106_v40  ;;  %v14238_v41 = vpop.permute.xlu0 %1338  ;;  %v19366_v55 = vld [vmem:[#allocation24_spill] sm:$0xff]  ;;  %v19367_v40 = vld [vmem:[#allocation31_spill] sm:$0xff]  ;;  %v19370_v8 = vld [vmem:[#allocation26_spill] sm:$0xff] }
 0x178   :  { %19364 = vst [vmem:[#allocation14_spill] sm:$0xff] %v14224_v35  ;;  %v14236_v31 = vadd.f32 %v544_v10, %v14108_v25  ;;  %19365 = vst [vmem:[#allocation21_spill] sm:$0xff] %v14238_v41  ;;  %1952 = vrot.lane.b32.xlu1 %v19343_v34, %s13083_s15  ;;  %v14243_v13 = vadd.f32 %v545_v61, %v14114_v57  ;;  %v14246_v32 = vadd.f32 %v546_v22, %v14116_v28  ;;  %v19371_v23 = vld [vmem:[#allocation30_spill] sm:$0xff]  ;;  %v19375_v10 = vld [vmem:[#allocation28_spill] sm:$0xff] }
 0x179   :  { %v14249_v12 = vadd.f32 %v547_v59, %v14118_v29  ;;  %v601_v25 = vsel %vm19249_vm5, %v19367_v40, %v19366_v55  ;;  %1954 = vrot.lane.b32.xlu0 %v19344_v56, %s13083_s15  ;;  %v14258_v2 = vadd.f32 %v548_v50, %v14129_v58  ;;  %v14261_v57 = vadd.f32 %v549_v0, %v14131_v20  ;;  %v19369_v29 = vld [vmem:[#allocation25_spill] sm:$0xff]  ;;  %v19374_v0 = vld [vmem:[#allocation27_spill] sm:$0xff] }
 0x17a   :  { %v550_v28 = vmul.f32 %v513_v42, %v19368_v30  ;;  %v551_v51 = vmul.f32 %v517_v53, %v19368_v30  ;;  %v600_v54 = vsel %vm19249_vm5, %v19366_v55, %v19369_v29  ;;  %v599_v16 = vsel %vm19249_vm5, %v19369_v29, %v19370_v8  ;;  %v19372_v58 = vld [vmem:[#allocation29_spill] sm:$0xff] }
 0x17b   :  { %v595_v20 = vsel %vm19249_vm5, %v19372_v58, %v19371_v23  ;;  %v594_v42 = vsel %vm19249_vm5, %v19371_v23, %v19367_v40  ;;  %v14281_v53 = vpop.permute.xlu1 %1340  ;;  %v598_v37 = vsel %vm19249_vm5, %v19370_v8, %v19374_v0  ;;  %v597_v50 = vsel %vm19249_vm5, %v19374_v0, %v19375_v10  ;;  %v14297_v59 = vpop.permute.xlu0 %1342 }
 0x17c   :  { %19373 = vst [vmem:[#allocation13_spill] sm:$0xff] %v14281_v53  ;;  %v596_v61 = vsel %vm19249_vm5, %v19375_v10, %v19372_v58  ;;  %v615_v22 = vrot.slane %v601_v25, %v13128_v4  ;;  %19376 = vst [vmem:[#allocation15_spill] sm:$0xff] %v14297_v59  ;;  %1956 = vrot.lane.b32.xlu1 %v13164_v15, %s13083_s15  ;;  %v552_v55 = vmul.f32 %v521_v49, %v19368_v30 }
 0x17d   :  { %v553_v40 = vmul.f32 %v525_v36, %v19368_v30  ;;  %v554_v29 = vmul.f32 %v529_v17, %v19368_v30  ;;  %v555_v8 = vmul.f32 %v533_v44, %v19368_v30  ;;  %1958 = vrot.lane.b32.xlu0 %v13160_v14, %s13083_s15  ;;  %v619_v25 = vrot.slane %v600_v54, %v13128_v4 }
 0x17e   :  { %v623_v23 = vrot.slane %v599_v16, %v13128_v4  ;;  %v14310_v58 = vrot.slane %v595_v20, %v13128_v4  ;;  %v14313_v0 = vrot.slane %v594_v42, %v13128_v4  ;;  %v556_v49 = vmul.f32 %v14179_v46, %v19368_v30  ;;  %v19378_v16 = vld [vmem:[#allocation32_spill] sm:$0xff] }
 0x17f   :  { %v627_v36 = vrot.slane %v598_v37, %v13128_v4  ;;  %v631_v17 = vrot.slane %v597_v50, %v13128_v4  ;;  %v635_v44 = vrot.slane %v596_v61, %v13128_v4  ;;  %v14320_v10 = vpop.permute.xlu1 %1344  ;;  %v557_v54 = vmul.f32 %v14182_v26, %v19368_v30  ;;  %v14327_v53 = vpop.permute.xlu0 %1346  ;;  %v12571_v26 = vld [vmem:[%s19067_s1 + $0x130] sm:$0xff] }
 0x180   :  { %19377 = vst [vmem:[#allocation16_spill] sm:$0xff] %v14320_v10  ;;  %v644_v20 = vmul.f32 %v615_v22, %v19378_v16  ;;  %v645_v59 = vmul.f32 %v619_v25, %v19378_v16  ;;  %v646_v42 = vmul.f32 %v623_v23, %v19378_v16  ;;  %19379 = vst [vmem:[#allocation20_spill] sm:$0xff] %v14327_v53  ;;  %1960 = vrot.lane.b32.xlu1 %v13178_v19, %s13083_s15  ;;  %v12572_v10 = vld [vmem:[%s19067_s1 + $0x138] sm:$0x7f] }
 0x181   :  { %v14331_v46 = vadd.f32 %v550_v28, %v464_v62  ;;  %v647_v37 = vmul.f32 %v627_v36, %v19378_v16  ;;  %v648_v50 = vmul.f32 %v631_v17, %v19378_v16  ;;  %v649_v61 = vmul.f32 %v635_v44, %v19378_v16  ;;  %1962 = vrot.lane.b32.xlu0 %v13174_v18, %s13083_s15 }
 0x182   :  { %v14341_v30 = vadd.f32 %v551_v51, %v465_v7  ;;  %v14343_v53 = vadd.f32 %v552_v55, %v466_v33  ;;  %v650_v62 = vmul.f32 %v14310_v58, %v19378_v16  ;;  %v651_v28 = vmul.f32 %v14313_v0, %v19378_v16 }
 0x183   :  { %v569_v35 = vadd.f32 %v553_v40, %v14213_v5  ;;  %v570_v41 = vadd.f32 %v554_v29, %v14216_v27  ;;  %v571_v39 = vadd.f32 %v555_v8, %v14219_v52  ;;  %v572_v7 = vadd.f32 %v556_v49, %v14222_v3  ;;  %v14356_v33 = vpop.permute.xlu1 %1348  ;;  %v14362_v60 = vpop.permute.xlu0 %1350  ;;  %v19381_v3 = vld [vmem:[#allocation34_spill] sm:$0xff]  ;;  %v19382_v40 = vld [vmem:[#allocation41_spill] sm:$0xff]  ;;  %v19384_v8 = vld [vmem:[#allocation35_spill] sm:$0xff] }
 0x184   :  { %v573_v51 = vadd.f32 %v557_v54, %v14227_v48  ;;  %v660_v55 = vadd.f32 %v644_v20, %v14230_v47  ;;  %v661_v16 = vadd.f32 %v645_v59, %v14233_v63  ;;  %v662_v43 = vadd.f32 %v646_v42, %v14236_v31  ;;  %19380 = vst [vmem:[#allocation19_spill] sm:$0xff] %v14362_v60  ;;  %v19383_v31 = vld [vmem:[#allocation33_spill] sm:$0xff]  ;;  %v19386_v49 = vld [vmem:[#allocation40_spill] sm:$0xff]  ;;  %v19390_v20 = vld [vmem:[#allocation38_spill] sm:$0xff] }
 0x185   :  { %1975 = vperm.xlu1 %12951, %v12571_v26   ;;  %v663_v5 = vadd.f32 %v647_v37, %v14243_v13  ;;  %v664_v27 = vadd.f32 %v648_v50, %v14246_v32  ;;  %v665_v52 = vadd.f32 %v649_v61, %v14249_v12  ;;  %v703_v48 = vsel %vm19248_vm6, %v19382_v40, %v19381_v3  ;;  %v19385_v32 = vld [vmem:[#allocation36_spill] sm:$0xff] }
 0x186   :  { %1980 = vperm.xlu0 %12950, %v12572_v10   ;;  %v666_v47 = vadd.f32 %v650_v62, %v14258_v2  ;;  %v667_v63 = vadd.f32 %v651_v28, %v14261_v57  ;;  %v652_v59 = vmul.f32 %v615_v22, %v19383_v31  ;;  %v653_v29 = vmul.f32 %v619_v25, %v19383_v31  ;;  %v19387_v10 = vld [vmem:[#allocation39_spill] sm:$0xff]  ;;  %v19389_v25 = vld [vmem:[#allocation37_spill] sm:$0xff] }
 0x187   :  { %v702_v13 = vsel %vm19248_vm6, %v19381_v3, %v19384_v8  ;;  %v701_v12 = vsel %vm19248_vm6, %v19384_v8, %v19385_v32  ;;  %v697_v2 = vsel %vm19248_vm6, %v19387_v10, %v19386_v49  ;;  %v696_v57 = vsel %vm19248_vm6, %v19386_v49, %v19382_v40  ;;  %v14391_v22 = vpop.permute.xlu1 %1363  ;;  %v14407_v61 = vpop.permute.xlu0 %1368 }
 0x188   :  { %19388 = vst [vmem:[#allocation17_spill] sm:$0xff] %v14391_v22  ;;  %v700_v54 = vsel %vm19248_vm6, %v19385_v32, %v19389_v25  ;;  %v699_v42 = vsel %vm19248_vm6, %v19389_v25, %v19390_v20  ;;  %v698_v37 = vsel %vm19248_vm6, %v19390_v20, %v19387_v10  ;;  %v717_v50 = vrot.slane %v703_v48, %v13128_v4 }
 0x189   :  { %19391 = vst [vmem:[#allocation18_spill] sm:$0xff] %v14407_v61  ;;  %2050 = vrot.lane.b32.xlu1 %v13138_v9, %s13084_s30  ;;  %v654_v26 = vmul.f32 %v623_v23, %v19383_v31  ;;  %v655_v62 = vmul.f32 %v627_v36, %v19383_v31  ;;  %v656_v28 = vmul.f32 %v631_v17, %v19383_v31 }
 0x18a   :  { %v657_v3 = vmul.f32 %v635_v44, %v19383_v31  ;;  %2052 = vrot.lane.b32.xlu0 %v13150_v11, %s13084_s30  ;;  %v721_v40 = vrot.slane %v702_v13, %v13128_v4  ;;  %v725_v48 = vrot.slane %v701_v12, %v13128_v4  ;;  %v14420_v8 = vrot.slane %v697_v2, %v13128_v4  ;;  %v19393_v12 = vld [vmem:[#allocation42_spill] sm:$0xff] }
 0x18b   :  { %v14423_v32 = vrot.slane %v696_v57, %v13128_v4  ;;  %v658_v23 = vmul.f32 %v14310_v58, %v19383_v31  ;;  %v729_v36 = vrot.slane %v700_v54, %v13128_v4  ;;  %v733_v17 = vrot.slane %v699_v42, %v13128_v4  ;;  %v14430_v49 = vpop.permute.xlu1 %1438  ;;  %v14437_v25 = vpop.permute.xlu0 %1440 }
 0x18c   :  { %v737_v44 = vrot.slane %v698_v37, %v13128_v4  ;;  %19392 = vst [vmem:[#allocation22_spill] sm:$0xff] %v14430_v49  ;;  %v659_v13 = vmul.f32 %v14313_v0, %v19383_v31  ;;  %v746_v10 = vmul.f32 %v717_v50, %v19393_v12  ;;  %v747_v2 = vmul.f32 %v721_v40, %v19393_v12 }
 0x18d   :  { %v748_v57 = vmul.f32 %v725_v48, %v19393_v12  ;;  %19394 = vst [vmem:[#allocation24_spill] sm:$0xff] %v14437_v25  ;;  %2054 = vrot.lane.b32.xlu1 %v19343_v34, %s13084_s30  ;;  %v14442_v58 = vadd.f32 %v652_v59, %v14331_v46  ;;  %v749_v54 = vmul.f32 %v729_v36, %v19393_v12 }
 0x18e   :  { %v750_v20 = vmul.f32 %v733_v17, %v19393_v12  ;;  %v751_v0 = vmul.f32 %v737_v44, %v19393_v12  ;;  %2056 = vrot.lane.b32.xlu0 %v19344_v56, %s13084_s30  ;;  %v14450_v31 = vadd.f32 %v653_v29, %v14341_v30  ;;  %v14453_v42 = vadd.f32 %v654_v26, %v14343_v53 }
 0x18f   :  { %v752_v37 = vmul.f32 %v14420_v8, %v19393_v12  ;;  %v753_v46 = vmul.f32 %v14423_v32, %v19393_v12  ;;  %v14459_v59 = vadd.f32 %v655_v62, %v569_v35  ;;  %v14461_v49 = vadd.f32 %v656_v28, %v570_v41  ;;  %v14467_v22 = vpop.permute.xlu1 %1442  ;;  %v14477_v60 = vpop.permute.xlu0 %1444  ;;  %v19399_v62 = vld [vmem:[#allocation43_spill] sm:$0xff]  ;;  %v19403_v12 = vld [vmem:[#allocation49_spill] sm:$0xff] }
 0x190   :  { %v14463_v25 = vadd.f32 %v657_v3, %v571_v39  ;;  %v14465_v61 = vadd.f32 %v658_v23, %v572_v7  ;;  %19395 = vst [vmem:[#allocation31_spill] sm:$0xff] %v14467_v22  ;;  %v14469_v30 = vadd.f32 %v659_v13, %v573_v51  ;;  %v14471_v53 = vadd.f32 %v746_v10, %v660_v55  ;;  %v19397_v7 = vld [vmem:[#allocation44_spill] sm:$0xff]  ;;  %v19398_v51 = vld [vmem:[#allocation51_spill] sm:$0xff]  ;;  %v19401_v3 = vld [vmem:[#allocation46_spill] sm:$0xff] }
 0x191   :  { %v14473_v29 = vadd.f32 %v747_v2, %v661_v16  ;;  %v14475_v26 = vadd.f32 %v748_v57, %v662_v43  ;;  %19396 = vst [vmem:[#allocation23_spill] sm:$0xff] %v14477_v60  ;;  %2058 = vrot.lane.b32.xlu1 %v13164_v15, %s13084_s30  ;;  %v14481_v35 = vadd.f32 %v749_v54, %v663_v5  ;;  %v19402_v13 = vld [vmem:[#allocation50_spill] sm:$0xff]  ;;  %v19406_v2 = vld [vmem:[#allocation48_spill] sm:$0xff] }
 0x192   :  { %v14483_v39 = vadd.f32 %v750_v20, %v664_v27  ;;  %v14485_v41 = vadd.f32 %v751_v0, %v665_v52  ;;  %v805_v55 = vsel %vm19247_vm7, %v19398_v51, %v19397_v7  ;;  %2060 = vrot.lane.b32.xlu0 %v13160_v14, %s13084_s30  ;;  %v14493_v43 = vadd.f32 %v752_v37, %v666_v47  ;;  %v19400_v27 = vld [vmem:[#allocation45_spill] sm:$0xff] }
 0x193   :  { %v14495_v16 = vadd.f32 %v753_v46, %v667_v63  ;;  %v754_v28 = vmul.f32 %v717_v50, %v19399_v62  ;;  %v755_v5 = vmul.f32 %v721_v40, %v19399_v62  ;;  %v804_v52 = vsel %vm19247_vm7, %v19397_v7, %v19400_v27  ;;  %v14515_v50 = vpop.permute.xlu1 %1446  ;;  %v19405_v40 = vld [vmem:[#allocation47_spill] sm:$0xff]  ;;  %v14531_v0 = vpop.permute.xlu0 %1448 }
 0x194   :  { %v803_v23 = vsel %vm19247_vm7, %v19400_v27, %v19401_v3  ;;  %v799_v47 = vsel %vm19247_vm7, %v19403_v12, %v19402_v13  ;;  %v798_v63 = vsel %vm19247_vm7, %v19402_v13, %v19398_v51  ;;  %19404 = vst [vmem:[#allocation25_spill] sm:$0xff] %v14515_v50  ;;  %v802_v10 = vsel %vm19247_vm7, %v19401_v3, %v19405_v40 }
 0x195   :  { %v801_v57 = vsel %vm19247_vm7, %v19405_v40, %v19406_v2  ;;  %v800_v54 = vsel %vm19247_vm7, %v19406_v2, %v19403_v12  ;;  %v819_v20 = vrot.slane %v805_v55, %v13128_v4  ;;  %19407 = vst [vmem:[#allocation26_spill] sm:$0xff] %v14531_v0  ;;  %2062 = vrot.lane.b32.xlu1 %v13178_v19, %s13084_s30  ;;  %v12573_v55 = vld [vmem:[%s19067_s1 + $0x140] sm:$0xff] }
 0x196   :  { %v756_v37 = vmul.f32 %v725_v48, %v19399_v62  ;;  %v757_v46 = vmul.f32 %v729_v36, %v19399_v62  ;;  %v758_v7 = vmul.f32 %v733_v17, %v19399_v62  ;;  %v759_v51 = vmul.f32 %v737_v44, %v19399_v62  ;;  %2064 = vrot.lane.b32.xlu0 %v13174_v18, %s13084_s30  ;;  %v12574_v36 = vld [vmem:[%s19067_s1 + $0x148] sm:$0x7f] }
 0x197   :  { %v823_v27 = vrot.slane %v804_v52, %v13128_v4  ;;  %v827_v3 = vrot.slane %v803_v23, %v13128_v4  ;;  %v14547_v13 = vrot.slane %v799_v47, %v13128_v4  ;;  %v14550_v48 = vrot.slane %v798_v63, %v13128_v4  ;;  %v14560_v23 = vpop.permute.xlu1 %1450  ;;  %v19409_v63 = vld [vmem:[#allocation52_spill] sm:$0xff]  ;;  %v14567_v22 = vpop.permute.xlu0 %1452 }
 0x198   :  { %v760_v17 = vmul.f32 %v14420_v8, %v19399_v62  ;;  %v831_v44 = vrot.slane %v802_v10, %v13128_v4  ;;  %v835_v12 = vrot.slane %v801_v57, %v13128_v4  ;;  %v839_v52 = vrot.slane %v800_v54, %v13128_v4  ;;  %19408 = vst [vmem:[#allocation30_spill] sm:$0xff] %v14560_v23 }
 0x199   :  { %v761_v47 = vmul.f32 %v14423_v32, %v19399_v62  ;;  %v848_v40 = vmul.f32 %v819_v20, %v19409_v63  ;;  %v849_v2 = vmul.f32 %v823_v27, %v19409_v63  ;;  %v850_v0 = vmul.f32 %v827_v3, %v19409_v63  ;;  %19410 = vst [vmem:[#allocation29_spill] sm:$0xff] %v14567_v22 }
 0x19a   :  { %2077 = vperm.xlu1 %12951, %v12573_v55   ;;  %v770_v8 = vadd.f32 %v754_v28, %v14442_v58  ;;  %v851_v10 = vmul.f32 %v831_v44, %v19409_v63  ;;  %v852_v57 = vmul.f32 %v835_v12, %v19409_v63  ;;  %v853_v54 = vmul.f32 %v839_v52, %v19409_v63 }
 0x19b   :  { %2082 = vperm.xlu0 %12950, %v12574_v36   ;;  %v771_v32 = vadd.f32 %v755_v5, %v14450_v31  ;;  %v772_v62 = vadd.f32 %v756_v37, %v14453_v42  ;;  %v854_v23 = vmul.f32 %v14547_v13, %v19409_v63  ;;  %v855_v60 = vmul.f32 %v14550_v48, %v19409_v63  ;;  %v14583_v22 = vpop.permute.xlu1 %1465  ;;  %v14589_v36 = vpop.permute.xlu0 %1470 }
 0x19c   :  { %v773_v55 = vadd.f32 %v757_v46, %v14459_v59  ;;  %v774_v58 = vadd.f32 %v758_v7, %v14461_v49  ;;  %v775_v28 = vadd.f32 %v759_v51, %v14463_v25  ;;  %v776_v50 = vadd.f32 %v760_v17, %v14465_v61  ;;  %19411 = vst [vmem:[#allocation27_spill] sm:$0xff] %v14583_v22  ;;  %v19413_v59 = vld [vmem:[#allocation54_spill] sm:$0xff]  ;;  %v19416_v7 = vld [vmem:[#allocation55_spill] sm:$0xff]  ;;  %v19418_v17 = vld [vmem:[#allocation60_spill] sm:$0xff] }
 0x19d   :  { %v777_v31 = vadd.f32 %v761_v47, %v14469_v30  ;;  %v864_v42 = vadd.f32 %v848_v40, %v14471_v53  ;;  %v865_v5 = vadd.f32 %v849_v2, %v14473_v29  ;;  %v866_v37 = vadd.f32 %v850_v0, %v14475_v26  ;;  %19412 = vst [vmem:[#allocation28_spill] sm:$0xff] %v14589_v36  ;;  %v19414_v30 = vld [vmem:[#allocation61_spill] sm:$0xff]  ;;  %v19419_v47 = vld [vmem:[#allocation59_spill] sm:$0xff] }
 0x19e   :  { %2152 = vrot.lane.b32.xlu1 %v13138_v9, %s19199_s21  ;;  %v867_v49 = vadd.f32 %v851_v10, %v14481_v35  ;;  %v868_v61 = vadd.f32 %v852_v57, %v14483_v39  ;;  %v869_v25 = vadd.f32 %v853_v54, %v14485_v41  ;;  %v907_v53 = vsel %vm19246_vm8, %v19414_v30, %v19413_v59  ;;  %v19415_v0 = vld [vmem:[#allocation53_spill] sm:$0xff]  ;;  %v19417_v41 = vld [vmem:[#allocation56_spill] sm:$0xff] }
 0x19f   :  { %2154 = vrot.lane.b32.xlu0 %v13150_v11, %s19199_s21  ;;  %v870_v29 = vadd.f32 %v854_v23, %v14493_v43  ;;  %v871_v26 = vadd.f32 %v855_v60, %v14495_v16  ;;  %v856_v46 = vmul.f32 %v819_v20, %v19415_v0  ;;  %v857_v35 = vmul.f32 %v823_v27, %v19415_v0  ;;  %v14622_v16 = vpop.permute.xlu1 %1540  ;;  %v19421_v20 = vld [vmem:[#allocation57_spill] sm:$0xff]  ;;  %v19422_v23 = vld [vmem:[#allocation58_spill] sm:$0xff]  ;;  %v14638_v10 = vpop.permute.xlu0 %1542 }
 0x1a0   :  { %v906_v39 = vsel %vm19246_vm8, %v19413_v59, %v19416_v7  ;;  %v905_v51 = vsel %vm19246_vm8, %v19416_v7, %v19417_v41  ;;  %v901_v43 = vsel %vm19246_vm8, %v19419_v47, %v19418_v17  ;;  %v900_v60 = vsel %vm19246_vm8, %v19418_v17, %v19414_v30  ;;  %19420 = vst [vmem:[#allocation32_spill] sm:$0xff] %v14622_v16 }
 0x1a1   :  { %v904_v27 = vsel %vm19246_vm8, %v19417_v41, %v19421_v20  ;;  %v903_v63 = vsel %vm19246_vm8, %v19421_v20, %v19422_v23  ;;  %v902_v40 = vsel %vm19246_vm8, %v19422_v23, %v19419_v47  ;;  %v921_v2 = vrot.slane %v907_v53, %v13128_v4  ;;  %19423 = vst [vmem:[#allocation34_spill] sm:$0xff] %v14638_v10 }
 0x1a2   :  { %2156 = vrot.lane.b32.xlu1 %v19343_v34, %s19199_s21  ;;  %v858_v57 = vmul.f32 %v827_v3, %v19415_v0  ;;  %v859_v54 = vmul.f32 %v831_v44, %v19415_v0  ;;  %v860_v59 = vmul.f32 %v835_v12, %v19415_v0  ;;  %v861_v30 = vmul.f32 %v839_v52, %v19415_v0 }
 0x1a3   :  { %2158 = vrot.lane.b32.xlu0 %v19344_v56, %s19199_s21  ;;  %v925_v53 = vrot.slane %v906_v39, %v13128_v4  ;;  %v929_v7 = vrot.slane %v905_v51, %v13128_v4  ;;  %v14651_v41 = vrot.slane %v901_v43, %v13128_v4  ;;  %v14654_v17 = vrot.slane %v900_v60, %v13128_v4  ;;  %v14661_v47 = vpop.permute.xlu1 %1544  ;;  %v19425_v51 = vld [vmem:[#allocation62_spill] sm:$0xff]  ;;  %v14668_v23 = vpop.permute.xlu0 %1546 }
 0x1a4   :  { %v862_v3 = vmul.f32 %v14547_v13, %v19415_v0  ;;  %v933_v44 = vrot.slane %v904_v27, %v13128_v4  ;;  %v937_v12 = vrot.slane %v903_v63, %v13128_v4  ;;  %v941_v52 = vrot.slane %v902_v40, %v13128_v4  ;;  %19424 = vst [vmem:[#allocation41_spill] sm:$0xff] %v14661_v47 }
 0x1a5   :  { %v863_v39 = vmul.f32 %v14550_v48, %v19415_v0  ;;  %v950_v43 = vmul.f32 %v921_v2, %v19425_v51  ;;  %v951_v20 = vmul.f32 %v925_v53, %v19425_v51  ;;  %v952_v60 = vmul.f32 %v929_v7, %v19425_v51  ;;  %19426 = vst [vmem:[#allocation33_spill] sm:$0xff] %v14668_v23 }
 0x1a6   :  { %2160 = vrot.lane.b32.xlu1 %v13164_v15, %s19199_s21  ;;  %v14672_v13 = vadd.f32 %v856_v46, %v770_v8  ;;  %v953_v27 = vmul.f32 %v933_v44, %v19425_v51  ;;  %v954_v63 = vmul.f32 %v937_v12, %v19425_v51  ;;  %v955_v40 = vmul.f32 %v941_v52, %v19425_v51 }
 0x1a7   :  { %2162 = vrot.lane.b32.xlu0 %v13160_v14, %s19199_s21  ;;  %v14679_v48 = vadd.f32 %v857_v35, %v771_v32  ;;  %v14681_v0 = vadd.f32 %v858_v57, %v772_v62  ;;  %v956_v47 = vmul.f32 %v14651_v41, %v19425_v51  ;;  %v957_v8 = vmul.f32 %v14654_v17, %v19425_v51  ;;  %v14695_v36 = vpop.permute.xlu1 %1548  ;;  %v14705_v22 = vpop.permute.xlu0 %1550 }
 0x1a8   :  { %v14687_v46 = vadd.f32 %v859_v54, %v773_v55  ;;  %v14689_v23 = vadd.f32 %v860_v59, %v774_v58  ;;  %v14691_v16 = vadd.f32 %v861_v30, %v775_v28  ;;  %v14693_v10 = vadd.f32 %v862_v3, %v776_v50  ;;  %19427 = vst [vmem:[#allocation35_spill] sm:$0xff] %v14705_v22  ;;  %v19428_v28 = vld [vmem:[#allocation64_spill] sm:$0xff]  ;;  %v12576_v59 = vld [vmem:[%s19067_s1 + $0x158] sm:$0x7f] }
 0x1a9   :  { %v14697_v32 = vadd.f32 %v863_v39, %v777_v31  ;;  %v14699_v62 = vadd.f32 %v950_v43, %v864_v42  ;;  %v14701_v35 = vadd.f32 %v951_v20, %v865_v5  ;;  %v14703_v57 = vadd.f32 %v952_v60, %v866_v37  ;;  %v19429_v31 = vld [vmem:[#allocation71_spill] sm:$0xff]  ;;  %v12575_v5 = vld [vmem:[%s19067_s1 + $0x150] sm:$0xff]  ;;  %v19431_v30 = vld [vmem:[#allocation65_spill] sm:$0xff] }
 0x1aa   :  { %2164 = vrot.lane.b32.xlu1 %v13178_v19, %s19199_s21  ;;  %v14709_v55 = vadd.f32 %v953_v27, %v867_v49  ;;  %v14711_v58 = vadd.f32 %v954_v63, %v868_v61  ;;  %v14713_v50 = vadd.f32 %v955_v40, %v869_v25  ;;  %v1009_v42 = vsel %vm19245_vm9, %v19429_v31, %v19428_v28  ;;  %v19430_v61 = vld [vmem:[#allocation63_spill] sm:$0xff]  ;;  %v19432_v39 = vld [vmem:[#allocation66_spill] sm:$0xff]  ;;  %v19436_v60 = vld [vmem:[#allocation68_spill] sm:$0xff] }
 0x1ab   :  { %2166 = vrot.lane.b32.xlu0 %v13174_v18, %s19199_s21  ;;  %v14724_v37 = vadd.f32 %v956_v47, %v870_v29  ;;  %v14726_v49 = vadd.f32 %v957_v8, %v871_v26  ;;  %v958_v54 = vmul.f32 %v921_v2, %v19430_v61  ;;  %v959_v25 = vmul.f32 %v925_v53, %v19430_v61  ;;  %v19433_v26 = vld [vmem:[#allocation70_spill] sm:$0xff]  ;;  %v19434_v47 = vld [vmem:[#allocation69_spill] sm:$0xff]  ;;  %v14749_v51 = vpop.permute.xlu1 %1552  ;;  %v19435_v43 = vld [vmem:[#allocation67_spill] sm:$0xff]  ;;  %v14765_v8 = vpop.permute.xlu0 %1554  ;;  %s13088_s21 = smov 86  }
 0x1ac   :  { %v1008_v3 = vsel %vm19245_vm9, %v19428_v28, %v19431_v30  ;;  %v1007_v29 = vsel %vm19245_vm9, %v19431_v30, %v19432_v39  ;;  %v1003_v2 = vsel %vm19245_vm9, %v19434_v47, %v19433_v26  ;;  %v1002_v53 = vsel %vm19245_vm9, %v19433_v26, %v19429_v31 }
 0x1ad   :  { %v1006_v20 = vsel %vm19245_vm9, %v19432_v39, %v19435_v43  ;;  %v1005_v27 = vsel %vm19245_vm9, %v19435_v43, %v19436_v60  ;;  %v1004_v63 = vsel %vm19245_vm9, %v19436_v60, %v19434_v47  ;;  %v1023_v40 = vrot.slane %v1009_v42, %v13128_v4 }
 0x1ae   :  { %2179 = vperm.xlu1 %12951, %v12575_v5   ;;  %v960_v28 = vmul.f32 %v929_v7, %v19430_v61  ;;  %v961_v31 = vmul.f32 %v933_v44, %v19430_v61  ;;  %v962_v30 = vmul.f32 %v937_v12, %v19430_v61  ;;  %v963_v39 = vmul.f32 %v941_v52, %v19430_v61 }
 0x1af   :  { %2184 = vperm.xlu0 %12950, %v12576_v59   ;;  %v1027_v26 = vrot.slane %v1008_v3, %v13128_v4  ;;  %v1031_v47 = vrot.slane %v1007_v29, %v13128_v4  ;;  %v14774_v42 = vrot.slane %v1003_v2, %v13128_v4  ;;  %v14777_v43 = vrot.slane %v1002_v53, %v13128_v4  ;;  %v14784_v5 = vpop.permute.xlu1 %1567  ;;  %v19438_v3 = vld [vmem:[#allocation72_spill] sm:$0xff]  ;;  %v14791_v60 = vpop.permute.xlu0 %1572 }
 0x1b0   :  { %v964_v7 = vmul.f32 %v14651_v41, %v19430_v61  ;;  %v1035_v44 = vrot.slane %v1006_v20, %v13128_v4  ;;  %v1039_v12 = vrot.slane %v1005_v27, %v13128_v4  ;;  %v1043_v52 = vrot.slane %v1004_v63, %v13128_v4  ;;  %19437 = vst [vmem:[#allocation36_spill] sm:$0xff] %v14784_v5 }
 0x1b1   :  { %v965_v59 = vmul.f32 %v14654_v17, %v19430_v61  ;;  %v1052_v29 = vmul.f32 %v1023_v40, %v19438_v3  ;;  %v1053_v2 = vmul.f32 %v1027_v26, %v19438_v3  ;;  %v1054_v53 = vmul.f32 %v1031_v47, %v19438_v3  ;;  %19439 = vst [vmem:[#allocation40_spill] sm:$0xff] %v14791_v60 }
 0x1b2   :  { %2254 = vrot.lane.b32.xlu1 %v13138_v9, %s13086_s0  ;;  %v14796_v41 = vadd.f32 %v958_v54, %v14672_v13  ;;  %v1055_v20 = vmul.f32 %v1035_v44, %v19438_v3  ;;  %v1056_v27 = vmul.f32 %v1039_v12, %v19438_v3  ;;  %v1057_v17 = vmul.f32 %v1043_v52, %v19438_v3 }
 0x1b3   :  { %2256 = vrot.lane.b32.xlu0 %v13150_v11, %s13086_s0  ;;  %v14804_v61 = vadd.f32 %v959_v25, %v14679_v48  ;;  %v14807_v63 = vadd.f32 %v960_v28, %v14681_v0  ;;  %v1058_v60 = vmul.f32 %v14774_v42, %v19438_v3  ;;  %v1059_v13 = vmul.f32 %v14777_v43, %v19438_v3  ;;  %v14825_v0 = vpop.permute.xlu1 %1642  ;;  %v19445_v3 = vld [vmem:[#allocation76_spill] sm:$0xff] }
 0x1b4   :  { %v14814_v54 = vadd.f32 %v961_v31, %v14687_v46  ;;  %v14817_v5 = vadd.f32 %v962_v30, %v14689_v23  ;;  %v14820_v22 = vadd.f32 %v963_v39, %v14691_v16  ;;  %v14823_v48 = vadd.f32 %v964_v7, %v14693_v10  ;;  %19440 = vst [vmem:[#allocation39_spill] sm:$0xff] %v14825_v0  ;;  %v14839_v31 = vpop.permute.xlu0 %1644  ;;  %v19443_v30 = vld [vmem:[#allocation73_spill] sm:$0xff]  ;;  %v19444_v7 = vld [vmem:[#allocation75_spill] sm:$0xff] }
 0x1b5   :  { %v14828_v25 = vadd.f32 %v965_v59, %v14697_v32  ;;  %v14831_v28 = vadd.f32 %v1052_v29, %v14699_v62  ;;  %v14834_v46 = vadd.f32 %v1053_v2, %v14701_v35  ;;  %v14837_v23 = vadd.f32 %v1054_v53, %v14703_v57  ;;  %19441 = vst [vmem:[#allocation37_spill] sm:$0xff] %v14839_v31  ;;  %v19442_v62 = vld [vmem:[#allocation74_spill] sm:$0xff]  ;;  %v19447_v29 = vld [vmem:[#allocation77_spill] sm:$0xff] }
 0x1b6   :  { %2258 = vrot.lane.b32.xlu1 %v19343_v34, %s13086_s0  ;;  %v14844_v16 = vadd.f32 %v1055_v20, %v14709_v55  ;;  %v14847_v10 = vadd.f32 %v1056_v27, %v14711_v58  ;;  %v14850_v32 = vadd.f32 %v1057_v17, %v14713_v50  ;;  %v1111_v35 = vsel %vm19244_vm10, %v13936_v1, %v19442_v62  ;;  %v12578_v50 = vld [vmem:[%s19067_s1 + $0x168] sm:$0x7f] }
 0x1b7   :  { %2260 = vrot.lane.b32.xlu0 %v19344_v56, %s13086_s0  ;;  %v14859_v57 = vadd.f32 %v1058_v60, %v14724_v37  ;;  %v14862_v55 = vadd.f32 %v1059_v13, %v14726_v49  ;;  %v1060_v58 = vmul.f32 %v1023_v40, %v19443_v30  ;;  %v1061_v39 = vmul.f32 %v1027_v26, %v19443_v30  ;;  %v14885_v26 = vpop.permute.xlu1 %1646 }
 0x1b8   :  { %v1110_v59 = vsel %vm19244_vm10, %v19442_v62, %v19444_v7  ;;  %v1109_v37 = vsel %vm19244_vm10, %v19444_v7, %v19445_v3  ;;  %v1105_v49 = vsel %vm19244_vm10, %v13882_v21, %v13920_v38  ;;  %v1104_v40 = vsel %vm19244_vm10, %v13920_v38, %v13936_v1  ;;  %19446 = vst [vmem:[#allocation38_spill] sm:$0xff] %v14885_v26  ;;  %v14901_v38 = vpop.permute.xlu0 %1648 }
 0x1b9   :  { %v1108_v2 = vsel %vm19244_vm10, %v19445_v3, %v19447_v29  ;;  %v1107_v53 = vsel %vm19244_vm10, %v19447_v29, %v13873_v24  ;;  %v1106_v60 = vsel %vm19244_vm10, %v13873_v24, %v13882_v21  ;;  %v1125_v20 = vrot.slane %v1111_v35, %v13128_v4  ;;  %19448 = vst [vmem:[#allocation42_spill] sm:$0xff] %v14901_v38  ;;  %v12577_v21 = vld [vmem:[%s19067_s1 + $0x160] sm:$0xff] }
 0x1ba   :  { %2262 = vrot.lane.b32.xlu1 %v13164_v15, %s13086_s0  ;;  %v1062_v1 = vmul.f32 %v1031_v47, %v19443_v30  ;;  %v1063_v27 = vmul.f32 %v1035_v44, %v19443_v30  ;;  %v1064_v17 = vmul.f32 %v1039_v12, %v19443_v30  ;;  %v1065_v13 = vmul.f32 %v1043_v52, %v19443_v30  ;;  %v12580_v44 = vld [vmem:[%s19067_s1 + $0x178] sm:$0x7f] }
 0x1bb   :  { %2286 = vperm.xlu0 %12950, %v12578_v50   ;;  %v1129_v24 = vrot.slane %v1110_v59, %v13128_v4  ;;  %v1133_v62 = vrot.slane %v1109_v37, %v13128_v4  ;;  %v14915_v35 = vrot.slane %v1105_v49, %v13128_v4  ;;  %v14918_v47 = vrot.slane %v1104_v40, %v13128_v4  ;;  %v14928_v59 = vpop.permute.xlu1 %1650 }
 0x1bc   :  { %v1066_v12 = vmul.f32 %v14774_v42, %v19443_v30  ;;  %v1137_v52 = vrot.slane %v1108_v2, %v13128_v4  ;;  %v1141_v50 = vrot.slane %v1107_v53, %v13128_v4  ;;  %v1145_v7 = vrot.slane %v1106_v60, %v13128_v4  ;;  %19449 = vst [vmem:[#allocation44_spill] sm:$0xff] %v14928_v59  ;;  %v14935_v29 = vpop.permute.xlu0 %1652 }
 0x1bd   :  { %v1067_v3 = vmul.f32 %v14777_v43, %v19443_v30  ;;  %v1154_v37 = vmul.f32 %v1125_v20, %v13965_v45  ;;  %v1155_v49 = vmul.f32 %v1129_v24, %v13965_v45  ;;  %v1156_v40 = vmul.f32 %v1133_v62, %v13965_v45  ;;  %19450 = vst [vmem:[#allocation51_spill] sm:$0xff] %v14935_v29 }
 0x1be   :  { %2281 = vperm.xlu1 %12951, %v12577_v21   ;;  %v14938_v42 = vadd.f32 %v1060_v58, %v14796_v41  ;;  %v1157_v2 = vmul.f32 %v1137_v52, %v13965_v45  ;;  %v1158_v53 = vmul.f32 %v1141_v50, %v13965_v45  ;;  %v1159_v60 = vmul.f32 %v1145_v7, %v13965_v45 }
 0x1bf   :  { %2388 = vperm.xlu0 %12950, %v12580_v44   ;;  %v14944_v43 = vadd.f32 %v1061_v39, %v14804_v61  ;;  %v14947_v30 = vadd.f32 %v1062_v1, %v14807_v63  ;;  %v1160_v29 = vmul.f32 %v14915_v35, %v13965_v45  ;;  %v1161_v41 = vmul.f32 %v14918_v47, %v13965_v45  ;;  %v14965_v63 = vpop.permute.xlu1 %1654 }
 0x1c0   :  { %v14954_v58 = vadd.f32 %v1063_v27, %v14814_v54  ;;  %v14957_v21 = vadd.f32 %v1064_v17, %v14817_v5  ;;  %v14960_v44 = vadd.f32 %v1065_v13, %v14820_v22  ;;  %v14963_v61 = vadd.f32 %v1066_v12, %v14823_v48  ;;  %19451 = vst [vmem:[#allocation43_spill] sm:$0xff] %v14965_v63  ;;  %v14979_v54 = vpop.permute.xlu0 %1656  ;;  %v12579_v27 = vld [vmem:[%s19067_s1 + $0x170] sm:$0xff]  ;;  %v19455_v17 = vld [vmem:[#allocation78_spill] sm:$0xff]  ;;  %v19457_v12 = vld [vmem:[#allocation11_spill] sm:$0xff] }
 0x1c1   :  { %v14968_v39 = vadd.f32 %v1067_v3, %v14828_v25  ;;  %v14971_v1 = vadd.f32 %v1154_v37, %v14831_v28  ;;  %v14974_v45 = vadd.f32 %v1155_v49, %v14834_v46  ;;  %v14977_v5 = vadd.f32 %v1156_v40, %v14837_v23  ;;  %19452 = vst [vmem:[#allocation45_spill] sm:$0xff] %v14979_v54  ;;  %v19453_v28 = vld [vmem:[#allocation79_spill] sm:$0xff]  ;;  %v19454_v46 = vld [vmem:[#allocation8_spill] sm:$0xff]  ;;  %v19456_v13 = vld [vmem:[#allocation10_spill] sm:$0xff] }
 0x1c2   :  { %2362 = vrot.lane.b32.xlu1 %v19344_v56, %s13087_s11  ;;  %v14984_v22 = vadd.f32 %v1157_v2, %v14844_v16  ;;  %v14987_v48 = vadd.f32 %v1158_v53, %v14847_v10  ;;  %v14990_v25 = vadd.f32 %v1159_v60, %v14850_v32  ;;  %v1213_v23 = vsel %vm19240_vm11, %v19454_v46, %v19453_v28  ;;  %v12582_v37 = vld [vmem:[%s19067_s1 + $0x188] sm:$0x7f]  ;;  %v19458_v40 = vld [vmem:[#allocation80_spill] sm:$0xff]  ;;  %v19461_v53 = vld [vmem:[#allocation6_spill] sm:$0xff] }
 0x1c3   :  { %2364 = vrot.lane.b32.xlu0 %v13164_v15, %s13087_s11  ;;  %v1176_v16 = vadd.f32 %v1160_v29, %v14859_v57  ;;  %v15003_v10 = vadd.f32 %v1161_v41, %v14862_v55  ;;  %v1162_v32 = vmul.f32 %v1125_v20, %v19455_v17  ;;  %v1207_v3 = vsel %vm19240_vm11, %v19457_v12, %v19456_v13  ;;  %v19459_v55 = vld [vmem:[#allocation5_spill] sm:$0xff]  ;;  %v15026_v2 = vpop.permute.xlu1 %1669  ;;  %v19462_v60 = vld [vmem:[#allocation7_spill] sm:$0xff] }
 0x1c4   :  { %v1163_v49 = vmul.f32 %v1129_v24, %v19455_v17  ;;  %v1212_v57 = vsel %vm19240_vm11, %v19453_v28, %v19458_v40  ;;  %v1211_v20 = vsel %vm19240_vm11, %v19458_v40, %v19459_v55  ;;  %v1206_v29 = vsel %vm19240_vm11, %v19456_v13, %v19454_v46  ;;  %19460 = vst [vmem:[#allocation46_spill] sm:$0xff] %v15026_v2  ;;  %v15041_v46 = vpop.permute.xlu0 %1674 }
 0x1c5   :  { %v1210_v24 = vsel %vm19240_vm11, %v19459_v55, %v19461_v53  ;;  %v1209_v41 = vsel %vm19240_vm11, %v19461_v53, %v19462_v60  ;;  %v1208_v28 = vsel %vm19240_vm11, %v19462_v60, %v19457_v12  ;;  %v1227_v40 = vrot.slane %v1213_v23, %v13128_v4  ;;  %19463 = vst [vmem:[#allocation50_spill] sm:$0xff] %v15041_v46  ;;  %v12581_v46 = vld [vmem:[%s19067_s1 + $0x180] sm:$0xff] }
 0x1c6   :  { %2383 = vperm.xlu1 %12951, %v12579_v27   ;;  %v1164_v13 = vmul.f32 %v1133_v62, %v19455_v17  ;;  %v1165_v2 = vmul.f32 %v1137_v52, %v19455_v17  ;;  %v1166_v55 = vmul.f32 %v1141_v50, %v19455_v17  ;;  %v1251_v26 = vrot.slane %v1207_v3, %v13128_v4  ;;  %v19465_v3 = vld [vmem:[#allocation9_spill] sm:$0xff] }
 0x1c7   :  { %2490 = vperm.xlu0 %12950, %v12582_v37   ;;  %v1167_v53 = vmul.f32 %v1145_v7, %v19455_v17  ;;  %v1231_v38 = vrot.slane %v1212_v57, %v13128_v4  ;;  %v1235_v12 = vrot.slane %v1211_v20, %v13128_v4  ;;  %v1255_v23 = vrot.slane %v1206_v29, %v13128_v4  ;;  %v15056_v60 = vpop.permute.xlu1 %1744 }
 0x1c8   :  { %v1168_v27 = vmul.f32 %v14915_v35, %v19455_v17  ;;  %v1239_v62 = vrot.slane %v1210_v24, %v13128_v4  ;;  %v1243_v52 = vrot.slane %v1209_v41, %v13128_v4  ;;  %v1247_v50 = vrot.slane %v1208_v28, %v13128_v4  ;;  %19464 = vst [vmem:[#allocation49_spill] sm:$0xff] %v15056_v60  ;;  %v15063_v29 = vpop.permute.xlu0 %1746 }
 0x1c9   :  { %v1169_v7 = vmul.f32 %v14918_v47, %v19455_v17  ;;  %v1256_v37 = vmul.f32 %v1227_v40, %v19465_v3  ;;  %v1257_v57 = vmul.f32 %v1231_v38, %v19465_v3  ;;  %v1258_v20 = vmul.f32 %v1235_v12, %v19465_v3  ;;  %19466 = vst [vmem:[#allocation47_spill] sm:$0xff] %v15063_v29 }
 0x1ca   :  { %2360 = vrot.lane.b32.xlu1 %v19343_v34, %s13087_s11  ;;  %v1259_v35 = vmul.f32 %v1239_v62, %v19465_v3  ;;  %v1260_v24 = vmul.f32 %v1243_v52, %v19465_v3  ;;  %v1261_v41 = vmul.f32 %v1247_v50, %v19465_v3  ;;  %v1262_v28 = vmul.f32 %v1251_v26, %v19465_v3 }
 0x1cb   :  { %2464 = vrot.lane.b32.xlu0 %v19344_v56, %s13088_s21  ;;  %v1178_v47 = vadd.f32 %v1162_v32, %v14938_v42  ;;  %v1179_v17 = vadd.f32 %v1163_v49, %v14944_v43  ;;  %v1180_v29 = vadd.f32 %v1164_v13, %v14947_v30  ;;  %v1263_v60 = vmul.f32 %v1255_v23, %v19465_v3  ;;  %v15084_v0 = vpop.permute.xlu1 %1748 }
 0x1cc   :  { %v1181_v59 = vadd.f32 %v1165_v2, %v14954_v58  ;;  %v1182_v31 = vadd.f32 %v1166_v55, %v14957_v21  ;;  %v1183_v63 = vadd.f32 %v1167_v53, %v14960_v44  ;;  %v1184_v54 = vadd.f32 %v1168_v27, %v14963_v61  ;;  %v15090_v49 = vpop.permute.xlu0 %1750 }
 0x1cd   :  { %v1185_v42 = vadd.f32 %v1169_v7, %v14968_v39  ;;  %v1272_v43 = vadd.f32 %v1256_v37, %v14971_v1  ;;  %v1273_v30 = vadd.f32 %v1257_v57, %v14974_v45  ;;  %v1274_v32 = vadd.f32 %v1258_v20, %v14977_v5  ;;  %v19467_v1 = vld [vmem:[#allocation3_spill] sm:$0xff] }
 0x1ce   :  { %2466 = vrot.lane.b32.xlu1 %v13164_v15, %s13088_s21  ;;  %v1275_v58 = vadd.f32 %v1259_v35, %v14984_v22  ;;  %v1276_v21 = vadd.f32 %v1260_v24, %v14987_v48  ;;  %v1277_v44 = vadd.f32 %v1261_v41, %v14990_v25  ;;  %v1278_v61 = vadd.f32 %v1262_v28, %v1176_v16 }
 0x1cf   :  { %2485 = vperm.xlu0 %12950, %v12581_v46   ;;  %v1279_v39 = vadd.f32 %v1263_v60, %v15003_v10  ;;  %v1264_v45 = vmul.f32 %v1227_v40, %v19467_v1  ;;  %v1265_v5 = vmul.f32 %v1231_v38, %v19467_v1  ;;  %v1266_v2 = vmul.f32 %v1235_v12, %v19467_v1  ;;  %v15106_v16 = vpop.permute.xlu1 %1752  ;;  %v19468_v10 = vld [vmem:[#allocation4_spill] sm:$0xff] }
 0x1d0   :  { %v1267_v13 = vmul.f32 %v1239_v62, %v19467_v1  ;;  %v1268_v22 = vmul.f32 %v1243_v52, %v19467_v1  ;;  %v1269_v48 = vmul.f32 %v1247_v50, %v19467_v1  ;;  %v1270_v25 = vmul.f32 %v1251_v26, %v19467_v1  ;;  %v15115_v53 = vpop.permute.xlu0 %1754 }
 0x1d1   :  { %v1271_v46 = vmul.f32 %v1255_v23, %v19467_v1  ;;  %v1301_v55 = vmul.f32 %v19468_v10, %v13138_v9  ;;  %v1302_v38 = vmul.f32 %v19468_v10, %v13150_v11  ;;  %v1303_v40 = vmul.f32 %v19468_v10, %v19343_v34 }
 0x1d2   :  { %2358 = vrot.lane.b32.xlu1 %v13150_v11, %s13087_s11  ;;  %v1304_v26 = vmul.f32 %v19468_v10, %v19344_v56  ;;  %v1305_v12 = vmul.f32 %v19468_v10, %v13164_v15  ;;  %v1306_v23 = vmul.f32 %v19468_v10, %v13160_v14  ;;  %v1307_v27 = vmul.f32 %v19468_v10, %v13178_v19 }
 0x1d3   :  { %2462 = vrot.lane.b32.xlu0 %v19343_v34, %s13088_s21  ;;  %v1280_v62 = vadd.f32 %v1264_v45, %v1178_v47  ;;  %v1281_v52 = vadd.f32 %v1265_v5, %v1179_v17  ;;  %v1282_v50 = vadd.f32 %v1266_v2, %v1180_v29  ;;  %v1308_v60 = vmul.f32 %v19468_v10, %v13174_v18  ;;  %v15131_v20 = vpop.permute.xlu1 %1756  ;;  %v19469_v47 = vld [vmem:[#allocation12_spill] sm:$0xff]  ;;  %v19473_v45 = vld [vmem:[#allocation15_spill] sm:$0xff] }
 0x1d4   :  { %v1283_v7 = vadd.f32 %v1267_v13, %v1181_v59  ;;  %v1284_v3 = vadd.f32 %v1268_v22, %v1182_v31  ;;  %v1285_v37 = vadd.f32 %v1269_v48, %v1183_v63  ;;  %v1286_v57 = vadd.f32 %v1270_v25, %v1184_v54  ;;  %v15139_v1 = vpop.permute.xlu0 %1758  ;;  %v19474_v13 = vld [vmem:[#allocation16_spill] sm:$0xff] }
 0x1d5   :  { %v1287_v35 = vadd.f32 %v1271_v46, %v1185_v42  ;;  %v15133_v24 = vadd.f32 %v1301_v55, %v1272_v43  ;;  %v15135_v41 = vadd.f32 %v1302_v38, %v1273_v30  ;;  %v15137_v28 = vadd.f32 %v1303_v40, %v1274_v32  ;;  %v19475_v48 = vld [vmem:[#allocation20_spill] sm:$0xff]  ;;  %v19476_v46 = vld [vmem:[#allocation19_spill] sm:$0xff] }
 0x1d6   :  { %2356 = vrot.lane.b32.xlu1 %v13138_v9, %s13087_s11  ;;  %v15143_v29 = vadd.f32 %v1304_v26, %v1275_v58  ;;  %v15145_v59 = vadd.f32 %v1305_v12, %v1276_v21  ;;  %v15147_v31 = vadd.f32 %v1306_v23, %v1277_v44  ;;  %v15149_v63 = vadd.f32 %v1307_v27, %v1278_v61  ;;  %v19471_v61 = vld [vmem:[#allocation14_spill] sm:$0xff] }
 0x1d7   :  { %2460 = vrot.lane.b32.xlu0 %v13150_v11, %s13088_s21  ;;  %v15153_v54 = vadd.f32 %v1308_v60, %v1279_v39  ;;  %v1309_v17 = vmul.f32 %v19469_v47, %v13138_v9  ;;  %v1310_v42 = vmul.f32 %v19469_v47, %v13150_v11  ;;  %v1311_v43 = vmul.f32 %v19469_v47, %v19343_v34  ;;  %v15170_v44 = vpop.permute.xlu1 %1771  ;;  %v19470_v34 = vld [vmem:[#allocation21_spill] sm:$0xff] }
 0x1d8   :  { %v1312_v30 = vmul.f32 %v19469_v47, %v19344_v56  ;;  %v1313_v32 = vmul.f32 %v19469_v47, %v13164_v15  ;;  %v1314_v58 = vmul.f32 %v19469_v47, %v13160_v14  ;;  %v1315_v21 = vmul.f32 %v19469_v47, %v13178_v19  ;;  %v19472_v56 = vld [vmem:[#allocation13_spill] sm:$0xff]  ;;  %v15186_v2 = vpop.permute.xlu0 %1776 }
 0x1d9   :  { %v1316_v11 = vmul.f32 %v19469_v47, %v13174_v18  ;;  %v1359_v39 = vsel %vm19238_vm12, %v19471_v61, %v19470_v34  ;;  %v1358_v15 = vsel %vm19238_vm12, %v19470_v34, %v19472_v56  ;;  %v1357_v5 = vsel %vm19238_vm12, %v19472_v56, %v19473_v45 }
 0x1da   :  { %2268 = vrot.lane.b32.xlu1 %v13174_v18, %s13086_s0  ;;  %v1356_v22 = vsel %vm19238_vm12, %v19473_v45, %v19474_v13  ;;  %v1354_v25 = vsel %vm19238_vm12, %v19475_v48, %v14356_v33  ;;  %v1353_v10 = vsel %vm19238_vm12, %v14356_v33, %v19476_v46  ;;  %v1325_v55 = vadd.f32 %v1309_v17, %v1280_v62 }
 0x1db   :  { %2458 = vrot.lane.b32.xlu0 %v13138_v9, %s13088_s21  ;;  %v15204_v38 = vadd.f32 %v1310_v42, %v1281_v52  ;;  %v1355_v40 = vsel %vm19238_vm12, %v19474_v13, %v19475_v48  ;;  %v1360_v26 = vsel %vm19238_vm12, %v19476_v46, %v19471_v61  ;;  %v19212_v12 = vmov 0.0   ;;  %v15217_v62 = vpop.permute.xlu1 %1846 }
 0x1dc   :  { %2748 = vmatprep.mubr.f32.mxu1 %v19212_v12  ;;  %v1327_v33 = vadd.f32 %v1311_v43, %v1282_v50  ;;  %v1328_v23 = vadd.f32 %v1312_v30, %v1283_v7  ;;  %v1374_v9 = vrot.slane %v1359_v39, %v13128_v4  ;;  %v1378_v27 = vrot.slane %v1358_v15, %v13128_v4  ;;  %v15224_v42 = vpop.permute.xlu0 %1848  ;;  %v19477_v30 = vld [vmem:[#allocation17_spill] sm:$0xff] }
 0x1dd   :  { %2671 = vmatprep.mubr.f32.mxu0 %v19212_v12  ;;  %v1382_v52 = vrot.slane %v1357_v5, %v13128_v4  ;;  %v1386_v60 = vrot.slane %v1356_v22, %v13128_v4  ;;  %v1394_v47 = vrot.slane %v1354_v25, %v13128_v4  ;;  %v1398_v17 = vrot.slane %v1353_v10, %v13128_v4  ;;  %v19478_v5 = vld [vmem:[#allocation18_spill] sm:$0xff] }
 0x1de   :  { %2266 = vrot.lane.b32.xlu1 %v13178_v19, %s13086_s0  ;;  %v15228_v50 = vadd.f32 %v1313_v32, %v1284_v3  ;;  %v1390_v7 = vrot.slane %v1355_v40, %v13128_v4  ;;  %v1402_v43 = vrot.slane %v1360_v26, %v13128_v4  ;;  %v1403_v34 = vmul.f32 %v1374_v9, %v19477_v30  ;;  %v19482_v10 = vld [vmem:[#allocation22_spill] sm:$0xff] }
 0x1df   :  { %2370 = vrot.lane.b32.xlu0 %v13174_v18, %s13087_s11  ;;  %v15235_v61 = vadd.f32 %v1314_v58, %v1285_v37  ;;  %v1404_v39 = vmul.f32 %v1378_v27, %v19477_v30  ;;  %v1405_v56 = vmul.f32 %v1382_v52, %v19477_v30  ;;  %v1406_v15 = vmul.f32 %v1386_v60, %v19477_v30  ;;  %v15242_v22 = vpop.permute.xlu1 %1850  ;;  %v19496_v12 = vld [vmem:[#allocation34_spill] sm:$0xff] }
 0x1e0   :  { %v1331_v45 = vadd.f32 %v1315_v21, %v1286_v57  ;;  %v1332_v3 = vadd.f32 %v1316_v11, %v1287_v35  ;;  %v1407_v32 = vmul.f32 %v1390_v7, %v19477_v30  ;;  %v1411_v13 = vmul.f32 %v1374_v9, %v19478_v5  ;;  %19479 = vst [vmem:[#allocation48_spill] sm:$0xff] %v15242_v22  ;;  %v15248_v46 = vpop.permute.xlu0 %1852  ;;  %v19481_v11 = vld [vmem:[#allocation24_spill] sm:$0xff] }
 0x1e1   :  { %v1408_v48 = vmul.f32 %v1394_v47, %v19477_v30  ;;  %v1409_v25 = vmul.f32 %v1398_v17, %v19477_v30  ;;  %v1413_v37 = vmul.f32 %v1382_v52, %v19478_v5  ;;  %v1414_v58 = vmul.f32 %v1386_v60, %v19478_v5  ;;  %19480 = vst [vmem:[#allocation52_spill] sm:$0xff] %v15248_v46 }
 0x1e2   :  { %2264 = vrot.lane.b32.xlu1 %v13160_v14, %s13086_s0  ;;  %v1410_v57 = vmul.f32 %v1402_v43, %v19477_v30  ;;  %v15254_v35 = vadd.f32 %v1403_v34, %v15133_v24  ;;  %v1418_v21 = vmul.f32 %v1402_v43, %v19478_v5  ;;  %v1461_v40 = vsel %vm19237_vm13, %v19482_v10, %v19481_v11 }
 0x1e3   :  { %2368 = vrot.lane.b32.xlu0 %v13178_v19, %s13087_s11  ;;  %v15264_v26 = vadd.f32 %v1404_v39, %v15135_v41  ;;  %v15267_v9 = vadd.f32 %v1405_v56, %v15137_v28  ;;  %v15270_v52 = vadd.f32 %v1406_v15, %v15143_v29  ;;  %v1412_v24 = vmul.f32 %v1378_v27, %v19478_v5  ;;  %v15279_v41 = vpop.permute.xlu1 %1854  ;;  %v19484_v29 = vld [vmem:[#allocation29_spill] sm:$0xff] }
 0x1e4   :  { %v1415_v60 = vmul.f32 %v1390_v7, %v19478_v5  ;;  %v1416_v43 = vmul.f32 %v1394_v47, %v19478_v5  ;;  %v1417_v30 = vmul.f32 %v1398_v17, %v19478_v5  ;;  %v15276_v34 = vadd.f32 %v1411_v13, %v1325_v55  ;;  %19483 = vst [vmem:[#allocation54_spill] sm:$0xff] %v15279_v41  ;;  %v15286_v56 = vpop.permute.xlu0 %1856  ;;  %v19486_v55 = vld [vmem:[#allocation25_spill] sm:$0xff]  ;;  %v19487_v17 = vld [vmem:[#allocation23_spill] sm:$0xff] }
 0x1e5   :  { %v1429_v39 = vadd.f32 %v1413_v37, %v1327_v33  ;;  %v1476_v28 = vrot.slane %v1461_v40, %v13128_v4  ;;  %v1462_v27 = vsel %vm19237_vm13, %v19484_v29, %v19482_v10  ;;  %19485 = vst [vmem:[#allocation61_spill] sm:$0xff] %v15286_v56  ;;  %v1430_v47 = vadd.f32 %v1414_v58, %v1328_v23  ;;  %v19488_v33 = vld [vmem:[#allocation30_spill] sm:$0xff]  ;;  %v19489_v37 = vld [vmem:[#allocation31_spill] sm:$0xff]  ;;  %v19501_v41 = vld [vmem:[#allocation41_spill] sm:$0xff] }
 0x1e6   :  { %2472 = vrot.lane.b32.xlu1 %v13174_v18, %s13088_s21  ;;  %v1458_v7 = vsel %vm19237_vm13, %v19487_v17, %v19486_v55  ;;  %v1455_v15 = vsel %vm19237_vm13, %v19488_v33, %v19484_v29  ;;  %v1426_v5 = vadd.f32 %v1410_v57, %v15153_v54  ;;  %v1434_v13 = vadd.f32 %v1418_v21, %v1332_v3  ;;  %v19490_v58 = vld [vmem:[#allocation26_spill] sm:$0xff] }
 0x1e7   :  { %2366 = vrot.lane.b32.xlu0 %v13160_v14, %s13087_s11  ;;  %v1460_v18 = vsel %vm19237_vm13, %v19481_v11, %v19489_v37  ;;  %v1459_v23 = vsel %vm19237_vm13, %v19489_v37, %v19487_v17  ;;  %v1456_v10 = vsel %vm19237_vm13, %v19490_v58, %v19488_v33  ;;  %v1425_v40 = vadd.f32 %v1409_v25, %v15149_v63  ;;  %v15319_v57 = vpop.permute.xlu1 %1858 }
 0x1e8   :  { %v1457_v54 = vsel %vm19237_vm13, %v19486_v55, %v19490_v58  ;;  %v1504_v3 = vrot.slane %v1462_v27, %v13128_v4  ;;  %19491 = vst [vmem:[#allocation53_spill] sm:$0xff] %v15319_v57  ;;  %v1433_v21 = vadd.f32 %v1417_v30, %v1331_v45  ;;  %v1428_v11 = vadd.f32 %v1412_v24, %v15204_v38  ;;  %v15324_v37 = vpop.permute.xlu0 %1860  ;;  %v19492_v30 = vld [vmem:[#allocation27_spill] sm:$0xff] }
 0x1e9   :  { %v1488_v29 = vrot.slane %v1458_v7, %v13128_v4  ;;  %v1500_v17 = vrot.slane %v1455_v15, %v13128_v4  ;;  %v1423_v63 = vadd.f32 %v1407_v32, %v15145_v59  ;;  %v1424_v25 = vadd.f32 %v1408_v48, %v15147_v31 }
 0x1ea   :  { %2470 = vrot.lane.b32.xlu1 %v13178_v19, %s13088_s21  ;;  %v1480_v27 = vrot.slane %v1460_v18, %v13128_v4  ;;  %v1484_v55 = vrot.slane %v1459_v23, %v13128_v4  ;;  %v1496_v45 = vrot.slane %v1456_v10, %v13128_v4  ;;  %v1431_v38 = vadd.f32 %v1415_v60, %v15228_v50  ;;  %v19493_v19 = vld [vmem:[#allocation28_spill] sm:$0xff] }
 0x1eb   :  { %2468 = vrot.lane.b32.xlu0 %v13160_v14, %s13088_s21  ;;  %v1492_v24 = vrot.slane %v1457_v54, %v13128_v4  ;;  %v1505_v7 = vmul.f32 %v1476_v28, %v19492_v30  ;;  %v1516_v33 = vmul.f32 %v1488_v29, %v19493_v19  ;;  %v1432_v59 = vadd.f32 %v1416_v43, %v15235_v61  ;;  %v15344_v18 = vpop.permute.xlu1 %1873 }
 0x1ec   :  { %v1506_v31 = vmul.f32 %v1480_v27, %v19492_v30  ;;  %v1507_v32 = vmul.f32 %v1484_v55, %v19492_v30  ;;  %v1512_v48 = vmul.f32 %v1504_v3, %v19492_v30  ;;  %v1515_v15 = vmul.f32 %v1484_v55, %v19493_v19  ;;  %19494 = vst [vmem:[#allocation55_spill] sm:$0xff] %v15344_v18  ;;  %v15350_v58 = vpop.permute.xlu0 %1878  ;;  %v19497_v18 = vld [vmem:[#allocation32_spill] sm:$0xff] }
 0x1ed   :  { %v1508_v14 = vmul.f32 %v1488_v29, %v19492_v30  ;;  %v1511_v50 = vmul.f32 %v1500_v17, %v19492_v30  ;;  %v1519_v60 = vmul.f32 %v1500_v17, %v19493_v19  ;;  %v1520_v23 = vmul.f32 %v1504_v3, %v19493_v19  ;;  %19495 = vst [vmem:[#allocation56_spill] sm:$0xff] %v15350_v58  ;;  %v19498_v58 = vld [vmem:[#allocation33_spill] sm:$0xff] }
 0x1ee   :  { %v1509_v61 = vmul.f32 %v1492_v24, %v19492_v30  ;;  %v1510_v43 = vmul.f32 %v1496_v45, %v19492_v30  ;;  %v1513_v10 = vmul.f32 %v1476_v28, %v19493_v19  ;;  %v1514_v54 = vmul.f32 %v1480_v27, %v19493_v19 }
 0x1ef   :  { %v1517_v55 = vmul.f32 %v1492_v24, %v19493_v19  ;;  %v1518_v29 = vmul.f32 %v1496_v45, %v19493_v19  ;;  %v1563_v17 = vsel %vm19221_vm14, %v19497_v18, %v19496_v12  ;;  %v1532_v3 = vadd.f32 %v1516_v33, %v1430_v47  ;;  %v15370_v27 = vpop.permute.xlu1 %1948 }
 0x1f0   :  { %v1560_v56 = vsel %vm19221_vm14, %v19498_v58, %v14695_v36  ;;  %v1564_v28 = vsel %vm19221_vm14, %v14765_v8, %v19497_v18  ;;  %19499 = vst [vmem:[#allocation60_spill] sm:$0xff] %v15370_v27  ;;  %v1528_v24 = vadd.f32 %v1512_v48, %v1426_v5  ;;  %v1531_v45 = vadd.f32 %v1515_v15, %v1429_v39  ;;  %v15373_v30 = vpop.permute.xlu0 %1950 }
 0x1f1   :  { %19500 = vst [vmem:[#allocation59_spill] sm:$0xff] %v15373_v30  ;;  %v1536_v19 = vadd.f32 %v1520_v23, %v1434_v13  ;;  %v1524_v47 = vadd.f32 %v1508_v14, %v15270_v52  ;;  %v1527_v33 = vadd.f32 %v1511_v50, %v1425_v40  ;;  %v1535_v22 = vadd.f32 %v1519_v60, %v1433_v21 }
 0x1f2   :  { %v1578_v46 = vrot.slane %v1563_v17, %v13128_v4  ;;  %v1561_v18 = vsel %vm19221_vm14, %v19501_v41, %v19498_v58  ;;  %v1523_v27 = vadd.f32 %v1507_v32, %v15267_v9  ;;  %v1530_v5 = vadd.f32 %v1514_v54, %v1428_v11 }
 0x1f3   :  { %v1562_v39 = vsel %vm19221_vm14, %v19496_v12, %v19501_v41  ;;  %v1590_v13 = vrot.slane %v1560_v56, %v13128_v4  ;;  %v1557_v52 = vsel %vm19221_vm14, %v14749_v51, %v14765_v8  ;;  %v1606_v40 = vrot.slane %v1564_v28, %v13128_v4  ;;  %v15392_v21 = vpop.permute.xlu1 %1952  ;;  %v19503_v12 = vld [vmem:[#allocation35_spill] sm:$0xff]  ;;  %v19504_v56 = vld [vmem:[#allocation36_spill] sm:$0xff] }
 0x1f4   :  { %19502 = vst [vmem:[#allocation57_spill] sm:$0xff] %v15392_v21  ;;  %v1525_v48 = vadd.f32 %v1509_v61, %v1423_v63  ;;  %v1526_v15 = vadd.f32 %v1510_v43, %v1424_v25  ;;  %v15394_v9 = vadd.f32 %v1517_v55, %v1431_v38  ;;  %v15396_v11 = vadd.f32 %v1518_v29, %v1432_v59  ;;  %v15408_v63 = vpop.permute.xlu0 %1954  ;;  %v19506_v59 = vld [vmem:[#allocation40_spill] sm:$0xff] }
 0x1f5   :  { %v1586_v32 = vrot.slane %v1561_v18, %v13128_v4  ;;  %v1559_v41 = vsel %vm19221_vm14, %v14695_v36, %v19503_v12  ;;  %v1558_v8 = vsel %vm19221_vm14, %v19503_v12, %v14749_v51  ;;  %v1610_v14 = vmul.f32 %v1590_v13, %v19504_v56  ;;  %19505 = vst [vmem:[#allocation58_spill] sm:$0xff] %v15408_v63 }
 0x1f6   :  { %v1582_v25 = vrot.slane %v1562_v39, %v13128_v4  ;;  %v1602_v38 = vrot.slane %v1557_v52, %v13128_v4  ;;  %v1618_v50 = vmul.f32 %v1590_v13, %v19506_v59  ;;  %v1529_v60 = vadd.f32 %v1513_v10, %v15276_v34  ;;  %v19511_v52 = vld [vmem:[#allocation43_spill] sm:$0xff] }
 0x1f7   :  { %v1617_v23 = vmul.f32 %v1586_v32, %v19506_v59  ;;  %v1614_v36 = vmul.f32 %v1606_v40, %v19504_v56  ;;  %v1522_v58 = vadd.f32 %v1506_v31, %v15264_v26  ;;  %v1521_v51 = vadd.f32 %v1505_v7, %v15254_v35  ;;  %v15422_v29 = vpop.permute.xlu1 %1956  ;;  %v19509_v35 = vld [vmem:[#allocation39_spill] sm:$0xff]  ;;  %v19510_v7 = vld [vmem:[#allocation45_spill] sm:$0xff] }
 0x1f8   :  { %v1594_v61 = vrot.slane %v1559_v41, %v13128_v4  ;;  %v1598_v43 = vrot.slane %v1558_v8, %v13128_v4  ;;  %v1607_v54 = vmul.f32 %v1578_v46, %v19504_v56  ;;  %v1608_v55 = vmul.f32 %v1582_v25, %v19504_v56  ;;  %19507 = vst [vmem:[#allocation62_spill] sm:$0xff] %v15422_v29  ;;  %v15426_v17 = vpop.permute.xlu0 %1958  ;;  %v19513_v8 = vld [vmem:[#allocation44_spill] sm:$0xff] }
 0x1f9   :  { %v1609_v34 = vmul.f32 %v1586_v32, %v19504_v56  ;;  %v1615_v10 = vmul.f32 %v1578_v46, %v19506_v59  ;;  %19508 = vst [vmem:[#allocation64_spill] sm:$0xff] %v15426_v17  ;;  %v1622_v26 = vmul.f32 %v1606_v40, %v19506_v59  ;;  %v1626_v31 = vadd.f32 %v1610_v14, %v1524_v47  ;;  %v19512_v47 = vld [vmem:[#allocation37_spill] sm:$0xff] }
 0x1fa   :  { %v1666_v28 = vsel %vm19229_vm15, %v19510_v7, %v19509_v35  ;;  %v1634_v18 = vadd.f32 %v1618_v50, %v1532_v3  ;;  %v1613_v39 = vmul.f32 %v1602_v38, %v19504_v56  ;;  %v1621_v13 = vmul.f32 %v1602_v38, %v19506_v59  ;;  %v19514_v3 = vld [vmem:[#allocation42_spill] sm:$0xff] }
 0x1fb   :  { %v1659_v46 = vsel %vm19229_vm15, %v19511_v52, %v19510_v7  ;;  %v1630_v32 = vadd.f32 %v1614_v36, %v1528_v24  ;;  %v1633_v12 = vadd.f32 %v1617_v23, %v1531_v45  ;;  %v1616_v40 = vmul.f32 %v1582_v25, %v19506_v59  ;;  %v15449_v38 = vpop.permute.xlu1 %1960  ;;  %v19516_v45 = vld [vmem:[#allocation38_spill] sm:$0xff] }
 0x1fc   :  { %v1665_v41 = vsel %vm19229_vm15, %v19509_v35, %v19512_v47  ;;  %v1662_v14 = vsel %vm19229_vm15, %v19514_v3, %v19513_v8  ;;  %vm19230_vm14 = vcmp.lt.s32.totalorder %v13701_v6, 108  ;;  %19515 = vst [vmem:[#allocation71_spill] sm:$0xff] %v15449_v38  ;;  %v1611_v50 = vmul.f32 %v1594_v61, %v19504_v56  ;;  %v15458_v36 = vpop.permute.xlu0 %1962 }
 0x1fd   :  { %v1612_v24 = vmul.f32 %v1598_v43, %v19504_v56  ;;  %v1663_v25 = vsel %vm19229_vm15, %v19516_v45, %v19514_v3  ;;  %v1708_v23 = vrot.slane %v1666_v28, %v13128_v4  ;;  %v1638_v35 = vadd.f32 %v1622_v26, %v1536_v19 }
 0x1fe   :  { %v1625_v7 = vadd.f32 %v1609_v34, %v1523_v27  ;;  %v1704_v17 = vrot.slane %v1659_v46, %v13128_v4  ;;  %v1629_v21 = vadd.f32 %v1613_v39, %v1527_v33  ;;  %v1637_v63 = vadd.f32 %v1621_v13, %v1535_v22  ;;  %v19517_v33 = vld [vmem:[#allocation51_spill] sm:$0xff]  ;;  %v19519_v39 = vld [vmem:[#allocation50_spill] sm:$0xff] }
 0x1ff   :  { %v1619_v29 = vmul.f32 %v1594_v61, %v19506_v59  ;;  %v15463_v30 = vrot.slane %v1665_v41, %v13128_v4  ;;  %v1692_v56 = vrot.slane %v1662_v14, %v13128_v4  ;;  %v1632_v38 = vadd.f32 %v1616_v40, %v1530_v5 }
 0x200   :  { %v1620_v3 = vmul.f32 %v1598_v43, %v19506_v59  ;;  %v1688_v28 = vrot.slane %v1663_v25, %v13128_v4  ;;  %v15468_v57 = vpop.permute.xlu1 %1975  ;;  %v1627_v19 = vadd.f32 %v1611_v50, %v1525_v48  ;;  %v1628_v27 = vadd.f32 %v1612_v24, %v1526_v15  ;;  %v19518_v59 = vld [vmem:[#allocation46_spill] sm:$0xff] }
 0x201   :  { %v15470_v34 = vadd.f32 %v1615_v10, %v1529_v60  ;;  %v1664_v22 = vsel %vm19229_vm15, %v19512_v47, %v19516_v45  ;;  %v1660_v5 = vsel %vm19229_vm15, %v19517_v33, %v19511_v52  ;;  %v15480_v61 = vpop.permute.xlu0 %1980  ;;  %v1716_v43 = vmul.f32 %v1708_v23, %v19518_v59 }
 0x202   :  { %v1712_v26 = vmul.f32 %v1692_v56, %v19518_v59  ;;  %v1661_v48 = vsel %vm19229_vm15, %v19513_v8, %v19517_v33  ;;  %v1715_v15 = vmul.f32 %v1704_v17, %v19518_v59  ;;  %v1711_v60 = vmul.f32 %v1688_v28, %v19518_v59 }
 0x203   :  { %v1635_v10 = vadd.f32 %v1619_v29, %v15394_v9  ;;  %v1720_v13 = vmul.f32 %v1692_v56, %v19519_v39  ;;  %v1636_v52 = vadd.f32 %v1620_v3, %v15396_v11  ;;  %v1624_v46 = vadd.f32 %v1608_v55, %v1522_v58  ;;  %v19520_v58 = vld [vmem:[#allocation49_spill] sm:$0xff] }
 0x204   :  { %v1623_v40 = vadd.f32 %v1607_v54, %v1521_v51  ;;  %v1684_v47 = vrot.slane %v1664_v22, %v13128_v4  ;;  %v1700_v41 = vrot.slane %v1660_v5, %v13128_v4  ;;  %v15495_v14 = vpop.permute.xlu1 %2050  ;;  %v1724_v8 = vmul.f32 %v1708_v23, %v19519_v39  ;;  %v19521_v23 = vld [vmem:[#allocation47_spill] sm:$0xff] }
 0x205   :  { %v1719_v50 = vmul.f32 %v1688_v28, %v19519_v39  ;;  %v1696_v24 = vrot.slane %v1661_v48, %v13128_v4  ;;  %v15500_v45 = vpop.permute.xlu0 %2052  ;;  %v1732_v9 = vadd.f32 %v1716_v43, %v1630_v32  ;;  %v1728_v29 = vadd.f32 %v1712_v26, %v1626_v31 }
 0x206   :  { %v1723_v11 = vmul.f32 %v1704_v17, %v19519_v39  ;;  %v1768_v51 = vsel %vm19230_vm14, %v15139_v1, %v19520_v58  ;;  %v1731_v54 = vadd.f32 %v1715_v15, %v1629_v21  ;;  %v15507_v55 = vadd.f32 %v1711_v60, %v1625_v7 }
 0x207   :  { %v1718_v25 = vmul.f32 %v1684_v47, %v19519_v39  ;;  %v1767_v56 = vsel %vm19230_vm14, %v19520_v58, %v19521_v23  ;;  %v1761_v17 = vsel %vm19230_vm14, %v15131_v20, %v15139_v1  ;;  %v1736_v31 = vadd.f32 %v1720_v13, %v1634_v18 }
 0x208   :  { %v1713_v32 = vmul.f32 %v1696_v24, %v19518_v59  ;;  %v1764_v21 = vsel %vm19230_vm14, %v15090_v49, %v15106_v16  ;;  %vm19232_vm15 = vcmp.lt.s32.totalorder %v13701_v6, 107  ;;  %v15524_v7 = vpop.permute.xlu1 %2054  ;;  %v1740_v3 = vadd.f32 %v1724_v8, %v1638_v35 }
 0x209   :  { %v1735_v28 = vadd.f32 %v1719_v50, %v1633_v12  ;;  %v1714_v22 = vmul.f32 %v1700_v41, %v19518_v59  ;;  %v1810_v33 = vrot.slane %v1768_v51, %v13128_v4  ;;  %v15528_v5 = vpop.permute.xlu0 %2056  ;;  %v1739_v1 = vadd.f32 %v1723_v11, %v1637_v63 }
 0x20a   :  { %v1721_v18 = vmul.f32 %v1696_v24, %v19519_v39  ;;  %v1722_v43 = vmul.f32 %v1700_v41, %v19519_v39  ;;  %v15533_v26 = vrot.slane %v1767_v56, %v13128_v4  ;;  %v1806_v48 = vrot.slane %v1761_v17, %v13128_v4 }
 0x20b   :  { %v1734_v15 = vadd.f32 %v1718_v25, %v1632_v38  ;;  %v1717_v12 = vmul.f32 %v15463_v30, %v19519_v39  ;;  %v1765_v35 = vsel %vm19230_vm14, %v15084_v0, %v15090_v49  ;;  %v1794_v63 = vrot.slane %v1764_v21, %v13128_v4 }
 0x20c   :  { %v1729_v60 = vadd.f32 %v1713_v32, %v1627_v19  ;;  %v1710_v13 = vmul.f32 %v1684_v47, %v19518_v59  ;;  %v1766_v41 = vsel %vm19230_vm14, %v19521_v23, %v15084_v0  ;;  %v1762_v38 = vsel %vm19230_vm14, %v15115_v53, %v15131_v20  ;;  %v15552_v39 = vpop.permute.xlu1 %2058 }
 0x20d   :  { %v1730_v8 = vadd.f32 %v1714_v22, %v1628_v27  ;;  %v1709_v49 = vmul.f32 %v15463_v30, %v19518_v59  ;;  %v15556_v50 = vpop.permute.xlu0 %2060  ;;  %v1818_v19 = vmul.f32 %v1810_v33, %v15170_v44  ;;  %v1814_v47 = vmul.f32 %v1794_v63, %v15170_v44 }
 0x20e   :  { %v1737_v24 = vadd.f32 %v1721_v18, %v1635_v10  ;;  %v1738_v11 = vadd.f32 %v1722_v43, %v1636_v52  ;;  %v1790_v0 = vrot.slane %v1765_v35, %v13128_v4  ;;  %v1763_v20 = vsel %vm19230_vm14, %v15106_v16, %v15115_v53  ;;  %v19522_v43 = vld [vmem:[#allocation53_spill] sm:$0xff]  ;;  %v19524_v35 = vld [vmem:[#allocation52_spill] sm:$0xff] }
 0x20f   :  { %v1822_v27 = vmul.f32 %v1794_v63, %v15186_v2  ;;  %v1817_v58 = vmul.f32 %v1806_v48, %v15170_v44  ;;  %v1786_v30 = vrot.slane %v1766_v41, %v13128_v4  ;;  %v1802_v59 = vrot.slane %v1762_v38, %v13128_v4  ;;  %v19525_v41 = vld [vmem:[#allocation48_spill] sm:$0xff] }
 0x210   :  { %v1733_v51 = vadd.f32 %v1717_v12, %v15470_v34  ;;  %v1726_v25 = vadd.f32 %v1710_v13, %v1624_v46  ;;  %v15570_v10 = vpop.permute.xlu1 %2062  ;;  %v1826_v52 = vmul.f32 %v1810_v33, %v15186_v2  ;;  %v1821_v23 = vmul.f32 %v1790_v0, %v15186_v2  ;;  %v19523_v12 = vld [vmem:[#allocation54_spill] sm:$0xff] }
 0x211   :  { %v1813_v56 = vmul.f32 %v1790_v0, %v15170_v44  ;;  %v1725_v16 = vadd.f32 %v1709_v49, %v1623_v40  ;;  %v1798_v53 = vrot.slane %v1763_v20, %v13128_v4  ;;  %v15576_v17 = vpop.permute.xlu0 %2064  ;;  %v1834_v32 = vadd.f32 %v1818_v19, %v1732_v9 }
 0x212   :  { %v1830_v21 = vadd.f32 %v1814_v47, %v1728_v29  ;;  %v1825_v22 = vmul.f32 %v1806_v48, %v15186_v2  ;;  %v1870_v34 = vsel %vm19232_vm15, %v15324_v37, %v15217_v62  ;;  %v1838_v46 = vadd.f32 %v1822_v27, %v1736_v31 }
 0x213   :  { %v1833_v33 = vadd.f32 %v1817_v58, %v1731_v54  ;;  %v1820_v18 = vmul.f32 %v1786_v30, %v15186_v2  ;;  %v1869_v40 = vsel %vm19232_vm15, %v15217_v62, %v15224_v42  ;;  %v1863_v9 = vsel %vm19232_vm15, %v19522_v43, %v15324_v37 }
 0x214   :  { %v1815_v29 = vmul.f32 %v1798_v53, %v15170_v44  ;;  %v1816_v48 = vmul.f32 %v1802_v59, %v15170_v44  ;;  %v1866_v54 = vsel %vm19232_vm15, %v19524_v35, %v19523_v12  ;;  %v1842_v63 = vadd.f32 %v1826_v52, %v1740_v3 }
 0x215   :  { %v15598_v31 = vpop.permute.xlu1 %2077  ;;  %v1837_v13 = vadd.f32 %v1821_v23, %v1735_v28  ;;  %v1829_v62 = vadd.f32 %v1813_v56, %v15507_v55  ;;  %v1867_v37 = vsel %vm19232_vm15, %v19525_v41, %v19524_v35  ;;  %v1912_v38 = vrot.slane %v1870_v34, %v13128_v4 }
 0x216   :  { %vm19235_vm14 = vcmp.lt.s32.totalorder %v13701_v6, 106  ;;  %v15607_v49 = vpop.permute.xlu0 %2082  ;;  %v1841_v19 = vadd.f32 %v1825_v22, %v1739_v1  ;;  %v1823_v47 = vmul.f32 %v1798_v53, %v15186_v2  ;;  %v15611_v0 = vrot.slane %v1869_v40, %v13128_v4 }
 0x217   :  { %v1908_v3 = vrot.slane %v1863_v9, %v13128_v4  ;;  %v1824_v55 = vmul.f32 %v1802_v59, %v15186_v2  ;;  %v1819_v28 = vmul.f32 %v15533_v26, %v15186_v2  ;;  %v1896_v20 = vrot.slane %v1866_v54, %v13128_v4  ;;  %v19526_v2 = vld [vmem:[#allocation61_spill] sm:$0xff] }
 0x218   :  { %v1836_v27 = vadd.f32 %v1820_v18, %v1734_v15  ;;  %v1831_v58 = vadd.f32 %v1815_v29, %v1729_v60  ;;  %v1832_v52 = vadd.f32 %v1816_v48, %v1730_v8  ;;  %v1868_v1 = vsel %vm19232_vm15, %v15224_v42, %v19525_v41  ;;  %v19528_v8 = vld [vmem:[#allocation55_spill] sm:$0xff] }
 0x219   :  { %v1892_v23 = vrot.slane %v1867_v37, %v13128_v4  ;;  %v15623_v56 = vpop.permute.xlu1 %2152  ;;  %v1812_v53 = vmul.f32 %v1786_v30, %v15170_v44  ;;  %v1811_v59 = vmul.f32 %v15533_v26, %v15170_v44  ;;  %v1865_v15 = vsel %vm19232_vm15, %v19523_v12, %v19526_v2  ;;  %v19529_v30 = vld [vmem:[#allocation56_spill] sm:$0xff] }
 0x21a   :  { %v1864_v60 = vsel %vm19232_vm15, %v19526_v2, %v19522_v43  ;;  %v15636_v42 = vpop.permute.xlu0 %2154  ;;  %v1920_v22 = vmul.f32 %v1912_v38, %v19528_v8  ;;  %v1916_v34 = vmul.f32 %v1896_v20, %v19528_v8  ;;  %v1924_v18 = vmul.f32 %v1896_v20, %v19529_v30 }
 0x21b   :  { %19527 = vst [vmem:[#allocation63_spill] sm:$0xff] %v15636_v42  ;;  %v1919_v44 = vmul.f32 %v1908_v3, %v19528_v8  ;;  %v1915_v26 = vmul.f32 %v1892_v23, %v19528_v8  ;;  %v1839_v40 = vadd.f32 %v1823_v47, %v1737_v24  ;;  %v1888_v9 = vrot.slane %v1868_v1, %v13128_v4  ;;  %v19531_v1 = vld [vmem:[#allocation60_spill] sm:$0xff] }
 0x21c   :  { %v1928_v29 = vmul.f32 %v1912_v38, %v19529_v30  ;;  %v1840_v48 = vadd.f32 %v1824_v55, %v1738_v11  ;;  %v1835_v12 = vadd.f32 %v1819_v28, %v1733_v51  ;;  %v1900_v43 = vrot.slane %v1865_v15, %v13128_v4  ;;  %v19532_v28 = vld [vmem:[#allocation71_spill] sm:$0xff] }
 0x21d   :  { %v1904_v35 = vrot.slane %v1864_v60, %v13128_v4  ;;  %v15647_v54 = vpop.permute.xlu1 %2156  ;;  %v1828_v41 = vadd.f32 %v1812_v53, %v1726_v25  ;;  %v1827_v37 = vadd.f32 %v1811_v59, %v1725_v16  ;;  %v1936_v2 = vadd.f32 %v1920_v22, %v1834_v32  ;;  %v19534_v53 = vld [vmem:[#allocation62_spill] sm:$0xff] }
 0x21e   :  { %19530 = vst [vmem:[#allocation65_spill] sm:$0xff] %v15647_v54  ;;  %v15649_v20 = vpop.permute.xlu0 %2158  ;;  %v1923_v42 = vmul.f32 %v1892_v23, %v19529_v30  ;;  %v1932_v24 = vadd.f32 %v1916_v34, %v1830_v21  ;;  %v1927_v47 = vmul.f32 %v1908_v3, %v19529_v30  ;;  %v1972_v11 = vsel %vm19235_vm14, %v15458_v36, %v19531_v1  ;;  %v19533_v23 = vld [vmem:[#allocation59_spill] sm:$0xff]  ;;  %v19535_v59 = vld [vmem:[#allocation58_spill] sm:$0xff] }
 0x21f   :  { %v1940_v51 = vadd.f32 %v1924_v18, %v1838_v46  ;;  %v1935_v38 = vadd.f32 %v1919_v44, %v1833_v33  ;;  %v1931_v55 = vadd.f32 %v1915_v26, %v1829_v62  ;;  %v1965_v25 = vsel %vm19235_vm14, %v19532_v28, %v15458_v36 }
 0x220   :  { %v1944_v16 = vadd.f32 %v1928_v29, %v1842_v63  ;;  %v1922_v32 = vmul.f32 %v1888_v9, %v19529_v30  ;;  %v1917_v21 = vmul.f32 %v1900_v43, %v19528_v8  ;;  %v1971_v3 = vsel %vm19235_vm14, %v19531_v1, %v19533_v23  ;;  %v19536_v63 = vld [vmem:[#allocation57_spill] sm:$0xff] }
 0x221   :  { %v1968_v46 = vsel %vm19235_vm14, %v19535_v59, %v19534_v53  ;;  %v15671_v33 = vpop.permute.xlu1 %2160  ;;  %v1918_v62 = vmul.f32 %v1904_v35, %v19528_v8  ;;  %v1925_v36 = vmul.f32 %v1900_v43, %v19529_v30  ;;  %v1969_v15 = vsel %vm19235_vm14, %v19536_v63, %v19535_v59 }
 0x222   :  { %v2014_v60 = vrot.slane %v1972_v11, %v13128_v4  ;;  %vm19236_vm15 = vcmp.lt.s32.totalorder %v13701_v6, 90  ;;  %v15681_v22 = vpop.permute.xlu0 %2162  ;;  %v1939_v34 = vadd.f32 %v1923_v42, %v1837_v13  ;;  %v1943_v18 = vadd.f32 %v1927_v47, %v1841_v19 }
 0x223   :  { %19537 = vst [vmem:[#allocation66_spill] sm:$0xff] %v15681_v22  ;;  %v2010_v44 = vrot.slane %v1965_v25, %v13128_v4  ;;  %v1926_v26 = vmul.f32 %v1904_v35, %v19529_v30  ;;  %v1921_v29 = vmul.f32 %v15611_v0, %v19529_v30  ;;  %v1914_v43 = vmul.f32 %v1888_v9, %v19528_v8  ;;  %v19538_v9 = vld [vmem:[#allocation64_spill] sm:$0xff] }
 0x224   :  { %v15689_v1 = vrot.slane %v1971_v3, %v13128_v4  ;;  %v1998_v11 = vrot.slane %v1968_v46, %v13128_v4  ;;  %v1938_v59 = vadd.f32 %v1922_v32, %v1836_v27  ;;  %v1933_v54 = vadd.f32 %v1917_v21, %v1831_v58 }
 0x225   :  { %v1994_v22 = vrot.slane %v1969_v15, %v13128_v4  ;;  %v15693_v13 = vpop.permute.xlu1 %2164  ;;  %v1934_v19 = vadd.f32 %v1918_v62, %v1832_v52  ;;  %v15695_v42 = vadd.f32 %v1925_v36, %v1839_v40  ;;  %v1913_v35 = vmul.f32 %v15611_v0, %v19528_v8 }
 0x226   :  { %v1970_v30 = vsel %vm19235_vm14, %v19533_v23, %v19536_v63  ;;  %v1966_v27 = vsel %vm19235_vm14, %v19538_v9, %v19532_v28  ;;  %v15707_v58 = vpop.permute.xlu0 %2166  ;;  %v2022_v47 = vmul.f32 %v2014_v60, %v15468_v57  ;;  %v2018_v52 = vmul.f32 %v1998_v11, %v15468_v57 }
 0x227   :  { %v1967_v0 = vsel %vm19235_vm14, %v19534_v53, %v19538_v9  ;;  %v2026_v8 = vmul.f32 %v1998_v11, %v15480_v61  ;;  %v2021_v40 = vmul.f32 %v2010_v44, %v15468_v57  ;;  %v2017_v25 = vmul.f32 %v1994_v22, %v15468_v57 }
 0x228   :  { %v2030_v32 = vmul.f32 %v2014_v60, %v15480_v61  ;;  %v1942_v28 = vadd.f32 %v1926_v26, %v1840_v48  ;;  %v1937_v21 = vadd.f32 %v1921_v29, %v1835_v12  ;;  %v1930_v23 = vadd.f32 %v1914_v43, %v1828_v41 }
 0x229   :  { %v1990_v3 = vrot.slane %v1970_v30, %v13128_v4  ;;  %v2006_v46 = vrot.slane %v1966_v27, %v13128_v4  ;;  %v15721_v62 = vpop.permute.xlu1 %2179  ;;  %v2025_v36 = vmul.f32 %v1994_v22, %v15480_v61  ;;  %v1929_v53 = vadd.f32 %v1913_v35, %v1827_v37 }
 0x22a   :  { %v2002_v63 = vrot.slane %v1967_v0, %v13128_v4  ;;  %v15725_v15 = vpop.permute.xlu0 %2184  ;;  %v2038_v11 = vadd.f32 %v2022_v47, %v1936_v2  ;;  %v2034_v9 = vadd.f32 %v2018_v52, %v1932_v24  ;;  %v2029_v60 = vmul.f32 %v2010_v44, %v15480_v61 }
 0x22b   :  { %v2074_v48 = vsel %vm19236_vm15, %v15576_v17, %v15495_v14  ;;  %v2042_v12 = vadd.f32 %v2026_v8, %v1940_v51  ;;  %v2037_v41 = vadd.f32 %v2021_v40, %v1935_v38  ;;  %v2033_v26 = vadd.f32 %v2017_v25, %v1931_v55 }
 0x22c   :  { %v2067_v37 = vsel %vm19236_vm15, %v15570_v10, %v15576_v17  ;;  %v2046_v22 = vadd.f32 %v2030_v32, %v1944_v16  ;;  %v2024_v29 = vmul.f32 %v1990_v3, %v15480_v61  ;;  %v2019_v2 = vmul.f32 %v2002_v63, %v15468_v57 }
 0x22d   :  { %v2073_v24 = vsel %vm19236_vm15, %v15495_v14, %v15500_v45  ;;  %v2070_v51 = vsel %vm19236_vm15, %v15528_v5, %v15552_v39  ;;  %v15746_v38 = vpop.permute.xlu1 %2254  ;;  %v2041_v55 = vadd.f32 %v2025_v36, %v1939_v34  ;;  %v2020_v17 = vmul.f32 %v2006_v46, %v15468_v57 }
 0x22e   :  { %v2071_v16 = vsel %vm19236_vm15, %v15524_v7, %v15528_v5  ;;  %v2116_v44 = vrot.slane %v2074_v48, %v13128_v4  ;;  %vm19239_vm14 = vcmp.lt.s32.totalorder %v13701_v6, 89  ;;  %v15755_v14 = vpop.permute.xlu0 %2256  ;;  %v2045_v43 = vadd.f32 %v2029_v60, %v1943_v18 }
 0x22f   :  { %v2027_v35 = vmul.f32 %v2002_v63, %v15480_v61  ;;  %v2112_v30 = vrot.slane %v2067_v37, %v13128_v4  ;;  %v2028_v34 = vmul.f32 %v2006_v46, %v15480_v61  ;;  %v2023_v27 = vmul.f32 %v15689_v1, %v15480_v61 }
 0x230   :  { %v2016_v47 = vmul.f32 %v1990_v3, %v15468_v57  ;;  %v15764_v5 = vrot.slane %v2073_v24, %v13128_v4  ;;  %v2100_v52 = vrot.slane %v2070_v51, %v13128_v4  ;;  %v2040_v0 = vadd.f32 %v2024_v29, %v1938_v59 }
 0x231   :  { %v2035_v8 = vadd.f32 %v2019_v2, %v1933_v54  ;;  %v2096_v18 = vrot.slane %v2071_v16, %v13128_v4  ;;  %v2068_v40 = vsel %vm19236_vm15, %v15556_v50, %v15570_v10  ;;  %v15772_v25 = vpop.permute.xlu1 %2258  ;;  %v2036_v32 = vadd.f32 %v2020_v17, %v1934_v19 }
 0x232   :  { %v2015_v61 = vmul.f32 %v15689_v1, %v15468_v57  ;;  %v2072_v3 = vsel %vm19236_vm15, %v15500_v45, %v15524_v7  ;;  %v2069_v54 = vsel %vm19236_vm15, %v15552_v39, %v15556_v50  ;;  %v15784_v59 = vpop.permute.xlu0 %2260  ;;  %v2124_v10 = vmul.f32 %v2116_v44, %v15598_v31 }
 0x233   :  { %v2120_v46 = vmul.f32 %v2100_v52, %v15598_v31  ;;  %v2128_v19 = vmul.f32 %v2100_v52, %v15607_v49  ;;  %v2123_v57 = vmul.f32 %v2112_v30, %v15598_v31  ;;  %v2119_v1 = vmul.f32 %v2096_v18, %v15598_v31 }
 0x234   :  { %v2043_v36 = vadd.f32 %v2027_v35, %v15695_v42  ;;  %v2108_v45 = vrot.slane %v2068_v40, %v13128_v4  ;;  %v2044_v7 = vadd.f32 %v2028_v34, %v1942_v28  ;;  %v2039_v63 = vadd.f32 %v2023_v27, %v1937_v21  ;;  %v19539_v35 = vld [vmem:[#allocation63_spill] sm:$0xff] }
 0x235   :  { %v2032_v60 = vadd.f32 %v2016_v47, %v1930_v23  ;;  %v2092_v39 = vrot.slane %v2072_v3, %v13128_v4  ;;  %v2104_v50 = vrot.slane %v2069_v54, %v13128_v4  ;;  %v15795_v48 = vpop.permute.xlu1 %2262  ;;  %v2132_v37 = vmul.f32 %v2116_v44, %v15607_v49 }
 0x236   :  { %v2031_v29 = vadd.f32 %v2015_v61, %v1929_v53  ;;  %v15798_v2 = vpop.permute.xlu0 %2286  ;;  %v15800_v24 = vadd.f32 %v2124_v10, %v2038_v11  ;;  %v2127_v42 = vmul.f32 %v2096_v18, %v15607_v49  ;;  %v2136_v51 = vadd.f32 %v2120_v46, %v2034_v9 }
 0x237   :  { %v2131_v28 = vmul.f32 %v2112_v30, %v15607_v49  ;;  %vm19243_vm15 = vcmp.lt.s32.totalorder %v13701_v6, 88  ;;  %vm19242_vm13 = vcmp.lt.s32.totalorder %v13701_v6, 87  ;;  %v2144_v21 = vadd.f32 %v2128_v19, %v2042_v12 }
 0x238   :  { %v2139_v23 = vadd.f32 %v2123_v57, %v2037_v41  ;;  %v2135_v17 = vadd.f32 %v2119_v1, %v2033_v26  ;;  %v2126_v16 = vmul.f32 %v2092_v39, %v15607_v49  ;;  %v2169_v53 = vsel %vm19239_vm14, %v15693_v13, %v15707_v58  ;;  %v19541_v1 = vld [vmem:[#allocation66_spill] sm:$0xff] }
 0x239   :  { %v2176_v11 = vsel %vm19239_vm14, %v15707_v58, %v15623_v56  ;;  %v2121_v9 = vmul.f32 %v2104_v50, %v15598_v31  ;;  %v2122_v44 = vmul.f32 %v2108_v45, %v15598_v31  ;;  %v2175_v12 = vsel %vm19239_vm14, %v15623_v56, %v19539_v35  ;;  %v15821_v41 = vpop.permute.xlu1 %2281  ;;  %v19540_v56 = vld [vmem:[#allocation65_spill] sm:$0xff] }
 0x23a   :  { %v2148_v26 = vadd.f32 %v2132_v37, %v2046_v22  ;;  %v2129_v30 = vmul.f32 %v2104_v50, %v15607_v49  ;;  %v2130_v34 = vmul.f32 %v2108_v45, %v15607_v49  ;;  %v2172_v58 = vsel %vm19239_vm14, %v15649_v20, %v15671_v33  ;;  %v15829_v27 = vpop.permute.xlu0 %2388 }
 0x23b   :  { %v2143_v47 = vadd.f32 %v2127_v42, %v2041_v55  ;;  %v2147_v52 = vadd.f32 %v2131_v28, %v2045_v43  ;;  %v2125_v18 = vmul.f32 %v15764_v5, %v15607_v49  ;;  %v2173_v22 = vsel %vm19239_vm14, %v19540_v56, %v15649_v20 }
 0x23c   :  { %v2214_v40 = vrot.slane %v2169_v53, %v13128_v4  ;;  %v2218_v61 = vrot.slane %v2176_v11, %v13128_v4  ;;  %v2118_v3 = vmul.f32 %v2092_v39, %v15598_v31  ;;  %v15841_v54 = vrot.slane %v2175_v12, %v13128_v4 }
 0x23d   :  { %v15843_v10 = vadd.f32 %v2126_v16, %v2040_v0  ;;  %v15845_v55 = vadd.f32 %v2121_v9, %v2035_v8  ;;  %v15847_v43 = vadd.f32 %v2122_v44, %v2036_v32  ;;  %v2202_v49 = vrot.slane %v2172_v58, %v13128_v4  ;;  %v2363_v46 = vpop.permute.xlu1 %2362 }
 0x23e   :  { %v15850_v19 = vadd.f32 %v2129_v30, %v2043_v36  ;;  %v15852_v20 = vadd.f32 %v2130_v34, %v2044_v7  ;;  %v2117_v57 = vmul.f32 %v15764_v5, %v15598_v31  ;;  %v2174_v0 = vsel %vm19239_vm14, %v19539_v35, %v19540_v56  ;;  %v15865_v45 = vpop.permute.xlu0 %2364 }
 0x23f   :  { %v2198_v8 = vrot.slane %v2173_v22, %v13128_v4  ;;  %v2171_v32 = vsel %vm19239_vm14, %v15671_v33, %v19541_v1  ;;  %v2141_v36 = vadd.f32 %v2125_v18, %v2039_v63  ;;  %v2170_v31 = vsel %vm19239_vm14, %v19541_v1, %v15693_v13 }
 0x240   :  { %vm19241_vm12 = vcmp.lt.s32.totalorder %v13701_v6, 86  ;;  %v2226_v5 = vmul.f32 %v2218_v61, %v15721_v62  ;;  %v2222_v7 = vmul.f32 %v2202_v49, %v15721_v62  ;;  %v2225_v39 = vmul.f32 %v2214_v40, %v15721_v62 }
 0x241   :  { %v2274_v33 = vsel %vm19243_vm15, %v15784_v59, %v15795_v48  ;;  %v2230_v63 = vmul.f32 %v2202_v49, %v15725_v15  ;;  %v2234_v50 = vmul.f32 %v2218_v61, %v15725_v15  ;;  %v2221_v37 = vmul.f32 %v2198_v8, %v15721_v62  ;;  %v15883_v42 = vpop.permute.xlu1 %2383 }
 0x242   :  { %v2194_v13 = vrot.slane %v2174_v0, %v13128_v4  ;;  %v2229_v28 = vmul.f32 %v2198_v8, %v15725_v15  ;;  %v2134_v16 = vadd.f32 %v2118_v3, %v2032_v60  ;;  %v15886_v53 = vadd.f32 %v2117_v57, %v2031_v29  ;;  %v15893_v35 = vpop.permute.xlu0 %2490 }
 0x243   :  { %v2206_v11 = vrot.slane %v2171_v32, %v13128_v4  ;;  %v2210_v9 = vrot.slane %v2170_v31, %v13128_v4  ;;  %v2376_v44 = vsel %vm19242_vm13, %v2363_v46, %v15865_v45  ;;  %v2233_v12 = vmul.f32 %v2214_v40, %v15725_v15 }
 0x244   :  { %v2275_v30 = vsel %vm19243_vm15, %v15772_v25, %v15784_v59  ;;  %v2304_v60 = vrot.slane %v2274_v33, %v13128_v4  ;;  %v15902_v29 = vadd.f32 %v2226_v5, %v15800_v24  ;;  %v2238_v34 = vadd.f32 %v2222_v7, %v2136_v51 }
 0x245   :  { %v2246_v58 = vadd.f32 %v2230_v63, %v2144_v21  ;;  %v15904_v18 = vadd.f32 %v2234_v50, %v2148_v26  ;;  %v15906_v56 = vadd.f32 %v2225_v39, %v2139_v23  ;;  %v2237_v22 = vadd.f32 %v2221_v37, %v2135_v17  ;;  %v2361_v59 = vpop.permute.xlu1 %2360 }
 0x246   :  { %v2276_v40 = vsel %vm19243_vm15, %v15755_v14, %v15772_v25  ;;  %v2406_v61 = vrot.slane %v2376_v44, %v13128_v4  ;;  %v2245_v3 = vadd.f32 %v2229_v28, %v2143_v47  ;;  %v2228_v49 = vmul.f32 %v2194_v13, %v15725_v15  ;;  %v2465_v23 = vpop.permute.xlu0 %2464 }
 0x247   :  { %v2277_v24 = vsel %vm19243_vm15, %v15746_v38, %v15755_v14  ;;  %v2300_v51 = vrot.slane %v2275_v30, %v13128_v4  ;;  %v2377_v21 = vsel %vm19242_vm13, %v2361_v59, %v2363_v46  ;;  %v2227_v25 = vmul.f32 %v15841_v54, %v15725_v15 }
 0x248   :  { %v2332_v17 = vmul.f32 %v2304_v60, %v15798_v2  ;;  %v15924_v26 = vadd.f32 %v2233_v12, %v2147_v52  ;;  %v15927_v47 = vmul.f32 %v2206_v11, %v15721_v62  ;;  %v2220_v57 = vmul.f32 %v2194_v13, %v15721_v62 }
 0x249   :  { %v2296_v14 = vrot.slane %v2276_v40, %v13128_v4  ;;  %v2402_v0 = vrot.slane %v2377_v21, %v13128_v4  ;;  %vm2582_vm14 = vcmask 1046528   ;;  %v15933_v46 = vmul.f32 %v2210_v9, %v15721_v62  ;;  %v15940_v32 = vpop.permute.xlu1 %2466 }
 0x24a   :  { %v15936_v8 = vmul.f32 %v2206_v11, %v15725_v15  ;;  %v2292_v1 = vrot.slane %v2277_v24, %v13128_v4  ;;  %v2434_v52 = vmul.f32 %v2406_v61, %v15829_v27  ;;  %v2324_v31 = vmul.f32 %v2304_v60, %v15821_v41  ;;  %v15949_v39 = vpop.permute.xlu0 %2485 }
 0x24b   :  { %v15944_v5 = vmul.f32 %v2210_v9, %v15725_v15  ;;  %v2478_v7 = vsel %vm19241_vm12, %v2465_v23, %v15940_v32  ;;  %v2331_v33 = vmul.f32 %v2300_v51, %v15798_v2  ;;  %v2244_v63 = vadd.f32 %v2228_v49, %v15843_v10 }
 0x24c   :  { %v15953_v50 = vadd.f32 %v2227_v25, %v2141_v36  ;;  %v2508_v37 = vrot.slane %v2478_v7, %v13128_v4  ;;  %v2348_v13 = vadd.f32 %v2332_v17, %v2246_v58  ;;  %v2426_v28 = vmul.f32 %v2406_v61, %v15883_v42 }
 0x24d   :  { %v2236_v11 = vadd.f32 %v2220_v57, %v2134_v16  ;;  %v2433_v15 = vmul.f32 %v2402_v0, %v15829_v27  ;;  %v2323_v9 = vmul.f32 %v2300_v51, %v15821_v41  ;;  %v2330_v44 = vmul.f32 %v2296_v14, %v15798_v2  ;;  %v2359_v30 = vpop.permute.xlu1 %2358 }
 0x24e   :  { %v2219_v12 = vmul.f32 %v15841_v54, %v15721_v62  ;;  %v2450_v60 = vadd.f32 %v2434_v52, %v2348_v13  ;;  %v2536_v10 = vmul.f32 %v2508_v37, %v15893_v35  ;;  %v2340_v36 = vadd.f32 %v2324_v31, %v2238_v34  ;;  %v2463_v61 = vpop.permute.xlu0 %2462 }
 0x24f   :  { %v2528_v40 = vmul.f32 %v2508_v37, %v15949_v39  ;;  %v2425_v58 = vmul.f32 %v2402_v0, %v15883_v42  ;;  %v2378_v16 = vsel %vm19242_vm13, %v2359_v30, %v2361_v59  ;;  %v2347_v49 = vadd.f32 %v2331_v33, %v2245_v3 }
 0x250   :  { %v2322_v24 = vmul.f32 %v2296_v14, %v15821_v41  ;;  %v2398_v51 = vrot.slane %v2378_v16, %v13128_v4  ;;  %v2479_v62 = vsel %vm19241_vm12, %v2463_v61, %v2465_v23  ;;  %v15971_v54 = vadd.f32 %v2536_v10, %v2450_v60 }
 0x251   :  { %v2442_v21 = vadd.f32 %v2426_v28, %v2340_v36  ;;  %v2504_v34 = vrot.slane %v2479_v62, %v13128_v4  ;;  %v2449_v25 = vadd.f32 %v2433_v15, %v2347_v49  ;;  %v2339_v17 = vadd.f32 %v2323_v9, %v2237_v22  ;;  %v2357_v14 = vpop.permute.xlu1 %2356 }
 0x252   :  { %vm2575_vm11 = vcmask 121856   ;;  %v2235_v57 = vadd.f32 %v2219_v12, %v15886_v53  ;;  %v2424_v59 = vmul.f32 %v2398_v51, %v15883_v42  ;;  %v2432_v3 = vmul.f32 %v2398_v51, %v15829_v27  ;;  %v2461_v7 = vpop.permute.xlu0 %2460 }
 0x253   :  { %v2570_v0 = vmul.f32 %v15971_v54, %v15971_v54  ;;  %v15979_v52 = vadd.f32 %v2528_v40, %v2442_v21  ;;  %v2527_v23 = vmul.f32 %v2504_v34, %v15949_v39  ;;  %v2535_v31 = vmul.f32 %v2504_v34, %v15893_v35  ;;  %v16020_v21 = vld [vmem:[%s19068_s3] sm:$0xff] }
 0x254   :  { %v2379_v22 = vsel %vm19242_vm13, %v2357_v14, %v2359_v30  ;;  %v2441_v33 = vadd.f32 %v2425_v58, %v2339_v17  ;;  %v2480_v37 = vsel %vm19241_vm12, %v2461_v7, %v2463_v61  ;;  %v2346_v13 = vadd.f32 %v2330_v44, %v2244_v63 }
 0x255   :  { %v2394_v53 = vrot.slane %v2379_v22, %v13128_v4  ;;  %12587 = vmatprep.subr.msk.mxu1 %vm2582_vm14, %v2570_v0  ;;  %v2338_v28 = vadd.f32 %v2322_v24, %v2236_v11  ;;  %v2500_v15 = vrot.slane %v2480_v37, %v13128_v4  ;;  %v15990_v9 = vadd.f32 %v2535_v31, %v2449_v25  ;;  %v2269_v30 = vpop.permute.xlu1 %2268 }
 0x256   :  { %v15992_v12 = vadd.f32 %v2527_v23, %v2441_v33  ;;  %v2329_v60 = vmul.f32 %v2292_v1, %v15798_v2  ;;  %v2562_v10 = vmul.f32 %v15979_v52, %v15979_v52  ;;  %v2448_v36 = vadd.f32 %v2432_v3, %v2346_v13  ;;  %v16003_v44 = vpop.permute.xlu0 %2458 }
 0x257   :  { %v2440_v40 = vadd.f32 %v2424_v59, %v2338_v28  ;;  %v2321_v58 = vmul.f32 %v2292_v1, %v15821_v41  ;;  %v2431_v16 = vmul.f32 %v2394_v53, %v15829_v27  ;;  %v2526_v63 = vmul.f32 %v2500_v15, %v15949_v39  ;;  %v16051_v28 = vld [vmem:[%s19068_s3 + $0x8] sm:$0x7f] }
 0x258   :  { %v2278_v11 = vsel %vm19243_vm15, %v2269_v30, %v15746_v38  ;;  %v2569_v61 = vmul.f32 %v15990_v9, %v15990_v9  ;;  %v2423_v49 = vmul.f32 %v2394_v53, %v15883_v42  ;;  %v2481_v1 = vsel %vm19241_vm12, %v16003_v44, %v2461_v7 }
 0x259   :  { %v2320_v24 = vrot.slane %v2278_v11, %v13128_v4  ;;  %v2534_v51 = vmul.f32 %v2500_v15, %v15893_v35  ;;  %v2496_v62 = vrot.slane %v2481_v1, %v13128_v4  ;;  %v2561_v38 = vmul.f32 %v15992_v12, %v15992_v12  ;;  %v2267_v17 = vpop.permute.xlu1 %2266 }
 0x25a   :  { %12588 = vmatpush1.msk.msra.mxu1 %vm2582_vm14, %v2569_v61  ;;  %v2239_v34 = vadd.f32 %v15927_v47, %v15845_v55  ;;  %v2345_v25 = vadd.f32 %v2329_v60, %v15953_v50  ;;  %v16029_v3 = vadd.f32 %v15933_v46, %v15847_v43  ;;  %v16031_v0 = vadd.f32 %v2526_v63, %v2440_v40  ;;  %v2371_v47 = vpop.permute.xlu0 %2370 }
 0x25b   :  { %2714 = vmatprep.subr.mxu1 %v2562_v10  ;;  %v16025_v59 = vadd.f32 %v2534_v51, %v2448_v36  ;;  %v2337_v23 = vadd.f32 %v2321_v58, %v2235_v57  ;;  %v2525_v31 = vmul.f32 %v2496_v62, %v15949_v39  ;;  %v2533_v22 = vmul.f32 %v2496_v62, %v15893_v35 }
 0x25c   :  { %v2271_v55 = vsel %vm19243_vm15, %v2267_v17, %v2269_v30  ;;  %2715 = vmatpush1.msra.mxu1 %v2561_v38  ;;  %v2447_v50 = vadd.f32 %v2431_v16, %v2345_v25  ;;  %v2328_v7 = vmul.f32 %v2320_v24, %v15821_v41  ;;  %v2380_v43 = vsel %vm19242_vm13, %v2371_v47, %v2357_v14 }
 0x25d   :  { %v2316_v33 = vrot.slane %v2271_v55, %v13128_v4  ;;  %12589 = vmatmul.mubr.msk.f32.vlgmr.msra.gmra.mxu1 %vm2575_vm11, %v16020_v21  ;;  %v2439_v46 = vadd.f32 %v2423_v49, %v2337_v23  ;;  %v2336_v57 = vmul.f32 %v2320_v24, %v15798_v2  ;;  %v2422_v53 = vrot.slane %v2380_v43, %v13128_v4  ;;  %v2265_v60 = vpop.permute.xlu1 %2264 }
 0x25e   :  { %v2568_v37 = vmul.f32 %v16025_v59, %v16025_v59  ;;  %v19542_v13 = vmov 0.0   ;;  %v16053_v15 = vadd.f32 %v2533_v22, %v2447_v50  ;;  %v2247_v30 = vadd.f32 %v15936_v8, %v15850_v19  ;;  %v2369_v63 = vpop.permute.xlu0 %2368 }
 0x25f   :  { %2754 = vmatprep.mubr.f32.mxu1 %v19542_v13  ;;  %v2327_v14 = vmul.f32 %v2316_v33, %v15821_v41  ;;  %v2248_v10 = vadd.f32 %v15944_v5, %v15852_v20  ;;  %v2560_v36 = vmul.f32 %v16031_v0, %v16031_v0  ;;  %v2335_v40 = vmul.f32 %v2316_v33, %v15798_v2 }
 0x260   :  { %12583 = vmatprep.subr.msk.mxu0 %vm2582_vm14, %v2568_v37  ;;  %v2272_v58 = vsel %vm19243_vm15, %v2265_v60, %v2267_v17  ;;  %v2273_v16 = vsel %vm19243_vm15, %v15795_v48, %v2265_v60  ;;  %v16069_v11 = vadd.f32 %v2525_v31, %v2439_v46  ;;  %v2430_v19 = vmul.f32 %v2422_v53, %v15883_v42 }
 0x261   :  { %v2438_v20 = vmul.f32 %v2422_v53, %v15829_v27  ;;  %v2308_v8 = vrot.slane %v2273_v16, %v13128_v4  ;;  %v2312_v5 = vrot.slane %v2272_v58, %v13128_v4  ;;  %12590 = vmatmul.mubr.msk.f32.gmra.mxu1 %vm2575_vm11, %v16051_v28  ;;  %v2344_v61 = vadd.f32 %v2328_v7, %v15902_v29  ;;  %v2473_v25 = vpop.permute.xlu1 %2472 }
 0x262   :  { %v2352_v49 = vadd.f32 %v2336_v57, %v15904_v18  ;;  %v2373_v48 = vsel %vm19242_vm13, %v2369_v63, %v2371_v47  ;;  %v2567_v24 = vmul.f32 %v16053_v15, %v16053_v15  ;;  %2902 = vmatprep.mubr.f32.mxu1 %v19542_v13  ;;  %v2343_v1 = vadd.f32 %v2327_v14, %v15906_v56  ;;  %v2367_v23 = vpop.permute.xlu0 %2366 }
 0x263   :  { %v2325_v51 = vmul.f32 %v2308_v8, %v15821_v41  ;;  %v2326_v62 = vmul.f32 %v2312_v5, %v15821_v41  ;;  %v2333_v38 = vmul.f32 %v2308_v8, %v15798_v2  ;;  %v2334_v29 = vmul.f32 %v2312_v5, %v15798_v2 }
 0x264   :  { %v2418_v18 = vrot.slane %v2373_v48, %v13128_v4  ;;  %12584 = vmatpush1.msk.msra.mxu0 %vm2582_vm14, %v2567_v24  ;;  %v2482_v17 = vsel %vm19241_vm12, %v2473_v25, %v16003_v44  ;;  %v2559_v56 = vmul.f32 %v16069_v11, %v16069_v11  ;;  %v2351_v31 = vadd.f32 %v2335_v40, %v15924_v26 }
 0x265   :  { %v2454_v41 = vadd.f32 %v2438_v20, %v2352_v49  ;;  %v2341_v22 = vadd.f32 %v2325_v51, %v2239_v34  ;;  %2637 = vmatprep.subr.mxu0 %v2560_v36  ;;  %v2446_v55 = vadd.f32 %v2430_v19, %v2344_v61  ;;  %v2524_v50 = vrot.slane %v2482_v17, %v13128_v4  ;;  %v2471_v43 = vpop.permute.xlu1 %2470 }
 0x266   :  { %v2429_v2 = vmul.f32 %v2418_v18, %v15883_v42  ;;  %v2437_v47 = vmul.f32 %v2418_v18, %v15829_v27  ;;  %2638 = vmatpush1.msra.mxu0 %v2559_v56  ;;  %v2374_v44 = vsel %vm19242_vm13, %v2367_v23, %v2369_v63  ;;  %v2342_v7 = vadd.f32 %v2326_v62, %v16029_v3  ;;  %v2469_v14 = vpop.permute.xlu0 %2468 }
 0x267   :  { %v2349_v33 = vadd.f32 %v2333_v38, %v2247_v30  ;;  %v2375_v26 = vsel %vm19242_vm13, %v15865_v45, %v2367_v23  ;;  %v2414_v34 = vrot.slane %v2374_v44, %v13128_v4  ;;  %12585 = vmatmul.mubr.msk.f32.vlgmr.msra.gmra.mxu0 %vm2575_vm11, %v16020_v21  ;;  %v2350_v46 = vadd.f32 %v2334_v29, %v2248_v10 }
 0x268   :  { %v2445_v57 = vadd.f32 %v2429_v2, %v2343_v1  ;;  %v2453_v53 = vadd.f32 %v2437_v47, %v2351_v31  ;;  %v2540_v37 = vmul.f32 %v2524_v50, %v15893_v35  ;;  %2677 = vmatprep.mubr.f32.mxu0 %v19542_v13  ;;  %v2532_v3 = vmul.f32 %v2524_v50, %v15949_v39 }
 0x269   :  { %v2410_v60 = vrot.slane %v2375_v26, %v13128_v4  ;;  %v2436_v45 = vmul.f32 %v2414_v34, %v15829_v27  ;;  %v2475_v30 = vsel %vm19241_vm12, %v2471_v43, %v2473_v25  ;;  %v2476_v40 = vsel %vm19241_vm12, %v2469_v14, %v2471_v43 }
 0x26a   :  { %v16116_v36 = vadd.f32 %v2540_v37, %v2454_v41  ;;  %v2520_v10 = vrot.slane %v2475_v30, %v13128_v4  ;;  %v2477_v58 = vsel %vm19241_vm12, %v15940_v32, %v2469_v14  ;;  %v2428_v63 = vmul.f32 %v2414_v34, %v15883_v42 }
 0x26b   :  { %v2427_v16 = vmul.f32 %v2410_v60, %v15883_v42  ;;  %v2435_v19 = vmul.f32 %v2410_v60, %v15829_v27  ;;  %v2512_v20 = vrot.slane %v2477_v58, %v13128_v4  ;;  %12586 = vmatmul.mubr.msk.f32.gmra.mxu0 %vm2575_vm11, %v16051_v28  ;;  %v2516_v61 = vrot.slane %v2476_v40, %v13128_v4 }
 0x26c   :  { %v2531_v8 = vmul.f32 %v2520_v10, %v15949_v39  ;;  %v2539_v5 = vmul.f32 %v2520_v10, %v15893_v35  ;;  %v2574_v32 = vmul.f32 %v16116_v36, %v16116_v36  ;;  %2825 = vmatprep.mubr.f32.mxu0 %v19542_v13  ;;  %v2452_v42 = vadd.f32 %v2436_v45, %v2350_v46 }
 0x26d   :  { %v2451_v49 = vadd.f32 %v2435_v19, %v2349_v33  ;;  %v2529_v27 = vmul.f32 %v2512_v20, %v15949_v39  ;;  %v2537_v48 = vmul.f32 %v2512_v20, %v15893_v35  ;;  %v2530_v51 = vmul.f32 %v2516_v61, %v15949_v39 }
 0x26e   :  { %v16138_v24 = vadd.f32 %v2531_v8, %v2445_v57  ;;  %v16140_v1 = vadd.f32 %v2539_v5, %v2453_v53  ;;  %v2538_v62 = vmul.f32 %v2516_v61, %v15893_v35  ;;  %12595 = vmatprep.subr.msk.mxu1 %vm2582_vm14, %v2574_v32  ;;  %v2443_v38 = vadd.f32 %v2427_v16, %v2341_v22 }
 0x26f   :  { %v16145_v25 = vadd.f32 %v2537_v48, %v2451_v49  ;;  %v16147_v29 = vadd.f32 %v2532_v3, %v2446_v55  ;;  %v2444_v18 = vadd.f32 %v2428_v63, %v2342_v7 }
 0x270   :  { %v2573_v17 = vmul.f32 %v16140_v1, %v16140_v1  ;;  %v16151_v56 = vadd.f32 %v2538_v62, %v2452_v42  ;;  %v16153_v23 = vadd.f32 %v2529_v27, %v2443_v38  ;;  %v2565_v22 = vmul.f32 %v16138_v24, %v16138_v24 }
 0x271   :  { %v2571_v39 = vmul.f32 %v16145_v25, %v16145_v25  ;;  %v2566_v35 = vmul.f32 %v16147_v29, %v16147_v29  ;;  %v16159_v31 = vadd.f32 %v2530_v51, %v2444_v18 }
 0x272   :  { %v2572_v41 = vmul.f32 %v16151_v56, %v16151_v56  ;;  %12596 = vmatpush1.msk.msra.mxu1 %vm2582_vm14, %v2573_v17  ;;  %v2563_v2 = vmul.f32 %v16153_v23, %v16153_v23 }
 0x273   :  { %2868 = vmatprep.subr.mxu1 %v2566_v35  ;;  %v2564_v55 = vmul.f32 %v16159_v31, %v16159_v31 }
 0x274   :  { %12591 = vmatprep.subr.msk.mxu0 %vm2582_vm14, %v2572_v41  ;;  %2869 = vmatpush1.msra.mxu1 %v2565_v22 }
 0x275   :  { %12592 = vmatpush1.msk.msra.mxu0 %vm2582_vm14, %v2571_v39  ;;  %12597 = vmatmul.mubr.msk.f32.vlgmr.msra.gmra.mxu1 %vm2575_vm11, %v16020_v21 }
 0x276   :  { %2791 = vmatprep.subr.mxu0 %v2564_v55  ;;  %2908 = vmatprep.mubr.f32.mxu1 %v19542_v13 }
 0x277   :  { %2792 = vmatpush1.msra.mxu0 %v2563_v2 }
 0x278   :  { %12593 = vmatmul.mubr.msk.f32.vlgmr.msra.gmra.mxu0 %vm2575_vm11, %v16020_v21 }
 0x279   :  { %2831 = vmatprep.mubr.f32.mxu0 %v19542_v13  ;;  %12598 = vmatmul.mubr.msk.f32.gmra.mxu1 %vm2575_vm11, %v16051_v28 }
 0x27a   :  { %3409 = vmatprep.mubr.f32.mxu1 %v19542_v13 }
 0x27c   :  { %12594 = vmatmul.mubr.msk.f32.gmra.mxu0 %vm2575_vm11, %v16051_v28 }
 0x27d   :  { %3338 = vmatprep.mubr.f32.mxu0 %v19542_v13 }
 0x31d   :  { %v2750_v47 = vpop.f32.mrf.mxu1 }
 0x31e   :  { %12952 = vrsqrt.f32 %v2750_v47  ;;  %vm2931_vm12 = vcmp.eq.f32.partialorder %v2750_v47, inf  ;;  %v2934_v34 = vand.u32 2147483648, %v2750_v47  ;;  %vm2933_vm13 = vcmp.eq.f32.partialorder %v2750_v47, 0.0 }
 0x31f   :  { %v2752_v50 = vpop.f32.mrf.mxu1 }
 0x320   :  { %12954 = vrsqrt.f32 %v2752_v50  ;;  %vm2938_vm15 = vcmp.eq.f32.partialorder %v2752_v50, inf  ;;  %v2941_v57 = vand.u32 2147483648, %v2752_v50  ;;  %vm2940_vm10 = vcmp.eq.f32.partialorder %v2752_v50, 0.0 }
 0x321   :  { %v2756_v44 = vpop.f32.mrf.mxu1 }
 0x322   :  { %12956 = vrsqrt.f32 %v2756_v44  ;;  %vm2987_vm9 = vcmp.eq.f32.partialorder %v2756_v44, inf  ;;  %v2990_v45 = vand.u32 2147483648, %v2756_v44  ;;  %vm2989_vm8 = vcmp.eq.f32.partialorder %v2756_v44, 0.0 }
 0x323   :  { %v2758_v7 = vpop.f32.mrf.mxu1 }
 0x324   :  { %12958 = vrsqrt.f32 %v2758_v7  ;;  %vm2994_vm7 = vcmp.eq.f32.partialorder %v2758_v7, inf  ;;  %v2997_v63 = vand.u32 2147483648, %v2758_v7 }
 0x327   :  { %v2673_v21 = vpop.f32.mrf.mxu0 }
 0x328   :  { %12960 = vrsqrt.f32 %v2673_v21  ;;  %v2920_v38 = vand.u32 2147483648, %v2673_v21 }
 0x329   :  { %v16184_v33 = vpop.f32.mrf.mxu0 }
 0x32a   :  { %12962 = vrsqrt.f32 %v16184_v33  ;;  %v2927_v55 = vand.u32 2147483648, %v16184_v33 }
 0x32b   :  { %v12953_v26 = vpop.eup %12952  ;;  %v16187_v28 = vpop.f32.mrf.mxu0 }
 0x32c   :  { %v2930_v43 = vmul.f32 %v12953_v26, %v2750_v47  ;;  %12964 = vrsqrt.f32 %v16187_v28  ;;  %v2976_v26 = vand.u32 2147483648, %v16187_v28 }
 0x32d   :  { %v12955_v46 = vpop.eup %12954  ;;  %v16190_v53 = vpop.f32.mrf.mxu0 }
 0x32e   :  { %v2932_v37 = vsel %vm2931_vm12, %v2750_v47, %v2930_v43  ;;  %v2937_v14 = vmul.f32 %v12955_v46, %v2752_v50  ;;  %12966 = vrsqrt.f32 %v16190_v53  ;;  %vm2996_vm12 = vcmp.eq.f32.partialorder %v2758_v7, 0.0 }
 0x32f   :  { %v12957_v3 = vpop.eup %12956  ;;  %v16193_v60 = vsel %vm2933_vm13, %v2934_v34, %v2932_v37  ;;  %vm2973_vm13 = vcmp.eq.f32.partialorder %v16187_v28, inf  ;;  %v2983_v37 = vand.u32 2147483648, %v16190_v53 }
 0x330   :  { %v3029_v30 = vmax.f32 %v16193_v60, 1e-08  ;;  %v2939_v10 = vsel %vm2938_vm15, %v2752_v50, %v2937_v14  ;;  %v2986_v40 = vmul.f32 %v12957_v3, %v2756_v44  ;;  %vm2975_vm15 = vcmp.eq.f32.partialorder %v16187_v28, 0.0  ;;  %v16245_v3 = vld [vmem:[%s19069_s4] sm:$0xff] }
 0x331   :  { %v12959_v58 = vpop.eup %12958  ;;  %v16196_v16 = vsel %vm2940_vm10, %v2941_v57, %v2939_v10  ;;  %vm2917_vm10 = vcmp.eq.f32.partialorder %v2673_v21, inf }
 0x332   :  { %v3030_v19 = vmax.f32 %v16196_v16, 1e-08  ;;  %v2988_v20 = vsel %vm2987_vm9, %v2756_v44, %v2986_v40  ;;  %v2993_v8 = vmul.f32 %v12959_v58, %v2758_v7  ;;  %12968 = vrcp.f32 %v3029_v30 }
 0x333   :  { %v16199_v5 = vsel %vm2989_vm8, %v2990_v45, %v2988_v20  ;;  %vm2919_vm9 = vcmp.eq.f32.partialorder %v2673_v21, 0.0  ;;  %vm2924_vm8 = vcmp.eq.f32.partialorder %v16184_v33, inf }
 0x334   :  { %v3037_v61 = vmax.f32 %v16199_v5, 1e-08  ;;  %v2995_v32 = vsel %vm2994_vm7, %v2758_v7, %v2993_v8  ;;  %12970 = vrcp.f32 %v3030_v19  ;;  %vm2926_vm7 = vcmp.eq.f32.partialorder %v16184_v33, 0.0 }
 0x335   :  { %v12961_v49 = vpop.eup %12960  ;;  %v16202_v42 = vsel %vm2996_vm12, %v2997_v63, %v2995_v32  ;;  %v16204_v27 = vpop.f32.mrf.mxu1  ;;  %vm2980_vm12 = vcmp.eq.f32.partialorder %v16190_v53, inf  ;;  %v19543_v63 = vld [vmem:[#allocation2_spill] sm:$0xff] }
 0x336   :  { %v3038_v48 = vmax.f32 %v16202_v42, 1e-08  ;;  %v2916_v51 = vmul.f32 %v12961_v49, %v2673_v21  ;;  %12972 = vrsqrt.f32 %v16204_v27  ;;  %v19544_v19 = vsub.s32 2, %v19543_v63 }
 0x337   :  { %v12963_v62 = vpop.eup %12962  ;;  %12974 = vrcp.f32 %v3037_v61  ;;  %v16213_v35 = vpop.f32.mrf.mxu1  ;;  %v19545_v61 = vsub.s32 1, %v19543_v63 }
 0x338   :  { %v2918_v18 = vsel %vm2917_vm10, %v2673_v21, %v2916_v51  ;;  %v2923_v17 = vmul.f32 %v12963_v62, %v16184_v33  ;;  %v16211_v39 = vpop.f32.mrf.mxu0  ;;  %vm2982_vm10 = vcmp.eq.f32.partialorder %v16190_v53, 0.0  ;;  %v16259_v20 = vrot.slane %v16245_v3, %v19544_v19 }
 0x339   :  { %v12965_v41 = vpop.eup %12964  ;;  %v16215_v22 = vsel %vm2919_vm9, %v2920_v38, %v2918_v18  ;;  %12976 = vrsqrt.f32 %v16211_v39  ;;  %v16233_v46 = vpop.f32.mrf.mxu1  ;;  %v16271_v32 = vrot.slane %v16245_v3, %v19545_v61  ;;  %vm2959_vm9 = vcmp.eq.f32.partialorder %v16204_v27, inf }
 0x33a   :  { %12978 = vrcp.f32 %v3038_v48  ;;  %v3027_v2 = vmax.f32 %v16215_v22, 1e-08  ;;  %v2925_v47 = vsel %vm2924_vm8, %v16184_v33, %v2923_v17  ;;  %v2972_v50 = vmul.f32 %v12965_v41, %v16187_v28  ;;  %v16223_v44 = vpop.f32.mrf.mxu0 }
 0x33b   :  { %v12967_v7 = vpop.eup %12966  ;;  %v16225_v21 = vsel %vm2926_vm7, %v2927_v55, %v2925_v47  ;;  %12980 = vrsqrt.f32 %v16213_v35  ;;  %v16254_v40 = vpop.f32.mrf.mxu1  ;;  %vm2961_vm8 = vcmp.eq.f32.partialorder %v16204_v27, 0.0  ;;  %v2962_v48 = vand.u32 2147483648, %v16204_v27 }
 0x33c   :  { %12982 = vrcp.f32 %v3027_v2  ;;  %v3028_v34 = vmax.f32 %v16225_v21, 1e-08  ;;  %v2974_v43 = vsel %vm2973_vm13, %v16187_v28, %v2972_v50  ;;  %v2979_v33 = vmul.f32 %v12967_v7, %v16190_v53  ;;  %v16240_v14 = vpop.f32.mrf.mxu0 }
 0x33d   :  { %v16235_v57 = vsel %vm2975_vm15, %v2976_v26, %v2974_v43  ;;  %12984 = vrsqrt.f32 %v16223_v44  ;;  %vm2966_vm7 = vcmp.eq.f32.partialorder %v16213_v35, inf  ;;  %vm2945_vm13 = vcmp.eq.f32.partialorder %v16211_v39, inf }
 0x33e   :  { %12986 = vrcp.f32 %v3028_v34  ;;  %v3035_v28 = vmax.f32 %v16235_v57, 1e-08  ;;  %v2981_v45 = vsel %vm2980_vm12, %v16190_v53, %v2979_v33  ;;  %v16262_v8 = vpop.f32.mrf.mxu0  ;;  %v16266_v53 = vrot.slane %v16245_v3, %v13128_v4 }
 0x33f   :  { %v16250_v30 = vsel %vm2982_vm10, %v2983_v37, %v2981_v45  ;;  %12988 = vrsqrt.f32 %v16233_v46  ;;  %v12969_v58 = vpop.eup %12968  ;;  %vm2947_vm15 = vcmp.eq.f32.partialorder %v16211_v39, 0.0  ;;  %v2948_v18 = vand.u32 2147483648, %v16211_v39 }
 0x340   :  { %12990 = vrcp.f32 %v3035_v28  ;;  %v3036_v10 = vmax.f32 %v16250_v30, 1e-08  ;;  %v3061_v4 = vmul.f32 %v12969_v58, %v16193_v60  ;;  %vm2968_vm12 = vcmp.eq.f32.partialorder %v16213_v35, 0.0 }
 0x341   :  { %12992 = vrsqrt.f32 %v16240_v14  ;;  %v12971_v49 = vpop.eup %12970  ;;  %v2969_v17 = vand.u32 2147483648, %v16213_v35  ;;  %vm2952_vm10 = vcmp.eq.f32.partialorder %v16223_v44, inf  ;;  %vm2954_vm6 = vcmp.eq.f32.partialorder %v16223_v44, 0.0 }
 0x342   :  { %12994 = vrcp.f32 %v3036_v10  ;;  %v2955_v60 = vand.u32 2147483648, %v16223_v44  ;;  %vm3015_vm5 = vcmp.eq.f32.partialorder %v16233_v46, inf  ;;  %vm3017_vm4 = vcmp.eq.f32.partialorder %v16233_v46, 0.0 }
 0x343   :  { %12996 = vrsqrt.f32 %v16254_v40  ;;  %v12973_v51 = vpop.eup %12972  ;;  %v3018_v50 = vand.u32 2147483648, %v16233_v46  ;;  %v16299_v26 = vmul.f32 %v3061_v4, %v15992_v12  ;;  %vm3001_vm3 = vcmp.eq.f32.partialorder %v16240_v14, inf }
 0x344   :  { %12998 = vrsqrt.f32 %v16262_v8  ;;  %v12975_v62 = vpop.eup %12974  ;;  %v2958_v38 = vmul.f32 %v12973_v51, %v16204_v27  ;;  %v3004_v43 = vand.u32 2147483648, %v16240_v14  ;;  %v3062_v37 = vmul.f32 %v12971_v49, %v16196_v16 }
 0x345   :  { %v3025_v16 = vand.u32 2147483648, %v16254_v40  ;;  %vm3008_vm2 = vcmp.eq.f32.partialorder %v16262_v8, inf }
 0x346   :  { %v12977_v41 = vpop.eup %12976  ;;  %v2960_v2 = vsel %vm2959_vm9, %v16204_v27, %v2958_v38  ;;  %vm3003_vm9 = vcmp.eq.f32.partialorder %v16240_v14, 0.0 }
 0x347   :  { %v16290_v55 = vpop.eup %12978  ;;  %v2944_v47 = vmul.f32 %v12977_v41, %v16211_v39  ;;  %v16303_v34 = vsel %vm2961_vm8, %v2962_v48, %v2960_v2  ;;  %vm3022_vm8 = vcmp.eq.f32.partialorder %v16254_v40, inf }
 0x348   :  { %v12981_v7 = vpop.eup %12980  ;;  %v3033_v28 = vmax.f32 %v16303_v34, 1e-08 }
 0x349   :  { %v12983_v33 = vpop.eup %12982  ;;  %v2946_v45 = vsel %vm2945_vm13, %v16211_v39, %v2944_v47  ;;  %v2965_v12 = vmul.f32 %v12981_v7, %v16213_v35  ;;  %vm3024_vm13 = vcmp.eq.f32.partialorder %v16254_v40, 0.0 }
 0x34a   :  { %v12985_v27 = vpop.eup %12984  ;;  %v3059_v10 = vmul.f32 %v12983_v33, %v16215_v22  ;;  %v16317_v58 = vsel %vm2947_vm15, %v2948_v18, %v2946_v45  ;;  %13000 = vrcp.f32 %v3033_v28  ;;  %v3069_v18 = vmul.f32 %v12975_v62, %v16199_v5 }
 0x34b   :  { %v12987_v19 = vpop.eup %12986  ;;  %v3031_v61 = vmax.f32 %v16317_v58, 1e-08  ;;  %v2967_v49 = vsel %vm2966_vm7, %v16213_v35, %v2965_v12  ;;  %v2951_v48 = vmul.f32 %v12985_v27, %v16223_v44 }
 0x34c   :  { %v12989_v39 = vpop.eup %12988  ;;  %v3075_v22 = vmul.f32 %v3059_v10, %v16069_v11  ;;  %v3060_v51 = vmul.f32 %v12987_v19, %v16225_v21  ;;  %v16332_v4 = vsel %vm2968_vm12, %v2969_v17, %v2967_v49 }
 0x34d   :  { %v12991_v38 = vpop.eup %12990  ;;  %13002 = vrcp.f32 %v3031_v61  ;;  %v2953_v41 = vsel %vm2952_vm10, %v16223_v44, %v2951_v48  ;;  %v3014_v2 = vmul.f32 %v12989_v39, %v16233_v46  ;;  %v3034_v5 = vmax.f32 %v16332_v4, 1e-08 }
 0x34e   :  { %v12993_v47 = vpop.eup %12992  ;;  %v16340_v11 = vmul.f32 %v16266_v53, %v3075_v22  ;;  %v3076_v21 = vmul.f32 %v3060_v51, %v16031_v0  ;;  %v3067_v35 = vmul.f32 %v12991_v38, %v16235_v57  ;;  %v2956_v17 = vsel %vm2954_vm6, %v2955_v60, %v2953_v41 }
 0x34f   :  { %v12995_v7 = vpop.eup %12994  ;;  %v3032_v62 = vmax.f32 %v2956_v17, 1e-08  ;;  %v3016_v33 = vsel %vm3015_vm5, %v16233_v46, %v3014_v2  ;;  %v3000_v28 = vmul.f32 %v12993_v47, %v16240_v14  ;;  %v3011_v44 = vand.u32 2147483648, %v16262_v8 }
 0x350   :  { %v12997_v45 = vpop.eup %12996  ;;  %v3083_v12 = vmul.f32 %v3067_v35, %v16053_v15  ;;  %v3068_v0 = vmul.f32 %v12995_v7, %v16250_v30  ;;  %v16355_v57 = vsel %vm3017_vm4, %v3018_v50, %v3016_v33  ;;  %3149 = vrot.lane.b32.xlu1 %v16340_v11, %s13065_s20  ;;  %v16361_v27 = vmul.f32 %v16271_v32, %v3076_v21 }
 0x351   :  { %v12999_v60 = vpop.eup %12998  ;;  %13004 = vrcp.f32 %v3032_v62  ;;  %v3002_v15 = vsel %vm3001_vm3, %v16240_v14, %v3000_v28  ;;  %v3021_v30 = vmul.f32 %v12997_v45, %v16254_v40  ;;  %v3041_v61 = vmax.f32 %v16355_v57, 1e-08 }
 0x352   :  { %v16368_v46 = vmul.f32 %v16266_v53, %v3083_v12  ;;  %v3084_v50 = vmul.f32 %v3068_v0, %v16025_v59  ;;  %v3005_v10 = vsel %vm3003_vm9, %v3004_v43, %v3002_v15  ;;  %v3007_v19 = vmul.f32 %v12999_v60, %v16262_v8 }
 0x353   :  { %13006 = vrcp.f32 %v3034_v5  ;;  %v3039_v49 = vmax.f32 %v3005_v10, 1e-08  ;;  %v3023_v48 = vsel %vm3022_vm8, %v16254_v40, %v3021_v30  ;;  %v19546_v39 = vsub.s32 3, %v19543_v63 }
 0x354   :  { %v3026_v59 = vsel %vm3024_vm13, %v3025_v16, %v3023_v48  ;;  %v3009_v14 = vsel %vm3008_vm2, %v16262_v8, %v3007_v19  ;;  %vm3010_vm3 = vcmp.eq.f32.partialorder %v16262_v8, 0.0  ;;  %3153 = vrot.lane.b32.xlu1 %v16361_v27, %s13065_s20  ;;  %3151 = vrot.lane.b32.xlu0 %v16368_v46, %s13065_s20  ;;  %v16393_v43 = vmul.f32 %v16259_v20, %v16299_v26 }
 0x355   :  { %v3107_v53 = vrot.slane %v16245_v3, %v19546_v39  ;;  %v3078_v22 = vmul.f32 %v3062_v37, %v15979_v52  ;;  %13008 = vrcp.f32 %v3039_v49  ;;  %v3012_v40 = vsel %vm3010_vm3, %v3011_v44, %v3009_v14 }
 0x356   :  { %v3085_v16 = vmul.f32 %v3069_v18, %v15990_v9  ;;  %v3070_v51 = vmul.f32 %v16290_v55, %v16202_v42  ;;  %v16400_v8 = vmul.f32 %v16271_v32, %v3084_v50  ;;  %v3040_v38 = vmax.f32 %v3012_v40, 1e-08 }
 0x357   :  { %13010 = vrcp.f32 %v3041_v61  ;;  %v3042_v41 = vmax.f32 %v3026_v59, 1e-08  ;;  %v13001_v52 = vpop.eup %13000  ;;  %v16406_v37 = vmul.f32 %v3107_v53, %v3078_v22  ;;  %v19547_v55 = vsub.s32 4, %v19543_v63 }
 0x358   :  { %13012 = vrcp.f32 %v3040_v38  ;;  %3157 = vrot.lane.b32.xlu1 %v16393_v43, %s13065_s20  ;;  %3155 = vrot.lane.b32.xlu0 %v16400_v8, %s13065_s20  ;;  %v16409_v9 = vmul.f32 %v16259_v20, %v3085_v16  ;;  %v3086_v42 = vmul.f32 %v3070_v51, %v15971_v54  ;;  %v3065_v54 = vmul.f32 %v13001_v52, %v16303_v34 }
 0x359   :  { %v3111_v18 = vrot.slane %v16245_v3, %v19547_v55  ;;  %13014 = vrcp.f32 %v3042_v41  ;;  %v19548_v35 = vsub.s32 5, %v19543_v63  ;;  %v19549_v33 = vsub.s32 6, %v19543_v63 }
 0x35a   :  { %v13003_v26 = vpop.eup %13002  ;;  %v16421_v20 = vmul.f32 %v3107_v53, %v3086_v42 }
 0x35b   :  { %v3063_v32 = vmul.f32 %v13003_v26, %v16317_v58  ;;  %v3115_v7 = vrot.slane %v16245_v3, %v19548_v35  ;;  %v3119_v34 = vrot.slane %v16245_v3, %v19549_v33 }
 0x35c   :  { %3161 = vrot.lane.b32.xlu1 %v16406_v37, %s13065_s20  ;;  %3159 = vrot.lane.b32.xlu0 %v16409_v9, %s13065_s20 }
 0x35d   :  { %v3079_v2 = vmul.f32 %v3063_v32, %v16153_v23 }
 0x35e   :  { %v13005_v47 = vpop.eup %13004 }
 0x35f   :  { %v16424_v21 = vmul.f32 %v3111_v18, %v3079_v2  ;;  %v3064_v58 = vmul.f32 %v13005_v47, %v2956_v17  ;;  %v3081_v17 = vmul.f32 %v3065_v54, %v16138_v24 }
 0x360   :  { %v13007_v5 = vpop.eup %13006  ;;  %3163 = vrot.lane.b32.xlu0 %v16421_v20, %s13065_s20 }
 0x361   :  { %v3080_v62 = vmul.f32 %v3064_v58, %v16159_v31  ;;  %3165 = vrot.lane.b32.xlu1 %v16424_v21, %s13065_s20  ;;  %v3066_v28 = vmul.f32 %v13007_v5, %v16332_v4  ;;  %v19550_v31 = vsub.s32 7, %v19543_v63  ;;  %v16447_v50 = vmul.f32 %v3119_v34, %v3081_v17 }
 0x362   :  { %v13009_v23 = vpop.eup %13008 }
 0x363   :  { %v16439_v45 = vmul.f32 %v3115_v7, %v3080_v62  ;;  %v3071_v12 = vmul.f32 %v13009_v23, %v3005_v10  ;;  %v3123_v15 = vrot.slane %v16245_v3, %v19550_v31  ;;  %v3082_v24 = vmul.f32 %v3066_v28, %v16147_v29  ;;  %v16663_v28 = vld [vmem:[%s19070_s2 + $0x4] sm:$0x7] }
 0x364   :  { %v13011_v0 = vpop.eup %13010 }
 0x365   :  { %v13013_v44 = vpop.eup %13012  ;;  %v3087_v60 = vmul.f32 %v3071_v12, %v16145_v25  ;;  %3169 = vrot.lane.b32.xlu1 %v16439_v45, %s13065_s20  ;;  %v3073_v4 = vmul.f32 %v13011_v0, %v16355_v57  ;;  %v16458_v25 = vmul.f32 %v3123_v15, %v3082_v24 }
 0x366   :  { %v3072_v30 = vmul.f32 %v13013_v44, %v3012_v40  ;;  %v13015_v10 = vpop.eup %13014 }
 0x367   :  { %v16451_v19 = vmul.f32 %v3111_v18, %v3087_v60  ;;  %v3089_v3 = vmul.f32 %v3073_v4, %v16140_v1  ;;  %v3074_v49 = vmul.f32 %v13015_v10, %v3026_v59 }
 0x368   :  { %v3088_v61 = vmul.f32 %v3072_v30, %v16151_v56 }
 0x369   :  { %3167 = vrot.lane.b32.xlu0 %v16451_v19, %s13065_s20  ;;  %3173 = vrot.lane.b32.xlu1 %v16447_v50, %s13065_s20  ;;  %v16467_v29 = vmul.f32 %v3119_v34, %v3089_v3  ;;  %v3090_v56 = vmul.f32 %v3074_v49, %v16116_v36 }
 0x36a   :  { %v16461_v48 = vmul.f32 %v3115_v7, %v3088_v61 }
 0x36b   :  { %v16474_v1 = vmul.f32 %v3123_v15, %v3090_v56 }
 0x36d   :  { %3171 = vrot.lane.b32.xlu0 %v16461_v48, %s13065_s20  ;;  %3177 = vrot.lane.b32.xlu1 %v16458_v25, %s13065_s20 }
 0x371   :  { %3175 = vrot.lane.b32.xlu0 %v16467_v29, %s13065_s20  ;;  %3199 = vrot.lane.b32.xlu1 %v16340_v11, %s13066_s24 }
 0x375   :  { %3179 = vrot.lane.b32.xlu0 %v16474_v1, %s13065_s20  ;;  %3203 = vrot.lane.b32.xlu1 %v16361_v27, %s13066_s24 }
 0x379   :  { %3201 = vrot.lane.b32.xlu0 %v16368_v46, %s13066_s24  ;;  %3207 = vrot.lane.b32.xlu1 %v16393_v43, %s13066_s24 }
 0x37d   :  { %3205 = vrot.lane.b32.xlu0 %v16400_v8, %s13066_s24  ;;  %3211 = vrot.lane.b32.xlu1 %v16406_v37, %s13066_s24 }
 0x381   :  { %3209 = vrot.lane.b32.xlu0 %v16409_v9, %s13066_s24  ;;  %3215 = vrot.lane.b32.xlu1 %v16424_v21, %s13066_s24 }
 0x385   :  { %3213 = vrot.lane.b32.xlu0 %v16421_v20, %s13066_s24  ;;  %3219 = vrot.lane.b32.xlu1 %v16439_v45, %s13066_s24 }
 0x389   :  { %3217 = vrot.lane.b32.xlu0 %v16451_v19, %s13066_s24  ;;  %3223 = vrot.lane.b32.xlu1 %v16447_v50, %s13066_s24 }
 0x38d   :  { %3221 = vrot.lane.b32.xlu0 %v16461_v48, %s13066_s24  ;;  %3227 = vrot.lane.b32.xlu1 %v16458_v25, %s13066_s24 }
 0x391   :  { %3225 = vrot.lane.b32.xlu0 %v16467_v29, %s13066_s24  ;;  %3871 = vrot.lane.b32.xlu1 %v16340_v11, %s13067_s29 }
 0x395   :  { %3229 = vrot.lane.b32.xlu0 %v16474_v1, %s13066_s24  ;;  %3875 = vrot.lane.b32.xlu1 %v16361_v27, %s13067_s29 }
 0x399   :  { %3873 = vrot.lane.b32.xlu0 %v16368_v46, %s13067_s29  ;;  %3879 = vrot.lane.b32.xlu1 %v16393_v43, %s13067_s29 }
 0x39d   :  { %3877 = vrot.lane.b32.xlu0 %v16400_v8, %s13067_s29  ;;  %3883 = vrot.lane.b32.xlu1 %v16406_v37, %s13067_s29 }
 0x3a1   :  { %3881 = vrot.lane.b32.xlu0 %v16409_v9, %s13067_s29  ;;  %3887 = vrot.lane.b32.xlu1 %v16424_v21, %s13067_s29 }
 0x3a5   :  { %3885 = vrot.lane.b32.xlu0 %v16421_v20, %s13067_s29  ;;  %3891 = vrot.lane.b32.xlu1 %v16439_v45, %s13067_s29 }
 0x3a9   :  { %3889 = vrot.lane.b32.xlu0 %v16451_v19, %s13067_s29  ;;  %3895 = vrot.lane.b32.xlu1 %v16447_v50, %s13067_s29 }
 0x3ad   :  { %3893 = vrot.lane.b32.xlu0 %v16461_v48, %s13067_s29  ;;  %3899 = vrot.lane.b32.xlu1 %v16458_v25, %s13067_s29 }
 0x3b1   :  { %3897 = vrot.lane.b32.xlu0 %v16467_v29, %s13067_s29  ;;  %4240 = vrot.lane.b32.xlu1 %v16340_v11, %s13068_s9 }
 0x3b5   :  { %3901 = vrot.lane.b32.xlu0 %v16474_v1, %s13067_s29  ;;  %4244 = vrot.lane.b32.xlu1 %v16361_v27, %s13068_s9 }
 0x3b9   :  { %4242 = vrot.lane.b32.xlu0 %v16368_v46, %s13068_s9  ;;  %4248 = vrot.lane.b32.xlu1 %v16393_v43, %s13068_s9 }
 0x3bd   :  { %4246 = vrot.lane.b32.xlu0 %v16400_v8, %s13068_s9  ;;  %4252 = vrot.lane.b32.xlu1 %v16406_v37, %s13068_s9 }
 0x3c1   :  { %4250 = vrot.lane.b32.xlu0 %v16409_v9, %s13068_s9  ;;  %4256 = vrot.lane.b32.xlu1 %v16424_v21, %s13068_s9 }
 0x3c2   :  { %v16556_v36 = vpop.permute.xlu1 %3149 }
 0x3c5   :  { %4254 = vrot.lane.b32.xlu0 %v16421_v20, %s13068_s9  ;;  %4260 = vrot.lane.b32.xlu1 %v16439_v45, %s13068_s9 }
 0x3c6   :  { %v16562_v57 = vpop.permute.xlu1 %3153  ;;  %v16564_v39 = vpop.permute.xlu0 %3151 }
 0x3c9   :  { %4258 = vrot.lane.b32.xlu0 %v16451_v19, %s13068_s9  ;;  %4264 = vrot.lane.b32.xlu1 %v16447_v50, %s13068_s9 }
 0x3ca   :  { %v16570_v53 = vpop.permute.xlu1 %3157  ;;  %v16572_v59 = vpop.permute.xlu0 %3155 }
 0x3cd   :  { %4262 = vrot.lane.b32.xlu0 %v16461_v48, %s13068_s9  ;;  %4268 = vrot.lane.b32.xlu1 %v16458_v25, %s13068_s9 }
 0x3ce   :  { %v16578_v14 = vpop.permute.xlu1 %3161  ;;  %v16580_v22 = vpop.permute.xlu0 %3159 }
 0x3d1   :  { %4266 = vrot.lane.b32.xlu0 %v16467_v29, %s13068_s9  ;;  %4609 = vrot.lane.b32.xlu1 %v16340_v11, %s13069_s14 }
 0x3d2   :  { %v16590_v16 = vpop.permute.xlu0 %3163 }
 0x3d3   :  { %v16586_v40 = vpop.permute.xlu1 %3165 }
 0x3d5   :  { %4270 = vrot.lane.b32.xlu0 %v16474_v1, %s13068_s9  ;;  %4613 = vrot.lane.b32.xlu1 %v16361_v27, %s13069_s14 }
 0x3d7   :  { %v16594_v51 = vpop.permute.xlu1 %3169 }
 0x3d9   :  { %4611 = vrot.lane.b32.xlu0 %v16368_v46, %s13069_s14  ;;  %4617 = vrot.lane.b32.xlu1 %v16393_v43, %s13069_s14 }
 0x3db   :  { %v16600_v38 = vpop.permute.xlu0 %3167  ;;  %v16602_v41 = vpop.permute.xlu1 %3173 }
 0x3dd   :  { %4615 = vrot.lane.b32.xlu0 %v16400_v8, %s13069_s14  ;;  %4621 = vrot.lane.b32.xlu1 %v16406_v37, %s13069_s14 }
 0x3df   :  { %v16608_v52 = vpop.permute.xlu0 %3171  ;;  %v16610_v26 = vpop.permute.xlu1 %3177 }
 0x3e1   :  { %4619 = vrot.lane.b32.xlu0 %v16409_v9, %s13069_s14  ;;  %4625 = vrot.lane.b32.xlu1 %v16424_v21, %s13069_s14 }
 0x3e3   :  { %v16616_v42 = vpop.permute.xlu0 %3175  ;;  %v3200_v32 = vpop.permute.xlu1 %3199 }
 0x3e5   :  { %4623 = vrot.lane.b32.xlu0 %v16421_v20, %s13069_s14  ;;  %4629 = vrot.lane.b32.xlu1 %v16439_v45, %s13069_s14 }
 0x3e7   :  { %v16622_v55 = vpop.permute.xlu0 %3179  ;;  %v3204_v18 = vpop.permute.xlu1 %3203 }
 0x3e8   :  { %v3243_v3 = vsel %vm185_vm1, %v3200_v32, %v3204_v18 }
 0x3e9   :  { %4627 = vrot.lane.b32.xlu0 %v16451_v19, %s13069_s14  ;;  %4633 = vrot.lane.b32.xlu1 %v16447_v50, %s13069_s14 }
 0x3eb   :  { %v3202_v2 = vpop.permute.xlu0 %3201  ;;  %v3208_v47 = vpop.permute.xlu1 %3207 }
 0x3ec   :  { %v3241_v0 = vsel %vm185_vm1, %v3204_v18, %v3208_v47 }
 0x3ed   :  { %4631 = vrot.lane.b32.xlu0 %v16461_v48, %s13069_s14  ;;  %4637 = vrot.lane.b32.xlu1 %v16458_v25, %s13069_s14 }
 0x3ef   :  { %v3206_v54 = vpop.permute.xlu0 %3205  ;;  %v16632_v58 = vpop.permute.xlu1 %3211 }
 0x3f0   :  { %v3244_v35 = vsel %vm185_vm1, %v3202_v2, %v3206_v54  ;;  %v3239_v17 = vsel %vm185_vm1, %v3208_v47, %v16632_v58 }
 0x3f1   :  { %4635 = vrot.lane.b32.xlu0 %v16467_v29, %s13069_s14  ;;  %12600 = vmatprep.subr.msk.mxu0 %vm2582_vm14, %v3244_v35 }
 0x3f2   :  { %4978 = vrot.lane.b32.xlu1 %v16340_v11, %s13070_s19 }
 0x3f3   :  { %v3210_v7 = vpop.permute.xlu0 %3209  ;;  %v16641_v5 = vpop.permute.xlu1 %3215 }
 0x3f4   :  { %v3242_v34 = vsel %vm185_vm1, %v3206_v54, %v3210_v7 }
 0x3f5   :  { %4639 = vrot.lane.b32.xlu0 %v16474_v1, %s13069_s14 }
 0x3f6   :  { %4982 = vrot.lane.b32.xlu1 %v16361_v27, %s13070_s19 }
 0x3f7   :  { %v3214_v62 = vpop.permute.xlu0 %3213  ;;  %v3220_v23 = vpop.permute.xlu1 %3219 }
 0x3f8   :  { %v3240_v33 = vsel %vm185_vm1, %v3210_v7, %v3214_v62  ;;  %v3190_v7 = vsel %vm83_vm0, %v16580_v22, %v16590_v16 }
 0x3f9   :  { %4980 = vrot.lane.b32.xlu0 %v16368_v46, %s13070_s19  ;;  %12603 = vmatprep.subr.msk.mxu1 %vm2582_vm14, %v3240_v33  ;;  %v3235_v33 = vsel %vm185_vm1, %v16641_v5, %v3220_v23 }
 0x3fa   :  { %12604 = vmatpush1.msk.msra.mxu1 %vm2582_vm14, %v3242_v34  ;;  %4986 = vrot.lane.b32.xlu1 %v16393_v43, %s13070_s19 }
 0x3fb   :  { %3375 = vmatprep.subr.mxu1 %v3239_v17  ;;  %v3218_v12 = vpop.permute.xlu0 %3217  ;;  %v3224_v44 = vpop.permute.xlu1 %3223  ;;  %v3192_v17 = vsel %vm83_vm0, %v16572_v59, %v16580_v22  ;;  %v3194_v22 = vsel %vm83_vm0, %v16564_v39, %v16572_v59  ;;  %v3148_v59 = vld [vmem:[%s19070_s2] sm:$0x7] }
 0x3fc   :  { %3376 = vmatpush1.msra.mxu1 %v3241_v0  ;;  %v3233_v35 = vsel %vm185_vm1, %v3220_v23, %v3224_v44  ;;  %v3189_v23 = vsel %vm83_vm0, %v16570_v53, %v16578_v14 }
 0x3fd   :  { %4984 = vrot.lane.b32.xlu0 %v16400_v8, %s13070_s19  ;;  %12605 = vmatmul.mubr.msk.f32.vlgmr.msra.gmra.mxu1 %vm2575_vm11, %v16663_v28 }
 0x3fe   :  { %4990 = vrot.lane.b32.xlu1 %v16406_v37, %s13070_s19  ;;  %3551 = vmatprep.mubr.f32.mxu1 %v19542_v13 }
 0x3ff   :  { %v3222_v60 = vpop.permute.xlu0 %3221  ;;  %v3228_v31 = vpop.permute.xlu1 %3227 }
 0x400   :  { %v3245_v56 = vsel %vm185_vm1, %v3228_v31, %v3200_v32  ;;  %v3236_v18 = vsel %vm185_vm1, %v3218_v12, %v3222_v60  ;;  %v3238_v32 = vsel %vm185_vm1, %v3214_v62, %v3218_v12  ;;  %v3237_v12 = vsel %vm185_vm1, %v16632_v58, %v16641_v5 }
 0x401   :  { %4988 = vrot.lane.b32.xlu0 %v16409_v9, %s13070_s19  ;;  %v3191_v58 = vsel %vm83_vm0, %v16562_v57, %v16570_v53  ;;  %v3196_v53 = vsel %vm83_vm0, %v16622_v55, %v16564_v39  ;;  %v3184_v39 = vsel %vm83_vm0, %v16608_v52, %v16616_v42 }
 0x402   :  { %4994 = vrot.lane.b32.xlu1 %v16424_v21, %s13070_s19 }
 0x403   :  { %v3226_v15 = vpop.permute.xlu0 %3225  ;;  %v16678_v30 = vpop.permute.xlu1 %3871 }
 0x404   :  { %v3234_v49 = vsel %vm185_vm1, %v3222_v60, %v3226_v15  ;;  %v3193_v60 = vsel %vm83_vm0, %v16556_v36, %v16562_v57  ;;  %v3181_v57 = vsel %vm83_vm0, %v16602_v41, %v16610_v26 }
 0x405   :  { %4992 = vrot.lane.b32.xlu0 %v16421_v20, %s13070_s19 }
 0x406   :  { %4998 = vrot.lane.b32.xlu1 %v16439_v45, %s13070_s19 }
 0x407   :  { %v3230_v24 = vpop.permute.xlu0 %3229  ;;  %v16684_v4 = vpop.permute.xlu1 %3875 }
 0x408   :  { %v3246_v10 = vsel %vm185_vm1, %v3230_v24, %v3202_v2  ;;  %v3232_v61 = vsel %vm185_vm1, %v3226_v15, %v3230_v24  ;;  %v3231_v2 = vsel %vm185_vm1, %v3224_v44, %v3228_v31  ;;  %v3182_v44 = vsel %vm83_vm0, %v16616_v42, %v16622_v55 }
 0x409   :  { %4996 = vrot.lane.b32.xlu0 %v16451_v19, %s13070_s19  ;;  %12601 = vmatpush1.msk.msra.mxu0 %vm2582_vm14, %v3246_v10  ;;  %v3195_v55 = vsel %vm83_vm0, %v16610_v26, %v16556_v36  ;;  %v3186_v36 = vsel %vm83_vm0, %v16600_v38, %v16608_v52  ;;  %v3183_v42 = vsel %vm83_vm0, %v16594_v51, %v16602_v41  ;;  %vm19551_vm1 = vcmp.lt.s32.totalorder %v13701_v6, 40 }
 0x40a   :  { %12609 = vmatprep.subr.msk.mxu1 %vm2582_vm14, %v3232_v61  ;;  %3304 = vmatprep.subr.mxu0 %v3243_v3  ;;  %v3188_v41 = vsel %vm83_vm0, %v16590_v16, %v16600_v38  ;;  %v3185_v24 = vsel %vm83_vm0, %v16586_v40, %v16594_v51  ;;  %v3187_v10 = vsel %vm83_vm0, %v16578_v14, %v16586_v40  ;;  %vm19552_vm2 = vmmov %vm19551_vm1  ;;  %v12624_v3 = vld [vmem:[%s19070_s2 + $0x8] sm:$0x7] }
 0x40b   :  { %12610 = vmatpush1.msk.msra.mxu1 %vm2582_vm14, %v3234_v49  ;;  %3305 = vmatpush1.msra.mxu0 %v3245_v56  ;;  %v16703_v47 = vpop.permute.xlu0 %3873  ;;  %v16707_v54 = vpop.permute.xlu1 %3879  ;;  %vm19553_vm4 = vmmov %vm19551_vm1 }
 0x40c   :  { %3517 = vmatprep.subr.mxu1 %v3231_v2  ;;  %12606 = vmatprep.subr.msk.mxu0 %vm2582_vm14, %v3236_v18  ;;  %vm19554_vm0 = vmmov %vm19551_vm1 }
 0x40d   :  { %3518 = vmatpush1.msra.mxu1 %v3233_v35  ;;  %5002 = vrot.lane.b32.xlu1 %v16447_v50, %s13070_s19  ;;  %vm19555_vm5 = vmmov %vm19554_vm0 }
 0x40e   :  { %5000 = vrot.lane.b32.xlu0 %v16461_v48, %s13070_s19  ;;  %12602 = vmatmul.mubr.msk.f32.vlgmr.msra.gmra.mxu0 %vm2575_vm11, %v16663_v28  ;;  %v3913_v40 = vsel %vm19555_vm5, %v16684_v4, %v16707_v54  ;;  %vm19556_vm6 = vmmov %vm19554_vm0 }
 0x40f   :  { %12607 = vmatpush1.msk.msra.mxu0 %vm2582_vm14, %v3238_v32  ;;  %12615 = vmatprep.subr.msk.mxu1 %vm2582_vm14, %v3190_v7  ;;  %v3878_v62 = vpop.permute.xlu0 %3877  ;;  %v16729_v34 = vpop.permute.xlu1 %3883  ;;  %vm19557_vm7 = vmmov %vm19554_vm0 }
 0x410   :  { %3446 = vmatprep.subr.mxu0 %v3235_v33  ;;  %12611 = vmatmul.mubr.msk.f32.vlgmr.msra.gmra.mxu1 %vm2575_vm11, %v16663_v28  ;;  %v3916_v16 = vsel %vm19552_vm2, %v16703_v47, %v3878_v62  ;;  %v3911_v14 = vsel %vm19554_vm0, %v16707_v54, %v16729_v34  ;;  %vm19558_vm15 = vmmov %vm19554_vm0 }
 0x411   :  { %12616 = vmatpush1.msk.msra.mxu1 %vm2582_vm14, %v3192_v17  ;;  %3447 = vmatpush1.msra.mxu0 %v3237_v12  ;;  %vm19559_vm12 = vmmov %vm19554_vm0 }
 0x412   :  { %3686 = vmatprep.subr.mxu1 %v3189_v23  ;;  %3480 = vmatprep.mubr.f32.mxu0 %v19542_v13  ;;  %v3915_v7 = vsel %vm19559_vm12, %v16678_v30, %v16684_v4  ;;  %vm19560_vm10 = vmmov %vm19554_vm0 }
 0x413   :  { %12612 = vmatprep.subr.msk.mxu0 %vm2582_vm14, %v3194_v22  ;;  %3687 = vmatpush1.msra.mxu1 %v3191_v58  ;;  %v3882_v5 = vpop.permute.xlu0 %3881  ;;  %v16756_v0 = vpop.permute.xlu1 %3887  ;;  %vm19561_vm9 = vmmov %vm19554_vm0 }
 0x414   :  { %5006 = vrot.lane.b32.xlu1 %v16458_v25, %s13070_s19  ;;  %5004 = vrot.lane.b32.xlu0 %v16467_v29, %s13070_s19  ;;  %v3914_v61 = vsel %vm19553_vm4, %v3878_v62, %v3882_v5  ;;  %vm19562_vm8 = vmmov %vm19554_vm0  ;;  %vm19567_vm4 = vcmp.lt.s32.totalorder %v13701_v6, 39 }
 0x415   :  { %12608 = vmatmul.mubr.msk.f32.vlgmr.msra.gmra.mxu0 %vm2575_vm11, %v16663_v28  ;;  %3720 = vmatprep.mubr.f32.mxu1 %v19542_v13  ;;  %vm19563_vm13 = vmmov %vm19554_vm0 }
 0x416   :  { %12613 = vmatpush1.msk.msra.mxu0 %vm2582_vm14, %v3196_v53  ;;  %12621 = vmatprep.subr.msk.mxu1 %vm2582_vm14, %v3182_v44  ;;  %vm19564_vm3 = vmmov %vm19554_vm0 }
 0x417   :  { %3615 = vmatprep.subr.mxu0 %v3193_v60  ;;  %12617 = vmatmul.mubr.msk.f32.vlgmr.msra.gmra.mxu1 %vm2575_vm11, %v3148_v59  ;;  %v16791_v28 = vpop.permute.xlu0 %3885  ;;  %v16793_v31 = vpop.permute.xlu1 %3891  ;;  %vm19566_vm2 = vmmov %vm19554_vm0 }
 0x418   :  { %12622 = vmatpush1.msk.msra.mxu1 %vm2582_vm14, %v3184_v39  ;;  %3616 = vmatpush1.msra.mxu0 %v3195_v55  ;;  %v3912_v26 = vsel %vm19551_vm1, %v3882_v5, %v16791_v28  ;;  %vm19565_vm1 = vmmov %vm19554_vm0  ;;  %v3909_v5 = vsel %vm19566_vm2, %v16729_v34, %v16756_v0 }
 0x419   :  { %3828 = vmatprep.subr.mxu1 %v3181_v57  ;;  %3649 = vmatprep.mubr.f32.mxu0 %v19542_v13  ;;  %v3907_v23 = vsel %vm19565_vm1, %v16756_v0, %v16793_v31  ;;  %vm19568_vm0 = vmmov %vm19567_vm4 }
 0x41a   :  { %12618 = vmatprep.subr.msk.mxu0 %vm2582_vm14, %v3186_v36  ;;  %3829 = vmatpush1.msra.mxu1 %v3183_v42  ;;  %vm19569_vm5 = vmmov %vm19568_vm0 }
 0x41b   :  { %5347 = vrot.lane.b32.xlu1 %v16340_v11, %s13071_s25  ;;  %5008 = vrot.lane.b32.xlu0 %v16474_v1, %s13070_s19  ;;  %v3890_v15 = vpop.permute.xlu0 %3889  ;;  %v3896_v52 = vpop.permute.xlu1 %3895  ;;  %vm19573_vm12 = vmmov %vm19568_vm0 }
 0x41c   :  { %12614 = vmatmul.mubr.msk.f32.vlgmr.msra.gmra.mxu0 %vm2575_vm11, %v3148_v59  ;;  %3862 = vmatprep.mubr.f32.mxu1 %v19542_v13  ;;  %v3910_v12 = vsel %vm19564_vm3, %v16791_v28, %v3890_v15  ;;  %v12637_v28 = vld [vmem:[%s19070_s2 + $0xc] sm:$0x7]  ;;  %vm19578_vm3 = vmmov %vm19568_vm0 }
 0x41d   :  { %12619 = vmatpush1.msk.msra.mxu0 %vm2582_vm14, %v3188_v41  ;;  %12628 = vmatprep.subr.msk.mxu1 %vm2582_vm14, %v3912_v26  ;;  %vm19579_vm1 = vmmov %vm19568_vm0 }
 0x41e   :  { %3757 = vmatprep.subr.mxu0 %v3185_v24  ;;  %12623 = vmatmul.mubr.msk.f32.vlgmr.msra.gmra.mxu1 %vm2575_vm11, %v3148_v59  ;;  %vm19580_vm2 = vmmov %vm19568_vm0 }
 0x41f   :  { %3758 = vmatpush1.msra.mxu0 %v3187_v10  ;;  %5351 = vrot.lane.b32.xlu1 %v16361_v27, %s13071_s25  ;;  %v3894_v38 = vpop.permute.xlu0 %3893  ;;  %v3900_v51 = vpop.permute.xlu1 %3899 }
 0x420   :  { %12625 = vmatprep.subr.msk.mxu0 %vm2582_vm14, %v3916_v16  ;;  %5349 = vrot.lane.b32.xlu0 %v16368_v46, %s13071_s25  ;;  %v3903_v33 = vsel %vm19561_vm9, %v3896_v52, %v3900_v51  ;;  %v3908_v4 = vsel %vm19562_vm8, %v3890_v15, %v3894_v38  ;;  %vm19575_vm9 = vmmov %vm19568_vm0 }
 0x421   :  { %12629 = vmatpush1.msk.msra.mxu1 %vm2582_vm14, %v3914_v61  ;;  %3791 = vmatprep.mubr.f32.mxu0 %v19542_v13  ;;  %vm19576_vm8 = vmmov %vm19568_vm0 }
 0x422   :  { %4047 = vmatprep.subr.mxu1 %v3911_v14  ;;  %12620 = vmatmul.mubr.msk.f32.vlgmr.msra.gmra.mxu0 %vm2575_vm11, %v3148_v59 }
 0x423   :  { %4048 = vmatpush1.msra.mxu1 %v3913_v40  ;;  %5355 = vrot.lane.b32.xlu1 %v16393_v43, %s13071_s25  ;;  %v3898_v49 = vpop.permute.xlu0 %3897  ;;  %v16860_v56 = vpop.permute.xlu1 %4240 }
 0x424   :  { %5353 = vrot.lane.b32.xlu0 %v16400_v8, %s13071_s25  ;;  %4081 = vmatprep.mubr.f32.mxu1 %v19542_v13  ;;  %v3906_v32 = vsel %vm19558_vm15, %v3894_v38, %v3898_v49  ;;  %vm19572_vm15 = vmmov %vm19568_vm0 }
 0x425   :  { %12630 = vmatmul.mubr.msk.f32.vlgmr.msra.gmra.mxu1 %vm2575_vm11, %v12624_v3  ;;  %4010 = vmatprep.mubr.f32.mxu0 %v19542_v13 }
 0x426   :  { %4223 = vmatprep.mubr.f32.mxu1 %v19542_v13 }
 0x427   :  { %5359 = vrot.lane.b32.xlu1 %v16406_v37, %s13071_s25  ;;  %v3902_v2 = vpop.permute.xlu0 %3901  ;;  %v16870_v18 = vpop.permute.xlu1 %4244 }
 0x428   :  { %5357 = vrot.lane.b32.xlu0 %v16409_v9, %s13071_s25  ;;  %v3918_v54 = vsel %vm19556_vm6, %v3902_v2, %v16703_v47  ;;  %v3904_v35 = vsel %vm19557_vm7, %v3898_v49, %v3902_v2  ;;  %v3917_v47 = vsel %vm19560_vm10, %v3900_v51, %v16678_v30  ;;  %v3905_v30 = vsel %vm19563_vm13, %v16793_v31, %v3896_v52  ;;  %vm19570_vm6 = vmmov %vm19568_vm0 }
 0x429   :  { %12626 = vmatpush1.msk.msra.mxu0 %vm2582_vm14, %v3918_v54  ;;  %12634 = vmatprep.subr.msk.mxu1 %vm2582_vm14, %v3904_v35  ;;  %vm19571_vm7 = vmmov %vm19568_vm0  ;;  %v4284_v51 = vsel %vm19575_vm9, %v16860_v56, %v16870_v18 }
 0x42a   :  { %3976 = vmatprep.subr.mxu0 %v3915_v7  ;;  %12635 = vmatpush1.msk.msra.mxu1 %vm2582_vm14, %v3906_v32  ;;  %vm19574_vm10 = vmmov %vm19568_vm0 }
 0x42b   :  { %5363 = vrot.lane.b32.xlu1 %v16424_v21, %s13071_s25  ;;  %3977 = vmatpush1.msra.mxu0 %v3917_v47  ;;  %v4243_v62 = vpop.permute.xlu0 %4242  ;;  %v4249_v17 = vpop.permute.xlu1 %4248  ;;  %vm19577_vm13 = vmmov %vm19568_vm0 }
 0x42c   :  { %5361 = vrot.lane.b32.xlu0 %v16421_v20, %s13071_s25  ;;  %4189 = vmatprep.subr.mxu1 %v3903_v33  ;;  %v4282_v57 = vsel %vm19571_vm7, %v16870_v18, %v4249_v17 }
 0x42d   :  { %12631 = vmatprep.subr.msk.mxu0 %vm2582_vm14, %v3908_v4  ;;  %4190 = vmatpush1.msra.mxu1 %v3905_v30 }
 0x42e   :  { %12627 = vmatmul.mubr.msk.f32.vlgmr.msra.gmra.mxu0 %vm2575_vm11, %v12624_v3  ;;  %12636 = vmatmul.mubr.msk.f32.vlgmr.msra.gmra.mxu1 %vm2575_vm11, %v12624_v3 }
 0x42f   :  { %5367 = vrot.lane.b32.xlu1 %v16439_v45, %s13071_s25  ;;  %12632 = vmatpush1.msk.msra.mxu0 %vm2582_vm14, %v3910_v12  ;;  %v4247_v22 = vpop.permute.xlu0 %4246  ;;  %v16915_v58 = vpop.permute.xlu1 %4252 }
 0x430   :  { %5365 = vrot.lane.b32.xlu0 %v16451_v19, %s13071_s25  ;;  %4118 = vmatprep.subr.mxu0 %v3907_v23  ;;  %v4285_v59 = vsel %vm19567_vm4, %v4243_v62, %v4247_v22  ;;  %v4280_v55 = vsel %vm19570_vm6, %v4249_v17, %v16915_v58  ;;  %vm19581_vm4 = vmmov %vm19568_vm0  ;;  %v12650_v23 = vld [vmem:[%s19070_s2 + $0x10] sm:$0x7] }
 0x431   :  { %4119 = vmatpush1.msra.mxu0 %v3909_v5  ;;  %4152 = vmatprep.mubr.f32.mxu0 %v19542_v13 }
 0x432   :  { %12638 = vmatprep.subr.msk.mxu0 %vm2582_vm14, %v4285_v59  ;;  %12633 = vmatmul.mubr.msk.f32.vlgmr.msra.gmra.mxu0 %vm2575_vm11, %v12624_v3 }
 0x433   :  { %5371 = vrot.lane.b32.xlu1 %v16447_v50, %s13071_s25  ;;  %v4251_v53 = vpop.permute.xlu0 %4250  ;;  %v16930_v44 = vpop.permute.xlu1 %4256  ;;  %4450 = vmatprep.mubr.f32.mxu1 %v19542_v13 }
 0x434   :  { %5369 = vrot.lane.b32.xlu0 %v16461_v48, %s13071_s25  ;;  %4379 = vmatprep.mubr.f32.mxu0 %v19542_v13  ;;  %v4283_v39 = vsel %vm19569_vm5, %v4247_v22, %v4251_v53  ;;  %v4278_v32 = vsel %vm19568_vm0, %v16915_v58, %v16930_v44  ;;  %vm19582_vm5 = vcmp.lt.s32.totalorder %v13701_v6, 38 }
 0x435   :  { %vm19583_vm6 = vmmov %vm19582_vm5 }
 0x436   :  { %vm19584_vm7 = vmmov %vm19582_vm5 }
 0x437   :  { %5375 = vrot.lane.b32.xlu1 %v16458_v25, %s13071_s25  ;;  %v4255_v34 = vpop.permute.xlu0 %4254  ;;  %v4261_v0 = vpop.permute.xlu1 %4260  ;;  %vm19588_vm9 = vmmov %vm19582_vm5 }
 0x438   :  { %5373 = vrot.lane.b32.xlu0 %v16467_v29, %s13071_s25  ;;  %v4281_v60 = vsel %vm19568_vm0, %v4251_v53, %v4255_v34  ;;  %v4276_v18 = vsel %vm19581_vm4, %v16930_v44, %v4261_v0 }
 0x439   :  { %12641 = vmatprep.subr.msk.mxu1 %vm2582_vm14, %v4281_v60 }
 0x43a   :  { %12642 = vmatpush1.msk.msra.mxu1 %vm2582_vm14, %v4283_v39 }
 0x43b   :  { %5716 = vrot.lane.b32.xlu1 %v16340_v11, %s13072_s6  ;;  %4416 = vmatprep.subr.mxu1 %v4280_v55  ;;  %v4259_v31 = vpop.permute.xlu0 %4258  ;;  %v4265_v36 = vpop.permute.xlu1 %4264 }
 0x43c   :  { %5377 = vrot.lane.b32.xlu0 %v16474_v1, %s13071_s25  ;;  %4417 = vmatpush1.msra.mxu1 %v4282_v57  ;;  %v4274_v2 = vsel %vm19579_vm1, %v4261_v0, %v4265_v36 }
 0x43d   :  { %12643 = vmatmul.mubr.msk.f32.vlgmr.msra.gmra.mxu1 %vm2575_vm11, %v12637_v28 }
 0x43e   :  { %4592 = vmatprep.mubr.f32.mxu1 %v19542_v13 }
 0x43f   :  { %5720 = vrot.lane.b32.xlu1 %v16361_v27, %s13072_s6  ;;  %v4263_v42 = vpop.permute.xlu0 %4262  ;;  %v4269_v26 = vpop.permute.xlu1 %4268 }
 0x440   :  { %5718 = vrot.lane.b32.xlu0 %v16368_v46, %s13072_s6  ;;  %v4286_v61 = vsel %vm19576_vm8, %v4269_v26, %v16860_v56  ;;  %v4272_v14 = vsel %vm19577_vm13, %v4265_v36, %v4269_v26  ;;  %v4277_v49 = vsel %vm19578_vm3, %v4259_v31, %v4263_v42  ;;  %v4279_v56 = vsel %vm19580_vm2, %v4255_v34, %v4259_v31  ;;  %vm19589_vm8 = vmmov %vm19582_vm5 }
 0x441   :  { %vm19590_vm13 = vmmov %vm19582_vm5 }
 0x442   :  { %vm19591_vm3 = vmmov %vm19582_vm5 }
 0x443   :  { %5724 = vrot.lane.b32.xlu1 %v16393_v43, %s13072_s6  ;;  %v4267_v15 = vpop.permute.xlu0 %4266  ;;  %v16967_v52 = vpop.permute.xlu1 %4609  ;;  %vm19592_vm1 = vmmov %vm19591_vm3 }
 0x444   :  { %5722 = vrot.lane.b32.xlu0 %v16400_v8, %s13072_s6  ;;  %v4275_v38 = vsel %vm19574_vm10, %v4263_v42, %v4267_v15  ;;  %vm19587_vm10 = vmmov %vm19582_vm5 }
 0x445   :  { %vm19593_vm2 = vmmov %vm19592_vm1 }
 0x446   :  { %vm19594_vm4 = vmmov %vm19592_vm1 }
 0x447   :  { %5728 = vrot.lane.b32.xlu1 %v16406_v37, %s13072_s6  ;;  %v4271_v41 = vpop.permute.xlu0 %4270  ;;  %v16973_v24 = vpop.permute.xlu1 %4613  ;;  %vm19595_vm0 = vmmov %vm19592_vm1 }
 0x448   :  { %5726 = vrot.lane.b32.xlu0 %v16409_v9, %s13072_s6  ;;  %v4287_v10 = vsel %vm19572_vm15, %v4271_v41, %v4243_v62  ;;  %v4273_v16 = vsel %vm19573_vm12, %v4267_v15, %v4271_v41  ;;  %vm19585_vm15 = vmmov %vm19582_vm5  ;;  %v4653_v31 = vsel %vm19590_vm13, %v16967_v52, %v16973_v24 }
 0x449   :  { %12639 = vmatpush1.msk.msra.mxu0 %vm2582_vm14, %v4287_v10  ;;  %12647 = vmatprep.subr.msk.mxu1 %vm2582_vm14, %v4273_v16  ;;  %vm19586_vm12 = vmmov %vm19582_vm5 }
 0x44a   :  { %4345 = vmatprep.subr.mxu0 %v4284_v51  ;;  %12648 = vmatpush1.msk.msra.mxu1 %vm2582_vm14, %v4275_v38 }
 0x44b   :  { %5732 = vrot.lane.b32.xlu1 %v16424_v21, %s13072_s6  ;;  %4346 = vmatpush1.msra.mxu0 %v4286_v61  ;;  %v4612_v40 = vpop.permute.xlu0 %4611  ;;  %v4618_v3 = vpop.permute.xlu1 %4617 }
 0x44c   :  { %5730 = vrot.lane.b32.xlu0 %v16421_v20, %s13072_s6  ;;  %4558 = vmatprep.subr.mxu1 %v4272_v14  ;;  %v4651_v58 = vsel %vm19586_vm12, %v16973_v24, %v4618_v3 }
 0x44d   :  { %12644 = vmatprep.subr.msk.mxu0 %vm2582_vm14, %v4277_v49  ;;  %4559 = vmatpush1.msra.mxu1 %v4274_v2 }
 0x44e   :  { %12640 = vmatmul.mubr.msk.f32.vlgmr.msra.gmra.mxu0 %vm2575_vm11, %v12637_v28  ;;  %12649 = vmatmul.mubr.msk.f32.vlgmr.msra.gmra.mxu1 %vm2575_vm11, %v12637_v28 }
 0x44f   :  { %5736 = vrot.lane.b32.xlu1 %v16439_v45, %s13072_s6  ;;  %12645 = vmatpush1.msk.msra.mxu0 %vm2582_vm14, %v4279_v56  ;;  %v4616_v54 = vpop.permute.xlu0 %4615  ;;  %v17014_v35 = vpop.permute.xlu1 %4621  ;;  %v17153_v56 = vld [vmem:[%s19070_s2 + $0x14] sm:$0x7] }
 0x450   :  { %5734 = vrot.lane.b32.xlu0 %v16451_v19, %s13072_s6  ;;  %4487 = vmatprep.subr.mxu0 %v4276_v18  ;;  %v4654_v7 = vsel %vm19582_vm5, %v4612_v40, %v4616_v54  ;;  %v4649_v12 = vsel %vm19585_vm15, %v4618_v3, %v17014_v35  ;;  %vm19596_vm5 = vmmov %vm19595_vm0 }
 0x451   :  { %4488 = vmatpush1.msra.mxu0 %v4278_v32  ;;  %4521 = vmatprep.mubr.f32.mxu0 %v19542_v13 }
 0x452   :  { %12651 = vmatprep.subr.msk.mxu0 %vm2582_vm14, %v4654_v7  ;;  %12646 = vmatmul.mubr.msk.f32.vlgmr.msra.gmra.mxu0 %vm2575_vm11, %v12637_v28 }
 0x453   :  { %5740 = vrot.lane.b32.xlu1 %v16447_v50, %s13072_s6  ;;  %v4620_v47 = vpop.permute.xlu0 %4619  ;;  %v17029_v33 = vpop.permute.xlu1 %4625  ;;  %4819 = vmatprep.mubr.f32.mxu1 %v19542_v13 }
 0x454   :  { %5738 = vrot.lane.b32.xlu0 %v16461_v48, %s13072_s6  ;;  %4748 = vmatprep.mubr.f32.mxu0 %v19542_v13  ;;  %v4652_v30 = vsel %vm19584_vm7, %v4616_v54, %v4620_v47  ;;  %vm19598_vm7 = vcmp.lt.s32.totalorder %v13701_v6, 22 }
 0x455   :  { %vm19599_vm15 = vmmov %vm19598_vm7 }
 0x456   :  { %vm19600_vm12 = vmmov %vm19598_vm7 }
 0x457   :  { %5744 = vrot.lane.b32.xlu1 %v16458_v25, %s13072_s6  ;;  %v4624_v62 = vpop.permute.xlu0 %4623  ;;  %v4630_v17 = vpop.permute.xlu1 %4629  ;;  %vm19604_vm13 = vmmov %vm19598_vm7 }
 0x458   :  { %5742 = vrot.lane.b32.xlu0 %v16467_v29, %s13072_s6  ;;  %v4650_v4 = vsel %vm19583_vm6, %v4620_v47, %v4624_v62  ;;  %v4645_v24 = vsel %vm19596_vm5, %v17029_v33, %v4630_v17  ;;  %vm19597_vm6 = vmmov %vm19595_vm0 }
 0x459   :  { %12654 = vmatprep.subr.msk.mxu1 %vm2582_vm14, %v4650_v4  ;;  %v4647_v16 = vsel %vm19597_vm6, %v17014_v35, %v17029_v33 }
 0x45a   :  { %12655 = vmatpush1.msk.msra.mxu1 %vm2582_vm14, %v4652_v30 }
 0x45b   :  { %6085 = vrot.lane.b32.xlu1 %v16340_v11, %s13073_s12  ;;  %4785 = vmatprep.subr.mxu1 %v4649_v12  ;;  %v4628_v22 = vpop.permute.xlu0 %4627  ;;  %v4634_v5 = vpop.permute.xlu1 %4633 }
 0x45c   :  { %5746 = vrot.lane.b32.xlu0 %v16474_v1, %s13072_s6  ;;  %4786 = vmatpush1.msra.mxu1 %v4651_v58  ;;  %v4643_v15 = vsel %vm19594_vm4, %v4630_v17, %v4634_v5  ;;  %v4648_v41 = vsel %vm19595_vm0, %v4624_v62, %v4628_v22 }
 0x45d   :  { %12656 = vmatmul.mubr.msk.f32.vlgmr.msra.gmra.mxu1 %vm2575_vm11, %v12650_v23 }
 0x45e   :  { %4961 = vmatprep.mubr.f32.mxu1 %v19542_v13 }
 0x45f   :  { %6089 = vrot.lane.b32.xlu1 %v16361_v27, %s13073_s12  ;;  %v4632_v59 = vpop.permute.xlu0 %4631  ;;  %v4638_v53 = vpop.permute.xlu1 %4637 }
 0x460   :  { %6087 = vrot.lane.b32.xlu0 %v16368_v46, %s13073_s12  ;;  %v4655_v57 = vsel %vm19591_vm3, %v4638_v53, %v16967_v52  ;;  %v4641_v36 = vsel %vm19592_vm1, %v4634_v5, %v4638_v53  ;;  %v4646_v26 = vsel %vm19593_vm2, %v4628_v22, %v4632_v59  ;;  %vm19605_vm3 = vmmov %vm19598_vm7 }
 0x461   :  { %vm19606_vm1 = vmmov %vm19605_vm3 }
 0x462   :  { %vm19607_vm2 = vmmov %vm19606_vm1 }
 0x463   :  { %6093 = vrot.lane.b32.xlu1 %v16393_v43, %s13073_s12  ;;  %v4636_v44 = vpop.permute.xlu0 %4635  ;;  %vm19608_vm4 = vmmov %vm19606_vm1 }
 0x464   :  { %6091 = vrot.lane.b32.xlu0 %v16400_v8, %s13073_s12  ;;  %v17068_v34 = vpop.permute.xlu1 %4978  ;;  %v4644_v28 = vsel %vm19589_vm8, %v4632_v59, %v4636_v44  ;;  %vm19603_vm8 = vmmov %vm19598_vm7 }
 0x465   :  { %vm19609_vm0 = vmmov %vm19606_vm1 }
 0x466   :  { %vm19610_vm5 = vmmov %vm19609_vm0 }
 0x467   :  { %6097 = vrot.lane.b32.xlu1 %v16406_v37, %s13073_s12  ;;  %v4640_v0 = vpop.permute.xlu0 %4639  ;;  %vm19611_vm6 = vmmov %vm19609_vm0 }
 0x468   :  { %6095 = vrot.lane.b32.xlu0 %v16409_v9, %s13073_s12  ;;  %v4656_v60 = vsel %vm19587_vm10, %v4640_v0, %v4612_v40  ;;  %v4642_v39 = vsel %vm19588_vm9, %v4636_v44, %v4640_v0  ;;  %v17078_v55 = vpop.permute.xlu1 %4982  ;;  %vm19601_vm10 = vmmov %vm19598_vm7 }
 0x469   :  { %12652 = vmatpush1.msk.msra.mxu0 %vm2582_vm14, %v4656_v60  ;;  %12660 = vmatprep.subr.msk.mxu1 %vm2582_vm14, %v4642_v39  ;;  %vm19602_vm9 = vmmov %vm19598_vm7 }
 0x46a   :  { %4714 = vmatprep.subr.mxu0 %v4653_v31  ;;  %12661 = vmatpush1.msk.msra.mxu1 %vm2582_vm14, %v4644_v28 }
 0x46b   :  { %6101 = vrot.lane.b32.xlu1 %v16424_v21, %s13073_s12  ;;  %4715 = vmatpush1.msra.mxu0 %v4655_v57  ;;  %v17096_v42 = vpop.permute.xlu0 %4980 }
 0x46c   :  { %6099 = vrot.lane.b32.xlu0 %v16421_v20, %s13073_s12  ;;  %4927 = vmatprep.subr.mxu1 %v4641_v36  ;;  %v4987_v52 = vpop.permute.xlu1 %4986 }
 0x46d   :  { %12657 = vmatprep.subr.msk.mxu0 %vm2582_vm14, %v4646_v26  ;;  %4928 = vmatpush1.msra.mxu1 %v4643_v15  ;;  %v5020_v35 = vsel %vm19602_vm9, %v17078_v55, %v4987_v52 }
 0x46e   :  { %12653 = vmatmul.mubr.msk.f32.vlgmr.msra.gmra.mxu0 %vm2575_vm11, %v12650_v23  ;;  %12662 = vmatmul.mubr.msk.f32.vlgmr.msra.gmra.mxu1 %vm2575_vm11, %v12650_v23 }
 0x46f   :  { %6105 = vrot.lane.b32.xlu1 %v16439_v45, %s13073_s12  ;;  %12658 = vmatpush1.msk.msra.mxu0 %vm2582_vm14, %v4648_v41  ;;  %v4985_v10 = vpop.permute.xlu0 %4984 }
 0x470   :  { %6103 = vrot.lane.b32.xlu0 %v16451_v19, %s13073_s12  ;;  %4856 = vmatprep.subr.mxu0 %v4645_v24  ;;  %v5023_v38 = vsel %vm19598_vm7, %v17096_v42, %v4985_v10  ;;  %v17124_v51 = vpop.permute.xlu1 %4990  ;;  %vm19612_vm7 = vmmov %vm19609_vm0  ;;  %v12676_v24 = vld [vmem:[%s19070_s2 + $0x18] sm:$0x7] }
 0x471   :  { %4857 = vmatpush1.msra.mxu0 %v4647_v16  ;;  %4890 = vmatprep.mubr.f32.mxu0 %v19542_v13  ;;  %v5018_v2 = vsel %vm19601_vm10, %v4987_v52, %v17124_v51 }
 0x472   :  { %12664 = vmatprep.subr.msk.mxu0 %vm2582_vm14, %v5023_v38  ;;  %12659 = vmatmul.mubr.msk.f32.vlgmr.msra.gmra.mxu0 %vm2575_vm11, %v12650_v23  ;;  %v5022_v23 = vsel %vm19606_vm1, %v17068_v34, %v17078_v55 }
 0x473   :  { %6109 = vrot.lane.b32.xlu1 %v16447_v50, %s13073_s12  ;;  %v4989_v61 = vpop.permute.xlu0 %4988  ;;  %5188 = vmatprep.mubr.f32.mxu1 %v19542_v13 }
 0x474   :  { %6107 = vrot.lane.b32.xlu0 %v16461_v48, %s13073_s12  ;;  %5117 = vmatprep.mubr.f32.mxu0 %v19542_v13  ;;  %v17135_v14 = vpop.permute.xlu1 %4994  ;;  %v5021_v49 = vsel %vm19600_vm12, %v4985_v10, %v4989_v61  ;;  %vm19614_vm12 = vcmp.lt.s32.totalorder %v13701_v6, 21 }
 0x475   :  { %vm19615_vm10 = vmmov %vm19614_vm12 }
 0x476   :  { %vm19616_vm9 = vmmov %vm19615_vm10 }
 0x477   :  { %6113 = vrot.lane.b32.xlu1 %v16458_v25, %s13073_s12  ;;  %v4993_v40 = vpop.permute.xlu0 %4992 }
 0x478   :  { %6111 = vrot.lane.b32.xlu0 %v16467_v29, %s13073_s12  ;;  %v5019_v3 = vsel %vm19599_vm15, %v4989_v61, %v4993_v40  ;;  %v4999_v18 = vpop.permute.xlu1 %4998  ;;  %vm19613_vm15 = vmmov %vm19609_vm0 }
 0x479   :  { %12667 = vmatprep.subr.msk.mxu1 %vm2582_vm14, %v5019_v3  ;;  %v5014_v60 = vsel %vm19612_vm7, %v17135_v14, %v4999_v18  ;;  %v5016_v55 = vsel %vm19613_vm15, %v17124_v51, %v17135_v14 }
 0x47a   :  { %12668 = vmatpush1.msk.msra.mxu1 %vm2582_vm14, %v5021_v49 }
 0x47b   :  { %6454 = vrot.lane.b32.xlu1 %v16340_v11, %s13074_s18  ;;  %5154 = vmatprep.subr.mxu1 %v5018_v2  ;;  %v4997_v54 = vpop.permute.xlu0 %4996 }
 0x47c   :  { %6115 = vrot.lane.b32.xlu0 %v16474_v1, %s13073_s12  ;;  %5155 = vmatpush1.msra.mxu1 %v5020_v35 }
 0x47d   :  { %12669 = vmatmul.mubr.msk.f32.vlgmr.msra.gmra.mxu1 %vm2575_vm11, %v17153_v56 }
 0x47e   :  { %5330 = vmatprep.mubr.f32.mxu1 %v19542_v13 }
 0x47f   :  { %6458 = vrot.lane.b32.xlu1 %v16361_v27, %s13074_s18  ;;  %v5003_v32 = vpop.permute.xlu1 %5002 }
 0x480   :  { %6456 = vrot.lane.b32.xlu0 %v16368_v46, %s13074_s18  ;;  %v5001_v7 = vpop.permute.xlu0 %5000  ;;  %v5012_v44 = vsel %vm19610_vm5, %v4999_v18, %v5003_v32 }
 0x481   :  { %v5015_v53 = vsel %vm19609_vm0, %v4997_v54, %v5001_v7 }
 0x483   :  { %6462 = vrot.lane.b32.xlu1 %v16393_v43, %s13074_s18 }
 0x484   :  { %6460 = vrot.lane.b32.xlu0 %v16400_v8, %s13074_s18 }
 0x486   :  { %v5007_v47 = vpop.permute.xlu1 %5006  ;;  %v5005_v33 = vpop.permute.xlu0 %5004 }
 0x487   :  { %6466 = vrot.lane.b32.xlu1 %v16406_v37, %s13074_s18  ;;  %v5013_v12 = vsel %vm19605_vm3, %v5001_v7, %v5005_v33  ;;  %v5024_v58 = vsel %vm19607_vm2, %v5007_v47, %v17068_v34  ;;  %v5010_v5 = vsel %vm19608_vm4, %v5003_v32, %v5007_v47  ;;  %v5017_v34 = vsel %vm19611_vm6, %v4993_v40, %v4997_v54 }
 0x488   :  { %6464 = vrot.lane.b32.xlu0 %v16409_v9, %s13074_s18 }
 0x48b   :  { %6470 = vrot.lane.b32.xlu1 %v16424_v21, %s13074_s18 }
 0x48c   :  { %6468 = vrot.lane.b32.xlu0 %v16421_v20, %s13074_s18 }
 0x48d   :  { %v17181_v62 = vpop.permute.xlu1 %5347  ;;  %v5009_v17 = vpop.permute.xlu0 %5008 }
 0x48e   :  { %v5025_v4 = vsel %vm19603_vm8, %v5009_v17, %v17096_v42  ;;  %v5011_v30 = vsel %vm19604_vm13, %v5005_v33, %v5009_v17  ;;  %vm19617_vm8 = vmmov %vm19616_vm9 }
 0x48f   :  { %6474 = vrot.lane.b32.xlu1 %v16439_v45, %s13074_s18  ;;  %12665 = vmatpush1.msk.msra.mxu0 %vm2582_vm14, %v5025_v4  ;;  %vm19618_vm13 = vmmov %vm19617_vm8 }
 0x490   :  { %6472 = vrot.lane.b32.xlu0 %v16451_v19, %s13074_s18  ;;  %12673 = vmatprep.subr.msk.mxu1 %vm2582_vm14, %v5011_v30  ;;  %vm19619_vm3 = vmmov %vm19617_vm8 }
 0x491   :  { %5083 = vmatprep.subr.mxu0 %v5022_v23  ;;  %12674 = vmatpush1.msk.msra.mxu1 %vm2582_vm14, %v5013_v12  ;;  %v17201_v22 = vpop.permute.xlu1 %5351  ;;  %vm19620_vm1 = vmmov %vm19619_vm3 }
 0x492   :  { %5084 = vmatpush1.msra.mxu0 %v5024_v58  ;;  %5296 = vmatprep.subr.mxu1 %v5010_v5  ;;  %v5350_v59 = vpop.permute.xlu0 %5349  ;;  %vm19621_vm2 = vmmov %vm19620_vm1 }
 0x493   :  { %12670 = vmatprep.subr.msk.mxu0 %vm2582_vm14, %v5015_v53  ;;  %5297 = vmatpush1.msra.mxu1 %v5012_v44  ;;  %vm19622_vm4 = vmmov %vm19620_vm1 }
 0x494   :  { %6478 = vrot.lane.b32.xlu1 %v16447_v50, %s13074_s18  ;;  %6476 = vrot.lane.b32.xlu0 %v16461_v48, %s13074_s18  ;;  %v5391_v18 = vsel %vm19622_vm4, %v17181_v62, %v17201_v22  ;;  %vm19623_vm0 = vmmov %vm19620_vm1 }
 0x495   :  { %12666 = vmatmul.mubr.msk.f32.vlgmr.msra.gmra.mxu0 %vm2575_vm11, %v17153_v56  ;;  %v5356_v0 = vpop.permute.xlu1 %5355  ;;  %12675 = vmatmul.mubr.msk.f32.vlgmr.msra.gmra.mxu1 %vm2575_vm11, %v17153_v56  ;;  %vm19624_vm5 = vmmov %vm19623_vm0 }
 0x496   :  { %12671 = vmatpush1.msk.msra.mxu0 %vm2582_vm14, %v5017_v34  ;;  %v5354_v39 = vpop.permute.xlu0 %5353  ;;  %5259 = vmatprep.mubr.f32.mxu0 %v19542_v13  ;;  %v5389_v16 = vsel %vm19618_vm13, %v17201_v22, %v5356_v0  ;;  %vm19625_vm6 = vmmov %vm19623_vm0 }
 0x497   :  { %5225 = vmatprep.subr.mxu0 %v5014_v60  ;;  %v5392_v28 = vsel %vm19614_vm12, %v5350_v59, %v5354_v39  ;;  %5557 = vmatprep.mubr.f32.mxu1 %v19542_v13  ;;  %vm19626_vm7 = vmmov %vm19623_vm0  ;;  %v12689_v60 = vld [vmem:[%s19070_s2 + $0x1c] sm:$0x7] }
 0x498   :  { %5226 = vmatpush1.msra.mxu0 %v5016_v55  ;;  %6482 = vrot.lane.b32.xlu1 %v16458_v25, %s13074_s18  ;;  %vm19627_vm15 = vmmov %vm19623_vm0 }
 0x499   :  { %6480 = vrot.lane.b32.xlu0 %v16467_v29, %s13074_s18  ;;  %12677 = vmatprep.subr.msk.mxu0 %vm2582_vm14, %v5392_v28  ;;  %v17240_v31 = vpop.permute.xlu1 %5359  ;;  %vm19628_vm12 = vmmov %vm19623_vm0 }
 0x49a   :  { %v5358_v57 = vpop.permute.xlu0 %5357  ;;  %12672 = vmatmul.mubr.msk.f32.vlgmr.msra.gmra.mxu0 %vm2575_vm11, %v17153_v56  ;;  %v5387_v41 = vsel %vm19617_vm8, %v5356_v0, %v17240_v31 }
 0x49b   :  { %5486 = vmatprep.mubr.f32.mxu0 %v19542_v13  ;;  %v5390_v15 = vsel %vm19616_vm9, %v5354_v39, %v5358_v57  ;;  %vm19630_vm9 = vmmov %vm19623_vm0 }
 0x49c   :  { %6823 = vrot.lane.b32.xlu1 %v16340_v11, %s13075_s26 }
 0x49d   :  { %6484 = vrot.lane.b32.xlu0 %v16474_v1, %s13074_s18  ;;  %v5364_v36 = vpop.permute.xlu1 %5363 }
 0x49e   :  { %v5362_v42 = vpop.permute.xlu0 %5361  ;;  %v5385_v23 = vsel %vm19630_vm9, %v17240_v31, %v5364_v36 }
 0x49f   :  { %v5388_v26 = vsel %vm19615_vm10, %v5358_v57, %v5362_v42  ;;  %vm19629_vm10 = vcmp.lt.s32.totalorder %v13701_v6, 20 }
 0x4a0   :  { %6827 = vrot.lane.b32.xlu1 %v16361_v27, %s13075_s26  ;;  %12680 = vmatprep.subr.msk.mxu1 %vm2582_vm14, %v5388_v26  ;;  %vm19631_vm8 = vmmov %vm19629_vm10 }
 0x4a1   :  { %6825 = vrot.lane.b32.xlu0 %v16368_v46, %s13075_s26  ;;  %12681 = vmatpush1.msk.msra.mxu1 %vm2582_vm14, %v5390_v15  ;;  %v5368_v52 = vpop.permute.xlu1 %5367  ;;  %vm19632_vm13 = vmmov %vm19631_vm8 }
 0x4a2   :  { %5523 = vmatprep.subr.mxu1 %v5387_v41  ;;  %v5366_v10 = vpop.permute.xlu0 %5365  ;;  %v5383_v30 = vsel %vm19628_vm12, %v5364_v36, %v5368_v52 }
 0x4a3   :  { %5524 = vmatpush1.msra.mxu1 %v5389_v16  ;;  %v5386_v17 = vsel %vm19627_vm15, %v5362_v42, %v5366_v10 }
 0x4a4   :  { %6831 = vrot.lane.b32.xlu1 %v16393_v43, %s13075_s26  ;;  %12682 = vmatmul.mubr.msk.f32.vlgmr.msra.gmra.mxu1 %vm2575_vm11, %v12676_v24 }
 0x4a5   :  { %6829 = vrot.lane.b32.xlu0 %v16400_v8, %s13075_s26  ;;  %v5372_v38 = vpop.permute.xlu1 %5371  ;;  %5699 = vmatprep.mubr.f32.mxu1 %v19542_v13 }
 0x4a6   :  { %v5370_v51 = vpop.permute.xlu0 %5369  ;;  %v5381_v33 = vsel %vm19626_vm7, %v5368_v52, %v5372_v38 }
 0x4a7   :  { %v5384_v47 = vsel %vm19625_vm6, %v5366_v10, %v5370_v51 }
 0x4a8   :  { %6835 = vrot.lane.b32.xlu1 %v16406_v37, %s13075_s26 }
 0x4a9   :  { %6833 = vrot.lane.b32.xlu0 %v16409_v9, %s13075_s26  ;;  %v5376_v61 = vpop.permute.xlu1 %5375 }
 0x4aa   :  { %v5374_v14 = vpop.permute.xlu0 %5373  ;;  %v5393_v35 = vsel %vm19623_vm0, %v5376_v61, %v17181_v62  ;;  %v5379_v32 = vsel %vm19624_vm5, %v5372_v38, %v5376_v61 }
 0x4ab   :  { %v5382_v56 = vsel %vm19621_vm2, %v5370_v51, %v5374_v14 }
 0x4ac   :  { %6839 = vrot.lane.b32.xlu1 %v16424_v21, %s13075_s26 }
 0x4ad   :  { %6837 = vrot.lane.b32.xlu0 %v16421_v20, %s13075_s26  ;;  %v17282_v40 = vpop.permute.xlu1 %5716 }
 0x4ae   :  { %v5378_v3 = vpop.permute.xlu0 %5377 }
 0x4af   :  { %v5394_v49 = vsel %vm19619_vm3, %v5378_v3, %v5350_v59  ;;  %v5380_v2 = vsel %vm19620_vm1, %v5374_v14, %v5378_v3  ;;  %vm19633_vm3 = vmmov %vm19631_vm8 }
 0x4b0   :  { %6843 = vrot.lane.b32.xlu1 %v16439_v45, %s13075_s26  ;;  %12678 = vmatpush1.msk.msra.mxu0 %vm2582_vm14, %v5394_v49  ;;  %vm19634_vm1 = vmmov %vm19633_vm3 }
 0x4b1   :  { %6841 = vrot.lane.b32.xlu0 %v16451_v19, %s13075_s26  ;;  %12686 = vmatprep.subr.msk.mxu1 %vm2582_vm14, %v5380_v2  ;;  %v17300_v54 = vpop.permute.xlu1 %5720  ;;  %vm19635_vm2 = vmmov %vm19634_vm1 }
 0x4b2   :  { %5452 = vmatprep.subr.mxu0 %v5391_v18  ;;  %12687 = vmatpush1.msk.msra.mxu1 %vm2582_vm14, %v5382_v56  ;;  %v5719_v7 = vpop.permute.xlu0 %5718  ;;  %vm19636_vm4 = vmmov %vm19634_vm1 }
 0x4b3   :  { %5453 = vmatpush1.msra.mxu0 %v5393_v35  ;;  %5665 = vmatprep.subr.mxu1 %v5379_v32  ;;  %vm19637_vm0 = vmmov %vm19634_vm1 }
 0x4b4   :  { %12683 = vmatprep.subr.msk.mxu0 %vm2582_vm14, %v5384_v47  ;;  %5666 = vmatpush1.msra.mxu1 %v5381_v33  ;;  %v5760_v41 = vsel %vm19637_vm0, %v17282_v40, %v17300_v54  ;;  %vm19638_vm5 = vmmov %vm19637_vm0 }
 0x4b5   :  { %6851 = vrot.lane.b32.xlu1 %v16458_v25, %s13075_s26  ;;  %6853 = vrot.lane.b32.xlu0 %v16474_v1, %s13075_s26  ;;  %v5725_v62 = vpop.permute.xlu1 %5724  ;;  %vm19639_vm6 = vmmov %vm19637_vm0 }
 0x4b6   :  { %12679 = vmatmul.mubr.msk.f32.vlgmr.msra.gmra.mxu0 %vm2575_vm11, %v12676_v24  ;;  %v5723_v4 = vpop.permute.xlu0 %5722  ;;  %12688 = vmatmul.mubr.msk.f32.vlgmr.msra.gmra.mxu1 %vm2575_vm11, %v12676_v24  ;;  %v5758_v55 = vsel %vm19634_vm1, %v17300_v54, %v5725_v62  ;;  %vm19640_vm7 = vmmov %vm19637_vm0 }
 0x4b7   :  { %12684 = vmatpush1.msk.msra.mxu0 %vm2582_vm14, %v5386_v17  ;;  %v5761_v12 = vsel %vm19629_vm10, %v5719_v7, %v5723_v4  ;;  %5628 = vmatprep.mubr.f32.mxu0 %v19542_v13  ;;  %vm19641_vm15 = vmmov %vm19637_vm0 }
 0x4b8   :  { %5594 = vmatprep.subr.mxu0 %v5383_v30  ;;  %5926 = vmatprep.mubr.f32.mxu1 %v19542_v13  ;;  %vm19642_vm12 = vmmov %vm19637_vm0 }
 0x4b9   :  { %5595 = vmatpush1.msra.mxu0 %v5385_v23  ;;  %6849 = vrot.lane.b32.xlu1 %v16467_v29, %s13075_s26  ;;  %v17333_v22 = vpop.permute.xlu1 %5728  ;;  %vm19643_vm10 = vmmov %vm19637_vm0 }
 0x4ba   :  { %6845 = vrot.lane.b32.xlu0 %v16461_v48, %s13075_s26  ;;  %12690 = vmatprep.subr.msk.mxu0 %vm2582_vm14, %v5761_v12  ;;  %v5727_v58 = vpop.permute.xlu0 %5726  ;;  %v5756_v0 = vsel %vm19633_vm3, %v5725_v62, %v17333_v22  ;;  %vm19644_vm9 = vmmov %vm19637_vm0 }
 0x4bb   :  { %12685 = vmatmul.mubr.msk.f32.vlgmr.msra.gmra.mxu0 %vm2575_vm11, %v12676_v24  ;;  %v5759_v44 = vsel %vm19632_vm13, %v5723_v4, %v5727_v58  ;;  %vm19646_vm13 = vcmp.lt.s32.totalorder %v13701_v6, 19  ;;  %v12702_v4 = vld [vmem:[%s19070_s2 + $0x20] sm:$0x7] }
 0x4bc   :  { %5855 = vmatprep.mubr.f32.mxu0 %v19542_v13  ;;  %vm19647_vm3 = vmmov %vm19646_vm13 }
 0x4bd   :  { %7194 = vrot.lane.b32.xlu1 %v16368_v46, %s13076_s8  ;;  %v5733_v5 = vpop.permute.xlu1 %5732  ;;  %vm19648_vm1 = vmmov %vm19647_vm3 }
 0x4be   :  { %6847 = vrot.lane.b32.xlu0 %v16447_v50, %s13075_s26  ;;  %v5731_v59 = vpop.permute.xlu0 %5730 }
 0x4bf   :  { %v5757_v53 = vsel %vm19631_vm8, %v5727_v58, %v5731_v59  ;;  %vm19645_vm8 = vmmov %vm19637_vm0 }
 0x4c0   :  { %12693 = vmatprep.subr.msk.mxu1 %vm2582_vm14, %v5757_v53  ;;  %v5754_v56 = vsel %vm19645_vm8, %v17333_v22, %v5733_v5  ;;  %vm19651_vm0 = vmmov %vm19648_vm1 }
 0x4c1   :  { %7202 = vrot.lane.b32.xlu1 %v16409_v9, %s13076_s8  ;;  %12694 = vmatpush1.msk.msra.mxu1 %vm2582_vm14, %v5759_v44  ;;  %v5737_v34 = vpop.permute.xlu1 %5736  ;;  %vm19659_vm8 = vmmov %vm19651_vm0 }
 0x4c2   :  { %7198 = vrot.lane.b32.xlu0 %v16400_v8, %s13076_s8  ;;  %5892 = vmatprep.subr.mxu1 %v5756_v0  ;;  %v5735_v39 = vpop.permute.xlu0 %5734  ;;  %v5752_v49 = vsel %vm19644_vm9, %v5733_v5, %v5737_v34  ;;  %vm19658_vm9 = vmmov %vm19651_vm0 }
 0x4c3   :  { %5893 = vmatpush1.msra.mxu1 %v5758_v55  ;;  %v5755_v3 = vsel %vm19643_vm10, %v5731_v59, %v5735_v39  ;;  %vm19657_vm10 = vmmov %vm19651_vm0 }
 0x4c4   :  { %12695 = vmatmul.mubr.msk.f32.vlgmr.msra.gmra.mxu1 %vm2575_vm11, %v12689_v60 }
 0x4c5   :  { %7222 = vrot.lane.b32.xlu1 %v16474_v1, %s13076_s8  ;;  %v5741_v28 = vpop.permute.xlu1 %5740  ;;  %6068 = vmatprep.mubr.f32.mxu1 %v19542_v13 }
 0x4c6   :  { %7206 = vrot.lane.b32.xlu0 %v16421_v20, %s13076_s8  ;;  %v5739_v31 = vpop.permute.xlu0 %5738  ;;  %v5750_v14 = vsel %vm19642_vm12, %v5737_v34, %v5741_v28  ;;  %vm19656_vm12 = vmmov %vm19651_vm0 }
 0x4c7   :  { %v5753_v61 = vsel %vm19641_vm15, %v5735_v39, %v5739_v31  ;;  %vm19655_vm15 = vmmov %vm19651_vm0 }
 0x4c9   :  { %7196 = vrot.lane.b32.xlu1 %v16361_v27, %s13076_s8  ;;  %v5745_v57 = vpop.permute.xlu1 %5744 }
 0x4ca   :  { %7192 = vrot.lane.b32.xlu0 %v16340_v11, %s13076_s8  ;;  %v5743_v36 = vpop.permute.xlu0 %5742  ;;  %v5762_v16 = vsel %vm19639_vm6, %v5745_v57, %v17282_v40  ;;  %v5748_v38 = vsel %vm19640_vm7, %v5741_v28, %v5745_v57  ;;  %vm19653_vm6 = vmmov %vm19651_vm0 }
 0x4cb   :  { %v5751_v24 = vsel %vm19638_vm5, %v5739_v31, %v5743_v36  ;;  %vm19652_vm5 = vmmov %vm19651_vm0 }
 0x4cc   :  { %vm19654_vm7 = vmmov %vm19651_vm0 }
 0x4cd   :  { %7204 = vrot.lane.b32.xlu1 %v16406_v37, %s13076_s8  ;;  %v17375_v42 = vpop.permute.xlu1 %6085 }
 0x4ce   :  { %7200 = vrot.lane.b32.xlu0 %v16393_v43, %s13076_s8  ;;  %v5747_v26 = vpop.permute.xlu0 %5746 }
 0x4cf   :  { %v5763_v15 = vsel %vm19635_vm2, %v5747_v26, %v5719_v7  ;;  %v5749_v52 = vsel %vm19636_vm4, %v5743_v36, %v5747_v26  ;;  %vm19649_vm2 = vmmov %vm19648_vm1 }
 0x4d0   :  { %12691 = vmatpush1.msk.msra.mxu0 %vm2582_vm14, %v5763_v15  ;;  %12699 = vmatprep.subr.msk.mxu1 %vm2582_vm14, %v5749_v52  ;;  %vm19650_vm4 = vmmov %vm19648_vm1 }
 0x4d1   :  { %7210 = vrot.lane.b32.xlu1 %v16451_v19, %s13076_s8  ;;  %5821 = vmatprep.subr.mxu0 %v5760_v41  ;;  %v17393_v10 = vpop.permute.xlu1 %6089 }
 0x4d2   :  { %7220 = vrot.lane.b32.xlu0 %v16458_v25, %s13076_s8  ;;  %12700 = vmatpush1.msk.msra.mxu1 %vm2582_vm14, %v5751_v24  ;;  %v6088_v51 = vpop.permute.xlu0 %6087  ;;  %v6129_v0 = vsel %vm19653_vm6, %v17375_v42, %v17393_v10 }
 0x4d3   :  { %5822 = vmatpush1.msra.mxu0 %v5762_v16  ;;  %6034 = vmatprep.subr.mxu1 %v5748_v38 }
 0x4d4   :  { %12696 = vmatprep.subr.msk.mxu0 %vm2582_vm14, %v5753_v61  ;;  %6035 = vmatpush1.msra.mxu1 %v5750_v14 }
 0x4d5   :  { %7218 = vrot.lane.b32.xlu1 %v16467_v29, %s13076_s8  ;;  %12692 = vmatmul.mubr.msk.f32.vlgmr.msra.gmra.mxu0 %vm2575_vm11, %v12689_v60  ;;  %v6094_v40 = vpop.permute.xlu1 %6093 }
 0x4d6   :  { %7214 = vrot.lane.b32.xlu0 %v16461_v48, %s13076_s8  ;;  %12697 = vmatpush1.msk.msra.mxu0 %vm2582_vm14, %v5755_v3  ;;  %v6092_v2 = vpop.permute.xlu0 %6091  ;;  %v6127_v12 = vsel %vm19650_vm4, %v17393_v10, %v6094_v40 }
 0x4d7   :  { %5963 = vmatprep.subr.mxu0 %v5752_v49  ;;  %v6130_v18 = vsel %vm19646_vm13, %v6088_v51, %v6092_v2  ;;  %12701 = vmatmul.mubr.msk.f32.vlgmr.msra.gmra.mxu1 %vm2575_vm11, %v12689_v60  ;;  %vm19660_vm13 = vmmov %vm19651_vm0  ;;  %v12715_v49 = vld [vmem:[%s19070_s2 + $0x24] sm:$0x7] }
 0x4d8   :  { %5964 = vmatpush1.msra.mxu0 %v5754_v56  ;;  %5997 = vmatprep.mubr.f32.mxu0 %v19542_v13 }
 0x4d9   :  { %7212 = vrot.lane.b32.xlu1 %v16439_v45, %s13076_s8  ;;  %12703 = vmatprep.subr.msk.mxu0 %vm2582_vm14, %v6130_v18  ;;  %v17428_v54 = vpop.permute.xlu1 %6097 }
 0x4da   :  { %7208 = vrot.lane.b32.xlu0 %v16424_v21, %s13076_s8  ;;  %v6096_v35 = vpop.permute.xlu0 %6095  ;;  %12698 = vmatmul.mubr.msk.f32.vlgmr.msra.gmra.mxu0 %vm2575_vm11, %v12689_v60  ;;  %v6125_v17 = vsel %vm19649_vm2, %v6094_v40, %v17428_v54 }
 0x4db   :  { %6295 = vmatprep.mubr.f32.mxu1 %v19542_v13  ;;  %6224 = vmatprep.mubr.f32.mxu0 %v19542_v13  ;;  %v6128_v33 = vsel %vm19648_vm1, %v6092_v2, %v6096_v35  ;;  %vm19662_vm1 = vcmp.lt.s32.totalorder %v13701_v6, 18 }
 0x4dc   :  { %vm19663_vm2 = vmmov %vm19662_vm1 }
 0x4dd   :  { %7888 = vrot.lane.b32.xlu1 %v16400_v8, %s13077_s22  ;;  %v6102_v32 = vpop.permute.xlu1 %6101  ;;  %vm19664_vm4 = vmmov %vm19662_vm1 }
 0x4de   :  { %7216 = vrot.lane.b32.xlu0 %v16447_v50, %s13076_s8  ;;  %v6100_v7 = vpop.permute.xlu0 %6099 }
 0x4df   :  { %v6126_v47 = vsel %vm19647_vm3, %v6096_v35, %v6100_v7  ;;  %vm19661_vm3 = vmmov %vm19651_vm0 }
 0x4e0   :  { %12706 = vmatprep.subr.msk.mxu1 %vm2582_vm14, %v6126_v47  ;;  %v6123_v41 = vsel %vm19661_vm3, %v17428_v54, %v6102_v32 }
 0x4e1   :  { %7896 = vrot.lane.b32.xlu1 %v16421_v20, %s13077_s22  ;;  %12707 = vmatpush1.msk.msra.mxu1 %vm2582_vm14, %v6128_v33  ;;  %v6106_v62 = vpop.permute.xlu1 %6105 }
 0x4e2   :  { %7892 = vrot.lane.b32.xlu0 %v16409_v9, %s13077_s22  ;;  %6261 = vmatprep.subr.mxu1 %v6125_v17  ;;  %v6104_v30 = vpop.permute.xlu0 %6103  ;;  %v6121_v15 = vsel %vm19660_vm13, %v6102_v32, %v6106_v62 }
 0x4e3   :  { %6262 = vmatpush1.msra.mxu1 %v6127_v12  ;;  %v6124_v26 = vsel %vm19659_vm8, %v6100_v7, %v6104_v30 }
 0x4e4   :  { %12708 = vmatmul.mubr.msk.f32.vlgmr.msra.gmra.mxu1 %vm2575_vm11, %v12702_v4 }
 0x4e5   :  { %7884 = vrot.lane.b32.xlu1 %v16368_v46, %s13077_s22  ;;  %v6110_v23 = vpop.permute.xlu1 %6109  ;;  %6437 = vmatprep.mubr.f32.mxu1 %v19542_v13 }
 0x4e6   :  { %7900 = vrot.lane.b32.xlu0 %v16451_v19, %s13077_s22  ;;  %v6108_v22 = vpop.permute.xlu0 %6107  ;;  %v6119_v36 = vsel %vm19658_vm9, %v6106_v62, %v6110_v23 }
 0x4e7   :  { %v6122_v57 = vsel %vm19657_vm10, %v6104_v30, %v6108_v22 }
 0x4e9   :  { %7890 = vrot.lane.b32.xlu1 %v16393_v43, %s13077_s22  ;;  %v6114_v58 = vpop.permute.xlu1 %6113 }
 0x4ea   :  { %7886 = vrot.lane.b32.xlu0 %v16361_v27, %s13077_s22  ;;  %v6112_v5 = vpop.permute.xlu0 %6111  ;;  %v6131_v55 = vsel %vm19655_vm15, %v6114_v58, %v17375_v42  ;;  %v6117_v28 = vsel %vm19656_vm12, %v6110_v23, %v6114_v58 }
 0x4eb   :  { %v6120_v60 = vsel %vm19654_vm7, %v6108_v22, %v6112_v5 }
 0x4ed   :  { %7898 = vrot.lane.b32.xlu1 %v16424_v21, %s13077_s22  ;;  %v17470_v59 = vpop.permute.xlu1 %6454 }
 0x4ee   :  { %7894 = vrot.lane.b32.xlu0 %v16406_v37, %s13077_s22  ;;  %v6116_v53 = vpop.permute.xlu0 %6115 }
 0x4ef   :  { %v6132_v44 = vsel %vm19651_vm0, %v6116_v53, %v6088_v51  ;;  %v6118_v34 = vsel %vm19652_vm5, %v6112_v5, %v6116_v53  ;;  %vm19665_vm0 = vmmov %vm19662_vm1 }
 0x4f0   :  { %12704 = vmatpush1.msk.msra.mxu0 %vm2582_vm14, %v6132_v44  ;;  %12712 = vmatprep.subr.msk.mxu1 %vm2582_vm14, %v6118_v34  ;;  %vm19666_vm5 = vmmov %vm19665_vm0 }
 0x4f1   :  { %7904 = vrot.lane.b32.xlu1 %v16461_v48, %s13077_s22  ;;  %6190 = vmatprep.subr.mxu0 %v6129_v0  ;;  %v17488_v39 = vpop.permute.xlu1 %6458  ;;  %vm19667_vm6 = vmmov %vm19665_vm0 }
 0x4f2   :  { %7882 = vrot.lane.b32.xlu0 %v16340_v11, %s13077_s22  ;;  %12713 = vmatpush1.msk.msra.mxu1 %vm2582_vm14, %v6120_v60  ;;  %v6457_v31 = vpop.permute.xlu0 %6456  ;;  %vm19668_vm7 = vmmov %vm19665_vm0 }
 0x4f3   :  { %6191 = vmatpush1.msra.mxu0 %v6131_v55  ;;  %6403 = vmatprep.subr.mxu1 %v6117_v28  ;;  %vm19669_vm15 = vmmov %vm19665_vm0 }
 0x4f4   :  { %12709 = vmatprep.subr.msk.mxu0 %vm2582_vm14, %v6122_v57  ;;  %6404 = vmatpush1.msra.mxu1 %v6119_v36  ;;  %vm19670_vm12 = vmmov %vm19665_vm0 }
 0x4f5   :  { %7912 = vrot.lane.b32.xlu1 %v16474_v1, %s13077_s22  ;;  %12705 = vmatmul.mubr.msk.f32.vlgmr.msra.gmra.mxu0 %vm2575_vm11, %v12702_v4  ;;  %v6463_v42 = vpop.permute.xlu1 %6462  ;;  %vm19671_vm10 = vmmov %vm19665_vm0 }
 0x4f6   :  { %7908 = vrot.lane.b32.xlu0 %v16467_v29, %s13077_s22  ;;  %12710 = vmatpush1.msk.msra.mxu0 %vm2582_vm14, %v6124_v26  ;;  %v6461_v52 = vpop.permute.xlu0 %6460  ;;  %v6496_v56 = vsel %vm19666_vm5, %v17488_v39, %v6463_v42  ;;  %vm19672_vm9 = vmmov %vm19665_vm0 }
 0x4f7   :  { %6332 = vmatprep.subr.mxu0 %v6121_v15  ;;  %v6499_v24 = vsel %vm19662_vm1, %v6457_v31, %v6461_v52  ;;  %12714 = vmatmul.mubr.msk.f32.vlgmr.msra.gmra.mxu1 %vm2575_vm11, %v12702_v4  ;;  %vm19673_vm8 = vmmov %vm19665_vm0  ;;  %v12728_v15 = vld [vmem:[%s19070_s2 + $0x28] sm:$0x7] }
 0x4f8   :  { %6333 = vmatpush1.msra.mxu0 %v6123_v41  ;;  %6366 = vmatprep.mubr.f32.mxu0 %v19542_v13  ;;  %vm19674_vm13 = vmmov %vm19665_vm0 }
 0x4f9   :  { %7906 = vrot.lane.b32.xlu1 %v16447_v50, %s13077_s22  ;;  %12716 = vmatprep.subr.msk.mxu0 %vm2582_vm14, %v6499_v24  ;;  %v17523_v10 = vpop.permute.xlu1 %6466  ;;  %vm19675_vm3 = vmmov %vm19665_vm0 }
 0x4fa   :  { %7902 = vrot.lane.b32.xlu0 %v16439_v45, %s13077_s22  ;;  %v6465_v16 = vpop.permute.xlu0 %6464  ;;  %12711 = vmatmul.mubr.msk.f32.vlgmr.msra.gmra.mxu0 %vm2575_vm11, %v12702_v4  ;;  %v6494_v40 = vsel %vm19665_vm0, %v6463_v42, %v17523_v10  ;;  %v6498_v4 = vsel %vm19670_vm12, %v17470_v59, %v17488_v39  ;;  %vm19676_vm1 = vmmov %vm19665_vm0 }
 0x4fb   :  { %6664 = vmatprep.mubr.f32.mxu1 %v19542_v13  ;;  %6593 = vmatprep.mubr.f32.mxu0 %v19542_v13  ;;  %v6497_v14 = vsel %vm19664_vm4, %v6461_v52, %v6465_v16  ;;  %vm19678_vm4 = vmmov %vm19665_vm0 }
 0x4fd   :  { %8257 = vrot.lane.b32.xlu1 %v16400_v8, %s13078_s7  ;;  %v17532_v38 = vpop.permute.xlu1 %6470 }
 0x4fe   :  { %7910 = vrot.lane.b32.xlu0 %v16458_v25, %s13077_s22  ;;  %v6469_v51 = vpop.permute.xlu0 %6468  ;;  %v6492_v60 = vsel %vm19678_vm4, %v17523_v10, %v17532_v38 }
 0x4ff   :  { %v6495_v61 = vsel %vm19663_vm2, %v6465_v16, %v6469_v51  ;;  %vm19677_vm2 = vcmp.lt.s32.totalorder %v13701_v6, 2 }
 0x500   :  { %12719 = vmatprep.subr.msk.mxu1 %vm2582_vm14, %v6495_v61  ;;  %vm19679_vm0 = vmmov %vm19677_vm2 }
 0x501   :  { %8265 = vrot.lane.b32.xlu1 %v16421_v20, %s13078_s7  ;;  %12720 = vmatpush1.msk.msra.mxu1 %vm2582_vm14, %v6497_v14  ;;  %v6475_v3 = vpop.permute.xlu1 %6474  ;;  %vm19680_vm5 = vmmov %vm19679_vm0 }
 0x502   :  { %8261 = vrot.lane.b32.xlu0 %v16409_v9, %s13078_s7  ;;  %6630 = vmatprep.subr.mxu1 %v6494_v40  ;;  %v6473_v2 = vpop.permute.xlu0 %6472  ;;  %v6490_v34 = vsel %vm19676_vm1, %v17532_v38, %v6475_v3  ;;  %vm19684_vm12 = vmmov %vm19679_vm0 }
 0x503   :  { %6631 = vmatpush1.msra.mxu1 %v6496_v56  ;;  %v6493_v53 = vsel %vm19675_vm3, %v6469_v51, %v6473_v2  ;;  %vm19689_vm3 = vmmov %vm19679_vm0 }
 0x504   :  { %12721 = vmatmul.mubr.msk.f32.vlgmr.msra.gmra.mxu1 %vm2575_vm11, %v12715_v49  ;;  %vm19690_vm1 = vmmov %vm19679_vm0 }
 0x505   :  { %8253 = vrot.lane.b32.xlu1 %v16368_v46, %s13078_s7  ;;  %6806 = vmatprep.mubr.f32.mxu1 %v19542_v13  ;;  %vm19692_vm4 = vmmov %vm19679_vm0 }
 0x506   :  { %8269 = vrot.lane.b32.xlu0 %v16451_v19, %s13078_s7  ;;  %v6479_v18 = vpop.permute.xlu1 %6478  ;;  %v6477_v54 = vpop.permute.xlu0 %6476 }
 0x507   :  { %v6491_v58 = vsel %vm19673_vm8, %v6473_v2, %v6477_v54  ;;  %v6488_v5 = vsel %vm19674_vm13, %v6475_v3, %v6479_v18  ;;  %vm19687_vm8 = vmmov %vm19679_vm0 }
 0x508   :  { %vm19688_vm13 = vmmov %vm19679_vm0 }
 0x509   :  { %8259 = vrot.lane.b32.xlu1 %v16393_v43, %s13078_s7 }
 0x50a   :  { %8255 = vrot.lane.b32.xlu0 %v16361_v27, %s13078_s7  ;;  %v6483_v35 = vpop.permute.xlu1 %6482 }
 0x50b   :  { %v6481_v32 = vpop.permute.xlu0 %6480  ;;  %v6500_v12 = vsel %vm19671_vm10, %v6483_v35, %v17470_v59  ;;  %v6486_v23 = vsel %vm19672_vm9, %v6479_v18, %v6483_v35  ;;  %vm19685_vm10 = vmmov %vm19679_vm0 }
 0x50c   :  { %v6489_v17 = vsel %vm19669_vm15, %v6477_v54, %v6481_v32  ;;  %vm19683_vm15 = vmmov %vm19679_vm0 }
 0x50d   :  { %8267 = vrot.lane.b32.xlu1 %v16424_v21, %s13078_s7  ;;  %vm19686_vm9 = vmmov %vm19679_vm0 }
 0x50e   :  { %8263 = vrot.lane.b32.xlu0 %v16406_v37, %s13078_s7  ;;  %v17569_v7 = vpop.permute.xlu1 %6823 }
 0x50f   :  { %v6485_v47 = vpop.permute.xlu0 %6484 }
 0x510   :  { %v6501_v33 = vsel %vm19667_vm6, %v6485_v47, %v6457_v31  ;;  %v6487_v62 = vsel %vm19668_vm7, %v6481_v32, %v6485_v47  ;;  %vm19681_vm6 = vmmov %vm19679_vm0 }
 0x511   :  { %8273 = vrot.lane.b32.xlu1 %v16461_v48, %s13078_s7  ;;  %12717 = vmatpush1.msk.msra.mxu0 %vm2582_vm14, %v6501_v33  ;;  %vm19682_vm7 = vmmov %vm19679_vm0 }
 0x512   :  { %8251 = vrot.lane.b32.xlu0 %v16340_v11, %s13078_s7  ;;  %12725 = vmatprep.subr.msk.mxu1 %vm2582_vm14, %v6487_v62  ;;  %v6828_v30 = vpop.permute.xlu1 %6827 }
 0x513   :  { %6559 = vmatprep.subr.mxu0 %v6498_v4  ;;  %12726 = vmatpush1.msk.msra.mxu1 %vm2582_vm14, %v6489_v17  ;;  %v6826_v22 = vpop.permute.xlu0 %6825  ;;  %v6867_v38 = vsel %vm19684_vm12, %v17569_v7, %v6828_v30 }
 0x514   :  { %6560 = vmatpush1.msra.mxu0 %v6500_v12  ;;  %6772 = vmatprep.subr.mxu1 %v6486_v23 }
 0x515   :  { %12722 = vmatprep.subr.msk.mxu0 %vm2582_vm14, %v6491_v58  ;;  %6773 = vmatpush1.msra.mxu1 %v6488_v5 }
 0x516   :  { %8281 = vrot.lane.b32.xlu1 %v16474_v1, %s13078_s7  ;;  %8277 = vrot.lane.b32.xlu0 %v16467_v29, %s13078_s7  ;;  %v6832_v59 = vpop.permute.xlu1 %6831 }
 0x517   :  { %12718 = vmatmul.mubr.msk.f32.vlgmr.msra.gmra.mxu0 %vm2575_vm11, %v12715_v49  ;;  %v6830_v44 = vpop.permute.xlu0 %6829  ;;  %12727 = vmatmul.mubr.msk.f32.vlgmr.msra.gmra.mxu1 %vm2575_vm11, %v12715_v49  ;;  %v6865_v41 = vsel %vm19682_vm7, %v6828_v30, %v6832_v59 }
 0x518   :  { %12723 = vmatpush1.msk.msra.mxu0 %vm2582_vm14, %v6493_v53  ;;  %v6868_v0 = vsel %vm19677_vm2, %v6826_v22, %v6830_v44  ;;  %6735 = vmatprep.mubr.f32.mxu0 %v19542_v13  ;;  %vm19691_vm2 = vmmov %vm19679_vm0 }
 0x519   :  { %6701 = vmatprep.subr.mxu0 %v6490_v34  ;;  %7033 = vmatprep.mubr.f32.mxu1 %v19542_v13 }
 0x51a   :  { %6702 = vmatpush1.msra.mxu0 %v6492_v60  ;;  %8275 = vrot.lane.b32.xlu1 %v16447_v50, %s13078_s7  ;;  %v6836_v39 = vpop.permute.xlu1 %6835 }
 0x51b   :  { %8271 = vrot.lane.b32.xlu0 %v16439_v45, %s13078_s7  ;;  %12729 = vmatprep.subr.msk.mxu0 %vm2582_vm14, %v6868_v0  ;;  %v6834_v55 = vpop.permute.xlu0 %6833  ;;  %v6863_v42 = vsel %vm19681_vm6, %v6832_v59, %v6836_v39  ;;  %v12741_v0 = vld [vmem:[%s19070_s2 + $0x2c] sm:$0x7] }
 0x51c   :  { %12724 = vmatmul.mubr.msk.f32.vlgmr.msra.gmra.mxu0 %vm2575_vm11, %v12715_v49  ;;  %v6866_v36 = vsel %vm19680_vm5, %v6830_v44, %v6834_v55  ;;  %vm19693_vm5 = vcmp.lt.s32.totalorder %v13701_v6, 1 }
 0x51d   :  { %6962 = vmatprep.mubr.f32.mxu0 %v19542_v13  ;;  %vm19694_vm6 = vmmov %vm19693_vm5 }
 0x51e   :  { %8626 = vrot.lane.b32.xlu1 %v16400_v8, %s13079_s16  ;;  %v6840_v28 = vpop.permute.xlu1 %6839  ;;  %vm19695_vm7 = vmmov %vm19693_vm5 }
 0x51f   :  { %8279 = vrot.lane.b32.xlu0 %v16458_v25, %s13078_s7  ;;  %v6838_v31 = vpop.permute.xlu0 %6837  ;;  %v6861_v35 = vsel %vm19691_vm2, %v6836_v39, %v6840_v28  ;;  %vm19697_vm12 = vmmov %vm19693_vm5 }
 0x520   :  { %v6864_v57 = vsel %vm19679_vm0, %v6834_v55, %v6838_v31 }
 0x521   :  { %12732 = vmatprep.subr.msk.mxu1 %vm2582_vm14, %v6864_v57 }
 0x522   :  { %8634 = vrot.lane.b32.xlu1 %v16421_v20, %s13079_s16  ;;  %12733 = vmatpush1.msk.msra.mxu1 %vm2582_vm14, %v6866_v36  ;;  %v6844_v26 = vpop.permute.xlu1 %6843 }
 0x523   :  { %8630 = vrot.lane.b32.xlu0 %v16409_v9, %s13079_s16  ;;  %6999 = vmatprep.subr.mxu1 %v6863_v42  ;;  %v6842_v52 = vpop.permute.xlu0 %6841  ;;  %v6859_v18 = vsel %vm19690_vm1, %v6840_v28, %v6844_v26 }
 0x524   :  { %7000 = vmatpush1.msra.mxu1 %v6865_v41  ;;  %v6862_v2 = vsel %vm19689_vm3, %v6838_v31, %v6842_v52  ;;  %vm19702_vm3 = vmmov %vm19693_vm5 }
 0x525   :  { %12734 = vmatmul.mubr.msk.f32.vlgmr.msra.gmra.mxu1 %vm2575_vm11, %v12728_v15  ;;  %vm19703_vm1 = vmmov %vm19702_vm3 }
 0x526   :  { %8622 = vrot.lane.b32.xlu1 %v16368_v46, %s13079_s16  ;;  %7175 = vmatprep.mubr.f32.mxu1 %v19542_v13  ;;  %vm19704_vm2 = vmmov %vm19703_vm1 }
 0x527   :  { %8638 = vrot.lane.b32.xlu0 %v16451_v19, %s13079_s16  ;;  %v6852_v24 = vpop.permute.xlu1 %6851  ;;  %v6854_v10 = vpop.permute.xlu0 %6853 }
 0x528   :  { %v6870_v16 = vsel %vm19683_vm15, %v6854_v10, %v6826_v22  ;;  %v6869_v51 = vsel %vm19685_vm10, %v6852_v24, %v17569_v7  ;;  %vm19696_vm15 = vmmov %vm19693_vm5 }
 0x529   :  { %12730 = vmatpush1.msk.msra.mxu0 %vm2582_vm14, %v6870_v16  ;;  %vm19698_vm10 = vmmov %vm19693_vm5 }
 0x52a   :  { %8628 = vrot.lane.b32.xlu1 %v16393_v43, %s13079_s16  ;;  %6928 = vmatprep.subr.mxu0 %v6867_v38 }
 0x52b   :  { %8624 = vrot.lane.b32.xlu0 %v16361_v27, %s13079_s16  ;;  %v6850_v61 = vpop.permute.xlu1 %6849  ;;  %6929 = vmatpush1.msra.mxu0 %v6869_v51 }
 0x52c   :  { %v6846_v14 = vpop.permute.xlu0 %6845  ;;  %v6856_v3 = vsel %vm19686_vm9, %v6850_v61, %v6854_v10  ;;  %12731 = vmatmul.mubr.msk.f32.vlgmr.msra.gmra.mxu0 %vm2575_vm11, %v12728_v15  ;;  %vm19699_vm9 = vmmov %vm19693_vm5 }
 0x52d   :  { %v6858_v40 = vsel %vm19687_vm8, %v6846_v14, %v6850_v61  ;;  %v6860_v49 = vsel %vm19688_vm13, %v6842_v52, %v6846_v14  ;;  %12738 = vmatprep.subr.msk.mxu1 %vm2582_vm14, %v6856_v3  ;;  %7104 = vmatprep.mubr.f32.mxu0 %v19542_v13  ;;  %vm19700_vm8 = vmmov %vm19693_vm5  ;;  %v12754_v14 = vld [vmem:[%s19070_s2 + $0x30] sm:$0x7] }
 0x52e   :  { %8636 = vrot.lane.b32.xlu1 %v16424_v21, %s13079_s16  ;;  %12735 = vmatprep.subr.msk.mxu0 %vm2582_vm14, %v6860_v49  ;;  %vm19701_vm13 = vmmov %vm19693_vm5 }
 0x52f   :  { %8632 = vrot.lane.b32.xlu0 %v16406_v37, %s13079_s16  ;;  %12736 = vmatpush1.msk.msra.mxu0 %vm2582_vm14, %v6862_v2  ;;  %v7195_v56 = vpop.permute.xlu1 %7194 }
 0x530   :  { %12739 = vmatpush1.msk.msra.mxu1 %vm2582_vm14, %v6858_v40  ;;  %7070 = vmatprep.subr.mxu0 %v6859_v18  ;;  %v6848_v54 = vpop.permute.xlu0 %6847 }
 0x531   :  { %7071 = vmatpush1.msra.mxu0 %v6861_v35  ;;  %v6855_v32 = vsel %vm19692_vm4, %v6848_v54, %v6852_v24  ;;  %v6857_v7 = vsel %vm19679_vm0, %v6844_v26, %v6848_v54  ;;  %vm19705_vm4 = vmmov %vm19703_vm1 }
 0x532   :  { %8642 = vrot.lane.b32.xlu1 %v16461_v48, %s13079_s16  ;;  %7141 = vmatprep.subr.mxu1 %v6855_v32  ;;  %vm19706_vm0 = vmmov %vm19703_vm1 }
 0x533   :  { %8620 = vrot.lane.b32.xlu0 %v16340_v11, %s13079_s16  ;;  %7142 = vmatpush1.msra.mxu1 %v6857_v7  ;;  %v7203_v47 = vpop.permute.xlu1 %7202 }
 0x534   :  { %v7199_v33 = vpop.permute.xlu0 %7198  ;;  %12737 = vmatmul.mubr.msk.f32.vlgmr.msra.gmra.mxu0 %vm2575_vm11, %v12728_v15  ;;  %12740 = vmatmul.mubr.msk.f32.vlgmr.msra.gmra.mxu1 %vm2575_vm11, %v12728_v15 }
 0x535   :  { %v7237_v62 = vsel %vm19693_vm5, %v7195_v56, %v7199_v33  ;;  %7331 = vmatprep.mubr.f32.mxu0 %v19542_v13  ;;  %7402 = vmatprep.mubr.f32.mxu1 %v19542_v13  ;;  %v7235_v23 = vsel %vm19696_vm15, %v7199_v33, %v7203_v47  ;;  %vm19707_vm5 = vmmov %vm19706_vm0 }
 0x536   :  { %8650 = vrot.lane.b32.xlu1 %v16474_v1, %s13079_s16  ;;  %12742 = vmatprep.subr.msk.mxu0 %vm2582_vm14, %v7237_v62 }
 0x537   :  { %8646 = vrot.lane.b32.xlu0 %v16467_v29, %s13079_s16  ;;  %v7223_v17 = vpop.permute.xlu1 %7222 }
 0x538   :  { %v7239_v4 = vsel %vm19694_vm6, %v7223_v17, %v7195_v56  ;;  %v7207_v30 = vpop.permute.xlu0 %7206  ;;  %vm19708_vm6 = vmmov %vm19706_vm0 }
 0x539   :  { %12743 = vmatpush1.msk.msra.mxu0 %vm2582_vm14, %v7239_v4  ;;  %v7233_v12 = vsel %vm19695_vm7, %v7203_v47, %v7207_v30  ;;  %vm19709_vm7 = vcmp.lt.s32.totalorder %v13701_v6, 127 }
 0x53a   :  { %8644 = vrot.lane.b32.xlu1 %v16447_v50, %s13079_s16  ;;  %12745 = vmatprep.subr.msk.mxu1 %vm2582_vm14, %v7233_v12  ;;  %vm19710_vm15 = vmmov %vm19709_vm7 }
 0x53b   :  { %8640 = vrot.lane.b32.xlu0 %v16439_v45, %s13079_s16  ;;  %12746 = vmatpush1.msk.msra.mxu1 %vm2582_vm14, %v7235_v23  ;;  %v7197_v22 = vpop.permute.xlu1 %7196  ;;  %v12767_v23 = vld [vmem:[%s19070_s2 + $0x34] sm:$0x7] }
 0x53c   :  { %v7193_v58 = vpop.permute.xlu0 %7192 }
 0x53d   :  { %v7236_v5 = vsel %vm19697_vm12, %v7193_v58, %v7197_v22  ;;  %vm19711_vm12 = vmmov %vm19709_vm7 }
 0x53e   :  { %8995 = vrot.lane.b32.xlu1 %v16400_v8, %s13080_s27  ;;  %7297 = vmatprep.subr.mxu0 %v7236_v5 }
 0x53f   :  { %8648 = vrot.lane.b32.xlu0 %v16458_v25, %s13079_s16  ;;  %v7205_v59 = vpop.permute.xlu1 %7204 }
 0x540   :  { %v7201_v53 = vpop.permute.xlu0 %7200 }
 0x541   :  { %v7232_v44 = vsel %vm19698_vm10, %v7201_v53, %v7205_v59  ;;  %v7234_v34 = vsel %vm19699_vm9, %v7197_v22, %v7201_v53  ;;  %vm19712_vm10 = vmmov %vm19709_vm7 }
 0x542   :  { %9003 = vrot.lane.b32.xlu1 %v16421_v20, %s13080_s27  ;;  %7368 = vmatprep.subr.mxu1 %v7232_v44  ;;  %vm19713_vm9 = vmmov %vm19709_vm7 }
 0x543   :  { %8999 = vrot.lane.b32.xlu0 %v16409_v9, %s13080_s27  ;;  %7369 = vmatpush1.msra.mxu1 %v7234_v34  ;;  %v7211_v60 = vpop.permute.xlu1 %7210 }
 0x544   :  { %v7221_v39 = vpop.permute.xlu0 %7220  ;;  %12747 = vmatmul.mubr.msk.f32.vlgmr.msra.gmra.mxu1 %vm2575_vm11, %v12741_v0  ;;  %v7231_v42 = vsel %vm19704_vm2, %v7207_v30, %v7211_v60 }
 0x545   :  { %v7238_v55 = vsel %vm19700_vm8, %v7221_v39, %v7193_v58  ;;  %7544 = vmatprep.mubr.f32.mxu1 %v19542_v13  ;;  %vm19714_vm8 = vmmov %vm19709_vm7 }
 0x546   :  { %8991 = vrot.lane.b32.xlu1 %v16368_v46, %s13080_s27  ;;  %7298 = vmatpush1.msra.mxu0 %v7238_v55 }
 0x547   :  { %9007 = vrot.lane.b32.xlu0 %v16451_v19, %s13080_s27  ;;  %v7219_v28 = vpop.permute.xlu1 %7218  ;;  %12744 = vmatmul.mubr.msk.f32.vlgmr.msra.gmra.mxu0 %vm2575_vm11, %v12741_v0 }
 0x548   :  { %v7215_v31 = vpop.permute.xlu0 %7214  ;;  %v7225_v57 = vsel %vm19701_vm13, %v7219_v28, %v7223_v17  ;;  %7473 = vmatprep.mubr.f32.mxu0 %v19542_v13  ;;  %vm19715_vm13 = vmmov %vm19709_vm7 }
 0x549   :  { %v7227_v36 = vsel %vm19702_vm3, %v7215_v31, %v7219_v28  ;;  %v7229_v26 = vsel %vm19703_vm1, %v7211_v60, %v7215_v31  ;;  %12751 = vmatprep.subr.msk.mxu1 %vm2582_vm14, %v7225_v57  ;;  %vm19716_vm3 = vmmov %vm19709_vm7 }
 0x54a   :  { %8997 = vrot.lane.b32.xlu1 %v16393_v43, %s13080_s27  ;;  %12748 = vmatprep.subr.msk.mxu0 %vm2582_vm14, %v7229_v26  ;;  %vm19717_vm1 = vmmov %vm19716_vm3 }
 0x54b   :  { %8993 = vrot.lane.b32.xlu0 %v16361_v27, %s13080_s27  ;;  %12749 = vmatpush1.msk.msra.mxu0 %vm2582_vm14, %v7231_v42  ;;  %v7213_v15 = vpop.permute.xlu1 %7212  ;;  %vm19718_vm2 = vmmov %vm19717_vm1 }
 0x54c   :  { %12752 = vmatpush1.msk.msra.mxu1 %vm2582_vm14, %v7227_v36  ;;  %v7209_v52 = vpop.permute.xlu0 %7208 }
 0x54d   :  { %v7228_v41 = vsel %vm19705_vm4, %v7209_v52, %v7213_v15  ;;  %v7230_v24 = vsel %vm19706_vm0, %v7205_v59, %v7209_v52  ;;  %vm19719_vm4 = vmmov %vm19717_vm1 }
 0x54e   :  { %9005 = vrot.lane.b32.xlu1 %v16424_v21, %s13080_s27  ;;  %7439 = vmatprep.subr.mxu0 %v7228_v41  ;;  %vm19720_vm0 = vmmov %vm19717_vm1 }
 0x54f   :  { %9001 = vrot.lane.b32.xlu0 %v16406_v37, %s13080_s27  ;;  %7440 = vmatpush1.msra.mxu0 %v7230_v24  ;;  %v7889_v10 = vpop.permute.xlu1 %7888 }
 0x550   :  { %12755 = vmatprep.subr.msk.mxu0 %vm2582_vm14, %v16400_v8  ;;  %v7217_v16 = vpop.permute.xlu0 %7216  ;;  %12750 = vmatmul.mubr.msk.f32.vlgmr.msra.gmra.mxu0 %vm2575_vm11, %v12741_v0 }
 0x551   :  { %12756 = vmatpush1.msk.msra.mxu0 %vm2582_vm14, %v16368_v46  ;;  %v7224_v38 = vsel %vm19707_vm5, %v7217_v16, %v7221_v39  ;;  %v7226_v51 = vsel %vm19708_vm6, %v7213_v15, %v7217_v16  ;;  %7652 = vmatprep.mubr.f32.mxu0 %v19542_v13  ;;  %vm19721_vm5 = vmmov %vm19720_vm0 }
 0x552   :  { %9011 = vrot.lane.b32.xlu1 %v16461_v48, %s13080_s27  ;;  %7510 = vmatprep.subr.mxu1 %v7224_v38  ;;  %vm19722_vm6 = vmmov %vm19720_vm0 }
 0x553   :  { %8989 = vrot.lane.b32.xlu0 %v16340_v11, %s13080_s27  ;;  %7618 = vmatprep.subr.mxu0 %v16361_v27  ;;  %v7897_v61 = vpop.permute.xlu1 %7896 }
 0x554   :  { %7511 = vmatpush1.msra.mxu1 %v7226_v51  ;;  %7619 = vmatpush1.msra.mxu0 %v16340_v11  ;;  %v7893_v3 = vpop.permute.xlu0 %7892 }
 0x555   :  { %12758 = vmatprep.subr.msk.mxu1 %vm2582_vm14, %v16421_v20  ;;  %12761 = vmatprep.subr.msk.mxu0 %vm2582_vm14, %v16461_v48  ;;  %v7925_v2 = vsel %vm19709_vm7, %v7889_v10, %v7893_v3  ;;  %v7923_v62 = vsel %vm19714_vm8, %v7893_v3, %v7897_v61  ;;  %vm19723_vm7 = vmmov %vm19720_vm0 }
 0x556   :  { %12753 = vmatmul.mubr.msk.f32.vlgmr.msra.gmra.mxu1 %vm2575_vm11, %v12741_v0  ;;  %12757 = vmatmul.mubr.msk.f32.vlgmr.msra.gmra.mxu0 %vm2575_vm11, %v12754_v14 }
 0x557   :  { %12759 = vmatpush1.msk.msra.mxu1 %vm2582_vm14, %v16409_v9  ;;  %12762 = vmatpush1.msk.msra.mxu0 %vm2582_vm14, %v16451_v19  ;;  %v7885_v40 = vpop.permute.xlu1 %7884 }
 0x558   :  { %9019 = vrot.lane.b32.xlu1 %v16474_v1, %s13080_s27  ;;  %9015 = vrot.lane.b32.xlu0 %v16467_v29, %s13080_s27  ;;  %v7901_v49 = vpop.permute.xlu0 %7900  ;;  %v7927_v54 = vsel %vm19710_vm15, %v7885_v40, %v7889_v10  ;;  %vm19724_vm15 = vmmov %vm19720_vm0 }
 0x559   :  { %7689 = vmatprep.subr.mxu1 %v16406_v37  ;;  %7760 = vmatprep.subr.mxu0 %v16439_v45  ;;  %v7921_v32 = vsel %vm19711_vm12, %v7897_v61, %v7901_v49  ;;  %vm19725_vm12 = vcmp.lt.s32.totalorder %v13701_v6, 126 }
 0x55a   :  { %7690 = vmatpush1.msra.mxu1 %v16393_v43  ;;  %7761 = vmatpush1.msra.mxu0 %v16424_v21 }
 0x55b   :  { %7723 = vmatprep.mubr.f32.mxu1 %v19542_v13  ;;  %12764 = vmatprep.subr.msk.mxu1 %vm2582_vm14, %v16474_v1  ;;  %v7891_v56 = vpop.permute.xlu1 %7890 }
 0x55c   :  { %12768 = vmatprep.subr.msk.mxu0 %vm2582_vm14, %v7925_v2  ;;  %12760 = vmatmul.mubr.msk.f32.vlgmr.msra.gmra.mxu1 %vm2575_vm11, %v12754_v14  ;;  %v7887_v18 = vpop.permute.xlu0 %7886 }
 0x55d   :  { %7794 = vmatprep.mubr.f32.mxu0 %v19542_v13  ;;  %12765 = vmatpush1.msk.msra.mxu1 %vm2582_vm14, %v16467_v29  ;;  %v7924_v47 = vsel %vm19712_vm10, %v7887_v18, %v7891_v56  ;;  %vm19726_vm10 = vmmov %vm19725_vm12 }
 0x55e   :  { %9013 = vrot.lane.b32.xlu1 %v16447_v50, %s13080_s27  ;;  %9009 = vrot.lane.b32.xlu0 %v16439_v45, %s13080_s27 }
 0x55f   :  { %12763 = vmatmul.mubr.msk.f32.vlgmr.msra.gmra.mxu0 %vm2575_vm11, %v12754_v14  ;;  %7831 = vmatprep.subr.mxu1 %v16458_v25  ;;  %v7899_v35 = vpop.permute.xlu1 %7898 }
 0x560   :  { %12769 = vmatpush1.msk.msra.mxu0 %vm2582_vm14, %v7927_v54  ;;  %7832 = vmatpush1.msra.mxu1 %v16447_v50  ;;  %v7895_v7 = vpop.permute.xlu0 %7894 }
 0x561   :  { %7865 = vmatprep.mubr.f32.mxu1 %v19542_v13  ;;  %12771 = vmatprep.subr.msk.mxu1 %vm2582_vm14, %v7921_v32  ;;  %v7920_v33 = vsel %vm19713_vm9, %v7895_v7, %v7899_v35  ;;  %v7922_v17 = vsel %vm19715_vm13, %v7891_v56, %v7895_v7  ;;  %vm19727_vm9 = vmmov %vm19726_vm10 }
 0x562   :  { %12766 = vmatmul.mubr.msk.f32.vlgmr.msra.gmra.mxu1 %vm2575_vm11, %v12754_v14  ;;  %9364 = vrot.lane.b32.xlu1 %v16400_v8, %s13081_s13  ;;  %vm19728_vm8 = vmmov %vm19727_vm9 }
 0x563   :  { %12772 = vmatpush1.msk.msra.mxu1 %vm2582_vm14, %v7923_v62  ;;  %9017 = vrot.lane.b32.xlu0 %v16458_v25, %s13080_s27  ;;  %v7905_v4 = vpop.permute.xlu1 %7904  ;;  %vm19729_vm13 = vmmov %vm19728_vm8 }
 0x564   :  { %7987 = vmatprep.subr.mxu0 %v7924_v47  ;;  %8058 = vmatprep.subr.mxu1 %v7920_v33  ;;  %v7883_v30 = vpop.permute.xlu0 %7882  ;;  %v7919_v44 = vsel %vm19720_vm0, %v7901_v49, %v7905_v4  ;;  %v12780_v49 = vld [vmem:[%s19070_s2 + $0x38] sm:$0x7] }
 0x565   :  { %8059 = vmatpush1.msra.mxu1 %v7922_v17  ;;  %v7926_v12 = vsel %vm19716_vm3, %v7883_v30, %v7887_v18  ;;  %8021 = vmatprep.mubr.f32.mxu0 %v19542_v13  ;;  %vm19730_vm3 = vmmov %vm19728_vm8 }
 0x566   :  { %9372 = vrot.lane.b32.xlu1 %v16421_v20, %s13081_s13  ;;  %7988 = vmatpush1.msra.mxu0 %v7926_v12 }
 0x567   :  { %9368 = vrot.lane.b32.xlu0 %v16409_v9, %s13081_s13  ;;  %v7913_v22 = vpop.permute.xlu1 %7912  ;;  %8092 = vmatprep.mubr.f32.mxu1 %v19542_v13 }
 0x568   :  { %v7909_v58 = vpop.permute.xlu0 %7908  ;;  %v7929_v5 = vsel %vm19717_vm1, %v7913_v22, %v7885_v40  ;;  %12770 = vmatmul.mubr.msk.f32.vlgmr.msra.gmra.mxu0 %vm2575_vm11, %v12767_v23  ;;  %12773 = vmatmul.mubr.msk.f32.vlgmr.msra.gmra.mxu1 %vm2575_vm11, %v12767_v23  ;;  %vm19731_vm1 = vmmov %vm19730_vm3 }
 0x569   :  { %v7915_v59 = vsel %vm19718_vm2, %v7909_v58, %v7913_v22  ;;  %v7917_v53 = vsel %vm19719_vm4, %v7905_v4, %v7909_v58  ;;  %12777 = vmatprep.subr.msk.mxu1 %vm2582_vm14, %v7929_v5  ;;  %8163 = vmatprep.mubr.f32.mxu0 %v19542_v13  ;;  %vm19732_vm2 = vmmov %vm19731_vm1 }
 0x56a   :  { %9360 = vrot.lane.b32.xlu1 %v16368_v46, %s13081_s13  ;;  %12774 = vmatprep.subr.msk.mxu0 %vm2582_vm14, %v7917_v53  ;;  %vm19733_vm4 = vmmov %vm19731_vm1 }
 0x56b   :  { %9376 = vrot.lane.b32.xlu0 %v16451_v19, %s13081_s13  ;;  %12775 = vmatpush1.msk.msra.mxu0 %vm2582_vm14, %v7919_v44  ;;  %v7907_v34 = vpop.permute.xlu1 %7906  ;;  %vm19734_vm0 = vmmov %vm19731_vm1 }
 0x56c   :  { %12778 = vmatpush1.msk.msra.mxu1 %vm2582_vm14, %v7915_v59  ;;  %v7903_v0 = vpop.permute.xlu0 %7902  ;;  %8234 = vmatprep.mubr.f32.mxu1 %v19542_v13 }
 0x56d   :  { %v7916_v60 = vsel %vm19721_vm5, %v7903_v0, %v7907_v34  ;;  %v7918_v39 = vsel %vm19722_vm6, %v7899_v35, %v7903_v0  ;;  %vm19735_vm5 = vmmov %vm19734_vm0 }
 0x56e   :  { %9366 = vrot.lane.b32.xlu1 %v16393_v43, %s13081_s13  ;;  %8129 = vmatprep.subr.mxu0 %v7916_v60  ;;  %vm19736_vm6 = vmmov %vm19734_vm0 }
 0x56f   :  { %9362 = vrot.lane.b32.xlu0 %v16361_v27, %s13081_s13  ;;  %8130 = vmatpush1.msra.mxu0 %v7918_v39  ;;  %v8258_v55 = vpop.permute.xlu1 %8257 }
 0x570   :  { %v7911_v28 = vpop.permute.xlu0 %7910  ;;  %12776 = vmatmul.mubr.msk.f32.vlgmr.msra.gmra.mxu0 %vm2575_vm11, %v12767_v23 }
 0x571   :  { %v7928_v31 = vsel %vm19723_vm7, %v7911_v28, %v7883_v30  ;;  %v7914_v57 = vsel %vm19724_vm15, %v7907_v34, %v7911_v28  ;;  %8390 = vmatprep.mubr.f32.mxu0 %v19542_v13  ;;  %vm19737_vm7 = vmmov %vm19734_vm0 }
 0x572   :  { %9374 = vrot.lane.b32.xlu1 %v16424_v21, %s13081_s13  ;;  %8200 = vmatprep.subr.mxu1 %v7928_v31  ;;  %vm19738_vm15 = vmmov %vm19734_vm0 }
 0x573   :  { %9370 = vrot.lane.b32.xlu0 %v16406_v37, %s13081_s13  ;;  %8201 = vmatpush1.msra.mxu1 %v7914_v57  ;;  %v8266_v36 = vpop.permute.xlu1 %8265 }
 0x574   :  { %v8262_v26 = vpop.permute.xlu0 %8261  ;;  %12779 = vmatmul.mubr.msk.f32.vlgmr.msra.gmra.mxu1 %vm2575_vm11, %v12767_v23 }
 0x575   :  { %v8294_v42 = vsel %vm19725_vm12, %v8258_v55, %v8262_v26  ;;  %8461 = vmatprep.mubr.f32.mxu1 %v19542_v13  ;;  %v8292_v10 = vsel %vm19728_vm8, %v8262_v26, %v8266_v36  ;;  %vm19739_vm12 = vmmov %vm19734_vm0 }
 0x576   :  { %9380 = vrot.lane.b32.xlu1 %v16461_v48, %s13081_s13  ;;  %12781 = vmatprep.subr.msk.mxu0 %vm2582_vm14, %v8294_v42 }
 0x577   :  { %9358 = vrot.lane.b32.xlu0 %v16340_v11, %s13081_s13  ;;  %v8254_v15 = vpop.permute.xlu1 %8253 }
 0x578   :  { %v8296_v52 = vsel %vm19726_vm10, %v8254_v15, %v8258_v55  ;;  %v8270_v41 = vpop.permute.xlu0 %8269  ;;  %vm19740_vm10 = vmmov %vm19734_vm0 }
 0x579   :  { %12782 = vmatpush1.msk.msra.mxu0 %vm2582_vm14, %v8296_v52  ;;  %v8290_v24 = vsel %vm19727_vm9, %v8266_v36, %v8270_v41  ;;  %vm19741_vm9 = vcmp.lt.s32.totalorder %v13701_v6, 110 }
 0x57a   :  { %9388 = vrot.lane.b32.xlu1 %v16474_v1, %s13081_s13  ;;  %12784 = vmatprep.subr.msk.mxu1 %vm2582_vm14, %v8290_v24  ;;  %vm19742_vm8 = vmmov %vm19741_vm9 }
 0x57b   :  { %9384 = vrot.lane.b32.xlu0 %v16467_v29, %s13081_s13  ;;  %12785 = vmatpush1.msk.msra.mxu1 %vm2582_vm14, %v8292_v10  ;;  %v8260_v16 = vpop.permute.xlu1 %8259 }
 0x57c   :  { %v8256_v38 = vpop.permute.xlu0 %8255 }
 0x57d   :  { %v8293_v51 = vsel %vm19729_vm13, %v8256_v38, %v8260_v16  ;;  %vm19743_vm13 = vmmov %vm19742_vm8 }
 0x57e   :  { %9382 = vrot.lane.b32.xlu1 %v16447_v50, %s13081_s13  ;;  %8356 = vmatprep.subr.mxu0 %v8293_v51 }
 0x57f   :  { %9378 = vrot.lane.b32.xlu0 %v16439_v45, %s13081_s13  ;;  %v8268_v61 = vpop.permute.xlu1 %8267 }
 0x580   :  { %v8264_v14 = vpop.permute.xlu0 %8263 }
 0x581   :  { %v8289_v3 = vsel %vm19730_vm3, %v8264_v14, %v8268_v61  ;;  %v8291_v40 = vsel %vm19731_vm1, %v8260_v16, %v8264_v14  ;;  %vm19744_vm3 = vmmov %vm19742_vm8 }
 0x582   :  { %9733 = vrot.lane.b32.xlu1 %v16400_v8, %s13082_s23  ;;  %8427 = vmatprep.subr.mxu1 %v8289_v3  ;;  %vm19745_vm1 = vmmov %vm19744_vm3 }
 0x583   :  { %9386 = vrot.lane.b32.xlu0 %v16458_v25, %s13081_s13  ;;  %8428 = vmatpush1.msra.mxu1 %v8291_v40  ;;  %v8274_v2 = vpop.permute.xlu1 %8273 }
 0x584   :  { %v8252_v56 = vpop.permute.xlu0 %8251  ;;  %12786 = vmatmul.mubr.msk.f32.vlgmr.msra.gmra.mxu1 %vm2575_vm11, %v12780_v49  ;;  %v8288_v33 = vsel %vm19736_vm6, %v8270_v41, %v8274_v2 }
 0x585   :  { %v8295_v18 = vsel %vm19732_vm2, %v8252_v56, %v8256_v38  ;;  %8603 = vmatprep.mubr.f32.mxu1 %v19542_v13  ;;  %vm19746_vm2 = vmmov %vm19745_vm1 }
 0x586   :  { %9741 = vrot.lane.b32.xlu1 %v16421_v20, %s13082_s23  ;;  %8357 = vmatpush1.msra.mxu0 %v8295_v18 }
 0x587   :  { %9737 = vrot.lane.b32.xlu0 %v16409_v9, %s13082_s23  ;;  %12783 = vmatmul.mubr.msk.f32.vlgmr.msra.gmra.mxu0 %vm2575_vm11, %v12780_v49 }
 0x588   :  { %v8282_v54 = vpop.permute.xlu1 %8281  ;;  %v8278_v35 = vpop.permute.xlu0 %8277  ;;  %8532 = vmatprep.mubr.f32.mxu0 %v19542_v13 }
 0x589   :  { %v8284_v32 = vsel %vm19733_vm4, %v8278_v35, %v8282_v54  ;;  %v8286_v7 = vsel %vm19734_vm0, %v8274_v2, %v8278_v35  ;;  %v8298_v47 = vsel %vm19735_vm5, %v8282_v54, %v8254_v15  ;;  %vm19747_vm4 = vmmov %vm19745_vm1  ;;  %v12793_v15 = vld [vmem:[%s19070_s2 + $0x3c] sm:$0x7] }
 0x58a   :  { %9729 = vrot.lane.b32.xlu1 %v16368_v46, %s13082_s23  ;;  %12787 = vmatprep.subr.msk.mxu0 %vm2582_vm14, %v8286_v7  ;;  %vm19748_vm0 = vmmov %vm19745_vm1 }
 0x58b   :  { %9745 = vrot.lane.b32.xlu0 %v16451_v19, %s13082_s23  ;;  %12790 = vmatprep.subr.msk.mxu1 %vm2582_vm14, %v8298_v47  ;;  %vm19749_vm5 = vmmov %vm19748_vm0 }
 0x58c   :  { %12788 = vmatpush1.msk.msra.mxu0 %vm2582_vm14, %v8288_v33  ;;  %12791 = vmatpush1.msk.msra.mxu1 %vm2582_vm14, %v8284_v32  ;;  %v8276_v62 = vpop.permute.xlu1 %8275  ;;  %vm19750_vm6 = vmmov %vm19748_vm0 }
 0x58d   :  { %v8272_v17 = vpop.permute.xlu0 %8271 }
 0x58e   :  { %9735 = vrot.lane.b32.xlu1 %v16393_v43, %s13082_s23  ;;  %v8285_v4 = vsel %vm19737_vm7, %v8272_v17, %v8276_v62  ;;  %v8287_v30 = vsel %vm19738_vm15, %v8268_v61, %v8272_v17  ;;  %vm19751_vm7 = vmmov %vm19748_vm0 }
 0x58f   :  { %9731 = vrot.lane.b32.xlu0 %v16361_v27, %s13082_s23  ;;  %8498 = vmatprep.subr.mxu0 %v8285_v4  ;;  %vm19752_vm15 = vmmov %vm19748_vm0 }
 0x590   :  { %8499 = vmatpush1.msra.mxu0 %v8287_v30  ;;  %v8627_v12 = vpop.permute.xlu1 %8626 }
 0x591   :  { %v8280_v23 = vpop.permute.xlu0 %8279  ;;  %12789 = vmatmul.mubr.msk.f32.vlgmr.msra.gmra.mxu0 %vm2575_vm11, %v12780_v49 }
 0x592   :  { %9743 = vrot.lane.b32.xlu1 %v16424_v21, %s13082_s23  ;;  %v8297_v22 = vsel %vm19739_vm12, %v8280_v23, %v8252_v56  ;;  %v8283_v58 = vsel %vm19740_vm10, %v8276_v62, %v8280_v23  ;;  %8759 = vmatprep.mubr.f32.mxu0 %v19542_v13  ;;  %vm19753_vm12 = vmmov %vm19748_vm0 }
 0x593   :  { %9739 = vrot.lane.b32.xlu0 %v16406_v37, %s13082_s23  ;;  %8569 = vmatprep.subr.mxu1 %v8297_v22  ;;  %vm19754_vm10 = vmmov %vm19748_vm0 }
 0x594   :  { %8570 = vmatpush1.msra.mxu1 %v8283_v58  ;;  %v8635_v5 = vpop.permute.xlu1 %8634 }
 0x595   :  { %v8631_v59 = vpop.permute.xlu0 %8630  ;;  %12792 = vmatmul.mubr.msk.f32.vlgmr.msra.gmra.mxu1 %vm2575_vm11, %v12780_v49 }
 0x596   :  { %9749 = vrot.lane.b32.xlu1 %v16461_v48, %s13082_s23  ;;  %v8663_v53 = vsel %vm19741_vm9, %v8627_v12, %v8631_v59  ;;  %8830 = vmatprep.mubr.f32.mxu1 %v19542_v13  ;;  %v8661_v39 = vsel %vm19744_vm3, %v8631_v59, %v8635_v5  ;;  %vm19755_vm9 = vmmov %vm19748_vm0 }
 0x597   :  { %9727 = vrot.lane.b32.xlu0 %v16340_v11, %s13082_s23  ;;  %12794 = vmatprep.subr.msk.mxu0 %vm2582_vm14, %v8663_v53 }
 0x598   :  { %v8623_v44 = vpop.permute.xlu1 %8622 }
 0x599   :  { %v8665_v34 = vsel %vm19742_vm8, %v8623_v44, %v8627_v12  ;;  %v8639_v0 = vpop.permute.xlu0 %8638  ;;  %vm19756_vm8 = vmmov %vm19748_vm0 }
 0x59a   :  { %9757 = vrot.lane.b32.xlu1 %v16474_v1, %s13082_s23  ;;  %12795 = vmatpush1.msk.msra.mxu0 %vm2582_vm14, %v8665_v34  ;;  %v8659_v60 = vsel %vm19743_vm13, %v8635_v5, %v8639_v0  ;;  %vm19757_vm13 = vcmp.lt.s32.totalorder %v13701_v6, 109 }
 0x59b   :  { %9753 = vrot.lane.b32.xlu0 %v16467_v29, %s13082_s23  ;;  %12797 = vmatprep.subr.msk.mxu1 %vm2582_vm14, %v8659_v60  ;;  %vm19758_vm3 = vmmov %vm19757_vm13 }
 0x59c   :  { %12798 = vmatpush1.msk.msra.mxu1 %vm2582_vm14, %v8661_v39  ;;  %v8629_v55 = vpop.permute.xlu1 %8628 }
 0x59d   :  { %v8625_v28 = vpop.permute.xlu0 %8624 }
 0x59e   :  { %9751 = vrot.lane.b32.xlu1 %v16447_v50, %s13082_s23  ;;  %v8662_v31 = vsel %vm19745_vm1, %v8625_v28, %v8629_v55  ;;  %vm19759_vm1 = vmmov %vm19758_vm3 }
 0x59f   :  { %9747 = vrot.lane.b32.xlu0 %v16439_v45, %s13082_s23  ;;  %8725 = vmatprep.subr.mxu0 %v8662_v31 }
 0x5a0   :  { %v8637_v57 = vpop.permute.xlu1 %8636 }
 0x5a1   :  { %v8633_v36 = vpop.permute.xlu0 %8632 }
 0x5a2   :  { %10102 = vrot.lane.b32.xlu1 %v16400_v8, %s13083_s15  ;;  %v8658_v26 = vsel %vm19746_vm2, %v8633_v36, %v8637_v57  ;;  %v8660_v42 = vsel %vm19747_vm4, %v8629_v55, %v8633_v36  ;;  %vm19760_vm2 = vmmov %vm19759_vm1 }
 0x5a3   :  { %9755 = vrot.lane.b32.xlu0 %v16458_v25, %s13082_s23  ;;  %8796 = vmatprep.subr.mxu1 %v8658_v26  ;;  %vm19761_vm4 = vmmov %vm19759_vm1 }
 0x5a4   :  { %8797 = vmatpush1.msra.mxu1 %v8660_v42  ;;  %v8643_v52 = vpop.permute.xlu1 %8642 }
 0x5a5   :  { %v8621_v41 = vpop.permute.xlu0 %8620  ;;  %12799 = vmatmul.mubr.msk.f32.vlgmr.msra.gmra.mxu1 %vm2575_vm11, %v12793_v15  ;;  %v8657_v14 = vsel %vm19752_vm15, %v8639_v0, %v8643_v52 }
 0x5a6   :  { %10110 = vrot.lane.b32.xlu1 %v16421_v20, %s13083_s15  ;;  %v8664_v24 = vsel %vm19748_vm0, %v8621_v41, %v8625_v28  ;;  %8972 = vmatprep.mubr.f32.mxu1 %v19542_v13  ;;  %vm19762_vm0 = vmmov %vm19759_vm1 }
 0x5a7   :  { %10106 = vrot.lane.b32.xlu0 %v16409_v9, %s13083_s15  ;;  %8726 = vmatpush1.msra.mxu0 %v8664_v24  ;;  %vm19766_vm15 = vmmov %vm19762_vm0 }
 0x5a8   :  { %v8651_v10 = vpop.permute.xlu1 %8650  ;;  %12796 = vmatmul.mubr.msk.f32.vlgmr.msra.gmra.mxu0 %vm2575_vm11, %v12793_v15 }
 0x5a9   :  { %v8647_v16 = vpop.permute.xlu0 %8646  ;;  %v8667_v38 = vsel %vm19749_vm5, %v8651_v10, %v8623_v44  ;;  %8901 = vmatprep.mubr.f32.mxu0 %v19542_v13  ;;  %vm19763_vm5 = vmmov %vm19762_vm0  ;;  %v12806_v44 = vld [vmem:[%s19070_s2 + $0x40] sm:$0x7] }
 0x5aa   :  { %10098 = vrot.lane.b32.xlu1 %v16368_v46, %s13083_s15  ;;  %v8653_v51 = vsel %vm19750_vm6, %v8647_v16, %v8651_v10  ;;  %v8655_v61 = vsel %vm19751_vm7, %v8643_v52, %v8647_v16  ;;  %12803 = vmatprep.subr.msk.mxu1 %vm2582_vm14, %v8667_v38  ;;  %vm19764_vm6 = vmmov %vm19762_vm0 }
 0x5ab   :  { %10114 = vrot.lane.b32.xlu0 %v16451_v19, %s13083_s15  ;;  %12800 = vmatprep.subr.msk.mxu0 %vm2582_vm14, %v8655_v61  ;;  %vm19765_vm7 = vmmov %vm19762_vm0 }
 0x5ac   :  { %12801 = vmatpush1.msk.msra.mxu0 %vm2582_vm14, %v8657_v14  ;;  %12804 = vmatpush1.msk.msra.mxu1 %vm2582_vm14, %v8653_v51  ;;  %v8645_v3 = vpop.permute.xlu1 %8644 }
 0x5ad   :  { %v8641_v40 = vpop.permute.xlu0 %8640 }
 0x5ae   :  { %10104 = vrot.lane.b32.xlu1 %v16393_v43, %s13083_s15  ;;  %v8654_v49 = vsel %vm19753_vm12, %v8641_v40, %v8645_v3  ;;  %v8656_v2 = vsel %vm19754_vm10, %v8637_v57, %v8641_v40  ;;  %vm19767_vm12 = vmmov %vm19762_vm0 }
 0x5af   :  { %10100 = vrot.lane.b32.xlu0 %v16361_v27, %s13083_s15  ;;  %8867 = vmatprep.subr.mxu0 %v8654_v49  ;;  %vm19768_vm10 = vmmov %vm19762_vm0 }
 0x5b0   :  { %8868 = vmatpush1.msra.mxu0 %v8656_v2  ;;  %v8996_v56 = vpop.permute.xlu1 %8995 }
 0x5b1   :  { %v8649_v18 = vpop.permute.xlu0 %8648  ;;  %12802 = vmatmul.mubr.msk.f32.vlgmr.msra.gmra.mxu0 %vm2575_vm11, %v12793_v15 }
 0x5b2   :  { %10112 = vrot.lane.b32.xlu1 %v16424_v21, %s13083_s15  ;;  %v8666_v54 = vsel %vm19755_vm9, %v8649_v18, %v8621_v41  ;;  %v8652_v35 = vsel %vm19756_vm8, %v8645_v3, %v8649_v18  ;;  %9128 = vmatprep.mubr.f32.mxu0 %v19542_v13  ;;  %vm19769_vm9 = vmmov %vm19762_vm0  ;;  %v3340_v18 = vpop.f32.mrf.mxu0 }
 0x5b3   :  { %10108 = vrot.lane.b32.xlu0 %v16406_v37, %s13083_s15  ;;  %8938 = vmatprep.subr.mxu1 %v8666_v54  ;;  %vm19770_vm8 = vmmov %vm19762_vm0 }
 0x5b4   :  { %8939 = vmatpush1.msra.mxu1 %v8652_v35  ;;  %v9004_v32 = vpop.permute.xlu1 %9003  ;;  %v3411_v35 = vpop.f32.mrf.mxu1 }
 0x5b5   :  { %v9000_v7 = vpop.permute.xlu0 %8999  ;;  %12805 = vmatmul.mubr.msk.f32.vlgmr.msra.gmra.mxu1 %vm2575_vm11, %v12793_v15 }
 0x5b6   :  { %10118 = vrot.lane.b32.xlu1 %v16461_v48, %s13083_s15  ;;  %v9032_v47 = vsel %vm19757_vm13, %v8996_v56, %v9000_v7  ;;  %9199 = vmatprep.mubr.f32.mxu1 %v19542_v13  ;;  %v9030_v30 = vsel %vm19760_vm2, %v9000_v7, %v9004_v32  ;;  %vm19771_vm13 = vmmov %vm19762_vm0  ;;  %v3342_v7 = vpop.f32.mrf.mxu0 }
 0x5b7   :  { %10096 = vrot.lane.b32.xlu0 %v16340_v11, %s13083_s15  ;;  %12807 = vmatprep.subr.msk.mxu0 %vm2582_vm14, %v9032_v47  ;;  %v3413_v47 = vpop.f32.mrf.mxu1 }
 0x5b8   :  { %v8992_v33 = vpop.permute.xlu1 %8991 }
 0x5b9   :  { %v9034_v62 = vsel %vm19758_vm3, %v8992_v33, %v8996_v56  ;;  %v9008_v17 = vpop.permute.xlu0 %9007  ;;  %vm19772_vm3 = vmmov %vm19762_vm0 }
 0x5ba   :  { %10126 = vrot.lane.b32.xlu1 %v16474_v1, %s13083_s15  ;;  %12808 = vmatpush1.msk.msra.mxu0 %vm2582_vm14, %v9034_v62  ;;  %v9028_v4 = vsel %vm19759_vm1, %v9004_v32, %v9008_v17  ;;  %vm19773_vm1 = vcmp.lt.s32.totalorder %v13701_v6, 108  ;;  %v3482_v62 = vpop.f32.mrf.mxu0 }
 0x5bb   :  { %10122 = vrot.lane.b32.xlu0 %v16467_v29, %s13083_s15  ;;  %12810 = vmatprep.subr.msk.mxu1 %vm2582_vm14, %v9028_v4  ;;  %vm19774_vm2 = vmmov %vm19773_vm1  ;;  %v3553_v4 = vpop.f32.mrf.mxu1 }
 0x5bc   :  { %12811 = vmatpush1.msk.msra.mxu1 %vm2582_vm14, %v9030_v30  ;;  %v8998_v12 = vpop.permute.xlu1 %8997 }
 0x5bd   :  { %v8994_v23 = vpop.permute.xlu0 %8993 }
 0x5be   :  { %10120 = vrot.lane.b32.xlu1 %v16447_v50, %s13083_s15  ;;  %v9031_v22 = vsel %vm19761_vm4, %v8994_v23, %v8998_v12  ;;  %vm19775_vm4 = vmmov %vm19773_vm1 }
 0x5bf   :  { %10116 = vrot.lane.b32.xlu0 %v16439_v45, %s13083_s15  ;;  %9094 = vmatprep.subr.mxu0 %v9031_v22  ;;  %v3484_v22 = vpop.f32.mrf.mxu0 }
 0x5c0   :  { %v9006_v58 = vpop.permute.xlu1 %9005 }
 0x5c1   :  { %v9002_v5 = vpop.permute.xlu0 %9001 }
 0x5c2   :  { %10471 = vrot.lane.b32.xlu1 %v16400_v8, %s13084_s30  ;;  %v9027_v59 = vsel %vm19762_vm0, %v9002_v5, %v9006_v58  ;;  %v9029_v53 = vsel %vm19763_vm5, %v8998_v12, %v9002_v5  ;;  %vm19776_vm0 = vmmov %vm19773_vm1 }
 0x5c3   :  { %10124 = vrot.lane.b32.xlu0 %v16458_v25, %s13083_s15  ;;  %9165 = vmatprep.subr.mxu1 %v9027_v59  ;;  %s19777_s15 = smov 89   ;;  %vm19778_vm5 = vmmov %vm19776_vm0  ;;  %v3651_v59 = vpop.f32.mrf.mxu0 }
 0x5c4   :  { %9166 = vmatpush1.msra.mxu1 %v9029_v53  ;;  %v9012_v34 = vpop.permute.xlu1 %9011 }
 0x5c5   :  { %v8990_v0 = vpop.permute.xlu0 %8989  ;;  %12812 = vmatmul.mubr.msk.f32.vlgmr.msra.gmra.mxu1 %vm2575_vm11, %v12806_v44  ;;  %v9026_v36 = vsel %vm19768_vm10, %v9008_v17, %v9012_v34  ;;  %vm19783_vm10 = vmmov %vm19776_vm0 }
 0x5c6   :  { %10479 = vrot.lane.b32.xlu1 %v16421_v20, %s13084_s30  ;;  %v9033_v60 = vsel %vm19764_vm6, %v8990_v0, %v8994_v23  ;;  %9341 = vmatprep.mubr.f32.mxu1 %v19542_v13  ;;  %vm19779_vm6 = vmmov %vm19776_vm0  ;;  %v18184_v23 = vld [vmem:[%s19070_s2 + $0x44] sm:$0x7] }
 0x5c7   :  { %10475 = vrot.lane.b32.xlu0 %v16409_v9, %s13084_s30  ;;  %9095 = vmatpush1.msra.mxu0 %v9033_v60  ;;  %v3652_v60 = vadd.f32 %v3651_v59, %v3340_v18 }
 0x5c8   :  { %12809 = vmatmul.mubr.msk.f32.vlgmr.msra.gmra.mxu0 %vm2575_vm11, %v12806_v44 }
 0x5c9   :  { %9270 = vmatprep.mubr.f32.mxu0 %v19542_v13 }
 0x5ca   :  { %10467 = vrot.lane.b32.xlu1 %v16368_v46, %s13084_s30  ;;  %v9020_v39 = vpop.permute.xlu1 %9019  ;;  %v9016_v55 = vpop.permute.xlu0 %9015 }
 0x5cb   :  { %10483 = vrot.lane.b32.xlu0 %v16451_v19, %s13084_s30  ;;  %v9022_v28 = vsel %vm19765_vm7, %v9016_v55, %v9020_v39  ;;  %v9024_v31 = vsel %vm19766_vm15, %v9012_v34, %v9016_v55  ;;  %v9036_v57 = vsel %vm19767_vm12, %v9020_v39, %v8992_v33  ;;  %vm19780_vm7 = vmmov %vm19776_vm0 }
 0x5cc   :  { %12813 = vmatprep.subr.msk.mxu0 %vm2582_vm14, %v9024_v31  ;;  %12816 = vmatprep.subr.msk.mxu1 %vm2582_vm14, %v9036_v57  ;;  %vm19781_vm15 = vmmov %vm19776_vm0 }
 0x5cd   :  { %12814 = vmatpush1.msk.msra.mxu0 %vm2582_vm14, %v9026_v36  ;;  %12817 = vmatpush1.msk.msra.mxu1 %vm2582_vm14, %v9022_v28  ;;  %vm19782_vm12 = vmmov %vm19776_vm0 }
 0x5ce   :  { %10473 = vrot.lane.b32.xlu1 %v16393_v43, %s13084_s30 }
 0x5cf   :  { %10469 = vrot.lane.b32.xlu0 %v16361_v27, %s13084_s30 }
 0x5d0   :  { %v9014_v26 = vpop.permute.xlu1 %9013  ;;  %v9010_v42 = vpop.permute.xlu0 %9009 }
 0x5d1   :  { %v9023_v15 = vsel %vm19769_vm9, %v9010_v42, %v9014_v26  ;;  %v9025_v52 = vsel %vm19770_vm8, %v9006_v58, %v9010_v42  ;;  %v3555_v58 = vpop.f32.mrf.mxu1  ;;  %vm19784_vm9 = vmmov %vm19776_vm0 }
 0x5d2   :  { %10481 = vrot.lane.b32.xlu1 %v16424_v21, %s13084_s30  ;;  %9236 = vmatprep.subr.mxu0 %v9023_v15  ;;  %vm19785_vm8 = vmmov %vm19776_vm0 }
 0x5d3   :  { %10477 = vrot.lane.b32.xlu0 %v16406_v37, %s13084_s30  ;;  %9237 = vmatpush1.msra.mxu0 %v9025_v52 }
 0x5d4   :  { %v9365_v41 = vpop.permute.xlu1 %9364  ;;  %12815 = vmatmul.mubr.msk.f32.vlgmr.msra.gmra.mxu0 %vm2575_vm11, %v12806_v44 }
 0x5d5   :  { %v9018_v24 = vpop.permute.xlu0 %9017  ;;  %9497 = vmatprep.mubr.f32.mxu0 %v19542_v13 }
 0x5d6   :  { %10487 = vrot.lane.b32.xlu1 %v16461_v48, %s13084_s30  ;;  %v9035_v10 = vsel %vm19771_vm13, %v9018_v24, %v8990_v0  ;;  %v9021_v16 = vsel %vm19772_vm3, %v9014_v26, %v9018_v24  ;;  %v3653_v0 = vpop.f32.mrf.mxu0  ;;  %vm19786_vm13 = vmmov %vm19776_vm0 }
 0x5d7   :  { %10465 = vrot.lane.b32.xlu0 %v16340_v11, %s13084_s30  ;;  %9307 = vmatprep.subr.mxu1 %v9035_v10  ;;  %vm19787_vm3 = vmmov %vm19776_vm0 }
 0x5d8   :  { %9308 = vmatpush1.msra.mxu1 %v9021_v16  ;;  %v9373_v38 = vpop.permute.xlu1 %9372  ;;  %v3793_v31 = vpop.f32.mrf.mxu0 }
 0x5d9   :  { %v9369_v51 = vpop.permute.xlu0 %9368  ;;  %12818 = vmatmul.mubr.msk.f32.vlgmr.msra.gmra.mxu1 %vm2575_vm11, %v12806_v44  ;;  %v3722_v44 = vpop.f32.mrf.mxu1  ;;  %v3794_v16 = vadd.f32 %v3793_v31, %v3482_v62 }
 0x5da   :  { %10495 = vrot.lane.b32.xlu1 %v16474_v1, %s13084_s30  ;;  %v9401_v61 = vsel %vm19773_vm1, %v9365_v41, %v9369_v51  ;;  %9568 = vmatprep.mubr.f32.mxu1 %v19542_v13  ;;  %v9399_v2 = vsel %vm19776_vm0, %v9369_v51, %v9373_v38  ;;  %v3723_v39 = vadd.f32 %v3722_v44, %v3411_v35  ;;  %v3795_v24 = vpop.f32.mrf.mxu0  ;;  %vm19788_vm1 = vmmov %vm19776_vm0 }
 0x5db   :  { %10491 = vrot.lane.b32.xlu0 %v16467_v29, %s13084_s30  ;;  %12820 = vmatprep.subr.msk.mxu0 %vm2582_vm14, %v9401_v61  ;;  %v3724_v55 = vpop.f32.mrf.mxu1 }
 0x5dc   :  { %v9361_v14 = vpop.permute.xlu1 %9360  ;;  %v3725_v10 = vadd.f32 %v3724_v55, %v3413_v47 }
 0x5dd   :  { %v9403_v3 = vsel %vm19774_vm2, %v9361_v14, %v9365_v41  ;;  %v9377_v40 = vpop.permute.xlu0 %9376  ;;  %v3864_v42 = vpop.f32.mrf.mxu1  ;;  %v3654_v41 = vadd.f32 %v3653_v0, %v3342_v7  ;;  %vm19789_vm2 = vmmov %vm19776_vm0 }
 0x5de   :  { %10489 = vrot.lane.b32.xlu1 %v16447_v50, %s13084_s30  ;;  %12821 = vmatpush1.msk.msra.mxu0 %vm2582_vm14, %v9403_v3  ;;  %v9397_v49 = vsel %vm19775_vm4, %v9373_v38, %v9377_v40  ;;  %v3865_v38 = vadd.f32 %v3864_v42, %v3553_v4  ;;  %vm19790_vm4 = vcmp.lt.s32.totalorder %v13701_v6, 107 }
 0x5df   :  { %10485 = vrot.lane.b32.xlu0 %v16439_v45, %s13084_s30  ;;  %12823 = vmatprep.subr.msk.mxu1 %vm2582_vm14, %v9397_v49  ;;  %v3866_v51 = vpop.f32.mrf.mxu1  ;;  %vm19791_vm0 = vmmov %vm19790_vm4 }
 0x5e0   :  { %12824 = vmatpush1.msk.msra.mxu1 %vm2582_vm14, %v9399_v2  ;;  %v9367_v56 = vpop.permute.xlu1 %9366  ;;  %v3867_v18 = vadd.f32 %v3866_v51, %v3555_v58 }
 0x5e1   :  { %v9363_v54 = vpop.permute.xlu0 %9362 }
 0x5e2   :  { %10840 = vrot.lane.b32.xlu1 %v16400_v8, %s19777_s15  ;;  %v9400_v32 = vsel %vm19778_vm5, %v9363_v54, %v9367_v56  ;;  %vm19792_vm5 = vmmov %vm19791_vm0 }
 0x5e3   :  { %10493 = vrot.lane.b32.xlu0 %v16458_v25, %s13084_s30  ;;  %9463 = vmatprep.subr.mxu0 %v9400_v32 }
 0x5e4   :  { %v9375_v33 = vpop.permute.xlu1 %9374 }
 0x5e5   :  { %v9371_v17 = vpop.permute.xlu0 %9370 }
 0x5e6   :  { %10848 = vrot.lane.b32.xlu1 %v16421_v20, %s19777_s15  ;;  %v9396_v30 = vsel %vm19779_vm6, %v9371_v17, %v9375_v33  ;;  %v9398_v12 = vsel %vm19780_vm7, %v9367_v56, %v9371_v17  ;;  %v3796_v56 = vadd.f32 %v3795_v24, %v3484_v22  ;;  %vm19793_vm6 = vmmov %vm19791_vm0 }
 0x5e7   :  { %10844 = vrot.lane.b32.xlu0 %v16409_v9, %s19777_s15  ;;  %9534 = vmatprep.subr.mxu1 %v9396_v30  ;;  %vm19794_vm7 = vmmov %vm19791_vm0 }
 0x5e8   :  { %9535 = vmatpush1.msra.mxu1 %v9398_v12  ;;  %v9381_v5 = vpop.permute.xlu1 %9380 }
 0x5e9   :  { %v9359_v53 = vpop.permute.xlu0 %9358  ;;  %12825 = vmatmul.mubr.msk.f32.vlgmr.msra.gmra.mxu1 %vm2575_vm11, %v18184_v23  ;;  %v9395_v57 = vsel %vm19782_vm12, %v9377_v40, %v9381_v5  ;;  %v4083_v40 = vpop.f32.mrf.mxu1  ;;  %vm19796_vm12 = vmmov %vm19791_vm0 }
 0x5ea   :  { %10836 = vrot.lane.b32.xlu1 %v16368_v46, %s19777_s15  ;;  %v9402_v34 = vsel %vm19781_vm15, %v9359_v53, %v9363_v54  ;;  %9710 = vmatprep.mubr.f32.mxu1 %v19542_v13  ;;  %v4232_v32 = vadd.f32 %v4083_v40, %v3723_v39  ;;  %vm19795_vm15 = vmmov %vm19791_vm0 }
 0x5eb   :  { %10852 = vrot.lane.b32.xlu0 %v16451_v19, %s19777_s15  ;;  %9464 = vmatpush1.msra.mxu0 %v9402_v34  ;;  %v4085_v7 = vpop.f32.mrf.mxu1 }
 0x5ec   :  { %v9389_v28 = vpop.permute.xlu1 %9388  ;;  %12822 = vmatmul.mubr.msk.f32.vlgmr.msra.gmra.mxu0 %vm2575_vm11, %v18184_v23  ;;  %v4233_v58 = vadd.f32 %v4085_v7, %v3725_v10 }
 0x5ed   :  { %v9385_v36 = vpop.permute.xlu0 %9384  ;;  %v9405_v26 = vsel %vm19783_vm10, %v9389_v28, %v9361_v14  ;;  %9639 = vmatprep.mubr.f32.mxu0 %v19542_v13  ;;  %v4012_v14 = vpop.f32.mrf.mxu0  ;;  %vm19797_vm10 = vmmov %vm19791_vm0 }
 0x5ee   :  { %v9391_v15 = vsel %vm19784_vm9, %v9385_v36, %v9389_v28  ;;  %10842 = vrot.lane.b32.xlu1 %v16393_v43, %s19777_s15  ;;  %v9393_v52 = vsel %vm19785_vm8, %v9381_v5, %v9385_v36  ;;  %12829 = vmatprep.subr.msk.mxu1 %vm2582_vm14, %v9405_v26  ;;  %v4230_v35 = vadd.f32 %v4012_v14, %v3652_v60  ;;  %v4225_v4 = vpop.f32.mrf.mxu1  ;;  %vm19798_vm9 = vmmov %vm19791_vm0 }
 0x5ef   :  { %10838 = vrot.lane.b32.xlu0 %v16361_v27, %s19777_s15  ;;  %12826 = vmatprep.subr.msk.mxu0 %vm2582_vm14, %v9393_v52  ;;  %v4014_v54 = vpop.f32.mrf.mxu0  ;;  %v4236_v59 = vadd.f32 %v4225_v4, %v3865_v38  ;;  %vm19799_vm8 = vmmov %vm19791_vm0 }
 0x5f0   :  { %12827 = vmatpush1.msk.msra.mxu0 %vm2582_vm14, %v9395_v57  ;;  %12830 = vmatpush1.msk.msra.mxu1 %vm2582_vm14, %v9391_v15  ;;  %v9383_v61 = vpop.permute.xlu1 %9382  ;;  %v4231_v12 = vadd.f32 %v4014_v54, %v3654_v41  ;;  %v4227_v44 = vpop.f32.mrf.mxu1 }
 0x5f1   :  { %v9379_v3 = vpop.permute.xlu0 %9378  ;;  %v4154_v62 = vpop.f32.mrf.mxu0  ;;  %v4237_v31 = vadd.f32 %v4227_v44, %v3867_v18 }
 0x5f2   :  { %10850 = vrot.lane.b32.xlu1 %v16424_v21, %s19777_s15  ;;  %v9392_v49 = vsel %vm19786_vm13, %v9379_v3, %v9383_v61  ;;  %v9394_v2 = vsel %vm19787_vm3, %v9375_v33, %v9379_v3  ;;  %v4234_v5 = vadd.f32 %v4154_v62, %v3794_v16  ;;  %vm19800_vm13 = vmmov %vm19791_vm0 }
 0x5f3   :  { %10846 = vrot.lane.b32.xlu0 %v16406_v37, %s19777_s15  ;;  %9605 = vmatprep.subr.mxu0 %v9392_v49  ;;  %v4156_v22 = vpop.f32.mrf.mxu0  ;;  %vm19801_vm3 = vmmov %vm19791_vm0 }
 0x5f4   :  { %9606 = vmatpush1.msra.mxu0 %v9394_v2  ;;  %v9734_v47 = vpop.permute.xlu1 %9733  ;;  %v4235_v55 = vadd.f32 %v4156_v22, %v3796_v56 }
 0x5f5   :  { %v9387_v17 = vpop.permute.xlu0 %9386  ;;  %12828 = vmatmul.mubr.msk.f32.vlgmr.msra.gmra.mxu0 %vm2575_vm11, %v18184_v23  ;;  %v4381_v0 = vpop.f32.mrf.mxu0 }
 0x5f6   :  { %10856 = vrot.lane.b32.xlu1 %v16461_v48, %s19777_s15  ;;  %v9404_v33 = vsel %vm19788_vm1, %v9387_v17, %v9359_v53  ;;  %v9390_v30 = vsel %vm19789_vm2, %v9383_v61, %v9387_v17  ;;  %9866 = vmatprep.mubr.f32.mxu0 %v19542_v13  ;;  %v4452_v53 = vpop.f32.mrf.mxu1  ;;  %v4599_v57 = vadd.f32 %v4381_v0, %v4230_v35  ;;  %vm19802_vm1 = vmmov %vm19791_vm0 }
 0x5f7   :  { %10834 = vrot.lane.b32.xlu0 %v16340_v11, %s19777_s15  ;;  %9676 = vmatprep.subr.mxu1 %v9404_v33  ;;  %v4383_v28 = vpop.f32.mrf.mxu0  ;;  %v4601_v36 = vadd.f32 %v4452_v53, %v4232_v32  ;;  %vm19803_vm2 = vmmov %vm19791_vm0 }
 0x5f8   :  { %9677 = vmatpush1.msra.mxu1 %v9390_v30  ;;  %v9742_v34 = vpop.permute.xlu1 %9741  ;;  %v4600_v10 = vadd.f32 %v4383_v28, %v4231_v12 }
 0x5f9   :  { %v9738_v60 = vpop.permute.xlu0 %9737  ;;  %12831 = vmatmul.mubr.msk.f32.vlgmr.msra.gmra.mxu1 %vm2575_vm11, %v18184_v23  ;;  %v4454_v23 = vpop.f32.mrf.mxu1 }
 0x5fa   :  { %10864 = vrot.lane.b32.xlu1 %v16474_v1, %s19777_s15  ;;  %v9770_v39 = vsel %vm19790_vm4, %v9734_v47, %v9738_v60  ;;  %9937 = vmatprep.mubr.f32.mxu1 %v19542_v13  ;;  %v4523_v42 = vpop.f32.mrf.mxu0  ;;  %v4602_v16 = vadd.f32 %v4454_v23, %v4233_v58  ;;  %v9768_v51 = vsel %vm19793_vm6, %v9738_v60, %v9742_v34  ;;  %v18279_v58 = vld [vmem:[%s19070_s2 + $0x48] sm:$0x7]  ;;  %vm19804_vm4 = vmmov %vm19791_vm0 }
 0x5fb   :  { %10860 = vrot.lane.b32.xlu0 %v16467_v29, %s19777_s15  ;;  %12833 = vmatprep.subr.msk.mxu0 %vm2582_vm14, %v9770_v39  ;;  %v4594_v41 = vpop.f32.mrf.mxu1  ;;  %v4603_v61 = vadd.f32 %v4523_v42, %v4234_v5 }
 0x5fc   :  { %v18245_v26 = vpop.permute.xlu1 %9729  ;;  %v4525_v38 = vpop.f32.mrf.mxu0  ;;  %v4605_v14 = vadd.f32 %v4594_v41, %v4236_v59 }
 0x5fd   :  { %v9772_v15 = vsel %vm19791_vm0, %v18245_v26, %v9734_v47  ;;  %v18250_v52 = vpop.permute.xlu0 %9745  ;;  %v4596_v3 = vpop.f32.mrf.mxu1  ;;  %v4604_v56 = vadd.f32 %v4525_v38, %v4235_v55 }
 0x5fe   :  { %10858 = vrot.lane.b32.xlu1 %v16447_v50, %s19777_s15  ;;  %12834 = vmatpush1.msk.msra.mxu0 %vm2582_vm14, %v9772_v15  ;;  %v9766_v24 = vsel %vm19792_vm5, %v9742_v34, %v18250_v52  ;;  %v4750_v49 = vpop.f32.mrf.mxu0  ;;  %v4606_v18 = vadd.f32 %v4596_v3, %v4237_v31  ;;  %vm19805_vm5 = vcmp.lt.s32.totalorder %v13701_v6, 106 }
 0x5ff   :  { %10854 = vrot.lane.b32.xlu0 %v16439_v45, %s19777_s15  ;;  %12836 = vmatprep.subr.msk.mxu1 %vm2582_vm14, %v9766_v24  ;;  %v4821_v54 = vpop.f32.mrf.mxu1  ;;  %v4968_v7 = vadd.f32 %v4750_v49, %v4599_v57  ;;  %vm19806_vm6 = vmmov %vm19805_vm5 }
 0x600   :  { %12837 = vmatpush1.msk.msra.mxu1 %vm2582_vm14, %v9768_v51  ;;  %v9736_v40 = vpop.permute.xlu1 %9735  ;;  %v4752_v32 = vpop.f32.mrf.mxu0  ;;  %v4970_v47 = vadd.f32 %v4821_v54, %v4601_v36 }
 0x601   :  { %v9732_v2 = vpop.permute.xlu0 %9731  ;;  %v4823_v62 = vpop.f32.mrf.mxu1  ;;  %v4969_v5 = vadd.f32 %v4752_v32, %v4600_v10 }
 0x602   :  { %11209 = vrot.lane.b32.xlu1 %v16400_v8, %s13086_s0  ;;  %v9769_v35 = vsel %vm19794_vm7, %v9732_v2, %v9736_v40  ;;  %v4892_v4 = vpop.f32.mrf.mxu0  ;;  %v4971_v59 = vadd.f32 %v4823_v62, %v4602_v16  ;;  %vm19807_vm7 = vmmov %vm19805_vm5 }
 0x603   :  { %10862 = vrot.lane.b32.xlu0 %v16458_v25, %s19777_s15  ;;  %9832 = vmatprep.subr.mxu0 %v9769_v35  ;;  %v4963_v30 = vpop.f32.mrf.mxu1  ;;  %v4972_v34 = vadd.f32 %v4892_v4, %v4603_v61 }
 0x604   :  { %v9744_v17 = vpop.permute.xlu1 %9743  ;;  %v4894_v44 = vpop.f32.mrf.mxu0  ;;  %v4974_v0 = vadd.f32 %v4963_v30, %v4605_v14 }
 0x605   :  { %v9740_v33 = vpop.permute.xlu0 %9739  ;;  %v4965_v60 = vpop.f32.mrf.mxu1  ;;  %v4973_v57 = vadd.f32 %v4894_v44, %v4604_v56 }
 0x606   :  { %11217 = vrot.lane.b32.xlu1 %v16421_v20, %s13086_s0  ;;  %v9765_v12 = vsel %vm19795_vm15, %v9740_v33, %v9744_v17  ;;  %v9767_v22 = vsel %vm19796_vm12, %v9736_v40, %v9740_v33  ;;  %v5119_v39 = vpop.f32.mrf.mxu0  ;;  %v4975_v36 = vadd.f32 %v4965_v60, %v4606_v18  ;;  %vm19808_vm15 = vmmov %vm19805_vm5 }
 0x607   :  { %11213 = vrot.lane.b32.xlu0 %v16409_v9, %s13086_s0  ;;  %9903 = vmatprep.subr.mxu1 %v9765_v12  ;;  %v5190_v28 = vpop.f32.mrf.mxu1  ;;  %v5337_v42 = vadd.f32 %v5119_v39, %v4968_v7  ;;  %vm19809_vm12 = vmmov %vm19805_vm5 }
 0x608   :  { %9904 = vmatpush1.msra.mxu1 %v9767_v22  ;;  %v9750_v53 = vpop.permute.xlu1 %9749  ;;  %v5121_v23 = vpop.f32.mrf.mxu0  ;;  %v5339_v15 = vadd.f32 %v5190_v28, %v4970_v47 }
 0x609   :  { %v9728_v55 = vpop.permute.xlu0 %9727  ;;  %12838 = vmatmul.mubr.msk.f32.vlgmr.msra.gmra.mxu1 %vm2575_vm11, %v18279_v58  ;;  %v5192_v41 = vpop.f32.mrf.mxu1  ;;  %v9764_v16 = vsel %vm19798_vm9, %v18250_v52, %v9750_v53  ;;  %v5338_v52 = vadd.f32 %v5121_v23, %v4969_v5  ;;  %vm19811_vm9 = vmmov %vm19805_vm5 }
 0x60a   :  { %11205 = vrot.lane.b32.xlu1 %v16368_v46, %s13086_s0  ;;  %v9771_v31 = vsel %vm19797_vm10, %v9728_v55, %v9732_v2  ;;  %10079 = vmatprep.mubr.f32.mxu1 %v19542_v13  ;;  %v5261_v10 = vpop.f32.mrf.mxu0  ;;  %vm19810_vm10 = vmmov %vm19805_vm5 }
 0x60b   :  { %11221 = vrot.lane.b32.xlu0 %v16451_v19, %s13086_s0  ;;  %9833 = vmatpush1.msra.mxu0 %v9771_v31  ;;  %v5332_v61 = vpop.f32.mrf.mxu1  ;;  %v5341_v49 = vadd.f32 %v5261_v10, %v4972_v34 }
 0x60c   :  { %v9758_v24 = vpop.permute.xlu1 %9757  ;;  %12835 = vmatmul.mubr.msk.f32.vlgmr.msra.gmra.mxu0 %vm2575_vm11, %v18279_v58  ;;  %v5263_v40 = vpop.f32.mrf.mxu0  ;;  %v5343_v2 = vadd.f32 %v5332_v61, %v4974_v0 }
 0x60d   :  { %v9754_v38 = vpop.permute.xlu0 %9753  ;;  %v9774_v51 = vsel %vm19799_vm8, %v9758_v24, %v18245_v26  ;;  %10008 = vmatprep.mubr.f32.mxu0 %v19542_v13  ;;  %v5340_v26 = vadd.f32 %v5192_v41, %v4971_v59  ;;  %v5334_v56 = vpop.f32.mrf.mxu1  ;;  %v5342_v62 = vadd.f32 %v5263_v40, %v4973_v57  ;;  %vm19812_vm8 = vmmov %vm19805_vm5 }
 0x60e   :  { %v9760_v14 = vsel %vm19800_vm13, %v9754_v38, %v9758_v24  ;;  %11211 = vrot.lane.b32.xlu1 %v16393_v43, %s13086_s0  ;;  %v9762_v3 = vsel %vm19801_vm3, %v9750_v53, %v9754_v38  ;;  %12842 = vmatprep.subr.msk.mxu1 %vm2582_vm14, %v9774_v51  ;;  %v5488_v54 = vpop.f32.mrf.mxu0  ;;  %v5344_v4 = vadd.f32 %v5334_v56, %v4975_v36  ;;  %vm19813_vm13 = vmmov %vm19805_vm5 }
 0x60f   :  { %11207 = vrot.lane.b32.xlu0 %v16361_v27, %s13086_s0  ;;  %12839 = vmatprep.subr.msk.mxu0 %vm2582_vm14, %v9762_v3  ;;  %v5559_v32 = vpop.f32.mrf.mxu1  ;;  %v5706_v30 = vadd.f32 %v5488_v54, %v5337_v42  ;;  %vm19814_vm3 = vmmov %vm19805_vm5 }
 0x610   :  { %12840 = vmatpush1.msk.msra.mxu0 %vm2582_vm14, %v9764_v16  ;;  %12843 = vmatpush1.msk.msra.mxu1 %vm2582_vm14, %v9760_v14  ;;  %v9752_v18 = vpop.permute.xlu1 %9751  ;;  %v5490_v33 = vpop.f32.mrf.mxu0  ;;  %v5708_v12 = vadd.f32 %v5559_v32, %v5339_v15 }
 0x611   :  { %v9748_v35 = vpop.permute.xlu0 %9747  ;;  %v5561_v22 = vpop.f32.mrf.mxu1  ;;  %v5707_v60 = vadd.f32 %v5490_v33, %v5338_v52 }
 0x612   :  { %11219 = vrot.lane.b32.xlu1 %v16424_v21, %s13086_s0  ;;  %v9761_v7 = vsel %vm19802_vm1, %v9748_v35, %v9752_v18  ;;  %v9763_v47 = vsel %vm19803_vm2, %v9744_v17, %v9748_v35  ;;  %v5630_v59 = vpop.f32.mrf.mxu0  ;;  %v5709_v39 = vadd.f32 %v5561_v22, %v5340_v26  ;;  %vm19815_vm1 = vmmov %vm19814_vm3 }
 0x613   :  { %11215 = vrot.lane.b32.xlu0 %v16406_v37, %s13086_s0  ;;  %9974 = vmatprep.subr.mxu0 %v9761_v7  ;;  %v5701_v34 = vpop.f32.mrf.mxu1  ;;  %v5710_v28 = vadd.f32 %v5630_v59, %v5341_v49  ;;  %vm19816_vm2 = vmmov %vm19815_vm1 }
 0x614   :  { %9975 = vmatpush1.msra.mxu0 %v9763_v47  ;;  %v10103_v5 = vpop.permute.xlu1 %10102  ;;  %v5632_v53 = vpop.f32.mrf.mxu0  ;;  %v5712_v31 = vadd.f32 %v5701_v34, %v5343_v2 }
 0x615   :  { %v9756_v44 = vpop.permute.xlu0 %9755  ;;  %12841 = vmatmul.mubr.msk.f32.vlgmr.msra.gmra.mxu0 %vm2575_vm11, %v18279_v58  ;;  %v5703_v57 = vpop.f32.mrf.mxu1  ;;  %v5711_v41 = vadd.f32 %v5632_v53, %v5342_v62 }
 0x616   :  { %v9759_v17 = vsel %vm19804_vm4, %v9752_v18, %v9756_v44  ;;  %11225 = vrot.lane.b32.xlu1 %v16461_v48, %s13086_s0  ;;  %v9773_v0 = vsel %vm19791_vm0, %v9756_v44, %v9728_v55  ;;  %10235 = vmatprep.mubr.f32.mxu0 %v19542_v13  ;;  %v5857_v23 = vpop.f32.mrf.mxu0  ;;  %v5713_v10 = vadd.f32 %v5703_v57, %v5344_v4  ;;  %vm19817_vm4 = vmmov %vm19815_vm1 }
 0x617   :  { %11203 = vrot.lane.b32.xlu0 %v16340_v11, %s13086_s0  ;;  %10045 = vmatprep.subr.mxu1 %v9773_v0  ;;  %v5928_v55 = vpop.f32.mrf.mxu1  ;;  %v6075_v16 = vadd.f32 %v5857_v23, %v5706_v30  ;;  %vm19818_vm0 = vmmov %vm19815_vm1 }
 0x618   :  { %10046 = vmatpush1.msra.mxu1 %v9759_v17  ;;  %v10111_v36 = vpop.permute.xlu1 %10110  ;;  %v5859_v24 = vpop.f32.mrf.mxu0  ;;  %v6077_v38 = vadd.f32 %v5928_v55, %v5708_v12 }
 0x619   :  { %v10107_v42 = vpop.permute.xlu0 %10106  ;;  %12844 = vmatmul.mubr.msk.f32.vlgmr.msra.gmra.mxu1 %vm2575_vm11, %v18279_v58  ;;  %v5930_v58 = vpop.f32.mrf.mxu1  ;;  %v6076_v26 = vadd.f32 %v5859_v24, %v5707_v60 }
 0x61a   :  { %v10139_v15 = vsel %vm19805_vm5, %v10103_v5, %v10107_v42  ;;  %11233 = vrot.lane.b32.xlu1 %v16474_v1, %s13086_s0  ;;  %10306 = vmatprep.mubr.f32.mxu1 %v19542_v13  ;;  %v5999_v61 = vpop.f32.mrf.mxu0  ;;  %v6078_v49 = vadd.f32 %v5930_v58, %v5709_v39  ;;  %v10137_v56 = vsel %vm19808_vm15, %v10107_v42, %v10111_v36  ;;  %v18376_v39 = vld [vmem:[%s19070_s2 + $0x4c] sm:$0x7]  ;;  %vm19819_vm5 = vmmov %vm19818_vm0 }
 0x61b   :  { %11229 = vrot.lane.b32.xlu0 %v16467_v29, %s13086_s0  ;;  %12846 = vmatprep.subr.msk.mxu0 %vm2582_vm14, %v10139_v15  ;;  %v6070_v52 = vpop.f32.mrf.mxu1  ;;  %v6079_v18 = vadd.f32 %v5999_v61, %v5710_v28 }
 0x61c   :  { %v18342_v51 = vpop.permute.xlu1 %10098  ;;  %v6001_v2 = vpop.f32.mrf.mxu0  ;;  %v6081_v54 = vadd.f32 %v6070_v52, %v5712_v31 }
 0x61d   :  { %v10141_v14 = vsel %vm19806_vm6, %v18342_v51, %v10103_v5  ;;  %v18347_v3 = vpop.permute.xlu0 %10114  ;;  %v6072_v35 = vpop.f32.mrf.mxu1  ;;  %v6080_v62 = vadd.f32 %v6001_v2, %v5711_v41  ;;  %vm19820_vm6 = vmmov %vm19818_vm0 }
 0x61e   :  { %v10135_v40 = vsel %vm19807_vm7, %v10111_v36, %v18347_v3  ;;  %11227 = vrot.lane.b32.xlu1 %v16447_v50, %s13086_s0  ;;  %12847 = vmatpush1.msk.msra.mxu0 %vm2582_vm14, %v10141_v14  ;;  %v6226_v7 = vpop.f32.mrf.mxu0  ;;  %v6082_v4 = vadd.f32 %v6072_v35, %v5713_v10  ;;  %vm19821_vm7 = vcmp.lt.s32.totalorder %v13701_v6, 90 }
 0x61f   :  { %11223 = vrot.lane.b32.xlu0 %v16439_v45, %s13086_s0  ;;  %12849 = vmatprep.subr.msk.mxu1 %vm2582_vm14, %v10135_v40  ;;  %v6297_v33 = vpop.f32.mrf.mxu1  ;;  %v6444_v22 = vadd.f32 %v6226_v7, %v6075_v16  ;;  %vm19822_vm15 = vmmov %vm19821_vm7 }
 0x620   :  { %12850 = vmatpush1.msk.msra.mxu1 %vm2582_vm14, %v10137_v56  ;;  %v10105_v32 = vpop.permute.xlu1 %10104  ;;  %v6228_v12 = vpop.f32.mrf.mxu0  ;;  %v6446_v5 = vadd.f32 %v6297_v33, %v6077_v38 }
 0x621   :  { %v10101_v47 = vpop.permute.xlu0 %10100  ;;  %v6299_v59 = vpop.f32.mrf.mxu1  ;;  %v6445_v28 = vadd.f32 %v6228_v12, %v6076_v26 }
 0x622   :  { %11578 = vrot.lane.b32.xlu1 %v16400_v8, %s13087_s11  ;;  %v10138_v30 = vsel %vm19809_vm12, %v10101_v47, %v10105_v32  ;;  %v6368_v34 = vpop.f32.mrf.mxu0  ;;  %v6447_v31 = vadd.f32 %v6299_v59, %v6078_v49  ;;  %vm19823_vm12 = vmmov %vm19821_vm7 }
 0x623   :  { %11231 = vrot.lane.b32.xlu0 %v16458_v25, %s13086_s0  ;;  %10201 = vmatprep.subr.mxu0 %v10138_v30  ;;  %v6439_v0 = vpop.f32.mrf.mxu1  ;;  %v6448_v36 = vadd.f32 %v6368_v34, %v6079_v18 }
 0x624   :  { %v10113_v44 = vpop.permute.xlu1 %10112  ;;  %v6370_v57 = vpop.f32.mrf.mxu0  ;;  %v6450_v23 = vadd.f32 %v6439_v0, %v6081_v54 }
 0x625   :  { %v10109_v17 = vpop.permute.xlu0 %10108  ;;  %v6441_v42 = vpop.f32.mrf.mxu1  ;;  %v6449_v16 = vadd.f32 %v6370_v57, %v6080_v62 }
 0x626   :  { %v10136_v60 = vsel %vm19810_vm10, %v10105_v32, %v10109_v17  ;;  %11586 = vrot.lane.b32.xlu1 %v16421_v20, %s13087_s11  ;;  %v10134_v53 = vsel %vm19811_vm9, %v10109_v17, %v10113_v44  ;;  %v6595_v15 = vpop.f32.mrf.mxu0  ;;  %v6451_v38 = vadd.f32 %v6441_v42, %v6082_v4  ;;  %vm19824_vm10 = vmmov %vm19821_vm7 }
 0x627   :  { %11582 = vrot.lane.b32.xlu0 %v16409_v9, %s13087_s11  ;;  %10272 = vmatprep.subr.mxu1 %v10134_v53  ;;  %v6666_v24 = vpop.f32.mrf.mxu1  ;;  %v6813_v61 = vadd.f32 %v6595_v15, %v6444_v22  ;;  %vm19825_vm9 = vmmov %vm19821_vm7 }
 0x628   :  { %10273 = vmatpush1.msra.mxu1 %v10136_v60  ;;  %v10119_v55 = vpop.permute.xlu1 %10118  ;;  %v6597_v58 = vpop.f32.mrf.mxu0  ;;  %v6815_v14 = vadd.f32 %v6666_v24, %v6446_v5 }
 0x629   :  { %v10097_v41 = vpop.permute.xlu0 %10096  ;;  %12851 = vmatmul.mubr.msk.f32.vlgmr.msra.gmra.mxu1 %vm2575_vm11, %v18376_v39  ;;  %v6668_v52 = vpop.f32.mrf.mxu1  ;;  %v10133_v49 = vsel %vm19813_vm13, %v18347_v3, %v10119_v55  ;;  %v6814_v3 = vadd.f32 %v6597_v58, %v6445_v28  ;;  %vm19827_vm13 = vmmov %vm19821_vm7 }
 0x62a   :  { %v10140_v10 = vsel %vm19812_vm8, %v10097_v41, %v10101_v47  ;;  %11574 = vrot.lane.b32.xlu1 %v16368_v46, %s13087_s11  ;;  %10448 = vmatprep.mubr.f32.mxu1 %v19542_v13  ;;  %v6737_v26 = vpop.f32.mrf.mxu0  ;;  %vm19826_vm8 = vmmov %vm19821_vm7 }
 0x62b   :  { %11590 = vrot.lane.b32.xlu0 %v16451_v19, %s13087_s11  ;;  %10202 = vmatpush1.msra.mxu0 %v10140_v10  ;;  %v6808_v18 = vpop.f32.mrf.mxu1  ;;  %v6817_v7 = vadd.f32 %v6737_v26, %v6448_v36 }
 0x62c   :  { %v10127_v40 = vpop.permute.xlu1 %10126  ;;  %12848 = vmatmul.mubr.msk.f32.vlgmr.msra.gmra.mxu0 %vm2575_vm11, %v18376_v39  ;;  %v6739_v32 = vpop.f32.mrf.mxu0  ;;  %v6819_v47 = vadd.f32 %v6808_v18, %v6450_v23 }
 0x62d   :  { %v10143_v2 = vsel %vm19814_vm3, %v10127_v40, %v18342_v51  ;;  %v10123_v56 = vpop.permute.xlu0 %10122  ;;  %10377 = vmatprep.mubr.f32.mxu0 %v19542_v13  ;;  %v6816_v51 = vadd.f32 %v6668_v52, %v6447_v31  ;;  %v6810_v62 = vpop.f32.mrf.mxu1  ;;  %v6818_v59 = vadd.f32 %v6739_v32, %v6449_v16  ;;  %vm19828_vm3 = vmmov %vm19821_vm7 }
 0x62e   :  { %v10129_v54 = vsel %vm19815_vm1, %v10123_v56, %v10127_v40  ;;  %v10131_v35 = vsel %vm19816_vm2, %v10119_v55, %v10123_v56  ;;  %11580 = vrot.lane.b32.xlu1 %v16393_v43, %s13087_s11  ;;  %12855 = vmatprep.subr.msk.mxu1 %vm2582_vm14, %v10143_v2  ;;  %v6964_v33 = vpop.f32.mrf.mxu0  ;;  %v6820_v34 = vadd.f32 %v6810_v62, %v6451_v38  ;;  %vm19829_vm1 = vmmov %vm19828_vm3 }
 0x62f   :  { %11576 = vrot.lane.b32.xlu0 %v16361_v27, %s13087_s11  ;;  %12852 = vmatprep.subr.msk.mxu0 %vm2582_vm14, %v10131_v35  ;;  %v7035_v12 = vpop.f32.mrf.mxu1  ;;  %v7182_v0 = vadd.f32 %v6964_v33, %v6813_v61  ;;  %vm19830_vm2 = vmmov %vm19829_vm1 }
 0x630   :  { %12853 = vmatpush1.msk.msra.mxu0 %vm2582_vm14, %v10133_v49  ;;  %12856 = vmatpush1.msk.msra.mxu1 %vm2582_vm14, %v10129_v54  ;;  %v10121_v4 = vpop.permute.xlu1 %10120  ;;  %v6966_v17 = vpop.f32.mrf.mxu0  ;;  %v7184_v60 = vadd.f32 %v7035_v12, %v6815_v14 }
 0x631   :  { %v10117_v30 = vpop.permute.xlu0 %10116  ;;  %v7037_v53 = vpop.f32.mrf.mxu1  ;;  %v7183_v42 = vadd.f32 %v6966_v17, %v6814_v3 }
 0x632   :  { %v10132_v22 = vsel %vm19817_vm4, %v10113_v44, %v10117_v30  ;;  %11588 = vrot.lane.b32.xlu1 %v16424_v21, %s13087_s11  ;;  %v10130_v5 = vsel %vm19818_vm0, %v10117_v30, %v10121_v4  ;;  %v7106_v31 = vpop.f32.mrf.mxu0  ;;  %v7185_v15 = vadd.f32 %v7037_v53, %v6816_v51  ;;  %vm19831_vm4 = vmmov %vm19829_vm1 }
 0x633   :  { %11584 = vrot.lane.b32.xlu0 %v16406_v37, %s13087_s11  ;;  %10343 = vmatprep.subr.mxu0 %v10130_v5  ;;  %v7177_v57 = vpop.f32.mrf.mxu1  ;;  %v7186_v24 = vadd.f32 %v7106_v31, %v6817_v7  ;;  %vm19832_vm0 = vmmov %vm19829_vm1 }
 0x634   :  { %10344 = vmatpush1.msra.mxu0 %v10132_v22  ;;  %v10472_v28 = vpop.permute.xlu1 %10471  ;;  %v7108_v55 = vpop.f32.mrf.mxu0  ;;  %v7188_v10 = vadd.f32 %v7177_v57, %v6819_v47 }
 0x635   :  { %v10125_v44 = vpop.permute.xlu0 %10124  ;;  %12854 = vmatmul.mubr.msk.f32.vlgmr.msra.gmra.mxu0 %vm2575_vm11, %v18376_v39  ;;  %v7179_v16 = vpop.f32.mrf.mxu1  ;;  %v7187_v52 = vadd.f32 %v7108_v55, %v6818_v59  ;;  %v18473_v55 = vld [vmem:[%s19070_s2 + $0x50] sm:$0x7] }
 0x636   :  { %v10128_v36 = vsel %vm19819_vm5, %v10121_v4, %v10125_v44  ;;  %11594 = vrot.lane.b32.xlu1 %v16461_v48, %s13087_s11  ;;  %v10142_v23 = vsel %vm19820_vm6, %v10125_v44, %v10097_v41  ;;  %10604 = vmatprep.mubr.f32.mxu0 %v19542_v13  ;;  %v7333_v58 = vpop.f32.mrf.mxu0  ;;  %v7189_v26 = vadd.f32 %v7179_v16, %v6820_v34  ;;  %vm19833_vm5 = vmmov %vm19832_vm0 }
 0x637   :  { %11572 = vrot.lane.b32.xlu0 %v16340_v11, %s13087_s11  ;;  %10414 = vmatprep.subr.mxu1 %v10142_v23  ;;  %v7404_v41 = vpop.f32.mrf.mxu1  ;;  %v7551_v49 = vadd.f32 %v7333_v58, %v7182_v0  ;;  %vm19834_vm6 = vmmov %vm19832_vm0 }
 0x638   :  { %10415 = vmatpush1.msra.mxu1 %v10128_v36  ;;  %v10480_v38 = vpop.permute.xlu1 %10479  ;;  %v7335_v40 = vpop.f32.mrf.mxu0  ;;  %v7553_v2 = vadd.f32 %v7404_v41, %v7184_v60 }
 0x639   :  { %v10476_v61 = vpop.permute.xlu0 %10475  ;;  %12857 = vmatmul.mubr.msk.f32.vlgmr.msra.gmra.mxu1 %vm2575_vm11, %v18376_v39  ;;  %v7406_v39 = vpop.f32.mrf.mxu1  ;;  %v7552_v51 = vadd.f32 %v7335_v40, %v7183_v42 }
 0x63a   :  { %v10508_v14 = vsel %vm19821_vm7, %v10472_v28, %v10476_v61  ;;  %11602 = vrot.lane.b32.xlu1 %v16474_v1, %s13087_s11  ;;  %10675 = vmatprep.mubr.f32.mxu1 %v19542_v13  ;;  %v7475_v18 = vpop.f32.mrf.mxu0  ;;  %v7554_v7 = vadd.f32 %v7406_v39, %v7185_v15  ;;  %v10506_v62 = vsel %vm19824_vm10, %v10476_v61, %v10480_v38  ;;  %vm19835_vm7 = vmmov %vm19832_vm0 }
 0x63b   :  { %11598 = vrot.lane.b32.xlu0 %v16467_v29, %s13087_s11  ;;  %12859 = vmatprep.subr.msk.mxu0 %vm2582_vm14, %v10508_v14  ;;  %v7546_v3 = vpop.f32.mrf.mxu1  ;;  %v7555_v4 = vadd.f32 %v7475_v18, %v7186_v24 }
 0x63c   :  { %v18439_v56 = vpop.permute.xlu1 %10467  ;;  %v7477_v47 = vpop.f32.mrf.mxu0  ;;  %v7557_v33 = vadd.f32 %v7546_v3, %v7188_v10 }
 0x63d   :  { %v10510_v54 = vsel %vm19822_vm15, %v18439_v56, %v10472_v28  ;;  %v18444_v35 = vpop.permute.xlu0 %10483  ;;  %v7548_v30 = vpop.f32.mrf.mxu1  ;;  %v7556_v59 = vadd.f32 %v7477_v47, %v7187_v52  ;;  %vm19836_vm15 = vmmov %vm19832_vm0 }
 0x63e   :  { %v10504_v32 = vsel %vm19823_vm12, %v10480_v38, %v18444_v35  ;;  %11596 = vrot.lane.b32.xlu1 %v16447_v50, %s13087_s11  ;;  %12860 = vmatpush1.msk.msra.mxu0 %vm2582_vm14, %v10510_v54  ;;  %v7654_v22 = vpop.f32.mrf.mxu0  ;;  %v7558_v34 = vadd.f32 %v7548_v30, %v7189_v26  ;;  %vm19837_vm12 = vcmp.lt.s32.totalorder %v13701_v6, 89 }
 0x63f   :  { %11592 = vrot.lane.b32.xlu0 %v16439_v45, %s13087_s11  ;;  %12862 = vmatprep.subr.msk.mxu1 %vm2582_vm14, %v10504_v32  ;;  %v7725_v17 = vpop.f32.mrf.mxu1  ;;  %v7872_v53 = vadd.f32 %v7654_v22, %v7551_v49  ;;  %vm19838_vm10 = vmmov %vm19837_vm12 }
 0x640   :  { %12863 = vmatpush1.msk.msra.mxu1 %vm2582_vm14, %v10506_v62  ;;  %v10474_v12 = vpop.permute.xlu1 %10473  ;;  %v7656_v60 = vpop.f32.mrf.mxu0  ;;  %v7874_v28 = vadd.f32 %v7725_v17, %v7553_v2 }
 0x641   :  { %v10470_v5 = vpop.permute.xlu0 %10469  ;;  %v7727_v31 = vpop.f32.mrf.mxu1  ;;  %v7873_v15 = vadd.f32 %v7656_v60, %v7552_v51 }
 0x642   :  { %11947 = vrot.lane.b32.xlu1 %v16400_v8, %s13088_s21  ;;  %v10507_v0 = vsel %vm19825_vm9, %v10470_v5, %v10474_v12  ;;  %v7796_v57 = vpop.f32.mrf.mxu0  ;;  %v7875_v24 = vadd.f32 %v7727_v31, %v7554_v7  ;;  %vm19839_vm9 = vmmov %vm19838_vm10 }
 0x643   :  { %11600 = vrot.lane.b32.xlu0 %v16458_v25, %s13087_s11  ;;  %10570 = vmatprep.subr.mxu0 %v10507_v0  ;;  %v7867_v23 = vpop.f32.mrf.mxu1  ;;  %v7876_v16 = vadd.f32 %v7796_v57, %v7555_v4 }
 0x644   :  { %v10482_v44 = vpop.permute.xlu1 %10481  ;;  %v7798_v10 = vpop.f32.mrf.mxu0  ;;  %v7878_v38 = vadd.f32 %v7867_v23, %v7557_v33 }
 0x645   :  { %v10478_v36 = vpop.permute.xlu0 %10477  ;;  %v7869_v58 = vpop.f32.mrf.mxu1 }
 0x646   :  { %v10505_v42 = vsel %vm19826_vm8, %v10474_v12, %v10478_v36  ;;  %11955 = vrot.lane.b32.xlu1 %v16421_v20, %s13088_s21  ;;  %v10503_v8 = vsel %vm19827_vm13, %v10478_v36, %v10482_v44  ;;  %v8023_v61 = vpop.f32.mrf.mxu0  ;;  %v7879_v40 = vadd.f32 %v7869_v58, %v7558_v34  ;;  %vm19840_vm8 = vmmov %vm19839_vm9 }
 0x647   :  { %11951 = vrot.lane.b32.xlu0 %v16409_v9, %s13088_s21  ;;  %10641 = vmatprep.subr.mxu1 %v10503_v8  ;;  %v8094_v14 = vpop.f32.mrf.mxu1  ;;  %v7877_v9 = vadd.f32 %v7798_v10, %v7556_v59  ;;  %v18486_v49 = vadd.f32 %v8023_v61, %v7872_v53  ;;  %vm19841_vm13 = vmmov %vm19840_vm8 }
 0x648   :  { %10642 = vmatpush1.msra.mxu1 %v10505_v42  ;;  %v10488_v20 = vpop.permute.xlu1 %10487  ;;  %v8025_v26 = vpop.f32.mrf.mxu0  ;;  %v18488_v2 = vadd.f32 %v8094_v14, %v7874_v28 }
 0x649   :  { %12864 = vmatmul.mubr.msk.f32.vlgmr.msra.gmra.mxu1 %vm2575_vm11, %v18473_v55  ;;  %v10466_v41 = vpop.permute.xlu0 %10465  ;;  %v8096_v39 = vpop.f32.mrf.mxu1 }
 0x64a   :  { %v10509_v52 = vsel %vm19828_vm3, %v10466_v41, %v10470_v5  ;;  %11943 = vrot.lane.b32.xlu1 %v16368_v46, %s13088_s21  ;;  %10817 = vmatprep.mubr.f32.mxu1 %v19542_v13  ;;  %v8165_v54 = vpop.f32.mrf.mxu0  ;;  %v10502_v46 = vsel %vm19829_vm1, %v18444_v35, %v10488_v20  ;;  %v18506_v35 = vadd.f32 %v8025_v26, %v7873_v15  ;;  %vm19842_vm3 = vmmov %vm19840_vm8 }
 0x64b   :  { %11959 = vrot.lane.b32.xlu0 %v16451_v19, %s13088_s21  ;;  %10571 = vmatpush1.msra.mxu0 %v10509_v52  ;;  %v8236_v32 = vpop.f32.mrf.mxu1  ;;  %v8245_v62 = vadd.f32 %v8165_v54, %v7876_v16  ;;  %vm19843_vm1 = vmmov %vm19842_vm3 }
 0x64c   :  { %12861 = vmatmul.mubr.msk.f32.vlgmr.msra.gmra.mxu0 %vm2575_vm11, %v18473_v55  ;;  %v10496_v18 = vpop.permute.xlu1 %10495  ;;  %v8167_v47 = vpop.f32.mrf.mxu0  ;;  %v8247_v4 = vadd.f32 %v8236_v32, %v7878_v38 }
 0x64d   :  { %v10512_v3 = vsel %vm19830_vm2, %v10496_v18, %v18439_v56  ;;  %v10492_v19 = vpop.permute.xlu0 %10491  ;;  %10746 = vmatprep.mubr.f32.mxu0 %v19542_v13  ;;  %v18511_v56 = vadd.f32 %v8096_v39, %v7875_v24  ;;  %v8238_v33 = vpop.f32.mrf.mxu1  ;;  %v8246_v59 = vadd.f32 %v8167_v47, %v7877_v9  ;;  %vm19844_vm2 = vmmov %vm19843_vm1 }
 0x64e   :  { %v10498_v51 = vsel %vm19831_vm4, %v10492_v19, %v10496_v18  ;;  %v10500_v7 = vsel %vm19832_vm0, %v10488_v20, %v10492_v19  ;;  %11949 = vrot.lane.b32.xlu1 %v16393_v43, %s13088_s21  ;;  %12868 = vmatprep.subr.msk.mxu1 %vm2582_vm14, %v10512_v3  ;;  %v18515_v30 = vpop.f32.mrf.mxu0  ;;  %v8248_v34 = vadd.f32 %v8238_v33, %v7879_v40  ;;  %vm19845_vm4 = vmmov %vm19843_vm1 }
 0x64f   :  { %11945 = vrot.lane.b32.xlu0 %v16361_v27, %s13088_s21  ;;  %12865 = vmatprep.subr.msk.mxu0 %vm2582_vm14, %v10500_v7  ;;  %v18517_v22 = vpop.f32.mrf.mxu1  ;;  %vm19846_vm0 = vmmov %vm19843_vm1 }
 0x650   :  { %12866 = vmatpush1.msk.msra.mxu0 %vm2582_vm14, %v10502_v46  ;;  %12869 = vmatpush1.msk.msra.mxu1 %vm2582_vm14, %v10498_v51  ;;  %v10490_v43 = vpop.permute.xlu1 %10489  ;;  %v18525_v17 = vpop.f32.mrf.mxu0 }
 0x651   :  { %v10486_v12 = vpop.permute.xlu0 %10485  ;;  %v18529_v0 = vpop.f32.mrf.mxu1  ;;  %v8611_v63 = vadd.f32 %v18525_v17, %v18506_v35 }
 0x652   :  { %v10501_v27 = vsel %vm19833_vm5, %v10482_v44, %v10486_v12  ;;  %11957 = vrot.lane.b32.xlu1 %v16424_v21, %s13088_s21  ;;  %v10499_v5 = vsel %vm19834_vm6, %v10486_v12, %v10490_v43  ;;  %v8534_v53 = vpop.f32.mrf.mxu0  ;;  %vm19847_vm5 = vmmov %vm19846_vm0 }
 0x653   :  { %11953 = vrot.lane.b32.xlu0 %v16406_v37, %s13088_s21  ;;  %10712 = vmatprep.subr.mxu0 %v10499_v5  ;;  %v18542_v44 = vadd.f32 %v8534_v53, %v8245_v62  ;;  %vm19848_vm6 = vmmov %vm19846_vm0 }
 0x654   :  { %10713 = vmatpush1.msra.mxu0 %v10501_v27  ;;  %v10841_v60 = vpop.permute.xlu1 %10840  ;;  %v8536_v36 = vpop.f32.mrf.mxu0 }
 0x655   :  { %12867 = vmatmul.mubr.msk.f32.vlgmr.msra.gmra.mxu0 %vm2575_vm11, %v18473_v55  ;;  %v10494_v21 = vpop.permute.xlu0 %10493  ;;  %v8605_v28 = vpop.f32.mrf.mxu1  ;;  %v8615_v8 = vadd.f32 %v8536_v36, %v8246_v59 }
 0x656   :  { %v10497_v31 = vsel %vm19835_vm7, %v10490_v43, %v10494_v21  ;;  %11963 = vrot.lane.b32.xlu1 %v16461_v48, %s13088_s21  ;;  %v10511_v37 = vsel %vm19836_vm15, %v10494_v21, %v10466_v41  ;;  %10973 = vmatprep.mubr.f32.mxu0 %v19542_v13  ;;  %v18544_v57 = vadd.f32 %v8605_v28, %v8247_v4  ;;  %v12871_v41 = vld [vmem:[%s19070_s2 + $0x54] sm:$0x7]  ;;  %vm19849_vm7 = vmmov %vm19846_vm0 }
 0x657   :  { %11941 = vrot.lane.b32.xlu0 %v16340_v11, %s13088_s21  ;;  %10783 = vmatprep.subr.mxu1 %v10511_v37  ;;  %v8607_v42 = vpop.f32.mrf.mxu1  ;;  %vm19850_vm15 = vmmov %vm19846_vm0 }
 0x658   :  { %10784 = vmatpush1.msra.mxu1 %v10497_v31  ;;  %v10849_v23 = vpop.permute.xlu1 %10848  ;;  %v18548_v15 = vadd.f32 %v8607_v42, %v8248_v34 }
 0x659   :  { %12870 = vmatmul.mubr.msk.f32.vlgmr.msra.gmra.mxu1 %vm2575_vm11, %v18473_v55  ;;  %v10845_v48 = vpop.permute.xlu0 %10844 }
 0x65a   :  { %v10877_v24 = vsel %vm19837_vm12, %v10841_v60, %v10845_v48  ;;  %11971 = vrot.lane.b32.xlu1 %v16474_v1, %s13088_s21  ;;  %11044 = vmatprep.mubr.f32.mxu1 %v19542_v13  ;;  %v10875_v1 = vsel %vm19840_vm8, %v10845_v48, %v10849_v23  ;;  %vm19851_vm12 = vmmov %vm19846_vm0 }
 0x65b   :  { %11967 = vrot.lane.b32.xlu0 %v16467_v29, %s13088_s21  ;;  %12872 = vmatprep.subr.msk.mxu0 %vm2582_vm14, %v10877_v24 }
 0x65c   :  { %v10837_v11 = vpop.permute.xlu1 %10836 }
 0x65d   :  { %v10879_v55 = vsel %vm19838_vm10, %v10837_v11, %v10841_v60  ;;  %v10853_v10 = vpop.permute.xlu0 %10852  ;;  %vm19852_vm10 = vmmov %vm19846_vm0 }
 0x65e   :  { %v10873_v16 = vsel %vm19839_vm9, %v10849_v23, %v10853_v10  ;;  %11965 = vrot.lane.b32.xlu1 %v16447_v50, %s13088_s21  ;;  %12873 = vmatpush1.msk.msra.mxu0 %vm2582_vm14, %v10879_v55  ;;  %vm19853_vm9 = vcmp.lt.s32.totalorder %v13701_v6, 88 }
 0x65f   :  { %11961 = vrot.lane.b32.xlu0 %v16439_v45, %s13088_s21  ;;  %12875 = vmatprep.subr.msk.mxu1 %vm2582_vm14, %v10873_v16  ;;  %vm19854_vm8 = vmmov %vm19853_vm9 }
 0x660   :  { %12876 = vmatpush1.msk.msra.mxu1 %vm2582_vm14, %v10875_v1  ;;  %v10843_v29 = vpop.permute.xlu1 %10842  ;;  %v12884_v1 = vld [vmem:[%s19070_s2 + $0x58] sm:$0x7] }
 0x661   :  { %v10839_v38 = vpop.permute.xlu0 %10838 }
 0x662   :  { %v10876_v58 = vsel %vm19841_vm13, %v10839_v38, %v10843_v29  ;;  %vm19855_vm13 = vmmov %vm19854_vm8 }
 0x663   :  { %11969 = vrot.lane.b32.xlu0 %v16458_v25, %s13088_s21  ;;  %10939 = vmatprep.subr.mxu0 %v10876_v58 }
 0x664   :  { %v10851_v50 = vpop.permute.xlu1 %10850 }
 0x665   :  { %v10847_v20 = vpop.permute.xlu0 %10846  ;;  %v18589_v26 = vpop.f32.mrf.mxu1 }
 0x666   :  { %v10874_v61 = vsel %vm19842_vm3, %v10843_v29, %v10847_v20  ;;  %v10872_v45 = vsel %vm19843_vm1, %v10847_v20, %v10851_v50  ;;  %vm19856_vm3 = vmmov %vm19854_vm8 }
 0x667   :  { %11010 = vmatprep.subr.mxu1 %v10872_v45  ;;  %v18606_v51 = vpop.f32.mrf.mxu1  ;;  %vm19857_vm1 = vmmov %vm19856_vm3 }
 0x668   :  { %11011 = vmatpush1.msra.mxu1 %v10874_v61  ;;  %v10857_v14 = vpop.permute.xlu1 %10856  ;;  %v18583_v25 = vpop.f32.mrf.mxu0 }
 0x669   :  { %12877 = vmatmul.mubr.msk.f32.vlgmr.msra.gmra.mxu1 %vm2575_vm11, %v12871_v41  ;;  %v10835_v52 = vpop.permute.xlu0 %10834  ;;  %v10871_v19 = vsel %vm19848_vm6, %v10853_v10, %v10857_v14 }
 0x66a   :  { %v10878_v9 = vsel %vm19844_vm2, %v10835_v52, %v10839_v38  ;;  %11186 = vmatprep.mubr.f32.mxu1 %v19542_v13  ;;  %v18594_v54 = vpop.f32.mrf.mxu0  ;;  %vm19858_vm2 = vmmov %vm19857_vm1 }
 0x66b   :  { %10940 = vmatpush1.msra.mxu0 %v10878_v9 }
 0x66c   :  { %12874 = vmatmul.mubr.msk.f32.vlgmr.msra.gmra.mxu0 %vm2575_vm11, %v12871_v41  ;;  %v10865_v40 = vpop.permute.xlu1 %10864 }
 0x66d   :  { %v10881_v39 = vsel %vm19845_vm4, %v10865_v40, %v10837_v11  ;;  %v10861_v18 = vpop.permute.xlu0 %10860  ;;  %11115 = vmatprep.mubr.f32.mxu0 %v19542_v13  ;;  %vm19859_vm4 = vmmov %vm19857_vm1 }
 0x66e   :  { %v10867_v46 = vsel %vm19846_vm0, %v10861_v18, %v10865_v40  ;;  %v10869_v3 = vsel %vm19847_vm5, %v10857_v14, %v10861_v18  ;;  %12881 = vmatprep.subr.msk.mxu1 %vm2582_vm14, %v10881_v39  ;;  %vm19860_vm0 = vmmov %vm19857_vm1 }
 0x66f   :  { %12878 = vmatprep.subr.msk.mxu0 %vm2582_vm14, %v10869_v3  ;;  %12882 = vmatpush1.msk.msra.mxu1 %vm2582_vm14, %v10867_v46  ;;  %vm19861_vm5 = vmmov %vm19860_vm0 }
 0x670   :  { %12879 = vmatpush1.msk.msra.mxu0 %vm2582_vm14, %v10871_v19  ;;  %v10859_v32 = vpop.permute.xlu1 %10858  ;;  %vm19862_vm6 = vmmov %vm19860_vm0 }
 0x671   :  { %v10855_v7 = vpop.permute.xlu0 %10854  ;;  %v8903_v47 = vpop.f32.mrf.mxu0 }
 0x672   :  { %v10870_v62 = vsel %vm19849_vm7, %v10851_v50, %v10855_v7  ;;  %v10868_v4 = vsel %vm19850_vm15, %v10855_v7, %v10859_v32  ;;  %v18613_v33 = vadd.f32 %v8903_v47, %v18542_v44  ;;  %vm19863_vm7 = vmmov %vm19860_vm0 }
 0x673   :  { %11081 = vmatprep.subr.mxu0 %v10868_v4  ;;  %v8905_v43 = vpop.f32.mrf.mxu0  ;;  %vm19864_vm15 = vmmov %vm19860_vm0 }
 0x674   :  { %11082 = vmatpush1.msra.mxu0 %v10870_v62  ;;  %v11210_v12 = vpop.permute.xlu1 %11209  ;;  %v18615_v27 = vadd.f32 %v8905_v43, %v8615_v8 }
 0x675   :  { %12880 = vmatmul.mubr.msk.f32.vlgmr.msra.gmra.mxu0 %vm2575_vm11, %v12871_v41  ;;  %v10863_v5 = vpop.permute.xlu0 %10862  ;;  %v8974_v59 = vpop.f32.mrf.mxu1 }
 0x676   :  { %v10866_v34 = vsel %vm19851_vm12, %v10859_v32, %v10863_v5  ;;  %v10880_v60 = vsel %vm19852_vm10, %v10863_v5, %v10835_v52  ;;  %11342 = vmatprep.mubr.f32.mxu0 %v19542_v13  ;;  %v18624_v53 = vadd.f32 %v8974_v59, %v18544_v57  ;;  %vm19865_vm12 = vmmov %vm19860_vm0 }
 0x677   :  { %11152 = vmatprep.subr.mxu1 %v10880_v60  ;;  %v8976_v21 = vpop.f32.mrf.mxu1  ;;  %vm19866_vm10 = vmmov %vm19860_vm0 }
 0x678   :  { %11153 = vmatpush1.msra.mxu1 %v10866_v34  ;;  %v11218_v28 = vpop.permute.xlu1 %11217  ;;  %v18627_v31 = vadd.f32 %v8976_v21, %v18548_v15 }
 0x679   :  { %12883 = vmatmul.mubr.msk.f32.vlgmr.msra.gmra.mxu1 %vm2575_vm11, %v12871_v41  ;;  %v11214_v37 = vpop.permute.xlu0 %11213 }
 0x67a   :  { %v11246_v44 = vsel %vm19853_vm9, %v11210_v12, %v11214_v37  ;;  %11413 = vmatprep.mubr.f32.mxu1 %v19542_v13  ;;  %v11244_v48 = vsel %vm19856_vm3, %v11214_v37, %v11218_v28  ;;  %vm19867_vm9 = vmmov %vm19860_vm0 }
 0x67b   :  { %12885 = vmatprep.subr.msk.mxu0 %vm2582_vm14, %v11246_v44 }
 0x67c   :  { %v11206_v36 = vpop.permute.xlu1 %11205 }
 0x67d   :  { %v11248_v57 = vsel %vm19854_vm8, %v11206_v36, %v11210_v12  ;;  %v11222_v23 = vpop.permute.xlu0 %11221  ;;  %vm19868_vm8 = vmmov %vm19860_vm0 }
 0x67e   :  { %v11242_v42 = vsel %vm19855_vm13, %v11218_v28, %v11222_v23  ;;  %12886 = vmatpush1.msk.msra.mxu0 %vm2582_vm14, %v11248_v57  ;;  %vm19869_vm13 = vcmp.lt.s32.totalorder %v13701_v6, 87 }
 0x67f   :  { %12888 = vmatprep.subr.msk.mxu1 %vm2582_vm14, %v11242_v42  ;;  %vm19870_vm3 = vmmov %vm19869_vm13 }
 0x680   :  { %12889 = vmatpush1.msk.msra.mxu1 %vm2582_vm14, %v11244_v48  ;;  %v11212_v8 = vpop.permute.xlu1 %11211 }
 0x681   :  { %v11208_v15 = vpop.permute.xlu0 %11207 }
 0x682   :  { %v11245_v24 = vsel %vm19857_vm1, %v11208_v15, %v11212_v8  ;;  %vm19871_vm1 = vmmov %vm19870_vm3 }
 0x683   :  { %11308 = vmatprep.subr.mxu0 %v11245_v24 }
 0x684   :  { %v11220_v11 = vpop.permute.xlu1 %11219 }
 0x685   :  { %v11216_v55 = vpop.permute.xlu0 %11215  ;;  %v18674_v18 = vpop.f32.mrf.mxu1 }
 0x686   :  { %v11243_v10 = vsel %vm19858_vm2, %v11212_v8, %v11216_v55  ;;  %v11241_v16 = vsel %vm19859_vm4, %v11216_v55, %v11220_v11  ;;  %vm19872_vm2 = vmmov %vm19871_vm1 }
 0x687   :  { %11379 = vmatprep.subr.mxu1 %v11241_v16  ;;  %v18681_v47 = vpop.f32.mrf.mxu1  ;;  %vm19873_vm4 = vmmov %vm19871_vm1 }
 0x688   :  { %11380 = vmatpush1.msra.mxu1 %v11243_v10  ;;  %v11226_v29 = vpop.permute.xlu1 %11225  ;;  %v18657_v20 = vpop.f32.mrf.mxu0 }
 0x689   :  { %12890 = vmatmul.mubr.msk.f32.vlgmr.msra.gmra.mxu1 %vm2575_vm11, %v12884_v1  ;;  %v11204_v38 = vpop.permute.xlu0 %11203  ;;  %v11240_v52 = vsel %vm19864_vm15, %v11222_v23, %v11226_v29 }
 0x68a   :  { %v11247_v58 = vsel %vm19860_vm0, %v11204_v38, %v11208_v15  ;;  %11555 = vmatprep.mubr.f32.mxu1 %v19542_v13  ;;  %v18672_v40 = vpop.f32.mrf.mxu0  ;;  %vm19874_vm0 = vmmov %vm19871_vm1 }
 0x68b   :  { %11309 = vmatpush1.msra.mxu0 %v11247_v58  ;;  %vm19878_vm15 = vmmov %vm19874_vm0 }
 0x68c   :  { %12887 = vmatmul.mubr.msk.f32.vlgmr.msra.gmra.mxu0 %vm2575_vm11, %v12884_v1  ;;  %v11234_v50 = vpop.permute.xlu1 %11233 }
 0x68d   :  { %v11250_v61 = vsel %vm19861_vm5, %v11234_v50, %v11206_v36  ;;  %v11230_v45 = vpop.permute.xlu0 %11229  ;;  %11484 = vmatprep.mubr.f32.mxu0 %v19542_v13  ;;  %vm19875_vm5 = vmmov %vm19874_vm0 }
 0x68e   :  { %v11236_v41 = vsel %vm19862_vm6, %v11230_v45, %v11234_v50  ;;  %v11238_v14 = vsel %vm19863_vm7, %v11226_v29, %v11230_v45  ;;  %12894 = vmatprep.subr.msk.mxu1 %vm2582_vm14, %v11250_v61  ;;  %vm19876_vm6 = vmmov %vm19874_vm0 }
 0x68f   :  { %12891 = vmatprep.subr.msk.mxu0 %vm2582_vm14, %v11238_v14  ;;  %12895 = vmatpush1.msk.msra.mxu1 %vm2582_vm14, %v11236_v41  ;;  %vm19877_vm7 = vmmov %vm19874_vm0 }
 0x690   :  { %12892 = vmatpush1.msk.msra.mxu0 %vm2582_vm14, %v11240_v52  ;;  %v11228_v9 = vpop.permute.xlu1 %11227 }
 0x691   :  { %v11224_v39 = vpop.permute.xlu0 %11223 }
 0x692   :  { %v11239_v46 = vsel %vm19865_vm12, %v11220_v11, %v11224_v39  ;;  %v11237_v3 = vsel %vm19866_vm10, %v11224_v39, %v11228_v9  ;;  %v12897_v11 = vld [vmem:[%s19070_s2 + $0x5c] sm:$0x7]  ;;  %vm19879_vm12 = vmmov %vm19874_vm0 }
 0x693   :  { %11450 = vmatprep.subr.mxu0 %v11237_v3  ;;  %vm19880_vm10 = vmmov %vm19874_vm0 }
 0x694   :  { %11451 = vmatpush1.msra.mxu0 %v11239_v46  ;;  %v11579_v19 = vpop.permute.xlu1 %11578  ;;  %v9272_v32 = vpop.f32.mrf.mxu0 }
 0x695   :  { %12893 = vmatmul.mubr.msk.f32.vlgmr.msra.gmra.mxu0 %vm2575_vm11, %v12884_v1  ;;  %v11232_v7 = vpop.permute.xlu0 %11231  ;;  %v18684_v62 = vadd.f32 %v9272_v32, %v18613_v33 }
 0x696   :  { %v11235_v4 = vsel %vm19867_vm9, %v11228_v9, %v11232_v7  ;;  %v11249_v43 = vsel %vm19868_vm8, %v11232_v7, %v11204_v38  ;;  %11711 = vmatprep.mubr.f32.mxu0 %v19542_v13  ;;  %v9274_v12 = vpop.f32.mrf.mxu0  ;;  %vm19881_vm9 = vmmov %vm19874_vm0 }
 0x697   :  { %11521 = vmatprep.subr.mxu1 %v11249_v43  ;;  %v18692_v5 = vadd.f32 %v9274_v12, %v18615_v27  ;;  %vm19882_vm8 = vmmov %vm19874_vm0 }
 0x698   :  { %11522 = vmatpush1.msra.mxu1 %v11235_v4  ;;  %v11587_v59 = vpop.permute.xlu1 %11586 }
 0x699   :  { %12896 = vmatmul.mubr.msk.f32.vlgmr.msra.gmra.mxu1 %vm2575_vm11, %v12884_v1  ;;  %v11583_v34 = vpop.permute.xlu0 %11582  ;;  %v9343_v33 = vpop.f32.mrf.mxu1 }
 0x69a   :  { %v11615_v60 = vsel %vm19869_vm13, %v11579_v19, %v11583_v34  ;;  %11782 = vmatprep.mubr.f32.mxu1 %v19542_v13  ;;  %v18699_v21 = vadd.f32 %v9343_v33, %v18624_v53  ;;  %v11613_v53 = vsel %vm19872_vm2, %v11583_v34, %v11587_v59  ;;  %vm19883_vm13 = vmmov %vm19874_vm0 }
 0x69b   :  { %12898 = vmatprep.subr.msk.mxu0 %vm2582_vm14, %v11615_v60  ;;  %v9345_v28 = vpop.f32.mrf.mxu1 }
 0x69c   :  { %v11575_v37 = vpop.permute.xlu1 %11574  ;;  %v18703_v27 = vadd.f32 %v9345_v28, %v18627_v31 }
 0x69d   :  { %v11617_v44 = vsel %vm19870_vm3, %v11575_v37, %v11579_v19  ;;  %v11591_v36 = vpop.permute.xlu0 %11590  ;;  %vm19884_vm3 = vmmov %vm19874_vm0 }
 0x69e   :  { %v11611_v57 = vsel %vm19871_vm1, %v11587_v59, %v11591_v36  ;;  %12899 = vmatpush1.msk.msra.mxu0 %vm2582_vm14, %v11617_v44  ;;  %vm19885_vm1 = vcmp.lt.s32.totalorder %v13701_v6, 86 }
 0x69f   :  { %12901 = vmatprep.subr.msk.mxu1 %vm2582_vm14, %v11611_v57  ;;  %vm19886_vm2 = vmmov %vm19885_vm1 }
 0x6a0   :  { %12902 = vmatpush1.msk.msra.mxu1 %vm2582_vm14, %v11613_v53  ;;  %v11581_v23 = vpop.permute.xlu1 %11580  ;;  %v12910_v53 = vld [vmem:[%s19070_s2 + $0x60] sm:$0x7] }
 0x6a1   :  { %v11577_v42 = vpop.permute.xlu0 %11576 }
 0x6a2   :  { %v11614_v31 = vsel %vm19873_vm4, %v11577_v42, %v11581_v23  ;;  %vm19887_vm4 = vmmov %vm19885_vm1 }
 0x6a3   :  { %11677 = vmatprep.subr.mxu0 %v11614_v31 }
 0x6a4   :  { %v11589_v48 = vpop.permute.xlu1 %11588 }
 0x6a5   :  { %v11585_v8 = vpop.permute.xlu0 %11584 }
 0x6a6   :  { %v11612_v15 = vsel %vm19874_vm0, %v11581_v23, %v11585_v8  ;;  %v11610_v24 = vsel %vm19875_vm5, %v11585_v8, %v11589_v48  ;;  %vm19888_vm0 = vmmov %vm19885_vm1 }
 0x6a7   :  { %11748 = vmatprep.subr.mxu1 %v11610_v24  ;;  %vm19889_vm5 = vmmov %vm19888_vm0 }
 0x6a8   :  { %11749 = vmatpush1.msra.mxu1 %v11612_v15  ;;  %v11595_v55 = vpop.permute.xlu1 %11594 }
 0x6a9   :  { %12903 = vmatmul.mubr.msk.f32.vlgmr.msra.gmra.mxu1 %vm2575_vm11, %v12897_v11  ;;  %v11573_v10 = vpop.permute.xlu0 %11572  ;;  %v11609_v61 = vsel %vm19880_vm10, %v11591_v36, %v11595_v55  ;;  %vm19894_vm10 = vmmov %vm19888_vm0 }
 0x6aa   :  { %v11616_v16 = vsel %vm19876_vm6, %v11573_v10, %v11577_v42  ;;  %11924 = vmatprep.mubr.f32.mxu1 %v19542_v13  ;;  %vm19890_vm6 = vmmov %vm19888_vm0 }
 0x6ab   :  { %11678 = vmatpush1.msra.mxu0 %v11616_v16 }
 0x6ac   :  { %12900 = vmatmul.mubr.msk.f32.vlgmr.msra.gmra.mxu0 %vm2575_vm11, %v12897_v11  ;;  %v11603_v1 = vpop.permute.xlu1 %11602 }
 0x6ad   :  { %v11619_v29 = vsel %vm19877_vm7, %v11603_v1, %v11575_v37  ;;  %v11599_v38 = vpop.permute.xlu0 %11598  ;;  %11853 = vmatprep.mubr.f32.mxu0 %v19542_v13  ;;  %vm19891_vm7 = vmmov %vm19888_vm0 }
 0x6ae   :  { %v11605_v58 = vsel %vm19878_vm15, %v11599_v38, %v11603_v1  ;;  %v11607_v50 = vsel %vm19879_vm12, %v11595_v55, %v11599_v38  ;;  %12907 = vmatprep.subr.msk.mxu1 %vm2582_vm14, %v11619_v29  ;;  %vm19892_vm15 = vmmov %vm19888_vm0 }
 0x6af   :  { %12904 = vmatprep.subr.msk.mxu0 %vm2582_vm14, %v11607_v50  ;;  %12908 = vmatpush1.msk.msra.mxu1 %vm2582_vm14, %v11605_v58  ;;  %vm19893_vm12 = vmmov %vm19888_vm0  ;;  %v9570_v50 = vpop.f32.mrf.mxu1 }
 0x6b0   :  { %12905 = vmatpush1.msk.msra.mxu0 %vm2582_vm14, %v11609_v61  ;;  %v11597_v45 = vpop.permute.xlu1 %11596  ;;  %v9499_v61 = vpop.f32.mrf.mxu0 }
 0x6b1   :  { %v11593_v41 = vpop.permute.xlu0 %11592 }
 0x6b2   :  { %v11608_v14 = vsel %vm19881_vm9, %v11589_v48, %v11593_v41  ;;  %v11606_v52 = vsel %vm19882_vm8, %v11593_v41, %v11597_v45  ;;  %vm19895_vm9 = vmmov %vm19888_vm0  ;;  %v9501_v41 = vpop.f32.mrf.mxu0 }
 0x6b3   :  { %11819 = vmatprep.subr.mxu0 %v11606_v52  ;;  %vm19896_vm8 = vmmov %vm19888_vm0 }
 0x6b4   :  { %11820 = vmatpush1.msra.mxu0 %v11608_v14  ;;  %v11948_v9 = vpop.permute.xlu1 %11947 }
 0x6b5   :  { %12906 = vmatmul.mubr.msk.f32.vlgmr.msra.gmra.mxu0 %vm2575_vm11, %v12897_v11  ;;  %v11601_v39 = vpop.permute.xlu0 %11600  ;;  %v18804_v52 = vpop.f32.mrf.mxu0 }
 0x6b6   :  { %v11604_v46 = vsel %vm19883_vm13, %v11597_v45, %v11601_v39  ;;  %v11618_v3 = vsel %vm19884_vm3, %v11601_v39, %v11573_v10  ;;  %12080 = vmatprep.mubr.f32.mxu0 %v19542_v13  ;;  %vm19897_vm13 = vmmov %vm19888_vm0  ;;  %v9572_v45 = vpop.f32.mrf.mxu1 }
 0x6b7   :  { %11890 = vmatprep.subr.mxu1 %v11618_v3  ;;  %vm19898_vm3 = vmmov %vm19888_vm0  ;;  %v18808_v39 = vpop.f32.mrf.mxu0 }
 0x6b8   :  { %11891 = vmatpush1.msra.mxu1 %v11604_v46  ;;  %v11956_v19 = vpop.permute.xlu1 %11955 }
 0x6b9   :  { %12909 = vmatmul.mubr.msk.f32.vlgmr.msra.gmra.mxu1 %vm2575_vm11, %v12897_v11  ;;  %v11952_v32 = vpop.permute.xlu0 %11951  ;;  %v18802_v14 = vpop.f32.mrf.mxu1 }
 0x6ba   :  { %v11984_v7 = vsel %vm19885_vm1, %v11948_v9, %v11952_v32  ;;  %12151 = vmatprep.mubr.f32.mxu1 %v19542_v13  ;;  %v11982_v34 = vsel %vm19888_vm0, %v11952_v32, %v11956_v19  ;;  %vm19899_vm1 = vmmov %vm19888_vm0 }
 0x6bb   :  { %12911 = vmatprep.subr.msk.mxu0 %vm2582_vm14, %v11984_v7 }
 0x6bc   :  { %v11944_v4 = vpop.permute.xlu1 %11943 }
 0x6bd   :  { %v11986_v43 = vsel %vm19886_vm2, %v11944_v4, %v11948_v9  ;;  %v11960_v12 = vpop.permute.xlu0 %11959  ;;  %vm19900_vm2 = vmmov %vm19888_vm0  ;;  %v18806_v9 = vpop.f32.mrf.mxu1 }
 0x6be   :  { %v11980_v59 = vsel %vm19887_vm4, %v11956_v19, %v11960_v12  ;;  %12912 = vmatpush1.msk.msra.mxu0 %vm2582_vm14, %v11986_v43 }
 0x6bf   :  { %12914 = vmatprep.subr.msk.mxu1 %vm2582_vm14, %v11980_v59 }
 0x6c0   :  { %12915 = vmatpush1.msk.msra.mxu1 %vm2582_vm14, %v11982_v34  ;;  %v11950_v33 = vpop.permute.xlu1 %11949 }
 0x6c1   :  { %v11946_v60 = vpop.permute.xlu0 %11945 }
 0x6c2   :  { %v11983_v28 = vsel %vm19889_vm5, %v11946_v60, %v11950_v33 }
 0x6c3   :  { %12046 = vmatprep.subr.mxu0 %v11983_v28 }
 0x6c4   :  { %v11958_v37 = vpop.permute.xlu1 %11957 }
 0x6c5   :  { %v11954_v44 = vpop.permute.xlu0 %11953 }
 0x6c6   :  { %v11981_v36 = vsel %vm19890_vm6, %v11950_v33, %v11954_v44  ;;  %v11979_v57 = vsel %vm19891_vm7, %v11954_v44, %v11958_v37 }
 0x6c7   :  { %12117 = vmatprep.subr.mxu1 %v11979_v57 }
 0x6c8   :  { %12118 = vmatpush1.msra.mxu1 %v11981_v36  ;;  %v11964_v23 = vpop.permute.xlu1 %11963 }
 0x6c9   :  { %12916 = vmatmul.mubr.msk.f32.vlgmr.msra.gmra.mxu1 %vm2575_vm11, %v12910_v53  ;;  %v11942_v42 = vpop.permute.xlu0 %11941  ;;  %v11978_v55 = vsel %vm19896_vm8, %v11960_v12, %v11964_v23  ;;  %v9939_v46 = vpop.f32.mrf.mxu1 }
 0x6ca   :  { %v11985_v31 = vsel %vm19892_vm15, %v11942_v42, %v11946_v60  ;;  %12293 = vmatprep.mubr.f32.mxu1 %v19542_v13 }
 0x6cb   :  { %12047 = vmatpush1.msra.mxu0 %v11985_v31  ;;  %v9941_v6 = vpop.f32.mrf.mxu1 }
 0x6cc   :  { %12913 = vmatmul.mubr.msk.f32.vlgmr.msra.gmra.mxu0 %vm2575_vm11, %v12910_v53  ;;  %v11972_v48 = vpop.permute.xlu1 %11971  ;;  %v9868_v3 = vpop.f32.mrf.mxu0 }
 0x6cd   :  { %v11988_v8 = vsel %vm19893_vm12, %v11972_v48, %v11944_v4  ;;  %v11968_v15 = vpop.permute.xlu0 %11967  ;;  %12222 = vmatprep.mubr.f32.mxu0 %v19542_v13 }
 0x6ce   :  { %v11974_v24 = vsel %vm19894_vm10, %v11968_v15, %v11972_v48  ;;  %v11976_v11 = vsel %vm19895_vm9, %v11964_v23, %v11968_v15  ;;  %12920 = vmatprep.subr.msk.mxu1 %vm2582_vm14, %v11988_v8  ;;  %v9870_v19 = vpop.f32.mrf.mxu0 }
 0x6cf   :  { %12917 = vmatprep.subr.msk.mxu0 %vm2582_vm14, %v11976_v11  ;;  %12921 = vmatpush1.msk.msra.mxu1 %vm2582_vm14, %v11974_v24 }
 0x6d0   :  { %12918 = vmatpush1.msk.msra.mxu0 %vm2582_vm14, %v11978_v55  ;;  %v11966_v10 = vpop.permute.xlu1 %11965 }
 0x6d1   :  { %v11962_v16 = vpop.permute.xlu0 %11961 }
 0x6d2   :  { %v11977_v13 = vsel %vm19897_vm13, %v11958_v37, %v11962_v16  ;;  %v11975_v1 = vsel %vm19898_vm3, %v11962_v16, %v11966_v10  ;;  %vm12476_vm13 = vcmask 1040384  }
 0x6d3   :  { %12188 = vmatprep.subr.mxu0 %v11975_v1 }
 0x6d4   :  { %12189 = vmatpush1.msra.mxu0 %v11977_v13  ;;  %v8613_v13 = vadd.f32 %v18529_v0, %v18511_v56 }
 0x6d5   :  { %12919 = vmatmul.mubr.msk.f32.vlgmr.msra.gmra.mxu0 %vm2575_vm11, %v12910_v53  ;;  %v11970_v29 = vpop.permute.xlu0 %11969  ;;  %v18812_v7 = vpop.f32.mrf.mxu0 }
 0x6d6   :  { %v11973_v38 = vsel %vm19899_vm1, %v11966_v10, %v11970_v29  ;;  %v11987_v58 = vsel %vm19900_vm2, %v11970_v29, %v11942_v42  ;;  %v8612_v10 = vadd.f32 %v18517_v22, %v18488_v2  ;;  %v8610_v29 = vadd.f32 %v18515_v30, %v18486_v49 }
 0x6d7   :  { %12259 = vmatprep.subr.mxu1 %v11987_v58  ;;  %v18816_v43 = vpop.f32.mrf.mxu0 }
 0x6d8   :  { %12260 = vmatpush1.msra.mxu1 %v11973_v38  ;;  %v8981_v58 = vadd.f32 %v18589_v26, %v8612_v10  ;;  %v8979_v22 = vadd.f32 %v18583_v25, %v8610_v29 }
 0x6d9   :  { %12922 = vmatmul.mubr.msk.f32.vlgmr.msra.gmra.mxu1 %vm2575_vm11, %v12910_v53  ;;  %v18810_v32 = vpop.f32.mrf.mxu1 }
 0x6da   :  { %v9350_v56 = vadd.f32 %v18674_v18, %v8981_v58  ;;  %v9348_v26 = vadd.f32 %v18657_v20, %v8979_v22 }
 0x6db   :  { %v18814_v4 = vpop.f32.mrf.mxu1 }
 0x6dc   :  { %v9719_v35 = vadd.f32 %v9570_v50, %v9350_v56  ;;  %v9717_v25 = vadd.f32 %v9499_v61, %v9348_v26 }
 0x6de   :  { %v10088_v18 = vadd.f32 %v9939_v46, %v9719_v35 }
 0x6e9   :  { %v10308_v12 = vpop.f32.mrf.mxu1 }
 0x6ea   :  { %v10457_v20 = vadd.f32 %v10308_v12, %v10088_v18 }
 0x6eb   :  { %v10310_v34 = vpop.f32.mrf.mxu1 }
 0x6ec   :  { %v10237_v59 = vpop.f32.mrf.mxu0 }
 0x6ee   :  { %v10239_v33 = vpop.f32.mrf.mxu0 }
 0x6f5   :  { %v18820_v28 = vpop.f32.mrf.mxu0 }
 0x6f7   :  { %v18824_v36 = vpop.f32.mrf.mxu0 }
 0x6f9   :  { %v18818_v60 = vpop.f32.mrf.mxu1 }
 0x6fb   :  { %v18822_v37 = vpop.f32.mrf.mxu1 }
 0x6fc   :  { %19901 = vst [vmem:[#allocation70_spill] sm:$0xff] %v18822_v37  ;;  %v8982_v37 = vadd.f32 %v18606_v51, %v8613_v13 }
 0x6fe   :  { %v9351_v30 = vadd.f32 %v18681_v47, %v8982_v37  ;;  %v10086_v47 = vadd.f32 %v9868_v3, %v9717_v25  ;;  %v9722_v3 = vadd.f32 %v18808_v39, %v18692_v5 }
 0x700   :  { %v9720_v13 = vadd.f32 %v9572_v45, %v9351_v30 }
 0x709   :  { %v10677_v44 = vpop.f32.mrf.mxu1 }
 0x70b   :  { %v10679_v53 = vpop.f32.mrf.mxu1 }
 0x70c   :  { %v10606_v57 = vpop.f32.mrf.mxu0 }
 0x70e   :  { %v10608_v42 = vpop.f32.mrf.mxu0 }
 0x715   :  { %v18828_v31 = vpop.f32.mrf.mxu0 }
 0x717   :  { %v18832_v15 = vpop.f32.mrf.mxu0 }
 0x719   :  { %v18826_v23 = vpop.f32.mrf.mxu1 }
 0x71b   :  { %v18830_v48 = vpop.f32.mrf.mxu1 }
 0x71c   :  { %19902 = vst [vmem:[#allocation69_spill] sm:$0xff] %v18830_v48 }
 0x729   :  { %v11046_v8 = vpop.f32.mrf.mxu1 }
 0x72b   :  { %v11048_v11 = vpop.f32.mrf.mxu1 }
 0x72c   :  { %v10975_v24 = vpop.f32.mrf.mxu0 }
 0x72e   :  { %v10977_v16 = vpop.f32.mrf.mxu0 }
 0x735   :  { %v18840_v1 = vpop.f32.mrf.mxu0 }
 0x737   :  { %v18850_v2 = vpop.f32.mrf.mxu0 }
 0x738   :  { %19905 = vst [vmem:[#allocation72_spill] sm:$0xff] %v18850_v2 }
 0x739   :  { %v18834_v55 = vpop.f32.mrf.mxu1 }
 0x73a   :  { %19903 = vst [vmem:[#allocation67_spill] sm:$0xff] %v18834_v55  ;;  %v8980_v55 = vadd.f32 %v18594_v54, %v8611_v63  ;;  %v10089_v54 = vadd.f32 %v9941_v6, %v9720_v13 }
 0x73b   :  { %v18844_v38 = vpop.f32.mrf.mxu1 }
 0x73c   :  { %19904 = vst [vmem:[#allocation68_spill] sm:$0xff] %v18844_v38  ;;  %v9349_v51 = vadd.f32 %v18672_v40, %v8980_v55  ;;  %v10458_v56 = vadd.f32 %v10310_v34, %v10089_v54  ;;  %v10455_v40 = vadd.f32 %v10237_v59, %v10086_v47  ;;  %v9723_v59 = vadd.f32 %v18802_v14, %v18699_v21 }
 0x73e   :  { %v9718_v58 = vadd.f32 %v9501_v41, %v9349_v51  ;;  %v10827_v55 = vadd.f32 %v10679_v53, %v10458_v56  ;;  %v9721_v41 = vadd.f32 %v18804_v52, %v18684_v62  ;;  %v10824_v6 = vadd.f32 %v10606_v57, %v10455_v40 }
 0x73f   :  { %v10091_v57 = vadd.f32 %v18816_v43, %v9722_v3  ;;  %v10092_v51 = vadd.f32 %v18810_v32, %v9723_v59 }
 0x740   :  { %v10087_v22 = vadd.f32 %v9870_v19, %v9718_v58  ;;  %v11196_v12 = vadd.f32 %v11048_v11, %v10827_v55  ;;  %v11193_v34 = vadd.f32 %v10975_v24, %v10824_v6 }
 0x741   :  { %v10460_v43 = vadd.f32 %v18824_v36, %v10091_v57  ;;  %v10461_v32 = vadd.f32 %v18818_v60, %v10092_v51 }
 0x742   :  { %v10456_v46 = vadd.f32 %v10239_v33, %v10087_v22 }
 0x743   :  { %v10829_v47 = vadd.f32 %v18832_v15, %v10460_v43  ;;  %v10830_v36 = vadd.f32 %v18826_v23, %v10461_v32  ;;  %v19909_v23 = vld [vmem:[#allocation70_spill] sm:$0xff]  ;;  %v19912_v57 = vld [vmem:[#allocation68_spill] sm:$0xff] }
 0x744   :  { %v10825_v35 = vadd.f32 %v10608_v42, %v10456_v46 }
 0x746   :  { %v11194_v62 = vadd.f32 %v10977_v16, %v10825_v35  ;;  %v9724_v16 = vadd.f32 %v18806_v9, %v18703_v27 }
 0x748   :  { %v10093_v9 = vadd.f32 %v18814_v4, %v9724_v16 }
 0x749   :  { %v11415_v48 = vpop.f32.mrf.mxu1 }
 0x74b   :  { %v11417_v49 = vpop.f32.mrf.mxu1 }
 0x74c   :  { %v11344_v0 = vpop.f32.mrf.mxu0  ;;  %v11565_v53 = vadd.f32 %v11417_v49, %v11196_v12 }
 0x74d   :  { %v11562_v52 = vadd.f32 %v11344_v0, %v11193_v34 }
 0x74e   :  { %v11346_v17 = vpop.f32.mrf.mxu0 }
 0x74f   :  { %v11563_v11 = vadd.f32 %v11346_v17, %v11194_v62 }
 0x755   :  { %v18860_v38 = vpop.f32.mrf.mxu0 }
 0x757   :  { %v18864_v2 = vpop.f32.mrf.mxu0 }
 0x759   :  { %v18857_v10 = vpop.f32.mrf.mxu1 }
 0x75a   :  { %19906 = vst [vmem:[#allocation74_spill] sm:$0xff] %v18857_v10  ;;  %v10826_v10 = vadd.f32 %v10677_v44, %v10457_v20 }
 0x75b   :  { %v18862_v29 = vpop.f32.mrf.mxu1 }
 0x75c   :  { %v11195_v61 = vadd.f32 %v11046_v8, %v10826_v10  ;;  %v10090_v10 = vadd.f32 %v18812_v7, %v9721_v41  ;;  %v10462_v41 = vadd.f32 %v19909_v23, %v10093_v9 }
 0x75e   :  { %v11564_v26 = vadd.f32 %v11415_v48, %v11195_v61  ;;  %v10459_v14 = vadd.f32 %v18820_v28, %v10090_v10 }
 0x760   :  { %v10828_v17 = vadd.f32 %v18828_v31, %v10459_v14 }
 0x769   :  { %v11784_v63 = vpop.f32.mrf.mxu1 }
 0x76a   :  { %v11933_v8 = vadd.f32 %v11784_v63, %v11564_v26 }
 0x76b   :  { %v11786_v50 = vpop.f32.mrf.mxu1 }
 0x76c   :  { %v11713_v37 = vpop.f32.mrf.mxu0  ;;  %v11934_v5 = vadd.f32 %v11786_v50, %v11565_v53  ;;  %v19907_v50 = vld [vmem:[#allocation72_spill] sm:$0xff] }
 0x76d   :  { %v11931_v42 = vadd.f32 %v11713_v37, %v11562_v52  ;;  %v11197_v37 = vadd.f32 %v18840_v1, %v10828_v17  ;;  %v11198_v56 = vadd.f32 %v19907_v50, %v10829_v47  ;;  %v19908_v1 = vld [vmem:[#allocation67_spill] sm:$0xff] }
 0x76e   :  { %v11715_v30 = vpop.f32.mrf.mxu0  ;;  %v11199_v61 = vadd.f32 %v19908_v1, %v10830_v36 }
 0x76f   :  { %v11932_v49 = vadd.f32 %v11715_v30, %v11563_v11  ;;  %v11566_v31 = vadd.f32 %v18860_v38, %v11197_v37  ;;  %v11567_v55 = vadd.f32 %v18864_v2, %v11198_v56  ;;  %v19910_v38 = vld [vmem:[#allocation74_spill] sm:$0xff] }
 0x770   :  { %v11568_v3 = vadd.f32 %v19910_v38, %v11199_v61 }
 0x775   :  { %v11855_v19 = vpop.f32.mrf.mxu0 }
 0x776   :  { %v11935_v30 = vadd.f32 %v11855_v19, %v11566_v31  ;;  %v19911_v19 = vld [vmem:[#allocation69_spill] sm:$0xff] }
 0x777   :  { %v11857_v39 = vpop.f32.mrf.mxu0  ;;  %v10831_v59 = vadd.f32 %v19911_v19, %v10462_v41 }
 0x778   :  { %v11936_v46 = vadd.f32 %v11857_v39, %v11567_v55 }
 0x779   :  { %v18866_v45 = vpop.f32.mrf.mxu1 }
 0x77a   :  { %v11937_v53 = vadd.f32 %v18866_v45, %v11568_v3 }
 0x77b   :  { %v18872_v44 = vpop.f32.mrf.mxu1 }
 0x789   :  { %v12153_v33 = vpop.f32.mrf.mxu1 }
 0x78a   :  { %v12302_v48 = vadd.f32 %v12153_v33, %v11933_v8 }
 0x78b   :  { %v12155_v24 = vpop.f32.mrf.mxu1 }
 0x78c   :  { %v12318_v13 = vmul.f32 %v12302_v48, %v12302_v48  ;;  %v12303_v25 = vadd.f32 %v12155_v24, %v11934_v5  ;;  %v12082_v21 = vpop.f32.mrf.mxu0  ;;  %v18902_v6 = vand.u32 2147483647, %v12302_v48  ;;  %v11200_v5 = vadd.f32 %v19912_v57, %v10831_v59 }
 0x78d   :  { %v12300_v7 = vadd.f32 %v12082_v21, %v11931_v42 }
 0x78e   :  { %v12334_v0 = vrot.slane %v12318_v13, 1  ;;  %v12319_v18 = vmul.f32 %v12303_v25, %v12303_v25  ;;  %v12084_v58 = vpop.f32.mrf.mxu0  ;;  %v18906_v12 = vand.u32 2147483647, %v12303_v25  ;;  %v12414_v10 = vmax.f32 %v18902_v6, 1e-08 }
 0x78f   :  { %v12316_v63 = vmul.f32 %v12300_v7, %v12300_v7  ;;  %v12301_v54 = vadd.f32 %v12084_v58, %v11932_v49  ;;  %v18916_v62 = vand.u32 2147483647, %v12300_v7  ;;  %v11569_v45 = vadd.f32 %v18862_v29, %v11200_v5 }
 0x790   :  { %v18886_v20 = vadd.f32 %v12334_v0, %v12318_v13  ;;  %v12335_v28 = vrot.slane %v12319_v18, 1  ;;  %v12415_v39 = vmax.f32 %v18906_v12, 1e-08 }
 0x791   :  { %v12332_v22 = vrot.slane %v12316_v63, 1  ;;  %v12317_v27 = vmul.f32 %v12301_v54, %v12301_v54  ;;  %v18925_v24 = vand.u32 2147483647, %v12301_v54  ;;  %v12412_v13 = vmax.f32 %v18916_v62, 1e-08 }
 0x792   :  { %13016 = vrsqrt.f32 %v18886_v20  ;;  %v18894_v60 = vadd.f32 %v12335_v28, %v12319_v18  ;;  %v11938_v7 = vadd.f32 %v18872_v44, %v11569_v45  ;;  %vm12372_vm11 = vcmp.eq.f32.partialorder %v18886_v20, inf }
 0x793   :  { %v18896_v15 = vadd.f32 %v12332_v22, %v12316_v63  ;;  %v12333_v40 = vrot.slane %v12317_v27, 1  ;;  %vm12374_vm14 = vcmp.eq.f32.partialorder %v18886_v20, 0.0  ;;  %v12375_v43 = vand.u32 2147483648, %v18886_v20 }
 0x794   :  { %13018 = vrsqrt.f32 %v18894_v60  ;;  %v12413_v0 = vmax.f32 %v18925_v24, 1e-08  ;;  %vm12379_vm4 = vcmp.eq.f32.partialorder %v18894_v60, inf  ;;  %vm12381_vm0 = vcmp.eq.f32.partialorder %v18894_v60, 0.0 }
 0x795   :  { %v12224_v4 = vpop.f32.mrf.mxu0  ;;  %13020 = vrsqrt.f32 %v18896_v15  ;;  %v18908_v26 = vadd.f32 %v12333_v40, %v12317_v27  ;;  %v12382_v32 = vand.u32 2147483648, %v18894_v60  ;;  %vm12358_vm5 = vcmp.eq.f32.partialorder %v18896_v15, inf }
 0x796   :  { %v12304_v2 = vadd.f32 %v12224_v4, %v11935_v30  ;;  %vm12360_vm6 = vcmp.eq.f32.partialorder %v18896_v15, 0.0  ;;  %v12361_v22 = vand.u32 2147483648, %v18896_v15 }
 0x797   :  { %v12226_v35 = vpop.f32.mrf.mxu0  ;;  %13022 = vrsqrt.f32 %v18908_v26  ;;  %vm12365_vm7 = vcmp.eq.f32.partialorder %v18908_v26, inf  ;;  %vm12367_vm15 = vcmp.eq.f32.partialorder %v18908_v26, 0.0 }
 0x798   :  { %v18910_v34 = vadd.f32 %v12226_v35, %v11936_v46  ;;  %v12320_v52 = vmul.f32 %v12304_v2, %v12304_v2  ;;  %13024 = vrcp.f32 %v12414_v10  ;;  %v18971_v55 = vand.u32 2147483647, %v12304_v2 }
 0x799   :  { %v12295_v8 = vpop.f32.mrf.mxu1  ;;  %13026 = vrcp.f32 %v12415_v39 }
 0x79a   :  { %v12321_v33 = vmul.f32 %v18910_v34, %v18910_v34  ;;  %v18922_v48 = vadd.f32 %v12295_v8, %v11937_v53  ;;  %v12336_v11 = vrot.slane %v12320_v52, 1  ;;  %v18979_v61 = vand.u32 2147483647, %v18910_v34 }
 0x79b   :  { %v12297_v14 = vpop.f32.mrf.mxu1  ;;  %v12416_v46 = vmax.f32 %v18971_v55, 1e-08 }
 0x79c   :  { %v12337_v42 = vrot.slane %v12321_v33, 1  ;;  %v12322_v51 = vmul.f32 %v18922_v48, %v18922_v48  ;;  %v18930_v25 = vadd.f32 %v12336_v11, %v12320_v52  ;;  %v18942_v18 = vadd.f32 %v12297_v14, %v11938_v7 }
 0x79d   :  { %v12417_v35 = vmax.f32 %v18979_v61, 1e-08  ;;  %v13090_v14 = vmov 1983009808  }
 0x79e   :  { %v18932_v21 = vadd.f32 %v12337_v42, %v12321_v33  ;;  %13028 = vrsqrt.f32 %v18930_v25  ;;  %v12338_v16 = vrot.slane %v12322_v51, 1  ;;  %v12323_v27 = vmul.f32 %v18942_v18, %v18942_v18 }
 0x79f   :  { %v13017_v49 = vpop.eup %13016  ;;  %vm12386_vm12 = vcmp.eq.f32.partialorder %v18930_v25, inf  ;;  %v12389_v59 = vand.u32 2147483648, %v18930_v25  ;;  %vm12388_vm10 = vcmp.eq.f32.partialorder %v18930_v25, 0.0  ;;  %v19006_v42 = vand.u32 2147483647, %v18922_v48 }
 0x7a0   :  { %v12371_v29 = vmul.f32 %v13017_v49, %v18886_v20  ;;  %13030 = vrsqrt.f32 %v18932_v21  ;;  %v12339_v30 = vrot.slane %v12323_v27, 1  ;;  %vm12393_vm9 = vcmp.eq.f32.partialorder %v18932_v21, inf }
 0x7a1   :  { %v13019_v58 = vpop.eup %13018  ;;  %13032 = vrcp.f32 %v12412_v13  ;;  %v12396_v10 = vand.u32 2147483648, %v18932_v21  ;;  %vm12395_vm8 = vcmp.eq.f32.partialorder %v18932_v21, 0.0  ;;  %v12496_v49 = vunpack.c.l.s4 %v13090_v14 }
 0x7a2   :  { %v12373_v44 = vsel %vm12372_vm11, %v18886_v20, %v12371_v29  ;;  %v13021_v17 = vpop.eup %13020  ;;  %v12378_v54 = vmul.f32 %v13019_v58, %v18894_v60  ;;  %v18955_v20 = vadd.f32 %v12338_v16, %v12322_v51  ;;  %13034 = vrcp.f32 %v12413_v0 }
 0x7a3   :  { %v18947_v63 = vsel %vm12374_vm14, %v12375_v43, %v12373_v44  ;;  %v12357_v28 = vmul.f32 %v13021_v17, %v18896_v15  ;;  %v18985_v38 = vadd.f32 %v12339_v30, %v12323_v27  ;;  %v12418_v48 = vmax.f32 %v19006_v42, 1e-08 }
 0x7a4   :  { %v12446_v47 = vmax.f32 %v18947_v63, 1e-08  ;;  %v12380_v37 = vsel %vm12379_vm4, %v18894_v60, %v12378_v54  ;;  %v13023_v9 = vpop.eup %13022  ;;  %v12368_v60 = vand.u32 2147483648, %v18908_v26  ;;  %v19015_v43 = vand.u32 2147483647, %v18942_v18 }
 0x7a5   :  { %v18963_v36 = vsel %vm12381_vm0, %v12382_v32, %v12380_v37  ;;  %v12359_v50 = vsel %vm12358_vm5, %v18896_v15, %v12357_v28  ;;  %v12364_v40 = vmul.f32 %v13023_v9, %v18908_v26  ;;  %v13025_v23 = vpop.eup %13024  ;;  %vm12400_vm3 = vcmp.eq.f32.partialorder %v18955_v20, inf }
 0x7a6   :  { %13036 = vrcp.f32 %v12446_v47  ;;  %v12447_v56 = vmax.f32 %v18963_v36, 1e-08  ;;  %v18968_v31 = vsel %vm12360_vm6, %v12361_v22, %v12359_v50  ;;  %v13027_v3 = vpop.eup %13026  ;;  %v12430_v5 = vmul.f32 %v13025_v23, %v18902_v6 }
 0x7a7   :  { %v12444_v1 = vmax.f32 %v18968_v31, 1e-08  ;;  %13038 = vrsqrt.f32 %v18955_v20  ;;  %v12366_v15 = vsel %vm12365_vm7, %v18908_v26, %v12364_v40  ;;  %v12403_v17 = vand.u32 2147483648, %v18955_v20 }
 0x7a8   :  { %13040 = vrcp.f32 %v12447_v56  ;;  %v18981_v4 = vsel %vm12367_vm15, %v12368_v60, %v12366_v15  ;;  %v12438_v29 = vmul.f32 %v12430_v5, %v18902_v6  ;;  %vm12402_vm1 = vcmp.eq.f32.partialorder %v18955_v20, 0.0 }
 0x7a9   :  { %13042 = vrcp.f32 %v12444_v1  ;;  %v12445_v41 = vmax.f32 %v18981_v4, 1e-08  ;;  %v12497_v22 = vunpack.c.0.s8 %v12496_v49  ;;  %v12419_v9 = vmax.f32 %v19015_v43, 1e-08 }
 0x7aa   :  { %vm12407_vm2 = vcmp.eq.f32.partialorder %v18985_v38, inf  ;;  %vm12409_vm11 = vcmp.eq.f32.partialorder %v18985_v38, 0.0 }
 0x7ab   :  { %v13029_v2 = vpop.eup %13028  ;;  %13044 = vrcp.f32 %v12445_v41  ;;  %v12410_v41 = vand.u32 2147483648, %v18985_v38 }
 0x7ac   :  { %v12385_v34 = vmul.f32 %v13029_v2, %v18930_v25  ;;  %13046 = vrsqrt.f32 %v18985_v38 }
 0x7ad   :  { %v13031_v26 = vpop.eup %13030  ;;  %13048 = vrcp.f32 %v12416_v46 }
 0x7ae   :  { %v13033_v19 = vpop.eup %13032  ;;  %v12392_v53 = vmul.f32 %v13031_v26, %v18932_v21  ;;  %v12387_v8 = vsel %vm12386_vm12, %v18930_v25, %v12385_v34  ;;  %13050 = vrcp.f32 %v12417_v35 }
 0x7af   :  { %v18997_v52 = vsel %vm12388_vm10, %v12389_v59, %v12387_v8  ;;  %v13035_v57 = vpop.eup %13034  ;;  %v12428_v54 = vmul.f32 %v13033_v19, %v18916_v62 }
 0x7b0   :  { %v12394_v33 = vsel %vm12393_vm9, %v18932_v21, %v12392_v53  ;;  %v12448_v39 = vmax.f32 %v18997_v52, 1e-08  ;;  %v12431_v21 = vmul.f32 %v13027_v3, %v18906_v12  ;;  %v19913_v3 = vld [vmem:[#allocation2_spill] sm:$0xff] }
 0x7b1   :  { %v19003_v11 = vsel %vm12395_vm8, %v12396_v10, %v12394_v33  ;;  %v12436_v60 = vmul.f32 %v12428_v54, %v18916_v62 }
 0x7b2   :  { %v12449_v51 = vmax.f32 %v19003_v11, 1e-08  ;;  %13052 = vrcp.f32 %v12448_v39  ;;  %v12439_v18 = vmul.f32 %v12431_v21, %v18906_v12 }
 0x7b3   :  { %v13037_v45 = vpop.eup %13036 }
 0x7b4   :  { %v12462_v13 = vmul.f32 %v13037_v45, %v18947_v63  ;;  %v13039_v25 = vpop.eup %13038  ;;  %13054 = vrcp.f32 %v12449_v51 }
 0x7b5   :  { %v13041_v7 = vpop.eup %13040  ;;  %v12399_v16 = vmul.f32 %v13039_v25, %v18955_v20  ;;  %13056 = vrcp.f32 %v12418_v48 }
 0x7b6   :  { %v13043_v0 = vpop.eup %13042  ;;  %v12470_v58 = vmul.f32 %v12462_v13, %v18947_v63  ;;  %v12463_v44 = vmul.f32 %v13041_v7, %v18963_v36  ;;  %v12429_v63 = vmul.f32 %v13035_v57, %v18925_v24 }
 0x7b7   :  { %v12460_v6 = vmul.f32 %v13043_v0, %v18968_v31  ;;  %v12401_v32 = vsel %vm12400_vm3, %v18955_v20, %v12399_v16 }
 0x7b8   :  { %v12471_v47 = vmul.f32 %v12463_v44, %v18963_v36  ;;  %v12404_v28 = vsel %vm12402_vm1, %v12403_v17, %v12401_v32  ;;  %v13045_v37 = vpop.eup %13044  ;;  %v12479_v56 = vsel %vm12476_vm13, %v12438_v29, %v12470_v58  ;;  %v12437_v30 = vmul.f32 %v12429_v63, %v18925_v24 }
 0x7b9   :  { %v12450_v27 = vmax.f32 %v12404_v28, 1e-08  ;;  %v13047_v50 = vpop.eup %13046  ;;  %v12468_v20 = vmul.f32 %v12460_v6, %v18968_v31  ;;  %v12461_v12 = vmul.f32 %v13045_v37, %v18981_v4  ;;  %v12500_v31 = vsub.s32 %v12497_v22, %v19913_v3 }
 0x7ba   :  { %v12480_v40 = vsel %vm12476_vm13, %v12439_v18, %v12471_v47  ;;  %v13049_v1 = vpop.eup %13048  ;;  %v12406_v15 = vmul.f32 %v13047_v50, %v18985_v38 }
 0x7bb   :  { %v12494_v36 = vcombine.low %v12479_v56, %v12480_v40  ;;  %13058 = vrcp.f32 %v12450_v27  ;;  %v12469_v23 = vmul.f32 %v12461_v12, %v18981_v4  ;;  %v13051_v46 = vpop.eup %13050  ;;  %v12477_v62 = vsel %vm12476_vm13, %v12436_v60, %v12468_v20 }
 0x7bc   :  { %v12408_v2 = vsel %vm12407_vm2, %v18985_v38, %v12406_v15  ;;  %13060 = vrcp.f32 %v12419_v9  ;;  %v12432_v19 = vmul.f32 %v13049_v1, %v18971_v55  ;;  %v12433_v59 = vmul.f32 %v13051_v46, %v18979_v61 }
 0x7bd   :  { %v12478_v35 = vsel %vm12476_vm13, %v12437_v30, %v12469_v23  ;;  %v12411_v26 = vsel %vm12409_vm11, %v12410_v41, %v12408_v2  ;;  %v12508_v8 = vrot.slane %v12494_v36, %v12500_v31 }
 0x7be   :  { %v12493_v24 = vcombine.low %v12477_v62, %v12478_v35  ;;  %v12451_v34 = vmax.f32 %v12411_v26, 1e-08  ;;  %v12440_v39 = vmul.f32 %v12432_v19, %v18971_v55  ;;  %v12441_v45 = vmul.f32 %v12433_v59, %v18979_v61 }
 0x7bf   :  { %v13053_v4 = vpop.eup %13052 }
 0x7c0   :  { %v12501_v10 = vrot.slane %v12493_v24, %v12500_v31  ;;  %v12464_v33 = vmul.f32 %v13053_v4, %v18997_v52  ;;  %13062 = vrcp.f32 %v12451_v34 }
 0x7c1   :  { %v13055_v53 = vpop.eup %13054 }
 0x7c2   :  { %v12465_v38 = vmul.f32 %v13055_v53, %v19003_v11  ;;  %v12509_v57 = vcombine.low %v12501_v10, %v12508_v8  ;;  %v12472_v5 = vmul.f32 %v12464_v33, %v18997_v52  ;;  %v13057_v13 = vpop.eup %13056 }
 0x7c3   :  { %v12434_v52 = vmul.f32 %v13057_v13, %v19006_v42 }
 0x7c4   :  { %v12473_v51 = vmul.f32 %v12465_v38, %v19003_v11  ;;  %12529 = vst [vmem:[%s19071_s5] sm:$0xff] %v12509_v57  ;;  %v12481_v25 = vsel %vm12476_vm13, %v12440_v39, %v12472_v5 }
 0x7c5   :  { %v12442_v48 = vmul.f32 %v12434_v52, %v19006_v42 }
 0x7c6   :  { %v12482_v21 = vsel %vm12476_vm13, %v12441_v45, %v12473_v51 }
 0x7c7   :  { %v12510_v14 = vcombine.low %v12481_v25, %v12482_v21 }
 0x7c8   :  { %v13059_v49 = vpop.eup %13058 }
 0x7c9   :  { %v13061_v7 = vpop.eup %13060  ;;  %v12466_v29 = vmul.f32 %v13059_v49, %v12404_v28  ;;  %v12518_v6 = vrot.slane %v12510_v14, %v12500_v31 }
 0x7ca   :  { %v12435_v55 = vmul.f32 %v13061_v7, %v19015_v43 }
 0x7cb   :  { %v12474_v16 = vmul.f32 %v12466_v29, %v12404_v28 }
 0x7cc   :  { %v12443_v0 = vmul.f32 %v12435_v55, %v19015_v43 }
 0x7cd   :  { %v13063_v61 = vpop.eup %13062  ;;  %v12483_v44 = vsel %vm12476_vm13, %v12442_v48, %v12474_v16 }
 0x7ce   :  { %v12467_v11 = vmul.f32 %v13063_v61, %v12411_v26 }
 0x7d0   :  { %v12475_v58 = vmul.f32 %v12467_v11, %v12411_v26 }
 0x7d2   :  { %v12484_v17 = vsel %vm12476_vm13, %v12443_v0, %v12475_v58 }
 0x7d3   :  { %v12511_v54 = vcombine.low %v12483_v44, %v12484_v17 }
 0x7d5   :  { %v12525_v32 = vrot.slane %v12511_v54, %v12500_v31 }
 0x7d7   :  { %v12526_v18 = vcombine.low %v12518_v6, %v12525_v32 }
 0x7d9   :  { %12530 = vst [vmem:[%s19071_s5 + $0x8] sm:$0xff] %v12526_v18 }

// kernel: a_call__.3
= control target key start
LH: loop header
LB: loop body
LE: loop exit
PB: predicated region body
PF: predicated region fallthrough
CT: control target
= control target key end

     0   :  { %s995_s30 = smov 0   ;;  %s1348_s0 = inlined_call_operand.vmem [shape: f32[32,128], index: 0, kind: input, shape index: {}]   ;;  %s1349_s1 = inlined_call_operand.vmem [shape: f32[32,128], index: 1, kind: input, shape index: {}]   ;;  %s1350_s2 = inlined_call_operand.vmem [shape: f32[32,128], index: 2, kind: input, shape index: {}]   ;;  %s1351_s3 = inlined_call_operand.vmem [shape: f32[32,128], index: 3, kind: input, shape index: {}]   ;;  %s1352_s4 = inlined_call_operand.vmem [shape: f32[8,32,128], index: 4, kind: input, shape index: {}]   ;;  %s1353_s5 = inlined_call_operand.vmem [shape: f32[8,32,128], index: 5, kind: input, shape index: {}]   ;;  %s1354_s6 = inlined_call_operand.vmem [shape: f32[8,32,128], index: 6, kind: input, shape index: {}]   ;;  %s1355_s7 = inlined_call_operand.vmem [shape: f32[8,32,128], index: 7, kind: input, shape index: {}]   ;;  %s1356_s8 = inlined_call_operand.vmem [shape: f32[8,32,128], index: 8, kind: output, shape index: {0}]   ;;  %s1357_s9 = inlined_call_operand.vmem [shape: f32[8,32,128], index: 9, kind: output, shape index: {1}]  }
   0x1 LB: > { %s898_s10 = sadd.s32 4294967295, %s943_s30   ;;  %p902_p0 = scmp.ge.s32.totalorder %s943_s30, 1  ;;  %s943_s30 = sphi %s995_s30, %s20_s30  }
   0x2   : > { %p328_p1 = scmp.lt.s32.totalorder %s943_s30, 3 }
   0x4   : > { %p329_p2 = pnand %p902_p0, %p328_p1 }
   0x5   : > { %s903_s11 = sshll.u32 (!%p329_p2), %s898_s10, 2 }
   0x6   : > { %332 = sbr.rel (%p329_p2) target bundleno = 78 (0x4e), region = 52  ;;  %p391_p3 = scmp.lt.s32.totalorder (!%p329_p2), %s903_s11, 7 }
   0xb   : > { %s1359_s11 = smov (!%p391_p3, %s903_s11), 7  ;;  %v1006_v0 = vld [vmem:[%s1348_s0] sm:$0xff]  ;;  %v1023_v3 = vld [vmem:[%s1348_s0 + $0x8] sm:$0xff]  ;;  %v1055_v7 = vld [vmem:[%s1348_s0 + $0x10] sm:$0xff] }
   0xc   : > { %v1011_v1 = vld [vmem:[%s1349_s1] sm:$0xff]  ;;  %s1018_s18 = sshll.u32 %s1359_s11, 5  ;;  %v1028_v4 = vld [vmem:[%s1349_s1 + $0x8] sm:$0xff]  ;;  %v1060_v8 = vld [vmem:[%s1349_s1 + $0x10] sm:$0xff] }
   0xd   : > { %v1016_v2 = vld [vmem:[%s1350_s2] sm:$0xff]  ;;  %v1033_v5 = vld [vmem:[%s1350_s2 + $0x8] sm:$0xff]  ;;  %s1039_s27 = scalar_lea.vmem %s1352_s4, %s1018_s18  ;;  %s1045_s10 = scalar_lea.vmem %s1353_s5, %s1018_s18  ;;  %v1065_v9 = vld [vmem:[%s1350_s2 + $0x10] sm:$0xff] }
   0xe   : > { %v1050_v6 = vld [vmem:[%s1351_s3] sm:$0xff]  ;;  %s1071_s22 = scalar_lea.vmem %s1354_s6, %s1018_s18  ;;  %s1077_s25 = scalar_lea.vmem %s1355_s7, %s1018_s18  ;;  %v1084_v12 = vld [vmem:[%s1351_s3 + $0x8] sm:$0xff]  ;;  %v1090_v14 = vld [vmem:[%s1348_s0 + $0x18] sm:$0xff] }
   0xf   : > { %v448_v10 = vld [vmem:[%s1039_s27] sm:$0xff]  ;;  %v449_v13 = vld [vmem:[%s1039_s27 + $0x8] sm:$0xff]  ;;  %v1095_v15 = vld [vmem:[%s1349_s1 + $0x18] sm:$0xff]  ;;  %s1146_s24 = scalar_lea.vmem %s1356_s8, %s1018_s18  ;;  %s1161_s29 = scalar_lea.vmem %s1357_s9, %s1018_s18 }
  0x10   : > { %v464_v11 = vld [vmem:[%s1045_s10] sm:$0xff]  ;;  %v1100_v16 = vld [vmem:[%s1350_s2 + $0x18] sm:$0xff]  ;;  %v512_v19 = vmul.f32 %v448_v10, %v1006_v0  ;;  %v465_v21 = vld [vmem:[%s1045_s10 + $0x8] sm:$0xff]  ;;  %v513_v22 = vmul.f32 %v449_v13, %v1023_v3  ;;  %v640_v24 = vmul.f32 %v448_v10, %v1011_v1  ;;  %v641_v62 = vmul.f32 %v449_v13, %v1028_v4 }
  0x11   : > { %v480_v17 = vld [vmem:[%s1071_s22] sm:$0xff]  ;;  %v528_v20 = vmul.f32 %v464_v11, %v1011_v1  ;;  %v1111_v23 = vld [vmem:[%s1351_s3 + $0x10] sm:$0xff]  ;;  %v481_v27 = vld [vmem:[%s1071_s22 + $0x8] sm:$0xff]  ;;  %v529_v29 = vmul.f32 %v465_v21, %v1028_v4  ;;  %v656_v31 = vmul.f32 %v464_v11, %v1006_v0  ;;  %v657_v63 = vmul.f32 %v465_v21, %v1023_v3 }
  0x12   : > { %v496_v18 = vld [vmem:[%s1077_s25] sm:$0xff]  ;;  %v560_v25 = vmul.f32 %v480_v17, %v1016_v2  ;;  %v497_v28 = vld [vmem:[%s1077_s25 + $0x8] sm:$0xff]  ;;  %v450_v30 = vld [vmem:[%s1039_s27 + $0x10] sm:$0xff]  ;;  %v561_v33 = vmul.f32 %v481_v27, %v1033_v5  ;;  %v688_v58 = vmul.f32 %v480_v17, %v1050_v6 }
  0x13   : > { %v592_v26 = vmul.f32 %v496_v18, %v1050_v6  ;;  %v544_v32 = vadd.f32 %v528_v20, %v512_v19  ;;  %v593_v34 = vmul.f32 %v497_v28, %v1084_v12  ;;  %v466_v35 = vld [vmem:[%s1045_s10 + $0x10] sm:$0xff]  ;;  %v514_v38 = vmul.f32 %v450_v30, %v1055_v7  ;;  %v451_v43 = vld [vmem:[%s1039_s27 + $0x18] sm:$0xff] }
  0x14   : > { %v482_v36 = vld [vmem:[%s1071_s22 + $0x10] sm:$0xff]  ;;  %v545_v39 = vadd.f32 %v529_v29, %v513_v22  ;;  %v530_v40 = vmul.f32 %v466_v35, %v1060_v8  ;;  %v467_v44 = vld [vmem:[%s1045_s10 + $0x18] sm:$0xff]  ;;  %v515_v49 = vmul.f32 %v451_v43, %v1090_v14  ;;  %v672_v55 = vsub.f32 %v640_v24, %v656_v31  ;;  %v452_v22 = vld [vmem:[%s1039_s27 + $0x20] sm:$0xff] }
  0x15   : > { %v498_v37 = vld [vmem:[%s1077_s25 + $0x10] sm:$0xff]  ;;  %v562_v41 = vmul.f32 %v482_v36, %v1065_v9  ;;  %v483_v45 = vld [vmem:[%s1071_s22 + $0x18] sm:$0xff]  ;;  %v576_v46 = vadd.f32 %v560_v25, %v544_v32  ;;  %v531_v50 = vmul.f32 %v467_v44, %v1095_v15  ;;  %v720_v59 = vmul.f32 %v496_v18, %v1016_v2  ;;  %v468_v24 = vld [vmem:[%s1045_s10 + $0x20] sm:$0xff] }
  0x16   : > { %v594_v42 = vmul.f32 %v498_v37, %v1111_v23  ;;  %v1136_v47 = vld [vmem:[%s1351_s3 + $0x18] sm:$0xff]  ;;  %v563_v51 = vmul.f32 %v483_v45, %v1100_v16  ;;  %v577_v52 = vadd.f32 %v561_v33, %v545_v39  ;;  %v546_v53 = vadd.f32 %v530_v40, %v514_v38  ;;  %v484_v29 = vld [vmem:[%s1071_s22 + $0x20] sm:$0xff]  ;;  %v469_v38 = vld [vmem:[%s1045_s10 + $0x28] sm:$0xff] }
  0x17   : > { %v499_v48 = vld [vmem:[%s1077_s25 + $0x18] sm:$0xff]  ;;  %v608_v56 = vadd.f32 %v592_v26, %v576_v46  ;;  %v547_v57 = vadd.f32 %v531_v50, %v515_v49  ;;  %v704_v11 = vadd.f32 %v688_v58, %v672_v55  ;;  %v689_v19 = vmul.f32 %v481_v27, %v1084_v12  ;;  %v454_v50 = vld [vmem:[%s1039_s27 + $0x30] sm:$0xff] }
  0x18   : > { %v595_v54 = vmul.f32 %v499_v48, %v1136_v47  ;;  %v609_v60 = vadd.f32 %v593_v34, %v577_v52  ;;  %v578_v61 = vadd.f32 %v562_v41, %v546_v53  ;;  %v721_v20 = vmul.f32 %v497_v28, %v1033_v5  ;;  %v500_v34 = vld [vmem:[%s1077_s25 + $0x20] sm:$0xff]  ;;  %v485_v41 = vld [vmem:[%s1071_s22 + $0x28] sm:$0xff]  ;;  %v502_v55 = vld [vmem:[%s1077_s25 + $0x30] sm:$0xff] }
  0x19   : > { %624 = vst [vmem:[%s1146_s24] sm:$0xff] %v608_v56  ;;  %v579_v10 = vadd.f32 %v563_v51, %v547_v57  ;;  %v673_v13 = vsub.f32 %v641_v62, %v657_v63  ;;  %v642_v18 = vmul.f32 %v450_v30, %v1060_v8  ;;  %v658_v21 = vmul.f32 %v466_v35, %v1055_v7  ;;  %v453_v35 = vld [vmem:[%s1039_s27 + $0x28] sm:$0xff]  ;;  %v455_v56 = vld [vmem:[%s1039_s27 + $0x38] sm:$0xff] }
  0x1a   : > { %625 = vst [vmem:[%s1146_s24 + $0x8] sm:$0xff] %v609_v60  ;;  %v610_v17 = vadd.f32 %v594_v42, %v578_v61  ;;  %v736_v26 = vsub.f32 %v704_v11, %v720_v59  ;;  %v690_v27 = vmul.f32 %v482_v36, %v1111_v23  ;;  %v722_v28 = vmul.f32 %v498_v37, %v1065_v9  ;;  %v501_v42 = vld [vmem:[%s1077_s25 + $0x28] sm:$0xff]  ;;  %v471_v61 = vld [vmem:[%s1045_s10 + $0x38] sm:$0xff] }
  0x1b   : > { %v611_v25 = vadd.f32 %v595_v54, %v579_v10  ;;  %v705_v31 = vadd.f32 %v689_v19, %v673_v13  ;;  %v674_v32 = vsub.f32 %v642_v18, %v658_v21  ;;  %v643_v30 = vmul.f32 %v451_v43, %v1095_v15  ;;  %v486_v54 = vld [vmem:[%s1071_s22 + $0x30] sm:$0xff]  ;;  %v487_v19 = vld [vmem:[%s1071_s22 + $0x38] sm:$0xff] }
  0x1c   : > { %626 = vst [vmem:[%s1146_s24 + $0x10] sm:$0xff] %v610_v17  ;;  %v659_v33 = vmul.f32 %v467_v44, %v1090_v14  ;;  %752 = vst [vmem:[%s1161_s29] sm:$0xff] %v736_v26  ;;  %v691_v36 = vmul.f32 %v483_v45, %v1136_v47  ;;  %v723_v37 = vmul.f32 %v499_v48, %v1100_v16  ;;  %v470_v45 = vld [vmem:[%s1045_s10 + $0x30] sm:$0xff] }
  0x1d   : > { %627 = vst [vmem:[%s1146_s24 + $0x18] sm:$0xff] %v611_v25  ;;  %v516_v39 = vmul.f32 %v452_v22, %v1006_v0  ;;  %v532_v40 = vmul.f32 %v468_v24, %v1011_v1  ;;  %v737_v43 = vsub.f32 %v705_v31, %v721_v20  ;;  %v706_v44 = vadd.f32 %v690_v27, %v674_v32  ;;  %v503_v20 = vld [vmem:[%s1077_s25 + $0x38] sm:$0xff] }
  0x1e   : > { %v675_v46 = vsub.f32 %v643_v30, %v659_v33  ;;  %v564_v49 = vmul.f32 %v484_v29, %v1016_v2  ;;  %v596_v48 = vmul.f32 %v500_v34, %v1050_v6  ;;  %v517_v52 = vmul.f32 %v453_v35, %v1023_v3 }
  0x1f   : > { %v548_v51 = vadd.f32 %v532_v40, %v516_v39  ;;  %v533_v53 = vmul.f32 %v469_v38, %v1028_v4  ;;  %753 = vst [vmem:[%s1161_s29 + $0x8] sm:$0xff] %v737_v43  ;;  %v738_v57 = vsub.f32 %v706_v44, %v722_v28  ;;  %v565_v59 = vmul.f32 %v485_v41, %v1033_v5 }
  0x20   : > { %v707_v58 = vadd.f32 %v691_v36, %v675_v46  ;;  %v597_v60 = vmul.f32 %v501_v42, %v1084_v12  ;;  %v518_v10 = vmul.f32 %v454_v50, %v1055_v7  ;;  %v534_v11 = vmul.f32 %v470_v45, %v1060_v8 }
  0x21   : > { %v580_v62 = vadd.f32 %v564_v49, %v548_v51  ;;  %v549_v63 = vadd.f32 %v533_v53, %v517_v52  ;;  %754 = vst [vmem:[%s1161_s29 + $0x10] sm:$0xff] %v738_v57  ;;  %v566_v13 = vmul.f32 %v486_v54, %v1065_v9  ;;  %v598_v18 = vmul.f32 %v502_v55, %v1111_v23 }
  0x22   : > { %v739_v17 = vsub.f32 %v707_v58, %v723_v37  ;;  %v519_v21 = vmul.f32 %v455_v56, %v1090_v14  ;;  %v550_v27 = vadd.f32 %v534_v11, %v518_v10  ;;  %v535_v28 = vmul.f32 %v471_v61, %v1095_v15  ;;  %v457_v10 = vld [vmem:[%s1039_s27 + $0x48] sm:$0xff] }
  0x23   : > { %v612_v25 = vadd.f32 %v596_v48, %v580_v62  ;;  %v581_v26 = vadd.f32 %v565_v59, %v549_v63  ;;  %v567_v31 = vmul.f32 %v487_v19, %v1100_v16  ;;  %v599_v32 = vmul.f32 %v503_v20, %v1136_v47  ;;  %v488_v59 = vld [vmem:[%s1071_s22 + $0x40] sm:$0xff]  ;;  %v473_v11 = vld [vmem:[%s1045_s10 + $0x48] sm:$0xff] }
  0x24   : > { %755 = vst [vmem:[%s1161_s29 + $0x18] sm:$0xff] %v739_v17  ;;  %v644_v30 = vmul.f32 %v452_v22, %v1011_v1  ;;  %v660_v33 = vmul.f32 %v468_v24, %v1006_v0  ;;  %v582_v37 = vadd.f32 %v566_v13, %v550_v27  ;;  %v551_v39 = vadd.f32 %v535_v28, %v519_v21  ;;  %v504_v63 = vld [vmem:[%s1077_s25 + $0x40] sm:$0xff]  ;;  %v489_v13 = vld [vmem:[%s1071_s22 + $0x48] sm:$0xff]  ;;  %v474_v27 = vld [vmem:[%s1045_s10 + $0x50] sm:$0xff] }
  0x25   : > { %628 = vst [vmem:[%s1146_s24 + $0x20] sm:$0xff] %v612_v25  ;;  %v613_v36 = vadd.f32 %v597_v60, %v581_v26  ;;  %v692_v40 = vmul.f32 %v484_v29, %v1050_v6  ;;  %v724_v44 = vmul.f32 %v500_v34, %v1016_v2  ;;  %v645_v46 = vmul.f32 %v453_v35, %v1028_v4  ;;  %v456_v35 = vld [vmem:[%s1039_s27 + $0x40] sm:$0xff] }
  0x26   : > { %v676_v43 = vsub.f32 %v644_v30, %v660_v33  ;;  %v661_v49 = vmul.f32 %v469_v38, %v1023_v3  ;;  %v614_v22 = vadd.f32 %v598_v18, %v582_v37  ;;  %v583_v24 = vadd.f32 %v567_v31, %v551_v39  ;;  %v472_v38 = vld [vmem:[%s1045_s10 + $0x40] sm:$0xff]  ;;  %v490_v30 = vld [vmem:[%s1071_s22 + $0x50] sm:$0xff] }
  0x27   : > { %629 = vst [vmem:[%s1146_s24 + $0x28] sm:$0xff] %v613_v36  ;;  %v693_v51 = vmul.f32 %v485_v41, %v1084_v12  ;;  %v725_v48 = vmul.f32 %v501_v42, %v1033_v5  ;;  %v646_v29 = vmul.f32 %v454_v50, %v1060_v8  ;;  %v662_v34 = vmul.f32 %v470_v45, %v1055_v7  ;;  %v506_v33 = vld [vmem:[%s1077_s25 + $0x50] sm:$0xff]  ;;  %v459_v36 = vld [vmem:[%s1039_s27 + $0x58] sm:$0xff] }
  0x28   : > { %v708_v52 = vadd.f32 %v692_v40, %v676_v43  ;;  %v677_v53 = vsub.f32 %v645_v46, %v661_v49  ;;  %630 = vst [vmem:[%s1146_s24 + $0x30] sm:$0xff] %v614_v22  ;;  %v615_v57 = vadd.f32 %v599_v32, %v583_v24  ;;  %v694_v58 = vmul.f32 %v486_v54, %v1111_v23 }
  0x29   : > { %v726_v41 = vmul.f32 %v502_v55, %v1065_v9  ;;  %v647_v42 = vmul.f32 %v455_v56, %v1095_v15  ;;  %v678_v62 = vsub.f32 %v646_v29, %v662_v34  ;;  %v663_v45 = vmul.f32 %v471_v61, %v1090_v14  ;;  %v505_v61 = vld [vmem:[%s1077_s25 + $0x48] sm:$0xff] }
  0x2a   : > { %v740_v60 = vsub.f32 %v708_v52, %v724_v44  ;;  %v709_v50 = vadd.f32 %v693_v51, %v677_v53  ;;  %631 = vst [vmem:[%s1146_s24 + $0x38] sm:$0xff] %v615_v57  ;;  %v695_v54 = vmul.f32 %v487_v19, %v1136_v47  ;;  %v727_v55 = vmul.f32 %v503_v20, %v1100_v16  ;;  %v458_v19 = vld [vmem:[%s1039_s27 + $0x50] sm:$0xff]  ;;  %v475_v44 = vld [vmem:[%s1045_s10 + $0x58] sm:$0xff] }
  0x2b   : > { %v520_v56 = vmul.f32 %v456_v35, %v1006_v0  ;;  %v536_v17 = vmul.f32 %v472_v38, %v1011_v1  ;;  %v710_v21 = vadd.f32 %v694_v58, %v678_v62  ;;  %v679_v25 = vsub.f32 %v647_v42, %v663_v45  ;;  %v491_v51 = vld [vmem:[%s1071_s22 + $0x58] sm:$0xff] }
  0x2c   : > { %756 = vst [vmem:[%s1161_s29 + $0x20] sm:$0xff] %v740_v60  ;;  %v741_v18 = vsub.f32 %v709_v50, %v725_v48  ;;  %v568_v26 = vmul.f32 %v488_v59, %v1016_v2  ;;  %v600_v28 = vmul.f32 %v504_v63, %v1050_v6  ;;  %v521_v31 = vmul.f32 %v457_v10, %v1023_v3  ;;  %v507_v48 = vld [vmem:[%s1077_s25 + $0x58] sm:$0xff] }
  0x2d   : > { %v552_v20 = vadd.f32 %v536_v17, %v520_v56  ;;  %v537_v32 = vmul.f32 %v473_v11, %v1028_v4  ;;  %v742_v37 = vsub.f32 %v710_v21, %v726_v41  ;;  %v711_v39 = vadd.f32 %v695_v54, %v679_v25 }
  0x2e   : > { %757 = vst [vmem:[%s1161_s29 + $0x28] sm:$0xff] %v741_v18  ;;  %v569_v40 = vmul.f32 %v489_v13, %v1033_v5  ;;  %v601_v43 = vmul.f32 %v505_v61, %v1084_v12  ;;  %v522_v22 = vmul.f32 %v458_v19, %v1055_v7  ;;  %v538_v24 = vmul.f32 %v474_v27, %v1060_v8 }
  0x2f   : > { %v584_v46 = vadd.f32 %v568_v26, %v552_v20  ;;  %v553_v49 = vadd.f32 %v537_v32, %v521_v31  ;;  %758 = vst [vmem:[%s1161_s29 + $0x30] sm:$0xff] %v742_v37  ;;  %v743_v52 = vsub.f32 %v711_v39, %v727_v55  ;;  %v570_v53 = vmul.f32 %v490_v30, %v1065_v9 }
  0x30   : > { %v602_v29 = vmul.f32 %v506_v33, %v1111_v23  ;;  %v523_v34 = vmul.f32 %v459_v36, %v1090_v14  ;;  %v554_v41 = vadd.f32 %v538_v24, %v522_v22  ;;  %v539_v42 = vmul.f32 %v475_v44, %v1095_v15  ;;  %v461_v22 = vld [vmem:[%s1039_s27 + $0x68] sm:$0xff] }
  0x31   : > { %v616_v57 = vadd.f32 %v600_v28, %v584_v46  ;;  %v585_v58 = vadd.f32 %v569_v40, %v553_v49  ;;  %759 = vst [vmem:[%s1161_s29 + $0x38] sm:$0xff] %v743_v52  ;;  %v571_v60 = vmul.f32 %v491_v51, %v1100_v16  ;;  %v603_v50 = vmul.f32 %v507_v48, %v1136_v47  ;;  %v492_v40 = vld [vmem:[%s1071_s22 + $0x60] sm:$0xff]  ;;  %v477_v24 = vld [vmem:[%s1045_s10 + $0x68] sm:$0xff] }
  0x32   : > { %v648_v62 = vmul.f32 %v456_v35, %v1011_v1  ;;  %v664_v45 = vmul.f32 %v472_v38, %v1006_v0  ;;  %v586_v55 = vadd.f32 %v570_v53, %v554_v41  ;;  %v555_v56 = vadd.f32 %v539_v42, %v523_v34  ;;  %v508_v49 = vld [vmem:[%s1077_s25 + $0x60] sm:$0xff]  ;;  %v493_v53 = vld [vmem:[%s1071_s22 + $0x68] sm:$0xff]  ;;  %v478_v41 = vld [vmem:[%s1045_s10 + $0x70] sm:$0xff] }
  0x33   : > { %632 = vst [vmem:[%s1146_s24 + $0x40] sm:$0xff] %v616_v57  ;;  %v617_v54 = vadd.f32 %v601_v43, %v585_v58  ;;  %v696_v17 = vmul.f32 %v488_v59, %v1050_v6  ;;  %v728_v21 = vmul.f32 %v504_v63, %v1016_v2  ;;  %v649_v25 = vmul.f32 %v457_v10, %v1028_v4  ;;  %v460_v10 = vld [vmem:[%s1039_s27 + $0x60] sm:$0xff] }
  0x34   : > { %v680_v18 = vsub.f32 %v648_v62, %v664_v45  ;;  %v665_v26 = vmul.f32 %v473_v11, %v1023_v3  ;;  %v618_v35 = vadd.f32 %v602_v29, %v586_v55  ;;  %v587_v38 = vadd.f32 %v571_v60, %v555_v56  ;;  %v476_v11 = vld [vmem:[%s1045_s10 + $0x60] sm:$0xff]  ;;  %v494_v62 = vld [vmem:[%s1071_s22 + $0x70] sm:$0xff] }
  0x35   : > { %633 = vst [vmem:[%s1146_s24 + $0x48] sm:$0xff] %v617_v54  ;;  %v697_v20 = vmul.f32 %v489_v13, %v1084_v12  ;;  %v729_v28 = vmul.f32 %v505_v61, %v1033_v5  ;;  %v650_v59 = vmul.f32 %v458_v19, %v1060_v8  ;;  %v666_v63 = vmul.f32 %v474_v27, %v1055_v7  ;;  %v510_v45 = vld [vmem:[%s1077_s25 + $0x70] sm:$0xff]  ;;  %v463_v54 = vld [vmem:[%s1039_s27 + $0x78] sm:$0xff] }
  0x36   : > { %v712_v31 = vadd.f32 %v696_v17, %v680_v18  ;;  %v681_v32 = vsub.f32 %v649_v25, %v665_v26  ;;  %634 = vst [vmem:[%s1146_s24 + $0x50] sm:$0xff] %v618_v35  ;;  %v619_v37 = vadd.f32 %v603_v50, %v587_v38  ;;  %v698_v39 = vmul.f32 %v490_v30, %v1111_v23 }
  0x37   : > { %v730_v13 = vmul.f32 %v506_v33, %v1065_v9  ;;  %v651_v61 = vmul.f32 %v459_v36, %v1095_v15  ;;  %v682_v46 = vsub.f32 %v650_v59, %v666_v63  ;;  %v667_v27 = vmul.f32 %v475_v44, %v1090_v14  ;;  %v509_v44 = vld [vmem:[%s1077_s25 + $0x68] sm:$0xff] }
  0x38   : > { %v744_v43 = vsub.f32 %v712_v31, %v728_v21  ;;  %v713_v19 = vadd.f32 %v697_v20, %v681_v32  ;;  %635 = vst [vmem:[%s1146_s24 + $0x58] sm:$0xff] %v619_v37  ;;  %v699_v30 = vmul.f32 %v491_v51, %v1136_v47  ;;  %v731_v33 = vmul.f32 %v507_v48, %v1100_v16  ;;  %v462_v51 = vld [vmem:[%s1039_s27 + $0x70] sm:$0xff]  ;;  %v479_v21 = vld [vmem:[%s1045_s10 + $0x78] sm:$0xff] }
  0x39   : > { %v524_v36 = vmul.f32 %v460_v10, %v1006_v0  ;;  %v540_v52 = vmul.f32 %v476_v11, %v1011_v1  ;;  %v714_v34 = vadd.f32 %v698_v39, %v682_v46  ;;  %v683_v57 = vsub.f32 %v651_v61, %v667_v27  ;;  %v495_v20 = vld [vmem:[%s1071_s22 + $0x78] sm:$0xff] }
  0x3a   : > { %760 = vst [vmem:[%s1161_s29 + $0x40] sm:$0xff] %v744_v43  ;;  %v745_v29 = vsub.f32 %v713_v19, %v729_v28  ;;  %v572_v58 = vmul.f32 %v492_v40, %v1016_v2  ;;  %v604_v42 = vmul.f32 %v508_v49, %v1050_v6  ;;  %v525_v60 = vmul.f32 %v461_v22, %v1023_v3  ;;  %v511_v28 = vld [vmem:[%s1077_s25 + $0x78] sm:$0xff] }
  0x3b   : > { %v556_v48 = vadd.f32 %v540_v52, %v524_v36  ;;  %v541_v50 = vmul.f32 %v477_v24, %v1028_v4  ;;  %v746_v55 = vsub.f32 %v714_v34, %v730_v13  ;;  %v715_v56 = vadd.f32 %v699_v30, %v683_v57 }
  0x3c   : > { %761 = vst [vmem:[%s1161_s29 + $0x48] sm:$0xff] %v745_v29  ;;  %v573_v17 = vmul.f32 %v493_v53, %v1033_v5  ;;  %v605_v18 = vmul.f32 %v509_v44, %v1084_v12  ;;  %v526_v35 = vmul.f32 %v462_v51, %v1055_v7  ;;  %v542_v38 = vmul.f32 %v478_v41, %v1060_v8 }
  0x3d   : > { %v588_v25 = vadd.f32 %v572_v58, %v556_v48  ;;  %v557_v26 = vadd.f32 %v541_v50, %v525_v60  ;;  %762 = vst [vmem:[%s1161_s29 + $0x50] sm:$0xff] %v746_v55  ;;  %v747_v31 = vsub.f32 %v715_v56, %v731_v33  ;;  %v574_v32 = vmul.f32 %v494_v62, %v1065_v9 }
  0x3e   : > { %v606_v59 = vmul.f32 %v510_v45, %v1111_v23  ;;  %v527_v63 = vmul.f32 %v463_v54, %v1090_v14  ;;  %v558_v13 = vadd.f32 %v542_v38, %v526_v35  ;;  %v543_v61 = vmul.f32 %v479_v21, %v1095_v15 }
  0x3f   : > { %v620_v37 = vadd.f32 %v604_v42, %v588_v25  ;;  %v589_v39 = vadd.f32 %v573_v17, %v557_v26  ;;  %763 = vst [vmem:[%s1161_s29 + $0x58] sm:$0xff] %v747_v31  ;;  %v575_v43 = vmul.f32 %v495_v20, %v1100_v16  ;;  %v607_v19 = vmul.f32 %v511_v28, %v1136_v47 }
  0x40   : > { %v652_v46 = vmul.f32 %v460_v10, %v1011_v1  ;;  %v668_v27 = vmul.f32 %v476_v11, %v1006_v0  ;;  %v590_v33 = vadd.f32 %v574_v32, %v558_v13  ;;  %v559_v36 = vadd.f32 %v543_v61, %v527_v63 }
  0x41   : > { %636 = vst [vmem:[%s1146_s24 + $0x60] sm:$0xff] %v620_v37  ;;  %v621_v30 = vadd.f32 %v605_v18, %v589_v39  ;;  %v700_v52 = vmul.f32 %v492_v40, %v1050_v6  ;;  %v732_v34 = vmul.f32 %v508_v49, %v1016_v2  ;;  %v653_v57 = vmul.f32 %v461_v22, %v1028_v4 }
  0x42   : > { %v684_v29 = vsub.f32 %v652_v46, %v668_v27  ;;  %v669_v58 = vmul.f32 %v477_v24, %v1023_v3  ;;  %v622_v48 = vadd.f32 %v606_v59, %v590_v33  ;;  %v591_v42 = vadd.f32 %v575_v43, %v559_v36 }
  0x43   : > { %637 = vst [vmem:[%s1146_s24 + $0x68] sm:$0xff] %v621_v30  ;;  %v701_v0 = vmul.f32 %v493_v53, %v1084_v12  ;;  %v733_v1 = vmul.f32 %v509_v44, %v1033_v5  ;;  %v654_v6 = vmul.f32 %v462_v51, %v1060_v8  ;;  %v670_v40 = vmul.f32 %v478_v41, %v1055_v7 }
  0x44   : > { %v716_v10 = vadd.f32 %v700_v52, %v684_v29  ;;  %v685_v11 = vsub.f32 %v653_v57, %v669_v58  ;;  %638 = vst [vmem:[%s1146_s24 + $0x70] sm:$0xff] %v622_v48  ;;  %v623_v2 = vadd.f32 %v607_v19, %v591_v42  ;;  %v702_v3 = vmul.f32 %v494_v62, %v1111_v23 }
  0x45   : > { %v734_v4 = vmul.f32 %v510_v45, %v1065_v9  ;;  %v655_v49 = vmul.f32 %v463_v54, %v1095_v15  ;;  %v686_v22 = vsub.f32 %v654_v6, %v670_v40  ;;  %v671_v24 = vmul.f32 %v479_v21, %v1090_v14 }
  0x46   : > { %v748_v12 = vsub.f32 %v716_v10, %v732_v34  ;;  %v717_v5 = vadd.f32 %v701_v0, %v685_v11  ;;  %639 = vst [vmem:[%s1146_s24 + $0x78] sm:$0xff] %v623_v2  ;;  %v703_v8 = vmul.f32 %v495_v20, %v1136_v47  ;;  %v735_v23 = vmul.f32 %v511_v28, %v1100_v16 }
  0x47   : > { %v718_v53 = vadd.f32 %v702_v3, %v686_v22  ;;  %v687_v44 = vsub.f32 %v655_v49, %v671_v24 }
  0x48   : > { %764 = vst [vmem:[%s1161_s29 + $0x60] sm:$0xff] %v748_v12  ;;  %v749_v7 = vsub.f32 %v717_v5, %v733_v1 }
  0x49   : > { %v750_v9 = vsub.f32 %v718_v53, %v734_v4  ;;  %v719_v51 = vadd.f32 %v703_v8, %v687_v44 }
  0x4a   : > { %765 = vst [vmem:[%s1161_s29 + $0x68] sm:$0xff] %v749_v7 }
  0x4b   : > { %766 = vst [vmem:[%s1161_s29 + $0x70] sm:$0xff] %v750_v9  ;;  %v751_v15 = vsub.f32 %v719_v51, %v735_v23 }
  0x4d   : > { %767 = vst [vmem:[%s1161_s29 + $0x78] sm:$0xff] %v751_v15 }
  0x4e PF: > { %s20_s30 = sadd.s32 1, %s943_s30  }
  0x4f   : > { %p17_p4 = scmp.ge.s32.totalorder %s20_s30, 4  }
  0x51   :  { %19 = sbr.rel (!%p17_p4) target bundleno = 1 (0x1), region = 103 }

// kernel: reverse.0
= control target key start
LH: loop header
LB: loop body
LE: loop exit
PB: predicated region body
PF: predicated region fallthrough
CT: control target
= control target key end

     0   :  { %v2_v0 = vlaneseq  ;;  %s762_s0 = inlined_call_operand.vmem [shape: f32[8,32,15], index: 0, kind: input, shape index: {}]   ;;  %s763_s1 = inlined_call_operand.vmem [shape: f32[8,32,15], index: 1, kind: output, shape index: {}]  }
   0x1   :  { %v99_v2 = vld [vmem:[%s762_s0 + $0x10] sm:$0xff]  ;;  %v95_v3 = vld [vmem:[%s762_s0] sm:$0xff]  ;;  %v101_v4 = vld [vmem:[%s762_s0 + $0x18] sm:$0xff] }
   0x2   :  { %v3_v1 = vsub.s32 14, %v2_v0  ;;  %v97_v5 = vld [vmem:[%s762_s0 + $0x8] sm:$0xff]  ;;  %v103_v7 = vld [vmem:[%s762_s0 + $0x20] sm:$0xff]  ;;  %v109_v8 = vld [vmem:[%s762_s0 + $0x38] sm:$0xff] }
   0x3   :  { %v105_v6 = vld [vmem:[%s762_s0 + $0x28] sm:$0xff]  ;;  %v107_v9 = vld [vmem:[%s762_s0 + $0x30] sm:$0xff]  ;;  %v111_v11 = vld [vmem:[%s762_s0 + $0x40] sm:$0xff] }
   0x4   :  { %4 = vset.pattern.permute.xlu0 %v3_v1  ;;  %559 = vset.pattern.permute.xlu1 %v3_v1  ;;  %v113_v10 = vld [vmem:[%s762_s0 + $0x48] sm:$0xff]  ;;  %v117_v12 = vld [vmem:[%s762_s0 + $0x58] sm:$0xff]  ;;  %v115_v13 = vld [vmem:[%s762_s0 + $0x50] sm:$0xff] }
   0x5   :  { %175 = vperm.xlu1 %559, %v99_v2   ;;  %163 = vperm.xlu0 %4, %v95_v3   ;;  %v121_v14 = vld [vmem:[%s762_s0 + $0x68] sm:$0xff]  ;;  %v119_v15 = vld [vmem:[%s762_s0 + $0x60] sm:$0xff]  ;;  %v125_v16 = vld [vmem:[%s762_s0 + $0x78] sm:$0xff] }
   0x6   :  { %v123_v17 = vld [vmem:[%s762_s0 + $0x70] sm:$0xff]  ;;  %v129_v18 = vld [vmem:[%s762_s0 + $0x88] sm:$0xff]  ;;  %v127_v19 = vld [vmem:[%s762_s0 + $0x80] sm:$0xff] }
   0x7   :  { %v133_v20 = vld [vmem:[%s762_s0 + $0x98] sm:$0xff]  ;;  %v131_v21 = vld [vmem:[%s762_s0 + $0x90] sm:$0xff]  ;;  %v137_v22 = vld [vmem:[%s762_s0 + $0xa8] sm:$0xff] }
   0x8   :  { %v135_v23 = vld [vmem:[%s762_s0 + $0xa0] sm:$0xff]  ;;  %v141_v24 = vld [vmem:[%s762_s0 + $0xb8] sm:$0xff]  ;;  %v139_v25 = vld [vmem:[%s762_s0 + $0xb0] sm:$0xff] }
   0x9   :  { %181 = vperm.xlu1 %559, %v101_v4   ;;  %169 = vperm.xlu0 %4, %v97_v5   ;;  %v145_v26 = vld [vmem:[%s762_s0 + $0xc8] sm:$0xff]  ;;  %v143_v27 = vld [vmem:[%s762_s0 + $0xc0] sm:$0xff]  ;;  %v149_v28 = vld [vmem:[%s762_s0 + $0xd8] sm:$0xff] }
   0xa   :  { %v147_v29 = vld [vmem:[%s762_s0 + $0xd0] sm:$0xff]  ;;  %v153_v30 = vld [vmem:[%s762_s0 + $0xe8] sm:$0xff]  ;;  %v151_v31 = vld [vmem:[%s762_s0 + $0xe0] sm:$0xff] }
   0xb   :  { %v157_v32 = vld [vmem:[%s762_s0 + $0xf8] sm:$0xff]  ;;  %v155_v33 = vld [vmem:[%s762_s0 + $0xf0] sm:$0xff] }
   0xd   :  { %193 = vperm.xlu1 %559, %v105_v6   ;;  %187 = vperm.xlu0 %4, %v103_v7  }
  0x11   :  { %205 = vperm.xlu1 %559, %v109_v8   ;;  %199 = vperm.xlu0 %4, %v107_v9  }
  0x15   :  { %217 = vperm.xlu1 %559, %v113_v10   ;;  %211 = vperm.xlu0 %4, %v111_v11  }
  0x19   :  { %229 = vperm.xlu1 %559, %v117_v12   ;;  %223 = vperm.xlu0 %4, %v115_v13  }
  0x1d   :  { %241 = vperm.xlu1 %559, %v121_v14   ;;  %235 = vperm.xlu0 %4, %v119_v15  }
  0x21   :  { %253 = vperm.xlu1 %559, %v125_v16   ;;  %247 = vperm.xlu0 %4, %v123_v17  }
  0x25   :  { %265 = vperm.xlu1 %559, %v129_v18   ;;  %259 = vperm.xlu0 %4, %v127_v19  }
  0x29   :  { %277 = vperm.xlu1 %559, %v133_v20   ;;  %271 = vperm.xlu0 %4, %v131_v21  }
  0x2d   :  { %289 = vperm.xlu1 %559, %v137_v22   ;;  %283 = vperm.xlu0 %4, %v135_v23  }
  0x31   :  { %301 = vperm.xlu1 %559, %v141_v24   ;;  %295 = vperm.xlu0 %4, %v139_v25  }
  0x35   :  { %313 = vperm.xlu1 %559, %v145_v26   ;;  %307 = vperm.xlu0 %4, %v143_v27  }
  0x39   :  { %325 = vperm.xlu1 %559, %v149_v28   ;;  %319 = vperm.xlu0 %4, %v147_v29  }
  0x3d   :  { %337 = vperm.xlu1 %559, %v153_v30   ;;  %331 = vperm.xlu0 %4, %v151_v31  }
  0x41   :  { %349 = vperm.xlu1 %559, %v157_v32   ;;  %343 = vperm.xlu0 %4, %v155_v33  }
  0x80   :  { %v176_v34 = vpop.permute.xlu1 %175  ;;  %v164_v35 = vpop.permute.xlu0 %163 }
  0x81   :  { %447 = vst [vmem:[%s763_s1 + $0x10] sm:$0xff] %v176_v34  ;;  %443 = vst [vmem:[%s763_s1] sm:$0xff] %v164_v35 }
  0x84   :  { %v182_v36 = vpop.permute.xlu1 %181  ;;  %v170_v37 = vpop.permute.xlu0 %169 }
  0x85   :  { %449 = vst [vmem:[%s763_s1 + $0x18] sm:$0xff] %v182_v36  ;;  %445 = vst [vmem:[%s763_s1 + $0x8] sm:$0xff] %v170_v37 }
  0x88   :  { %v194_v38 = vpop.permute.xlu1 %193  ;;  %v188_v39 = vpop.permute.xlu0 %187 }
  0x89   :  { %453 = vst [vmem:[%s763_s1 + $0x28] sm:$0xff] %v194_v38  ;;  %451 = vst [vmem:[%s763_s1 + $0x20] sm:$0xff] %v188_v39 }
  0x8c   :  { %v206_v40 = vpop.permute.xlu1 %205  ;;  %v200_v41 = vpop.permute.xlu0 %199 }
  0x8d   :  { %457 = vst [vmem:[%s763_s1 + $0x38] sm:$0xff] %v206_v40  ;;  %455 = vst [vmem:[%s763_s1 + $0x30] sm:$0xff] %v200_v41 }
  0x90   :  { %v218_v42 = vpop.permute.xlu1 %217  ;;  %v212_v43 = vpop.permute.xlu0 %211 }
  0x91   :  { %461 = vst [vmem:[%s763_s1 + $0x48] sm:$0xff] %v218_v42  ;;  %459 = vst [vmem:[%s763_s1 + $0x40] sm:$0xff] %v212_v43 }
  0x94   :  { %v230_v44 = vpop.permute.xlu1 %229  ;;  %v224_v45 = vpop.permute.xlu0 %223 }
  0x95   :  { %465 = vst [vmem:[%s763_s1 + $0x58] sm:$0xff] %v230_v44  ;;  %463 = vst [vmem:[%s763_s1 + $0x50] sm:$0xff] %v224_v45 }
  0x98   :  { %v242_v46 = vpop.permute.xlu1 %241  ;;  %v236_v47 = vpop.permute.xlu0 %235 }
  0x99   :  { %469 = vst [vmem:[%s763_s1 + $0x68] sm:$0xff] %v242_v46  ;;  %467 = vst [vmem:[%s763_s1 + $0x60] sm:$0xff] %v236_v47 }
  0x9c   :  { %v254_v48 = vpop.permute.xlu1 %253  ;;  %v248_v49 = vpop.permute.xlu0 %247 }
  0x9d   :  { %473 = vst [vmem:[%s763_s1 + $0x78] sm:$0xff] %v254_v48  ;;  %471 = vst [vmem:[%s763_s1 + $0x70] sm:$0xff] %v248_v49 }
  0xa0   :  { %v266_v50 = vpop.permute.xlu1 %265  ;;  %v260_v51 = vpop.permute.xlu0 %259 }
  0xa1   :  { %477 = vst [vmem:[%s763_s1 + $0x88] sm:$0xff] %v266_v50  ;;  %475 = vst [vmem:[%s763_s1 + $0x80] sm:$0xff] %v260_v51 }
  0xa4   :  { %v278_v52 = vpop.permute.xlu1 %277  ;;  %v272_v53 = vpop.permute.xlu0 %271 }
  0xa5   :  { %481 = vst [vmem:[%s763_s1 + $0x98] sm:$0xff] %v278_v52  ;;  %479 = vst [vmem:[%s763_s1 + $0x90] sm:$0xff] %v272_v53 }
  0xa8   :  { %v290_v54 = vpop.permute.xlu1 %289  ;;  %v284_v55 = vpop.permute.xlu0 %283 }
  0xa9   :  { %485 = vst [vmem:[%s763_s1 + $0xa8] sm:$0xff] %v290_v54  ;;  %483 = vst [vmem:[%s763_s1 + $0xa0] sm:$0xff] %v284_v55 }
  0xac   :  { %v302_v56 = vpop.permute.xlu1 %301  ;;  %v296_v57 = vpop.permute.xlu0 %295 }
  0xad   :  { %489 = vst [vmem:[%s763_s1 + $0xb8] sm:$0xff] %v302_v56  ;;  %487 = vst [vmem:[%s763_s1 + $0xb0] sm:$0xff] %v296_v57 }
  0xb0   :  { %v314_v58 = vpop.permute.xlu1 %313  ;;  %v308_v59 = vpop.permute.xlu0 %307 }
  0xb1   :  { %493 = vst [vmem:[%s763_s1 + $0xc8] sm:$0xff] %v314_v58  ;;  %491 = vst [vmem:[%s763_s1 + $0xc0] sm:$0xff] %v308_v59 }
  0xb4   :  { %v326_v60 = vpop.permute.xlu1 %325  ;;  %v320_v61 = vpop.permute.xlu0 %319 }
  0xb5   :  { %497 = vst [vmem:[%s763_s1 + $0xd8] sm:$0xff] %v326_v60  ;;  %495 = vst [vmem:[%s763_s1 + $0xd0] sm:$0xff] %v320_v61 }
  0xb8   :  { %v338_v62 = vpop.permute.xlu1 %337  ;;  %v332_v63 = vpop.permute.xlu0 %331 }
  0xb9   :  { %501 = vst [vmem:[%s763_s1 + $0xe8] sm:$0xff] %v338_v62  ;;  %499 = vst [vmem:[%s763_s1 + $0xe0] sm:$0xff] %v332_v63 }
  0xbc   :  { %v350_v0 = vpop.permute.xlu1 %349  ;;  %v344_v1 = vpop.permute.xlu0 %343 }
  0xbd   :  { %505 = vst [vmem:[%s763_s1 + $0xf8] sm:$0xff] %v350_v0  ;;  %503 = vst [vmem:[%s763_s1 + $0xf0] sm:$0xff] %v344_v1 }

</bundles_post_ra>
